<compile_context>
chip_gen: v5e
topology: v5e:2x2
jax: 0.10.0
libtpu: 0.0.40
codegen_flags: <defaults>
</compile_context>

<pallas_src>
import jax
import jax.numpy as jnp
from jax import lax
from jax.experimental import pallas as pl
from jax.experimental.pallas import tpu as pltpu


# ---------------------------------------------------------------------------
# Fused kernel: conv1+pool -> conv2+pool -> flatten -> fc1 -> fc2  (one image)
# ---------------------------------------------------------------------------
def fused_mnist_kernel(slab_ref, w1c_ref, b1c_ref, w2c_ref, b2c_ref, cmask_ref,
                       w1f_ref, b1f_ref, w2f_ref, b2f_ref,
                       out_ref,
                       f1z_ref, z2_ref, flat_ref):
    # ---- conv1 (3x3, pad=1) as ONE im2col GEMM; rows = 4 pool positions x 196 ----
    z1 = jnp.dot(slab_ref[0], w1c_ref[...],
                 preferred_element_type=jnp.float32)               # (784, 32) f32
    # maxpool(2x2) == max over the 4 pool-position row blocks
    m1 = jnp.maximum(jnp.maximum(z1[0:196], z1[196:392]),
                     jnp.maximum(z1[392:588], z1[588:784]))        # (196, 32)
    # bias + ReLU after the pool (exact: max commutes with +const, ReLU monotone)
    f1 = jnp.maximum(m1 + b1c_ref[...], 0.0)                       # (196, 32) f32

    # ---- conv2 (3x3, pad=1) via zero-padded row buffer + 9 shifted GEMMs ----
    # f1z rows: [16 zero rows | f1 (rows r = 14*i + j, 14x14 raster) | 16 zero rows]
    f1z_ref[0:16, :] = jnp.zeros((16, 32), jnp.float32)
    f1z_ref[212:228, :] = jnp.zeros((16, 32), jnp.float32)
    f1z_ref[16:212, :] = f1

    mL = cmask_ref[:, 0:1]          # valid when j >= 1  (for dx = -1)
    mR = cmask_ref[:, 1:2]          # valid when j <= 12 (for dx = +1)

    acc2 = jnp.zeros((196, 64), jnp.float32)
    for t in range(9):
        dy, dx = t // 3 - 1, t % 3 - 1
        start = 16 + 14 * dy + dx                                  # static, in [1, 31]
        sl = f1z_ref[start:start + 196, :].astype(jnp.bfloat16)    # shifted f1 rows
        if dx == -1:
            sl = sl * mL
        elif dx == 1:
            sl = sl * mR
        acc2 = acc2 + jnp.dot(sl, w2c_ref[t],
                              preferred_element_type=jnp.float32)  # (196, 64)
    # per-channel bias before the pool (exact)
    z2_ref[...] = acc2 + b2c_ref[...]

    # ---- maxpool(2x2) + flatten into (h, w, c) order expected by the permuted fc1 ----
    for p in range(49):
        y, x = p // 7, p % 7
        r0 = 28 * y + 2 * x
        a = jnp.maximum(z2_ref[r0:r0 + 1, :], z2_ref[r0 + 1:r0 + 2, :])
        b = jnp.maximum(z2_ref[r0 + 14:r0 + 15, :], z2_ref[r0 + 15:r0 + 16, :])
        flat_ref[0:1, 64 * p:64 * (p + 1)] = jnp.maximum(a, b)

    # ---- fc1 + ReLU + fc2 (output lanes zero-padded to 128 -> lane-dense store) ----
    flat = jnp.maximum(flat_ref[...], 0.0)                         # ReLU after pool (exact)
    h = jnp.dot(flat.astype(jnp.bfloat16), w1f_ref[...],
                preferred_element_type=jnp.float32) + b1f_ref[...]
    h = jnp.maximum(h, 0.0)
    out_ref[0] = jnp.dot(h.astype(jnp.bfloat16), w2f_ref[...],
                         preferred_element_type=jnp.float32) + b2f_ref[...]


# ---------------------------------------------------------------------------
# One-time parameter preparation (outside the jitted forward)
# ---------------------------------------------------------------------------
def prepare_params(params):
    w1c = jnp.transpose(params["conv1_w"], (2, 3, 1, 0)).reshape(9, 32).astype(jnp.bfloat16)
    b1c = params["conv1_b"].reshape(1, 32).astype(jnp.float32)
    w2c = jnp.transpose(params["conv2_w"], (2, 3, 1, 0)).reshape(9, 32, 64).astype(jnp.bfloat16)
    b2c = params["conv2_b"].reshape(1, 64).astype(jnp.float32)

    # fc1 rows permuted from PyTorch's (c, h, w) flatten order to our (h, w, c) order.
    w1f = params["fc1_w"].reshape(128, 64, 7, 7)
    w1f = jnp.transpose(w1f, (2, 3, 1, 0)).reshape(7 * 7 * 64, 128).astype(jnp.bfloat16)
    b1f = params["fc1_b"].reshape(1, 128).astype(jnp.float32)

    # fc2 zero-padded from 10 -> 128 output lanes (exact; sliced off in the wrapper).
    w2f = jnp.zeros((128, 128), jnp.float32).at[:, :10].set(params["fc2_w"].T).astype(jnp.bfloat16)
    b2f = jnp.zeros((1, 128), jnp.float32).at[0, :10].set(params["fc2_b"])

    # conv2 edge masks over the flattened 14x14 raster (r = 14*i + j).
    j = jnp.arange(196) % 14
    cmask = jnp.stack([(j >= 1), (j <= 12)], axis=1).astype(jnp.bfloat16)   # (196, 2)

    return dict(w1c=w1c, b1c=b1c, w2c=w2c, b2c=b2c, cmask=cmask,
                w1f=w1f, b1f=b1f, w2f=w2f, b2f=b2f)


# ---------------------------------------------------------------------------
# Glue: conv1 im2col (raw image is only ~3 KB/img; the blow-up here is trivial)
# ---------------------------------------------------------------------------
def build_conv1_slab(x_nchw):
    B = x_nchw.shape[0]
    x = jnp.transpose(x_nchw, (0, 2, 3, 1))                       # (B, 28, 28, 1)
    xp = jnp.pad(x, ((0, 0), (1, 1), (1, 1), (0, 0)))
    patches = jnp.stack(
        [xp[:, dy:dy + 28, dx:dx + 28, :] for dy in range(3) for dx in range(3)],
        axis=3)                                                   # (B, 28, 28, 9, 1)
    patches = patches.reshape(B, 28, 28, 9)

    def blk(oy, ox):
        return patches[:, oy::2, ox::2, :].reshape(B, 196, 9)

    slab = jnp.concatenate([blk(0, 0), blk(0, 1), blk(1, 0), blk(1, 1)], axis=1)
    return slab.astype(jnp.bfloat16)                              # (B, 784, 9)


# ---------------------------------------------------------------------------
# Full forward (matches MNIST_CNN.forward)
# ---------------------------------------------------------------------------
def mnist_cnn_forward(x_nchw, prep):
    B = x_nchw.shape[0]
    slab = build_conv1_slab(x_nchw)

    out = pl.pallas_call(
        fused_mnist_kernel,
        out_shape=jax.ShapeDtypeStruct((B, 1, 128), jnp.float32),
        grid=(B,),
        in_specs=[
            pl.BlockSpec((1, 784, 9), lambda b: (b, 0, 0)),       # conv1 im2col slab
            pl.BlockSpec((9, 32), lambda b: (0, 0)),              # conv1 weight
            pl.BlockSpec((1, 32), lambda b: (0, 0)),              # conv1 bias
            pl.BlockSpec((9, 32, 64), lambda b: (0, 0, 0)),       # conv2 weight (per tap)
            pl.BlockSpec((1, 64), lambda b: (0, 0)),              # conv2 bias
            pl.BlockSpec((196, 2), lambda b: (0, 0)),             # conv2 edge masks
            pl.BlockSpec((3136, 128), lambda b: (0, 0)),          # fc1 weight (permuted)
            pl.BlockSpec((1, 128), lambda b: (0, 0)),             # fc1 bias
            pl.BlockSpec((128, 128), lambda b: (0, 0)),           # fc2 weight (padded)
            pl.BlockSpec((1, 128), lambda b: (0, 0)),             # fc2 bias (padded)
        ],
        out_specs=pl.BlockSpec((1, 1, 128), lambda b: (b, 0, 0)),
        scratch_shapes=[
            pltpu.VMEM((228, 32), jnp.float32),    # zero-padded f1 rows
            pltpu.VMEM((196, 64), jnp.float32),    # conv2 pre-pool activations
            pltpu.VMEM((1, 3136), jnp.float32),    # flattened pooled conv2 (fc1 input)
        ],
        compiler_params=pltpu.CompilerParams(
            dimension_semantics=("parallel",)),
    )(slab, prep["w1c"], prep["b1c"], prep["w2c"], prep["b2c"], prep["cmask"],
      prep["w1f"], prep["b1f"], prep["w2f"], prep["b2f"])

    return out.reshape(B, 128)[:, :10]


# ---------------------------------------------------------------------------
# Pure-JAX f32 reference (independent correctness check)
# ---------------------------------------------------------------------------
def reference_forward(x_nchw, params):
    def conv(x, w, b):
        y = lax.conv_general_dilated(x, w, (1, 1), ((1, 1), (1, 1)),
                                     dimension_numbers=("NCHW", "OIHW", "NCHW"))
        return y + b[None, :, None, None]

    def pool(x):
        return lax.reduce_window(x, -jnp.inf, lax.max,
                                 (1, 1, 2, 2), (1, 1, 2, 2), "VALID")

    x = pool(jax.nn.relu(conv(x_nchw, params["conv1_w"], params["conv1_b"])))
    x = pool(jax.nn.relu(conv(x, params["conv2_w"], params["conv2_b"])))
    x = x.reshape(x.shape[0], -1)
    x = jax.nn.relu(x @ params["fc1_w"].T + params["fc1_b"])
    return x @ params["fc2_w"].T + params["fc2_b"]


# ---------------------------------------------------------------------------
if __name__ == "__main__":
    key = jax.random.PRNGKey(0)
    k_x, k1, k2, k3, k4, k5, k6, k7, k8 = jax.random.split(key, 9)

    B = 2
    x = jax.random.normal(k_x, (B, 1, 28, 28), dtype=jnp.float32)

    def init(k, shape, fan_in):
        return (jax.random.normal(k, shape, dtype=jnp.float32)
                / jnp.sqrt(jnp.float32(fan_in)))

    params = {
        "conv1_w": init(k1, (32, 1, 3, 3), 1 * 3 * 3),
        "conv1_b": init(k2, (32,), 1 * 3 * 3),
        "conv2_w": init(k3, (64, 32, 3, 3), 32 * 3 * 3),
        "conv2_b": init(k4, (64,), 32 * 3 * 3),
        "fc1_w": init(k5, (128, 64 * 7 * 7), 64 * 7 * 7),
        "fc1_b": init(k6, (128,), 64 * 7 * 7),
        "fc2_w": init(k7, (10, 128), 128),
        "fc2_b": init(k8, (10,), 128),
    }

    prep = prepare_params(params)                       # one-time weight prep
    forward = jax.jit(mnist_cnn_forward)

    logits = jax.block_until_ready(forward(x, prep))
    ref = jax.block_until_ready(reference_forward(x, params))

    assert logits.shape == (B, 10), logits.shape
    # bf16 MXU operands (f32 accumulation) -> looser tolerance than pure f32.
    assert jnp.allclose(logits, ref, rtol=5e-2, atol=5e-2), (
        f"max abs diff {jnp.max(jnp.abs(logits - ref))}")

    print("KERNEL_OK")
</pallas_src>

<mosaic_0001>
module attributes {stable_mosaic.version = 11 : i64} {
  func.func @fused_mnist_kernel(%arg0: i32, %arg1: memref<1x784x9xbf16, #tpu.memory_space<vmem>>, %arg2: memref<9x32xbf16, #tpu.memory_space<vmem>>, %arg3: memref<1x32xf32, #tpu.memory_space<vmem>>, %arg4: memref<9x32x64xbf16, #tpu.memory_space<vmem>>, %arg5: memref<1x64xf32, #tpu.memory_space<vmem>>, %arg6: memref<196x2xbf16, #tpu.memory_space<vmem>>, %arg7: memref<3136x128xbf16, #tpu.memory_space<vmem>>, %arg8: memref<1x128xf32, #tpu.memory_space<vmem>>, %arg9: memref<128x128xbf16, #tpu.memory_space<vmem>>, %arg10: memref<1x128xf32, #tpu.memory_space<vmem>>, %arg11: memref<1x1x128xf32, #tpu.memory_space<vmem>>, %arg12: memref<228x32xf32, #tpu.memory_space<vmem>>, %arg13: memref<196x64xf32, #tpu.memory_space<vmem>>, %arg14: memref<1x3136xf32, #tpu.memory_space<vmem>>) attributes {dimension_semantics = [#tpu.dimension_semantics<parallel>], iteration_bounds = array<i64: 2>, scalar_prefetch = 0 : i64, scratch_operands = 3 : i64, tpu.core_type = #tpu.core_type<tc>, window_params = [{transform_indices = @transform_0, window_bounds = array<i64: 1, 784, 9>}, {pipeline_mode = #tpu.pipeline_mode<synchronous>, transform_indices = @transform_1, window_bounds = array<i64: 9, 32>}, {pipeline_mode = #tpu.pipeline_mode<synchronous>, transform_indices = @transform_2, window_bounds = array<i64: 1, 32>}, {pipeline_mode = #tpu.pipeline_mode<synchronous>, transform_indices = @transform_3, window_bounds = array<i64: 9, 32, 64>}, {pipeline_mode = #tpu.pipeline_mode<synchronous>, transform_indices = @transform_4, window_bounds = array<i64: 1, 64>}, {pipeline_mode = #tpu.pipeline_mode<synchronous>, transform_indices = @transform_5, window_bounds = array<i64: 196, 2>}, {pipeline_mode = #tpu.pipeline_mode<synchronous>, transform_indices = @transform_6, window_bounds = array<i64: 3136, 128>}, {pipeline_mode = #tpu.pipeline_mode<synchronous>, transform_indices = @transform_7, window_bounds = array<i64: 1, 128>}, {pipeline_mode = #tpu.pipeline_mode<synchronous>, transform_indices = @transform_8, window_bounds = array<i64: 128, 128>}, {pipeline_mode = #tpu.pipeline_mode<synchronous>, transform_indices = @transform_9, window_bounds = array<i64: 1, 128>}, {transform_indices = @transform_10, window_bounds = array<i64: 1, 1, 128>}]} {
    %c0 = arith.constant 0 : index
    %c0_0 = arith.constant 0 : index
    %c0_1 = arith.constant 0 : index
    %0 = vector.load %arg1[%c0, %c0_0, %c0_1] : memref<1x784x9xbf16, #tpu.memory_space<vmem>>, vector<1x784x9xbf16>
    %1 = vector.shape_cast %0 : vector<1x784x9xbf16> to vector<784x9xbf16>
    %c0_2 = arith.constant 0 : index
    %c0_3 = arith.constant 0 : index
    %2 = vector.load %arg2[%c0_2, %c0_3] : memref<9x32xbf16, #tpu.memory_space<vmem>>, vector<9x32xbf16>
    %cst = arith.constant dense<0.000000e+00> : vector<784x32xf32>
    %3 = tpu.matmul %1, %2, %cst {dimension_numbers = #tpu.dot_dimension_numbers<[1], [0], [0], [1], [0, 0, 1, 1], [], []>} : vector<784x9xbf16>, vector<9x32xbf16>, vector<784x32xf32> -> vector<784x32xf32>
    %4 = vector.extract_strided_slice %3 {offsets = [0, 0], sizes = [196, 32], strides = [1, 1]} : vector<784x32xf32> to vector<196x32xf32>
    %5 = vector.extract_strided_slice %3 {offsets = [196, 0], sizes = [196, 32], strides = [1, 1]} : vector<784x32xf32> to vector<196x32xf32>
    %6 = arith.maximumf %4, %5 : vector<196x32xf32>
    %7 = vector.extract_strided_slice %3 {offsets = [392, 0], sizes = [196, 32], strides = [1, 1]} : vector<784x32xf32> to vector<196x32xf32>
    %8 = vector.extract_strided_slice %3 {offsets = [588, 0], sizes = [196, 32], strides = [1, 1]} : vector<784x32xf32> to vector<196x32xf32>
    %9 = arith.maximumf %7, %8 : vector<196x32xf32>
    %10 = arith.maximumf %6, %9 : vector<196x32xf32>
    %c0_4 = arith.constant 0 : index
    %c0_5 = arith.constant 0 : index
    %11 = vector.load %arg3[%c0_4, %c0_5] : memref<1x32xf32, #tpu.memory_space<vmem>>, vector<1x32xf32>
    %12 = vector.broadcast %11 : vector<1x32xf32> to vector<196x32xf32>
    %13 = arith.addf %10, %12 : vector<196x32xf32>
    %cst_6 = arith.constant 0.000000e+00 : f32
    %14 = vector.broadcast %cst_6 : f32 to vector<196x32xf32>
    %15 = arith.maximumf %13, %14 : vector<196x32xf32>
    %cst_7 = arith.constant 0.000000e+00 : f32
    %16 = vector.broadcast %cst_7 : f32 to vector<16x32xf32>
    %c0_8 = arith.constant 0 : index
    %c0_9 = arith.constant 0 : index
    %17 = vector.load %arg12[%c0_8, %c0_9] : memref<228x32xf32, #tpu.memory_space<vmem>>, vector<16x32xf32>
    tpu.vector_store %arg12[%c0_8, %c0_9], %16 {strides = array<i32>} : memref<228x32xf32, #tpu.memory_space<vmem>>, vector<16x32xf32>,
    %cst_10 = arith.constant 0.000000e+00 : f32
    %18 = vector.broadcast %cst_10 : f32 to vector<16x32xf32>
    %c212 = arith.constant 212 : index
    %c0_11 = arith.constant 0 : index
    %19 = vector.load %arg12[%c212, %c0_11] : memref<228x32xf32, #tpu.memory_space<vmem>>, vector<16x32xf32>
    tpu.vector_store %arg12[%c212, %c0_11], %18 {strides = array<i32>} : memref<228x32xf32, #tpu.memory_space<vmem>>, vector<16x32xf32>,
    %c16 = arith.constant 16 : index
    %c0_12 = arith.constant 0 : index
    %20 = vector.load %arg12[%c16, %c0_12] : memref<228x32xf32, #tpu.memory_space<vmem>>, vector<196x32xf32>
    tpu.vector_store %arg12[%c16, %c0_12], %15 {strides = array<i32>} : memref<228x32xf32, #tpu.memory_space<vmem>>, vector<196x32xf32>,
    %c0_13 = arith.constant 0 : index
    %c0_14 = arith.constant 0 : index
    %21 = vector.load %arg6[%c0_13, %c0_14] : memref<196x2xbf16, #tpu.memory_space<vmem>>, vector<196x1xbf16>
    %c0_15 = arith.constant 0 : index
    %c1 = arith.constant 1 : index
    %22 = vector.load %arg6[%c0_15, %c1] : memref<196x2xbf16, #tpu.memory_space<vmem>>, vector<196x1xbf16>
    %cst_16 = arith.constant 0.000000e+00 : f32
    %23 = vector.broadcast %cst_16 : f32 to vector<196x64xf32>
    %c1_17 = arith.constant 1 : index
    %c0_18 = arith.constant 0 : index
    %24 = vector.load %arg12[%c1_17, %c0_18] : memref<228x32xf32, #tpu.memory_space<vmem>>, vector<196x32xf32>
    %25 = arith.truncf %24 : vector<196x32xf32> to vector<196x32xbf16>
    %26 = vector.broadcast %21 : vector<196x1xbf16> to vector<196x32xbf16>
    %27 = arith.mulf %25, %26 : vector<196x32xbf16>
    %c0_19 = arith.constant 0 : index
    %c0_20 = arith.constant 0 : index
    %c0_21 = arith.constant 0 : index
    %28 = vector.load %arg4[%c0_19, %c0_20, %c0_21] : memref<9x32x64xbf16, #tpu.memory_space<vmem>>, vector<1x32x64xbf16>
    %29 = vector.shape_cast %28 : vector<1x32x64xbf16> to vector<32x64xbf16>
    %cst_22 = arith.constant dense<0.000000e+00> : vector<196x64xf32>
    %30 = tpu.matmul %27, %29, %cst_22 {dimension_numbers = #tpu.dot_dimension_numbers<[1], [0], [0], [1], [0, 0, 1, 1], [], []>} : vector<196x32xbf16>, vector<32x64xbf16>, vector<196x64xf32> -> vector<196x64xf32>
    %31 = arith.addf %23, %30 : vector<196x64xf32>
    %c2 = arith.constant 2 : index
    %c0_23 = arith.constant 0 : index
    %32 = vector.load %arg12[%c2, %c0_23] : memref<228x32xf32, #tpu.memory_space<vmem>>, vector<196x32xf32>
    %33 = arith.truncf %32 : vector<196x32xf32> to vector<196x32xbf16>
    %c1_24 = arith.constant 1 : index
    %c0_25 = arith.constant 0 : index
    %c0_26 = arith.constant 0 : index
    %34 = vector.load %arg4[%c1_24, %c0_25, %c0_26] : memref<9x32x64xbf16, #tpu.memory_space<vmem>>, vector<1x32x64xbf16>
    %35 = vector.shape_cast %34 : vector<1x32x64xbf16> to vector<32x64xbf16>
    %cst_27 = arith.constant dense<0.000000e+00> : vector<196x64xf32>
    %36 = tpu.matmul %33, %35, %cst_27 {dimension_numbers = #tpu.dot_dimension_numbers<[1], [0], [0], [1], [0, 0, 1, 1], [], []>} : vector<196x32xbf16>, vector<32x64xbf16>, vector<196x64xf32> -> vector<196x64xf32>
    %37 = arith.addf %31, %36 : vector<196x64xf32>
    %c3 = arith.constant 3 : index
    %c0_28 = arith.constant 0 : index
    %38 = vector.load %arg12[%c3, %c0_28] : memref<228x32xf32, #tpu.memory_space<vmem>>, vector<196x32xf32>
    %39 = arith.truncf %38 : vector<196x32xf32> to vector<196x32xbf16>
    %40 = vector.broadcast %22 : vector<196x1xbf16> to vector<196x32xbf16>
    %41 = arith.mulf %39, %40 : vector<196x32xbf16>
    %c2_29 = arith.constant 2 : index
    %c0_30 = arith.constant 0 : index
    %c0_31 = arith.constant 0 : index
    %42 = vector.load %arg4[%c2_29, %c0_30, %c0_31] : memref<9x32x64xbf16, #tpu.memory_space<vmem>>, vector<1x32x64xbf16>
    %43 = vector.shape_cast %42 : vector<1x32x64xbf16> to vector<32x64xbf16>
    %cst_32 = arith.constant dense<0.000000e+00> : vector<196x64xf32>
    %44 = tpu.matmul %41, %43, %cst_32 {dimension_numbers = #tpu.dot_dimension_numbers<[1], [0], [0], [1], [0, 0, 1, 1], [], []>} : vector<196x32xbf16>, vector<32x64xbf16>, vector<196x64xf32> -> vector<196x64xf32>
    %45 = arith.addf %37, %44 : vector<196x64xf32>
    %c15 = arith.constant 15 : index
    %c0_33 = arith.constant 0 : index
    %46 = vector.load %arg12[%c15, %c0_33] : memref<228x32xf32, #tpu.memory_space<vmem>>, vector<196x32xf32>
    %47 = arith.truncf %46 : vector<196x32xf32> to vector<196x32xbf16>
    %48 = vector.broadcast %21 : vector<196x1xbf16> to vector<196x32xbf16>
    %49 = arith.mulf %47, %48 : vector<196x32xbf16>
    %c3_34 = arith.constant 3 : index
    %c0_35 = arith.constant 0 : index
    %c0_36 = arith.constant 0 : index
    %50 = vector.load %arg4[%c3_34, %c0_35, %c0_36] : memref<9x32x64xbf16, #tpu.memory_space<vmem>>, vector<1x32x64xbf16>
    %51 = vector.shape_cast %50 : vector<1x32x64xbf16> to vector<32x64xbf16>
    %cst_37 = arith.constant dense<0.000000e+00> : vector<196x64xf32>
    %52 = tpu.matmul %49, %51, %cst_37 {dimension_numbers = #tpu.dot_dimension_numbers<[1], [0], [0], [1], [0, 0, 1, 1], [], []>} : vector<196x32xbf16>, vector<32x64xbf16>, vector<196x64xf32> -> vector<196x64xf32>
    %53 = arith.addf %45, %52 : vector<196x64xf32>
    %c16_38 = arith.constant 16 : index
    %c0_39 = arith.constant 0 : index
    %54 = vector.load %arg12[%c16_38, %c0_39] : memref<228x32xf32, #tpu.memory_space<vmem>>, vector<196x32xf32>
    %55 = arith.truncf %54 : vector<196x32xf32> to vector<196x32xbf16>
    %c4 = arith.constant 4 : index
    %c0_40 = arith.constant 0 : index
    %c0_41 = arith.constant 0 : index
    %56 = vector.load %arg4[%c4, %c0_40, %c0_41] : memref<9x32x64xbf16, #tpu.memory_space<vmem>>, vector<1x32x64xbf16>
    %57 = vector.shape_cast %56 : vector<1x32x64xbf16> to vector<32x64xbf16>
    %cst_42 = arith.constant dense<0.000000e+00> : vector<196x64xf32>
    %58 = tpu.matmul %55, %57, %cst_42 {dimension_numbers = #tpu.dot_dimension_numbers<[1], [0], [0], [1], [0, 0, 1, 1], [], []>} : vector<196x32xbf16>, vector<32x64xbf16>, vector<196x64xf32> -> vector<196x64xf32>
    %59 = arith.addf %53, %58 : vector<196x64xf32>
    %c17 = arith.constant 17 : index
    %c0_43 = arith.constant 0 : index
    %60 = vector.load %arg12[%c17, %c0_43] : memref<228x32xf32, #tpu.memory_space<vmem>>, vector<196x32xf32>
    %61 = arith.truncf %60 : vector<196x32xf32> to vector<196x32xbf16>
    %62 = vector.broadcast %22 : vector<196x1xbf16> to vector<196x32xbf16>
    %63 = arith.mulf %61, %62 : vector<196x32xbf16>
    %c5 = arith.constant 5 : index
    %c0_44 = arith.constant 0 : index
    %c0_45 = arith.constant 0 : index
    %64 = vector.load %arg4[%c5, %c0_44, %c0_45] : memref<9x32x64xbf16, #tpu.memory_space<vmem>>, vector<1x32x64xbf16>
    %65 = vector.shape_cast %64 : vector<1x32x64xbf16> to vector<32x64xbf16>
    %cst_46 = arith.constant dense<0.000000e+00> : vector<196x64xf32>
    %66 = tpu.matmul %63, %65, %cst_46 {dimension_numbers = #tpu.dot_dimension_numbers<[1], [0], [0], [1], [0, 0, 1, 1], [], []>} : vector<196x32xbf16>, vector<32x64xbf16>, vector<196x64xf32> -> vector<196x64xf32>
    %67 = arith.addf %59, %66 : vector<196x64xf32>
    %c29 = arith.constant 29 : index
    %c0_47 = arith.constant 0 : index
    %68 = vector.load %arg12[%c29, %c0_47] : memref<228x32xf32, #tpu.memory_space<vmem>>, vector<196x32xf32>
    %69 = arith.truncf %68 : vector<196x32xf32> to vector<196x32xbf16>
    %70 = vector.broadcast %21 : vector<196x1xbf16> to vector<196x32xbf16>
    %71 = arith.mulf %69, %70 : vector<196x32xbf16>
    %c6 = arith.constant 6 : index
    %c0_48 = arith.constant 0 : index
    %c0_49 = arith.constant 0 : index
    %72 = vector.load %arg4[%c6, %c0_48, %c0_49] : memref<9x32x64xbf16, #tpu.memory_space<vmem>>, vector<1x32x64xbf16>
    %73 = vector.shape_cast %72 : vector<1x32x64xbf16> to vector<32x64xbf16>
    %cst_50 = arith.constant dense<0.000000e+00> : vector<196x64xf32>
    %74 = tpu.matmul %71, %73, %cst_50 {dimension_numbers = #tpu.dot_dimension_numbers<[1], [0], [0], [1], [0, 0, 1, 1], [], []>} : vector<196x32xbf16>, vector<32x64xbf16>, vector<196x64xf32> -> vector<196x64xf32>
    %75 = arith.addf %67, %74 : vector<196x64xf32>
    %c30 = arith.constant 30 : index
    %c0_51 = arith.constant 0 : index
    %76 = vector.load %arg12[%c30, %c0_51] : memref<228x32xf32, #tpu.memory_space<vmem>>, vector<196x32xf32>
    %77 = arith.truncf %76 : vector<196x32xf32> to vector<196x32xbf16>
    %c7 = arith.constant 7 : index
    %c0_52 = arith.constant 0 : index
    %c0_53 = arith.constant 0 : index
    %78 = vector.load %arg4[%c7, %c0_52, %c0_53] : memref<9x32x64xbf16, #tpu.memory_space<vmem>>, vector<1x32x64xbf16>
    %79 = vector.shape_cast %78 : vector<1x32x64xbf16> to vector<32x64xbf16>
    %cst_54 = arith.constant dense<0.000000e+00> : vector<196x64xf32>
    %80 = tpu.matmul %77, %79, %cst_54 {dimension_numbers = #tpu.dot_dimension_numbers<[1], [0], [0], [1], [0, 0, 1, 1], [], []>} : vector<196x32xbf16>, vector<32x64xbf16>, vector<196x64xf32> -> vector<196x64xf32>
    %81 = arith.addf %75, %80 : vector<196x64xf32>
    %c31 = arith.constant 31 : index
    %c0_55 = arith.constant 0 : index
    %82 = vector.load %arg12[%c31, %c0_55] : memref<228x32xf32, #tpu.memory_space<vmem>>, vector<196x32xf32>
    %83 = arith.truncf %82 : vector<196x32xf32> to vector<196x32xbf16>
    %84 = vector.broadcast %22 : vector<196x1xbf16> to vector<196x32xbf16>
    %85 = arith.mulf %83, %84 : vector<196x32xbf16>
    %c8 = arith.constant 8 : index
    %c0_56 = arith.constant 0 : index
    %c0_57 = arith.constant 0 : index
    %86 = vector.load %arg4[%c8, %c0_56, %c0_57] : memref<9x32x64xbf16, #tpu.memory_space<vmem>>, vector<1x32x64xbf16>
    %87 = vector.shape_cast %86 : vector<1x32x64xbf16> to vector<32x64xbf16>
    %cst_58 = arith.constant dense<0.000000e+00> : vector<196x64xf32>
    %88 = tpu.matmul %85, %87, %cst_58 {dimension_numbers = #tpu.dot_dimension_numbers<[1], [0], [0], [1], [0, 0, 1, 1], [], []>} : vector<196x32xbf16>, vector<32x64xbf16>, vector<196x64xf32> -> vector<196x64xf32>
    %89 = arith.addf %81, %88 : vector<196x64xf32>
    %c0_59 = arith.constant 0 : index
    %c0_60 = arith.constant 0 : index
    %90 = vector.load %arg5[%c0_59, %c0_60] : memref<1x64xf32, #tpu.memory_space<vmem>>, vector<1x64xf32>
    %91 = vector.broadcast %90 : vector<1x64xf32> to vector<196x64xf32>
    %92 = arith.addf %89, %91 : vector<196x64xf32>
    %c0_61 = arith.constant 0 : index
    %c0_62 = arith.constant 0 : index
    %93 = vector.load %arg13[%c0_61, %c0_62] : memref<196x64xf32, #tpu.memory_space<vmem>>, vector<196x64xf32>
    tpu.vector_store %arg13[%c0_61, %c0_62], %92 {strides = array<i32>} : memref<196x64xf32, #tpu.memory_space<vmem>>, vector<196x64xf32>,
    %c0_63 = arith.constant 0 : index
    %c0_64 = arith.constant 0 : index
    %94 = vector.load %arg13[%c0_63, %c0_64] : memref<196x64xf32, #tpu.memory_space<vmem>>, vector<1x64xf32>
    %c1_65 = arith.constant 1 : index
    %c0_66 = arith.constant 0 : index
    %95 = vector.load %arg13[%c1_65, %c0_66] : memref<196x64xf32, #tpu.memory_space<vmem>>, vector<1x64xf32>
    %96 = arith.maximumf %94, %95 : vector<1x64xf32>
    %c14 = arith.constant 14 : index
    %c0_67 = arith.constant 0 : index
    %97 = vector.load %arg13[%c14, %c0_67] : memref<196x64xf32, #tpu.memory_space<vmem>>, vector<1x64xf32>
    %c15_68 = arith.constant 15 : index
    %c0_69 = arith.constant 0 : index
    %98 = vector.load %arg13[%c15_68, %c0_69] : memref<196x64xf32, #tpu.memory_space<vmem>>, vector<1x64xf32>
    %99 = arith.maximumf %97, %98 : vector<1x64xf32>
    %100 = arith.maximumf %96, %99 : vector<1x64xf32>
    %c0_70 = arith.constant 0 : index
    %c0_71 = arith.constant 0 : index
    %101 = vector.load %arg14[%c0_70, %c0_71] : memref<1x3136xf32, #tpu.memory_space<vmem>>, vector<1x64xf32>
    tpu.vector_store %arg14[%c0_70, %c0_71], %100 {strides = array<i32>} : memref<1x3136xf32, #tpu.memory_space<vmem>>, vector<1x64xf32>,
    %c2_72 = arith.constant 2 : index
    %c0_73 = arith.constant 0 : index
    %102 = vector.load %arg13[%c2_72, %c0_73] : memref<196x64xf32, #tpu.memory_space<vmem>>, vector<1x64xf32>
    %c3_74 = arith.constant 3 : index
    %c0_75 = arith.constant 0 : index
    %103 = vector.load %arg13[%c3_74, %c0_75] : memref<196x64xf32, #tpu.memory_space<vmem>>, vector<1x64xf32>
    %104 = arith.maximumf %102, %103 : vector<1x64xf32>
    %c16_76 = arith.constant 16 : index
    %c0_77 = arith.constant 0 : index
    %105 = vector.load %arg13[%c16_76, %c0_77] : memref<196x64xf32, #tpu.memory_space<vmem>>, vector<1x64xf32>
    %c17_78 = arith.constant 17 : index
    %c0_79 = arith.constant 0 : index
    %106 = vector.load %arg13[%c17_78, %c0_79] : memref<196x64xf32, #tpu.memory_space<vmem>>, vector<1x64xf32>
    %107 = arith.maximumf %105, %106 : vector<1x64xf32>
    %108 = arith.maximumf %104, %107 : vector<1x64xf32>
    %c0_80 = arith.constant 0 : index
    %c64 = arith.constant 64 : index
    %109 = vector.load %arg14[%c0_80, %c64] : memref<1x3136xf32, #tpu.memory_space<vmem>>, vector<1x64xf32>
    tpu.vector_store %arg14[%c0_80, %c64], %108 {strides = array<i32>} : memref<1x3136xf32, #tpu.memory_space<vmem>>, vector<1x64xf32>,
    %c4_81 = arith.constant 4 : index
    %c0_82 = arith.constant 0 : index
    %110 = vector.load %arg13[%c4_81, %c0_82] : memref<196x64xf32, #tpu.memory_space<vmem>>, vector<1x64xf32>
    %c5_83 = arith.constant 5 : index
    %c0_84 = arith.constant 0 : index
    %111 = vector.load %arg13[%c5_83, %c0_84] : memref<196x64xf32, #tpu.memory_space<vmem>>, vector<1x64xf32>
    %112 = arith.maximumf %110, %111 : vector<1x64xf32>
    %c18 = arith.constant 18 : index
    %c0_85 = arith.constant 0 : index
    %113 = vector.load %arg13[%c18, %c0_85] : memref<196x64xf32, #tpu.memory_space<vmem>>, vector<1x64xf32>
    %c19 = arith.constant 19 : index
    %c0_86 = arith.constant 0 : index
    %114 = vector.load %arg13[%c19, %c0_86] : memref<196x64xf32, #tpu.memory_space<vmem>>, vector<1x64xf32>
    %115 = arith.maximumf %113, %114 : vector<1x64xf32>
    %116 = arith.maximumf %112, %115 : vector<1x64xf32>
    %c0_87 = arith.constant 0 : index
    %c128 = arith.constant 128 : index
    %117 = vector.load %arg14[%c0_87, %c128] : memref<1x3136xf32, #tpu.memory_space<vmem>>, vector<1x64xf32>
    tpu.vector_store %arg14[%c0_87, %c128], %116 {strides = array<i32>} : memref<1x3136xf32, #tpu.memory_space<vmem>>, vector<1x64xf32>,
    %c6_88 = arith.constant 6 : index
    %c0_89 = arith.constant 0 : index
    %118 = vector.load %arg13[%c6_88, %c0_89] : memref<196x64xf32, #tpu.memory_space<vmem>>, vector<1x64xf32>
    %c7_90 = arith.constant 7 : index
    %c0_91 = arith.constant 0 : index
    %119 = vector.load %arg13[%c7_90, %c0_91] : memref<196x64xf32, #tpu.memory_space<vmem>>, vector<1x64xf32>
    %120 = arith.maximumf %118, %119 : vector<1x64xf32>
    %c20 = arith.constant 20 : index
    %c0_92 = arith.constant 0 : index
    %121 = vector.load %arg13[%c20, %c0_92] : memref<196x64xf32, #tpu.memory_space<vmem>>, vector<1x64xf32>
    %c21 = arith.constant 21 : index
    %c0_93 = arith.constant 0 : index
    %122 = vector.load %arg13[%c21, %c0_93] : memref<196x64xf32, #tpu.memory_space<vmem>>, vector<1x64xf32>
    %123 = arith.maximumf %121, %122 : vector<1x64xf32>
    %124 = arith.maximumf %120, %123 : vector<1x64xf32>
    %c0_94 = arith.constant 0 : index
    %c192 = arith.constant 192 : index
    %125 = vector.load %arg14[%c0_94, %c192] : memref<1x3136xf32, #tpu.memory_space<vmem>>, vector<1x64xf32>
    tpu.vector_store %arg14[%c0_94, %c192], %124 {strides = array<i32>} : memref<1x3136xf32, #tpu.memory_space<vmem>>, vector<1x64xf32>,
    %c8_95 = arith.constant 8 : index
    %c0_96 = arith.constant 0 : index
    %126 = vector.load %arg13[%c8_95, %c0_96] : memref<196x64xf32, #tpu.memory_space<vmem>>, vector<1x64xf32>
    %c9 = arith.constant 9 : index
    %c0_97 = arith.constant 0 : index
    %127 = vector.load %arg13[%c9, %c0_97] : memref<196x64xf32, #tpu.memory_space<vmem>>, vector<1x64xf32>
    %128 = arith.maximumf %126, %127 : vector<1x64xf32>
    %c22 = arith.constant 22 : index
    %c0_98 = arith.constant 0 : index
    %129 = vector.load %arg13[%c22, %c0_98] : memref<196x64xf32, #tpu.memory_space<vmem>>, vector<1x64xf32>
    %c23 = arith.constant 23 : index
    %c0_99 = arith.constant 0 : index
    %130 = vector.load %arg13[%c23, %c0_99] : memref<196x64xf32, #tpu.memory_space<vmem>>, vector<1x64xf32>
    %131 = arith.maximumf %129, %130 : vector<1x64xf32>
    %132 = arith.maximumf %128, %131 : vector<1x64xf32>
    %c0_100 = arith.constant 0 : index
    %c256 = arith.constant 256 : index
    %133 = vector.load %arg14[%c0_100, %c256] : memref<1x3136xf32, #tpu.memory_space<vmem>>, vector<1x64xf32>
    tpu.vector_store %arg14[%c0_100, %c256], %132 {strides = array<i32>} : memref<1x3136xf32, #tpu.memory_space<vmem>>, vector<1x64xf32>,
    %c10 = arith.constant 10 : index
    %c0_101 = arith.constant 0 : index
    %134 = vector.load %arg13[%c10, %c0_101] : memref<196x64xf32, #tpu.memory_space<vmem>>, vector<1x64xf32>
    %c11 = arith.constant 11 : index
    %c0_102 = arith.constant 0 : index
    %135 = vector.load %arg13[%c11, %c0_102] : memref<196x64xf32, #tpu.memory_space<vmem>>, vector<1x64xf32>
    %136 = arith.maximumf %134, %135 : vector<1x64xf32>
    %c24 = arith.constant 24 : index
    %c0_103 = arith.constant 0 : index
    %137 = vector.load %arg13[%c24, %c0_103] : memref<196x64xf32, #tpu.memory_space<vmem>>, vector<1x64xf32>
    %c25 = arith.constant 25 : index
    %c0_104 = arith.constant 0 : index
    %138 = vector.load %arg13[%c25, %c0_104] : memref<196x64xf32, #tpu.memory_space<vmem>>, vector<1x64xf32>
    %139 = arith.maximumf %137, %138 : vector<1x64xf32>
    %140 = arith.maximumf %136, %139 : vector<1x64xf32>
    %c0_105 = arith.constant 0 : index
    %c320 = arith.constant 320 : index
    %141 = vector.load %arg14[%c0_105, %c320] : memref<1x3136xf32, #tpu.memory_space<vmem>>, vector<1x64xf32>
    tpu.vector_store %arg14[%c0_105, %c320], %140 {strides = array<i32>} : memref<1x3136xf32, #tpu.memory_space<vmem>>, vector<1x64xf32>,
    %c12 = arith.constant 12 : index
    %c0_106 = arith.constant 0 : index
    %142 = vector.load %arg13[%c12, %c0_106] : memref<196x64xf32, #tpu.memory_space<vmem>>, vector<1x64xf32>
    %c13 = arith.constant 13 : index
    %c0_107 = arith.constant 0 : index
    %143 = vector.load %arg13[%c13, %c0_107] : memref<196x64xf32, #tpu.memory_space<vmem>>, vector<1x64xf32>
    %144 = arith.maximumf %142, %143 : vector<1x64xf32>
    %c26 = arith.constant 26 : index
    %c0_108 = arith.constant 0 : index
    %145 = vector.load %arg13[%c26, %c0_108] : memref<196x64xf32, #tpu.memory_space<vmem>>, vector<1x64xf32>
    %c27 = arith.constant 27 : index
    %c0_109 = arith.constant 0 : index
    %146 = vector.load %arg13[%c27, %c0_109] : memref<196x64xf32, #tpu.memory_space<vmem>>, vector<1x64xf32>
    %147 = arith.maximumf %145, %146 : vector<1x64xf32>
    %148 = arith.maximumf %144, %147 : vector<1x64xf32>
    %c0_110 = arith.constant 0 : index
    %c384 = arith.constant 384 : index
    %149 = vector.load %arg14[%c0_110, %c384] : memref<1x3136xf32, #tpu.memory_space<vmem>>, vector<1x64xf32>
    tpu.vector_store %arg14[%c0_110, %c384], %148 {strides = array<i32>} : memref<1x3136xf32, #tpu.memory_space<vmem>>, vector<1x64xf32>,
    %c28 = arith.constant 28 : index
    %c0_111 = arith.constant 0 : index
    %150 = vector.load %arg13[%c28, %c0_111] : memref<196x64xf32, #tpu.memory_space<vmem>>, vector<1x64xf32>
    %c29_112 = arith.constant 29 : index
    %c0_113 = arith.constant 0 : index
    %151 = vector.load %arg13[%c29_112, %c0_113] : memref<196x64xf32, #tpu.memory_space<vmem>>, vector<1x64xf32>
    %152 = arith.maximumf %150, %151 : vector<1x64xf32>
    %c42 = arith.constant 42 : index
    %c0_114 = arith.constant 0 : index
    %153 = vector.load %arg13[%c42, %c0_114] : memref<196x64xf32, #tpu.memory_space<vmem>>, vector<1x64xf32>
    %c43 = arith.constant 43 : index
    %c0_115 = arith.constant 0 : index
    %154 = vector.load %arg13[%c43, %c0_115] : memref<196x64xf32, #tpu.memory_space<vmem>>, vector<1x64xf32>
    %155 = arith.maximumf %153, %154 : vector<1x64xf32>
    %156 = arith.maximumf %152, %155 : vector<1x64xf32>
    %c0_116 = arith.constant 0 : index
    %c448 = arith.constant 448 : index
    %157 = vector.load %arg14[%c0_116, %c448] : memref<1x3136xf32, #tpu.memory_space<vmem>>, vector<1x64xf32>
    tpu.vector_store %arg14[%c0_116, %c448], %156 {strides = array<i32>} : memref<1x3136xf32, #tpu.memory_space<vmem>>, vector<1x64xf32>,
    %c30_117 = arith.constant 30 : index
    %c0_118 = arith.constant 0 : index
    %158 = vector.load %arg13[%c30_117, %c0_118] : memref<196x64xf32, #tpu.memory_space<vmem>>, vector<1x64xf32>
    %c31_119 = arith.constant 31 : index
    %c0_120 = arith.constant 0 : index
    %159 = vector.load %arg13[%c31_119, %c0_120] : memref<196x64xf32, #tpu.memory_space<vmem>>, vector<1x64xf32>
    %160 = arith.maximumf %158, %159 : vector<1x64xf32>
    %c44 = arith.constant 44 : index
    %c0_121 = arith.constant 0 : index
    %161 = vector.load %arg13[%c44, %c0_121] : memref<196x64xf32, #tpu.memory_space<vmem>>, vector<1x64xf32>
    %c45 = arith.constant 45 : index
    %c0_122 = arith.constant 0 : index
    %162 = vector.load %arg13[%c45, %c0_122] : memref<196x64xf32, #tpu.memory_space<vmem>>, vector<1x64xf32>
    %163 = arith.maximumf %161, %162 : vector<1x64xf32>
    %164 = arith.maximumf %160, %163 : vector<1x64xf32>
    %c0_123 = arith.constant 0 : index
    %c512 = arith.constant 512 : index
    %165 = vector.load %arg14[%c0_123, %c512] : memref<1x3136xf32, #tpu.memory_space<vmem>>, vector<1x64xf32>
    tpu.vector_store %arg14[%c0_123, %c512], %164 {strides = array<i32>} : memref<1x3136xf32, #tpu.memory_space<vmem>>, vector<1x64xf32>,
    %c32 = arith.constant 32 : index
    %c0_124 = arith.constant 0 : index
    %166 = vector.load %arg13[%c32, %c0_124] : memref<196x64xf32, #tpu.memory_space<vmem>>, vector<1x64xf32>
    %c33 = arith.constant 33 : index
    %c0_125 = arith.constant 0 : index
    %167 = vector.load %arg13[%c33, %c0_125] : memref<196x64xf32, #tpu.memory_space<vmem>>, vector<1x64xf32>
    %168 = arith.maximumf %166, %167 : vector<1x64xf32>
    %c46 = arith.constant 46 : index
    %c0_126 = arith.constant 0 : index
    %169 = vector.load %arg13[%c46, %c0_126] : memref<196x64xf32, #tpu.memory_space<vmem>>, vector<1x64xf32>
    %c47 = arith.constant 47 : index
    %c0_127 = arith.constant 0 : index
    %170 = vector.load %arg13[%c47, %c0_127] : memref<196x64xf32, #tpu.memory_space<vmem>>, vector<1x64xf32>
    %171 = arith.maximumf %169, %170 : vector<1x64xf32>
    %172 = arith.maximumf %168, %171 : vector<1x64xf32>
    %c0_128 = arith.constant 0 : index
    %c576 = arith.constant 576 : index
    %173 = vector.load %arg14[%c0_128, %c576] : memref<1x3136xf32, #tpu.memory_space<vmem>>, vector<1x64xf32>
    tpu.vector_store %arg14[%c0_128, %c576], %172 {strides = array<i32>} : memref<1x3136xf32, #tpu.memory_space<vmem>>, vector<1x64xf32>,
    %c34 = arith.constant 34 : index
    %c0_129 = arith.constant 0 : index
    %174 = vector.load %arg13[%c34, %c0_129] : memref<196x64xf32, #tpu.memory_space<vmem>>, vector<1x64xf32>
    %c35 = arith.constant 35 : index
    %c0_130 = arith.constant 0 : index
    %175 = vector.load %arg13[%c35, %c0_130] : memref<196x64xf32, #tpu.memory_space<vmem>>, vector<1x64xf32>
    %176 = arith.maximumf %174, %175 : vector<1x64xf32>
    %c48 = arith.constant 48 : index
    %c0_131 = arith.constant 0 : index
    %177 = vector.load %arg13[%c48, %c0_131] : memref<196x64xf32, #tpu.memory_space<vmem>>, vector<1x64xf32>
    %c49 = arith.constant 49 : index
    %c0_132 = arith.constant 0 : index
    %178 = vector.load %arg13[%c49, %c0_132] : memref<196x64xf32, #tpu.memory_space<vmem>>, vector<1x64xf32>
    %179 = arith.maximumf %177, %178 : vector<1x64xf32>
    %180 = arith.maximumf %176, %179 : vector<1x64xf32>
    %c0_133 = arith.constant 0 : index
    %c640 = arith.constant 640 : index
    %181 = vector.load %arg14[%c0_133, %c640] : memref<1x3136xf32, #tpu.memory_space<vmem>>, vector<1x64xf32>
    tpu.vector_store %arg14[%c0_133, %c640], %180 {strides = array<i32>} : memref<1x3136xf32, #tpu.memory_space<vmem>>, vector<1x64xf32>,
    %c36 = arith.constant 36 : index
    %c0_134 = arith.constant 0 : index
    %182 = vector.load %arg13[%c36, %c0_134] : memref<196x64xf32, #tpu.memory_space<vmem>>, vector<1x64xf32>
    %c37 = arith.constant 37 : index
    %c0_135 = arith.constant 0 : index
    %183 = vector.load %arg13[%c37, %c0_135] : memref<196x64xf32, #tpu.memory_space<vmem>>, vector<1x64xf32>
    %184 = arith.maximumf %182, %183 : vector<1x64xf32>
    %c50 = arith.constant 50 : index
    %c0_136 = arith.constant 0 : index
    %185 = vector.load %arg13[%c50, %c0_136] : memref<196x64xf32, #tpu.memory_space<vmem>>, vector<1x64xf32>
    %c51 = arith.constant 51 : index
    %c0_137 = arith.constant 0 : index
    %186 = vector.load %arg13[%c51, %c0_137] : memref<196x64xf32, #tpu.memory_space<vmem>>, vector<1x64xf32>
    %187 = arith.maximumf %185, %186 : vector<1x64xf32>
    %188 = arith.maximumf %184, %187 : vector<1x64xf32>
    %c0_138 = arith.constant 0 : index
    %c704 = arith.constant 704 : index
    %189 = vector.load %arg14[%c0_138, %c704] : memref<1x3136xf32, #tpu.memory_space<vmem>>, vector<1x64xf32>
    tpu.vector_store %arg14[%c0_138, %c704], %188 {strides = array<i32>} : memref<1x3136xf32, #tpu.memory_space<vmem>>, vector<1x64xf32>,
    %c38 = arith.constant 38 : index
    %c0_139 = arith.constant 0 : index
    %190 = vector.load %arg13[%c38, %c0_139] : memref<196x64xf32, #tpu.memory_space<vmem>>, vector<1x64xf32>
    %c39 = arith.constant 39 : index
    %c0_140 = arith.constant 0 : index
    %191 = vector.load %arg13[%c39, %c0_140] : memref<196x64xf32, #tpu.memory_space<vmem>>, vector<1x64xf32>
    %192 = arith.maximumf %190, %191 : vector<1x64xf32>
    %c52 = arith.constant 52 : index
    %c0_141 = arith.constant 0 : index
    %193 = vector.load %arg13[%c52, %c0_141] : memref<196x64xf32, #tpu.memory_space<vmem>>, vector<1x64xf32>
    %c53 = arith.constant 53 : index
    %c0_142 = arith.constant 0 : index
    %194 = vector.load %arg13[%c53, %c0_142] : memref<196x64xf32, #tpu.memory_space<vmem>>, vector<1x64xf32>
    %195 = arith.maximumf %193, %194 : vector<1x64xf32>
    %196 = arith.maximumf %192, %195 : vector<1x64xf32>
    %c0_143 = arith.constant 0 : index
    %c768 = arith.constant 768 : index
    %197 = vector.load %arg14[%c0_143, %c768] : memref<1x3136xf32, #tpu.memory_space<vmem>>, vector<1x64xf32>
    tpu.vector_store %arg14[%c0_143, %c768], %196 {strides = array<i32>} : memref<1x3136xf32, #tpu.memory_space<vmem>>, vector<1x64xf32>,
    %c40 = arith.constant 40 : index
    %c0_144 = arith.constant 0 : index
    %198 = vector.load %arg13[%c40, %c0_144] : memref<196x64xf32, #tpu.memory_space<vmem>>, vector<1x64xf32>
    %c41 = arith.constant 41 : index
    %c0_145 = arith.constant 0 : index
    %199 = vector.load %arg13[%c41, %c0_145] : memref<196x64xf32, #tpu.memory_space<vmem>>, vector<1x64xf32>
    %200 = arith.maximumf %198, %199 : vector<1x64xf32>
    %c54 = arith.constant 54 : index
    %c0_146 = arith.constant 0 : index
    %201 = vector.load %arg13[%c54, %c0_146] : memref<196x64xf32, #tpu.memory_space<vmem>>, vector<1x64xf32>
    %c55 = arith.constant 55 : index
    %c0_147 = arith.constant 0 : index
    %202 = vector.load %arg13[%c55, %c0_147] : memref<196x64xf32, #tpu.memory_space<vmem>>, vector<1x64xf32>
    %203 = arith.maximumf %201, %202 : vector<1x64xf32>
    %204 = arith.maximumf %200, %203 : vector<1x64xf32>
    %c0_148 = arith.constant 0 : index
    %c832 = arith.constant 832 : index
    %205 = vector.load %arg14[%c0_148, %c832] : memref<1x3136xf32, #tpu.memory_space<vmem>>, vector<1x64xf32>
    tpu.vector_store %arg14[%c0_148, %c832], %204 {strides = array<i32>} : memref<1x3136xf32, #tpu.memory_space<vmem>>, vector<1x64xf32>,
    %c56 = arith.constant 56 : index
    %c0_149 = arith.constant 0 : index
    %206 = vector.load %arg13[%c56, %c0_149] : memref<196x64xf32, #tpu.memory_space<vmem>>, vector<1x64xf32>
    %c57 = arith.constant 57 : index
    %c0_150 = arith.constant 0 : index
    %207 = vector.load %arg13[%c57, %c0_150] : memref<196x64xf32, #tpu.memory_space<vmem>>, vector<1x64xf32>
    %208 = arith.maximumf %206, %207 : vector<1x64xf32>
    %c70 = arith.constant 70 : index
    %c0_151 = arith.constant 0 : index
    %209 = vector.load %arg13[%c70, %c0_151] : memref<196x64xf32, #tpu.memory_space<vmem>>, vector<1x64xf32>
    %c71 = arith.constant 71 : index
    %c0_152 = arith.constant 0 : index
    %210 = vector.load %arg13[%c71, %c0_152] : memref<196x64xf32, #tpu.memory_space<vmem>>, vector<1x64xf32>
    %211 = arith.maximumf %209, %210 : vector<1x64xf32>
    %212 = arith.maximumf %208, %211 : vector<1x64xf32>
    %c0_153 = arith.constant 0 : index
    %c896 = arith.constant 896 : index
    %213 = vector.load %arg14[%c0_153, %c896] : memref<1x3136xf32, #tpu.memory_space<vmem>>, vector<1x64xf32>
    tpu.vector_store %arg14[%c0_153, %c896], %212 {strides = array<i32>} : memref<1x3136xf32, #tpu.memory_space<vmem>>, vector<1x64xf32>,
    %c58 = arith.constant 58 : index
    %c0_154 = arith.constant 0 : index
    %214 = vector.load %arg13[%c58, %c0_154] : memref<196x64xf32, #tpu.memory_space<vmem>>, vector<1x64xf32>
    %c59 = arith.constant 59 : index
    %c0_155 = arith.constant 0 : index
    %215 = vector.load %arg13[%c59, %c0_155] : memref<196x64xf32, #tpu.memory_space<vmem>>, vector<1x64xf32>
    %216 = arith.maximumf %214, %215 : vector<1x64xf32>
    %c72 = arith.constant 72 : index
    %c0_156 = arith.constant 0 : index
    %217 = vector.load %arg13[%c72, %c0_156] : memref<196x64xf32, #tpu.memory_space<vmem>>, vector<1x64xf32>
    %c73 = arith.constant 73 : index
    %c0_157 = arith.constant 0 : index
    %218 = vector.load %arg13[%c73, %c0_157] : memref<196x64xf32, #tpu.memory_space<vmem>>, vector<1x64xf32>
    %219 = arith.maximumf %217, %218 : vector<1x64xf32>
    %220 = arith.maximumf %216, %219 : vector<1x64xf32>
    %c0_158 = arith.constant 0 : index
    %c960 = arith.constant 960 : index
    %221 = vector.load %arg14[%c0_158, %c960] : memref<1x3136xf32, #tpu.memory_space<vmem>>, vector<1x64xf32>
    tpu.vector_store %arg14[%c0_158, %c960], %220 {strides = array<i32>} : memref<1x3136xf32, #tpu.memory_space<vmem>>, vector<1x64xf32>,
    %c60 = arith.constant 60 : index
    %c0_159 = arith.constant 0 : index
    %222 = vector.load %arg13[%c60, %c0_159] : memref<196x64xf32, #tpu.memory_space<vmem>>, vector<1x64xf32>
    %c61 = arith.constant 61 : index
    %c0_160 = arith.constant 0 : index
    %223 = vector.load %arg13[%c61, %c0_160] : memref<196x64xf32, #tpu.memory_space<vmem>>, vector<1x64xf32>
    %224 = arith.maximumf %222, %223 : vector<1x64xf32>
    %c74 = arith.constant 74 : index
    %c0_161 = arith.constant 0 : index
    %225 = vector.load %arg13[%c74, %c0_161] : memref<196x64xf32, #tpu.memory_space<vmem>>, vector<1x64xf32>
    %c75 = arith.constant 75 : index
    %c0_162 = arith.constant 0 : index
    %226 = vector.load %arg13[%c75, %c0_162] : memref<196x64xf32, #tpu.memory_space<vmem>>, vector<1x64xf32>
    %227 = arith.maximumf %225, %226 : vector<1x64xf32>
    %228 = arith.maximumf %224, %227 : vector<1x64xf32>
    %c0_163 = arith.constant 0 : index
    %c1024 = arith.constant 1024 : index
    %229 = vector.load %arg14[%c0_163, %c1024] : memref<1x3136xf32, #tpu.memory_space<vmem>>, vector<1x64xf32>
    tpu.vector_store %arg14[%c0_163, %c1024], %228 {strides = array<i32>} : memref<1x3136xf32, #tpu.memory_space<vmem>>, vector<1x64xf32>,
    %c62 = arith.constant 62 : index
    %c0_164 = arith.constant 0 : index
    %230 = vector.load %arg13[%c62, %c0_164] : memref<196x64xf32, #tpu.memory_space<vmem>>, vector<1x64xf32>
    %c63 = arith.constant 63 : index
    %c0_165 = arith.constant 0 : index
    %231 = vector.load %arg13[%c63, %c0_165] : memref<196x64xf32, #tpu.memory_space<vmem>>, vector<1x64xf32>
    %232 = arith.maximumf %230, %231 : vector<1x64xf32>
    %c76 = arith.constant 76 : index
    %c0_166 = arith.constant 0 : index
    %233 = vector.load %arg13[%c76, %c0_166] : memref<196x64xf32, #tpu.memory_space<vmem>>, vector<1x64xf32>
    %c77 = arith.constant 77 : index
    %c0_167 = arith.constant 0 : index
    %234 = vector.load %arg13[%c77, %c0_167] : memref<196x64xf32, #tpu.memory_space<vmem>>, vector<1x64xf32>
    %235 = arith.maximumf %233, %234 : vector<1x64xf32>
    %236 = arith.maximumf %232, %235 : vector<1x64xf32>
    %c0_168 = arith.constant 0 : index
    %c1088 = arith.constant 1088 : index
    %237 = vector.load %arg14[%c0_168, %c1088] : memref<1x3136xf32, #tpu.memory_space<vmem>>, vector<1x64xf32>
    tpu.vector_store %arg14[%c0_168, %c1088], %236 {strides = array<i32>} : memref<1x3136xf32, #tpu.memory_space<vmem>>, vector<1x64xf32>,
    %c64_169 = arith.constant 64 : index
    %c0_170 = arith.constant 0 : index
    %238 = vector.load %arg13[%c64_169, %c0_170] : memref<196x64xf32, #tpu.memory_space<vmem>>, vector<1x64xf32>
    %c65 = arith.constant 65 : index
    %c0_171 = arith.constant 0 : index
    %239 = vector.load %arg13[%c65, %c0_171] : memref<196x64xf32, #tpu.memory_space<vmem>>, vector<1x64xf32>
    %240 = arith.maximumf %238, %239 : vector<1x64xf32>
    %c78 = arith.constant 78 : index
    %c0_172 = arith.constant 0 : index
    %241 = vector.load %arg13[%c78, %c0_172] : memref<196x64xf32, #tpu.memory_space<vmem>>, vector<1x64xf32>
    %c79 = arith.constant 79 : index
    %c0_173 = arith.constant 0 : index
    %242 = vector.load %arg13[%c79, %c0_173] : memref<196x64xf32, #tpu.memory_space<vmem>>, vector<1x64xf32>
    %243 = arith.maximumf %241, %242 : vector<1x64xf32>
    %244 = arith.maximumf %240, %243 : vector<1x64xf32>
    %c0_174 = arith.constant 0 : index
    %c1152 = arith.constant 1152 : index
    %245 = vector.load %arg14[%c0_174, %c1152] : memref<1x3136xf32, #tpu.memory_space<vmem>>, vector<1x64xf32>
    tpu.vector_store %arg14[%c0_174, %c1152], %244 {strides = array<i32>} : memref<1x3136xf32, #tpu.memory_space<vmem>>, vector<1x64xf32>,
    %c66 = arith.constant 66 : index
    %c0_175 = arith.constant 0 : index
    %246 = vector.load %arg13[%c66, %c0_175] : memref<196x64xf32, #tpu.memory_space<vmem>>, vector<1x64xf32>
    %c67 = arith.constant 67 : index
    %c0_176 = arith.constant 0 : index
    %247 = vector.load %arg13[%c67, %c0_176] : memref<196x64xf32, #tpu.memory_space<vmem>>, vector<1x64xf32>
    %248 = arith.maximumf %246, %247 : vector<1x64xf32>
    %c80 = arith.constant 80 : index
    %c0_177 = arith.constant 0 : index
    %249 = vector.load %arg13[%c80, %c0_177] : memref<196x64xf32, #tpu.memory_space<vmem>>, vector<1x64xf32>
    %c81 = arith.constant 81 : index
    %c0_178 = arith.constant 0 : index
    %250 = vector.load %arg13[%c81, %c0_178] : memref<196x64xf32, #tpu.memory_space<vmem>>, vector<1x64xf32>
    %251 = arith.maximumf %249, %250 : vector<1x64xf32>
    %252 = arith.maximumf %248, %251 : vector<1x64xf32>
    %c0_179 = arith.constant 0 : index
    %c1216 = arith.constant 1216 : index
    %253 = vector.load %arg14[%c0_179, %c1216] : memref<1x3136xf32, #tpu.memory_space<vmem>>, vector<1x64xf32>
    tpu.vector_store %arg14[%c0_179, %c1216], %252 {strides = array<i32>} : memref<1x3136xf32, #tpu.memory_space<vmem>>, vector<1x64xf32>,
    %c68 = arith.constant 68 : index
    %c0_180 = arith.constant 0 : index
    %254 = vector.load %arg13[%c68, %c0_180] : memref<196x64xf32, #tpu.memory_space<vmem>>, vector<1x64xf32>
    %c69 = arith.constant 69 : index
    %c0_181 = arith.constant 0 : index
    %255 = vector.load %arg13[%c69, %c0_181] : memref<196x64xf32, #tpu.memory_space<vmem>>, vector<1x64xf32>
    %256 = arith.maximumf %254, %255 : vector<1x64xf32>
    %c82 = arith.constant 82 : index
    %c0_182 = arith.constant 0 : index
    %257 = vector.load %arg13[%c82, %c0_182] : memref<196x64xf32, #tpu.memory_space<vmem>>, vector<1x64xf32>
    %c83 = arith.constant 83 : index
    %c0_183 = arith.constant 0 : index
    %258 = vector.load %arg13[%c83, %c0_183] : memref<196x64xf32, #tpu.memory_space<vmem>>, vector<1x64xf32>
    %259 = arith.maximumf %257, %258 : vector<1x64xf32>
    %260 = arith.maximumf %256, %259 : vector<1x64xf32>
    %c0_184 = arith.constant 0 : index
    %c1280 = arith.constant 1280 : index
    %261 = vector.load %arg14[%c0_184, %c1280] : memref<1x3136xf32, #tpu.memory_space<vmem>>, vector<1x64xf32>
    tpu.vector_store %arg14[%c0_184, %c1280], %260 {strides = array<i32>} : memref<1x3136xf32, #tpu.memory_space<vmem>>, vector<1x64xf32>,
    %c84 = arith.constant 84 : index
    %c0_185 = arith.constant 0 : index
    %262 = vector.load %arg13[%c84, %c0_185] : memref<196x64xf32, #tpu.memory_space<vmem>>, vector<1x64xf32>
    %c85 = arith.constant 85 : index
    %c0_186 = arith.constant 0 : index
    %263 = vector.load %arg13[%c85, %c0_186] : memref<196x64xf32, #tpu.memory_space<vmem>>, vector<1x64xf32>
    %264 = arith.maximumf %262, %263 : vector<1x64xf32>
    %c98 = arith.constant 98 : index
    %c0_187 = arith.constant 0 : index
    %265 = vector.load %arg13[%c98, %c0_187] : memref<196x64xf32, #tpu.memory_space<vmem>>, vector<1x64xf32>
    %c99 = arith.constant 99 : index
    %c0_188 = arith.constant 0 : index
    %266 = vector.load %arg13[%c99, %c0_188] : memref<196x64xf32, #tpu.memory_space<vmem>>, vector<1x64xf32>
    %267 = arith.maximumf %265, %266 : vector<1x64xf32>
    %268 = arith.maximumf %264, %267 : vector<1x64xf32>
    %c0_189 = arith.constant 0 : index
    %c1344 = arith.constant 1344 : index
    %269 = vector.load %arg14[%c0_189, %c1344] : memref<1x3136xf32, #tpu.memory_space<vmem>>, vector<1x64xf32>
    tpu.vector_store %arg14[%c0_189, %c1344], %268 {strides = array<i32>} : memref<1x3136xf32, #tpu.memory_space<vmem>>, vector<1x64xf32>,
    %c86 = arith.constant 86 : index
    %c0_190 = arith.constant 0 : index
    %270 = vector.load %arg13[%c86, %c0_190] : memref<196x64xf32, #tpu.memory_space<vmem>>, vector<1x64xf32>
    %c87 = arith.constant 87 : index
    %c0_191 = arith.constant 0 : index
    %271 = vector.load %arg13[%c87, %c0_191] : memref<196x64xf32, #tpu.memory_space<vmem>>, vector<1x64xf32>
    %272 = arith.maximumf %270, %271 : vector<1x64xf32>
    %c100 = arith.constant 100 : index
    %c0_192 = arith.constant 0 : index
    %273 = vector.load %arg13[%c100, %c0_192] : memref<196x64xf32, #tpu.memory_space<vmem>>, vector<1x64xf32>
    %c101 = arith.constant 101 : index
    %c0_193 = arith.constant 0 : index
    %274 = vector.load %arg13[%c101, %c0_193] : memref<196x64xf32, #tpu.memory_space<vmem>>, vector<1x64xf32>
    %275 = arith.maximumf %273, %274 : vector<1x64xf32>
    %276 = arith.maximumf %272, %275 : vector<1x64xf32>
    %c0_194 = arith.constant 0 : index
    %c1408 = arith.constant 1408 : index
    %277 = vector.load %arg14[%c0_194, %c1408] : memref<1x3136xf32, #tpu.memory_space<vmem>>, vector<1x64xf32>
    tpu.vector_store %arg14[%c0_194, %c1408], %276 {strides = array<i32>} : memref<1x3136xf32, #tpu.memory_space<vmem>>, vector<1x64xf32>,
    %c88 = arith.constant 88 : index
    %c0_195 = arith.constant 0 : index
    %278 = vector.load %arg13[%c88, %c0_195] : memref<196x64xf32, #tpu.memory_space<vmem>>, vector<1x64xf32>
    %c89 = arith.constant 89 : index
    %c0_196 = arith.constant 0 : index
    %279 = vector.load %arg13[%c89, %c0_196] : memref<196x64xf32, #tpu.memory_space<vmem>>, vector<1x64xf32>
    %280 = arith.maximumf %278, %279 : vector<1x64xf32>
    %c102 = arith.constant 102 : index
    %c0_197 = arith.constant 0 : index
    %281 = vector.load %arg13[%c102, %c0_197] : memref<196x64xf32, #tpu.memory_space<vmem>>, vector<1x64xf32>
    %c103 = arith.constant 103 : index
    %c0_198 = arith.constant 0 : index
    %282 = vector.load %arg13[%c103, %c0_198] : memref<196x64xf32, #tpu.memory_space<vmem>>, vector<1x64xf32>
    %283 = arith.maximumf %281, %282 : vector<1x64xf32>
    %284 = arith.maximumf %280, %283 : vector<1x64xf32>
    %c0_199 = arith.constant 0 : index
    %c1472 = arith.constant 1472 : index
    %285 = vector.load %arg14[%c0_199, %c1472] : memref<1x3136xf32, #tpu.memory_space<vmem>>, vector<1x64xf32>
    tpu.vector_store %arg14[%c0_199, %c1472], %284 {strides = array<i32>} : memref<1x3136xf32, #tpu.memory_space<vmem>>, vector<1x64xf32>,
    %c90 = arith.constant 90 : index
    %c0_200 = arith.constant 0 : index
    %286 = vector.load %arg13[%c90, %c0_200] : memref<196x64xf32, #tpu.memory_space<vmem>>, vector<1x64xf32>
    %c91 = arith.constant 91 : index
    %c0_201 = arith.constant 0 : index
    %287 = vector.load %arg13[%c91, %c0_201] : memref<196x64xf32, #tpu.memory_space<vmem>>, vector<1x64xf32>
    %288 = arith.maximumf %286, %287 : vector<1x64xf32>
    %c104 = arith.constant 104 : index
    %c0_202 = arith.constant 0 : index
    %289 = vector.load %arg13[%c104, %c0_202] : memref<196x64xf32, #tpu.memory_space<vmem>>, vector<1x64xf32>
    %c105 = arith.constant 105 : index
    %c0_203 = arith.constant 0 : index
    %290 = vector.load %arg13[%c105, %c0_203] : memref<196x64xf32, #tpu.memory_space<vmem>>, vector<1x64xf32>
    %291 = arith.maximumf %289, %290 : vector<1x64xf32>
    %292 = arith.maximumf %288, %291 : vector<1x64xf32>
    %c0_204 = arith.constant 0 : index
    %c1536 = arith.constant 1536 : index
    %293 = vector.load %arg14[%c0_204, %c1536] : memref<1x3136xf32, #tpu.memory_space<vmem>>, vector<1x64xf32>
    tpu.vector_store %arg14[%c0_204, %c1536], %292 {strides = array<i32>} : memref<1x3136xf32, #tpu.memory_space<vmem>>, vector<1x64xf32>,
    %c92 = arith.constant 92 : index
    %c0_205 = arith.constant 0 : index
    %294 = vector.load %arg13[%c92, %c0_205] : memref<196x64xf32, #tpu.memory_space<vmem>>, vector<1x64xf32>
    %c93 = arith.constant 93 : index
    %c0_206 = arith.constant 0 : index
    %295 = vector.load %arg13[%c93, %c0_206] : memref<196x64xf32, #tpu.memory_space<vmem>>, vector<1x64xf32>
    %296 = arith.maximumf %294, %295 : vector<1x64xf32>
    %c106 = arith.constant 106 : index
    %c0_207 = arith.constant 0 : index
    %297 = vector.load %arg13[%c106, %c0_207] : memref<196x64xf32, #tpu.memory_space<vmem>>, vector<1x64xf32>
    %c107 = arith.constant 107 : index
    %c0_208 = arith.constant 0 : index
    %298 = vector.load %arg13[%c107, %c0_208] : memref<196x64xf32, #tpu.memory_space<vmem>>, vector<1x64xf32>
    %299 = arith.maximumf %297, %298 : vector<1x64xf32>
    %300 = arith.maximumf %296, %299 : vector<1x64xf32>
    %c0_209 = arith.constant 0 : index
    %c1600 = arith.constant 1600 : index
    %301 = vector.load %arg14[%c0_209, %c1600] : memref<1x3136xf32, #tpu.memory_space<vmem>>, vector<1x64xf32>
    tpu.vector_store %arg14[%c0_209, %c1600], %300 {strides = array<i32>} : memref<1x3136xf32, #tpu.memory_space<vmem>>, vector<1x64xf32>,
    %c94 = arith.constant 94 : index
    %c0_210 = arith.constant 0 : index
    %302 = vector.load %arg13[%c94, %c0_210] : memref<196x64xf32, #tpu.memory_space<vmem>>, vector<1x64xf32>
    %c95 = arith.constant 95 : index
    %c0_211 = arith.constant 0 : index
    %303 = vector.load %arg13[%c95, %c0_211] : memref<196x64xf32, #tpu.memory_space<vmem>>, vector<1x64xf32>
    %304 = arith.maximumf %302, %303 : vector<1x64xf32>
    %c108 = arith.constant 108 : index
    %c0_212 = arith.constant 0 : index
    %305 = vector.load %arg13[%c108, %c0_212] : memref<196x64xf32, #tpu.memory_space<vmem>>, vector<1x64xf32>
    %c109 = arith.constant 109 : index
    %c0_213 = arith.constant 0 : index
    %306 = vector.load %arg13[%c109, %c0_213] : memref<196x64xf32, #tpu.memory_space<vmem>>, vector<1x64xf32>
    %307 = arith.maximumf %305, %306 : vector<1x64xf32>
    %308 = arith.maximumf %304, %307 : vector<1x64xf32>
    %c0_214 = arith.constant 0 : index
    %c1664 = arith.constant 1664 : index
    %309 = vector.load %arg14[%c0_214, %c1664] : memref<1x3136xf32, #tpu.memory_space<vmem>>, vector<1x64xf32>
    tpu.vector_store %arg14[%c0_214, %c1664], %308 {strides = array<i32>} : memref<1x3136xf32, #tpu.memory_space<vmem>>, vector<1x64xf32>,
    %c96 = arith.constant 96 : index
    %c0_215 = arith.constant 0 : index
    %310 = vector.load %arg13[%c96, %c0_215] : memref<196x64xf32, #tpu.memory_space<vmem>>, vector<1x64xf32>
    %c97 = arith.constant 97 : index
    %c0_216 = arith.constant 0 : index
    %311 = vector.load %arg13[%c97, %c0_216] : memref<196x64xf32, #tpu.memory_space<vmem>>, vector<1x64xf32>
    %312 = arith.maximumf %310, %311 : vector<1x64xf32>
    %c110 = arith.constant 110 : index
    %c0_217 = arith.constant 0 : index
    %313 = vector.load %arg13[%c110, %c0_217] : memref<196x64xf32, #tpu.memory_space<vmem>>, vector<1x64xf32>
    %c111 = arith.constant 111 : index
    %c0_218 = arith.constant 0 : index
    %314 = vector.load %arg13[%c111, %c0_218] : memref<196x64xf32, #tpu.memory_space<vmem>>, vector<1x64xf32>
    %315 = arith.maximumf %313, %314 : vector<1x64xf32>
    %316 = arith.maximumf %312, %315 : vector<1x64xf32>
    %c0_219 = arith.constant 0 : index
    %c1728 = arith.constant 1728 : index
    %317 = vector.load %arg14[%c0_219, %c1728] : memref<1x3136xf32, #tpu.memory_space<vmem>>, vector<1x64xf32>
    tpu.vector_store %arg14[%c0_219, %c1728], %316 {strides = array<i32>} : memref<1x3136xf32, #tpu.memory_space<vmem>>, vector<1x64xf32>,
    %c112 = arith.constant 112 : index
    %c0_220 = arith.constant 0 : index
    %318 = vector.load %arg13[%c112, %c0_220] : memref<196x64xf32, #tpu.memory_space<vmem>>, vector<1x64xf32>
    %c113 = arith.constant 113 : index
    %c0_221 = arith.constant 0 : index
    %319 = vector.load %arg13[%c113, %c0_221] : memref<196x64xf32, #tpu.memory_space<vmem>>, vector<1x64xf32>
    %320 = arith.maximumf %318, %319 : vector<1x64xf32>
    %c126 = arith.constant 126 : index
    %c0_222 = arith.constant 0 : index
    %321 = vector.load %arg13[%c126, %c0_222] : memref<196x64xf32, #tpu.memory_space<vmem>>, vector<1x64xf32>
    %c127 = arith.constant 127 : index
    %c0_223 = arith.constant 0 : index
    %322 = vector.load %arg13[%c127, %c0_223] : memref<196x64xf32, #tpu.memory_space<vmem>>, vector<1x64xf32>
    %323 = arith.maximumf %321, %322 : vector<1x64xf32>
    %324 = arith.maximumf %320, %323 : vector<1x64xf32>
    %c0_224 = arith.constant 0 : index
    %c1792 = arith.constant 1792 : index
    %325 = vector.load %arg14[%c0_224, %c1792] : memref<1x3136xf32, #tpu.memory_space<vmem>>, vector<1x64xf32>
    tpu.vector_store %arg14[%c0_224, %c1792], %324 {strides = array<i32>} : memref<1x3136xf32, #tpu.memory_space<vmem>>, vector<1x64xf32>,
    %c114 = arith.constant 114 : index
    %c0_225 = arith.constant 0 : index
    %326 = vector.load %arg13[%c114, %c0_225] : memref<196x64xf32, #tpu.memory_space<vmem>>, vector<1x64xf32>
    %c115 = arith.constant 115 : index
    %c0_226 = arith.constant 0 : index
    %327 = vector.load %arg13[%c115, %c0_226] : memref<196x64xf32, #tpu.memory_space<vmem>>, vector<1x64xf32>
    %328 = arith.maximumf %326, %327 : vector<1x64xf32>
    %c128_227 = arith.constant 128 : index
    %c0_228 = arith.constant 0 : index
    %329 = vector.load %arg13[%c128_227, %c0_228] : memref<196x64xf32, #tpu.memory_space<vmem>>, vector<1x64xf32>
    %c129 = arith.constant 129 : index
    %c0_229 = arith.constant 0 : index
    %330 = vector.load %arg13[%c129, %c0_229] : memref<196x64xf32, #tpu.memory_space<vmem>>, vector<1x64xf32>
    %331 = arith.maximumf %329, %330 : vector<1x64xf32>
    %332 = arith.maximumf %328, %331 : vector<1x64xf32>
    %c0_230 = arith.constant 0 : index
    %c1856 = arith.constant 1856 : index
    %333 = vector.load %arg14[%c0_230, %c1856] : memref<1x3136xf32, #tpu.memory_space<vmem>>, vector<1x64xf32>
    tpu.vector_store %arg14[%c0_230, %c1856], %332 {strides = array<i32>} : memref<1x3136xf32, #tpu.memory_space<vmem>>, vector<1x64xf32>,
    %c116 = arith.constant 116 : index
    %c0_231 = arith.constant 0 : index
    %334 = vector.load %arg13[%c116, %c0_231] : memref<196x64xf32, #tpu.memory_space<vmem>>, vector<1x64xf32>
    %c117 = arith.constant 117 : index
    %c0_232 = arith.constant 0 : index
    %335 = vector.load %arg13[%c117, %c0_232] : memref<196x64xf32, #tpu.memory_space<vmem>>, vector<1x64xf32>
    %336 = arith.maximumf %334, %335 : vector<1x64xf32>
    %c130 = arith.constant 130 : index
    %c0_233 = arith.constant 0 : index
    %337 = vector.load %arg13[%c130, %c0_233] : memref<196x64xf32, #tpu.memory_space<vmem>>, vector<1x64xf32>
    %c131 = arith.constant 131 : index
    %c0_234 = arith.constant 0 : index
    %338 = vector.load %arg13[%c131, %c0_234] : memref<196x64xf32, #tpu.memory_space<vmem>>, vector<1x64xf32>
    %339 = arith.maximumf %337, %338 : vector<1x64xf32>
    %340 = arith.maximumf %336, %339 : vector<1x64xf32>
    %c0_235 = arith.constant 0 : index
    %c1920 = arith.constant 1920 : index
    %341 = vector.load %arg14[%c0_235, %c1920] : memref<1x3136xf32, #tpu.memory_space<vmem>>, vector<1x64xf32>
    tpu.vector_store %arg14[%c0_235, %c1920], %340 {strides = array<i32>} : memref<1x3136xf32, #tpu.memory_space<vmem>>, vector<1x64xf32>,
    %c118 = arith.constant 118 : index
    %c0_236 = arith.constant 0 : index
    %342 = vector.load %arg13[%c118, %c0_236] : memref<196x64xf32, #tpu.memory_space<vmem>>, vector<1x64xf32>
    %c119 = arith.constant 119 : index
    %c0_237 = arith.constant 0 : index
    %343 = vector.load %arg13[%c119, %c0_237] : memref<196x64xf32, #tpu.memory_space<vmem>>, vector<1x64xf32>
    %344 = arith.maximumf %342, %343 : vector<1x64xf32>
    %c132 = arith.constant 132 : index
    %c0_238 = arith.constant 0 : index
    %345 = vector.load %arg13[%c132, %c0_238] : memref<196x64xf32, #tpu.memory_space<vmem>>, vector<1x64xf32>
    %c133 = arith.constant 133 : index
    %c0_239 = arith.constant 0 : index
    %346 = vector.load %arg13[%c133, %c0_239] : memref<196x64xf32, #tpu.memory_space<vmem>>, vector<1x64xf32>
    %347 = arith.maximumf %345, %346 : vector<1x64xf32>
    %348 = arith.maximumf %344, %347 : vector<1x64xf32>
    %c0_240 = arith.constant 0 : index
    %c1984 = arith.constant 1984 : index
    %349 = vector.load %arg14[%c0_240, %c1984] : memref<1x3136xf32, #tpu.memory_space<vmem>>, vector<1x64xf32>
    tpu.vector_store %arg14[%c0_240, %c1984], %348 {strides = array<i32>} : memref<1x3136xf32, #tpu.memory_space<vmem>>, vector<1x64xf32>,
    %c120 = arith.constant 120 : index
    %c0_241 = arith.constant 0 : index
    %350 = vector.load %arg13[%c120, %c0_241] : memref<196x64xf32, #tpu.memory_space<vmem>>, vector<1x64xf32>
    %c121 = arith.constant 121 : index
    %c0_242 = arith.constant 0 : index
    %351 = vector.load %arg13[%c121, %c0_242] : memref<196x64xf32, #tpu.memory_space<vmem>>, vector<1x64xf32>
    %352 = arith.maximumf %350, %351 : vector<1x64xf32>
    %c134 = arith.constant 134 : index
    %c0_243 = arith.constant 0 : index
    %353 = vector.load %arg13[%c134, %c0_243] : memref<196x64xf32, #tpu.memory_space<vmem>>, vector<1x64xf32>
    %c135 = arith.constant 135 : index
    %c0_244 = arith.constant 0 : index
    %354 = vector.load %arg13[%c135, %c0_244] : memref<196x64xf32, #tpu.memory_space<vmem>>, vector<1x64xf32>
    %355 = arith.maximumf %353, %354 : vector<1x64xf32>
    %356 = arith.maximumf %352, %355 : vector<1x64xf32>
    %c0_245 = arith.constant 0 : index
    %c2048 = arith.constant 2048 : index
    %357 = vector.load %arg14[%c0_245, %c2048] : memref<1x3136xf32, #tpu.memory_space<vmem>>, vector<1x64xf32>
    tpu.vector_store %arg14[%c0_245, %c2048], %356 {strides = array<i32>} : memref<1x3136xf32, #tpu.memory_space<vmem>>, vector<1x64xf32>,
    %c122 = arith.constant 122 : index
    %c0_246 = arith.constant 0 : index
    %358 = vector.load %arg13[%c122, %c0_246] : memref<196x64xf32, #tpu.memory_space<vmem>>, vector<1x64xf32>
    %c123 = arith.constant 123 : index
    %c0_247 = arith.constant 0 : index
    %359 = vector.load %arg13[%c123, %c0_247] : memref<196x64xf32, #tpu.memory_space<vmem>>, vector<1x64xf32>
    %360 = arith.maximumf %358, %359 : vector<1x64xf32>
    %c136 = arith.constant 136 : index
    %c0_248 = arith.constant 0 : index
    %361 = vector.load %arg13[%c136, %c0_248] : memref<196x64xf32, #tpu.memory_space<vmem>>, vector<1x64xf32>
    %c137 = arith.constant 137 : index
    %c0_249 = arith.constant 0 : index
    %362 = vector.load %arg13[%c137, %c0_249] : memref<196x64xf32, #tpu.memory_space<vmem>>, vector<1x64xf32>
    %363 = arith.maximumf %361, %362 : vector<1x64xf32>
    %364 = arith.maximumf %360, %363 : vector<1x64xf32>
    %c0_250 = arith.constant 0 : index
    %c2112 = arith.constant 2112 : index
    %365 = vector.load %arg14[%c0_250, %c2112] : memref<1x3136xf32, #tpu.memory_space<vmem>>, vector<1x64xf32>
    tpu.vector_store %arg14[%c0_250, %c2112], %364 {strides = array<i32>} : memref<1x3136xf32, #tpu.memory_space<vmem>>, vector<1x64xf32>,
    %c124 = arith.constant 124 : index
    %c0_251 = arith.constant 0 : index
    %366 = vector.load %arg13[%c124, %c0_251] : memref<196x64xf32, #tpu.memory_space<vmem>>, vector<1x64xf32>
    %c125 = arith.constant 125 : index
    %c0_252 = arith.constant 0 : index
    %367 = vector.load %arg13[%c125, %c0_252] : memref<196x64xf32, #tpu.memory_space<vmem>>, vector<1x64xf32>
    %368 = arith.maximumf %366, %367 : vector<1x64xf32>
    %c138 = arith.constant 138 : index
    %c0_253 = arith.constant 0 : index
    %369 = vector.load %arg13[%c138, %c0_253] : memref<196x64xf32, #tpu.memory_space<vmem>>, vector<1x64xf32>
    %c139 = arith.constant 139 : index
    %c0_254 = arith.constant 0 : index
    %370 = vector.load %arg13[%c139, %c0_254] : memref<196x64xf32, #tpu.memory_space<vmem>>, vector<1x64xf32>
    %371 = arith.maximumf %369, %370 : vector<1x64xf32>
    %372 = arith.maximumf %368, %371 : vector<1x64xf32>
    %c0_255 = arith.constant 0 : index
    %c2176 = arith.constant 2176 : index
    %373 = vector.load %arg14[%c0_255, %c2176] : memref<1x3136xf32, #tpu.memory_space<vmem>>, vector<1x64xf32>
    tpu.vector_store %arg14[%c0_255, %c2176], %372 {strides = array<i32>} : memref<1x3136xf32, #tpu.memory_space<vmem>>, vector<1x64xf32>,
    %c140 = arith.constant 140 : index
    %c0_256 = arith.constant 0 : index
    %374 = vector.load %arg13[%c140, %c0_256] : memref<196x64xf32, #tpu.memory_space<vmem>>, vector<1x64xf32>
    %c141 = arith.constant 141 : index
    %c0_257 = arith.constant 0 : index
    %375 = vector.load %arg13[%c141, %c0_257] : memref<196x64xf32, #tpu.memory_space<vmem>>, vector<1x64xf32>
    %376 = arith.maximumf %374, %375 : vector<1x64xf32>
    %c154 = arith.constant 154 : index
    %c0_258 = arith.constant 0 : index
    %377 = vector.load %arg13[%c154, %c0_258] : memref<196x64xf32, #tpu.memory_space<vmem>>, vector<1x64xf32>
    %c155 = arith.constant 155 : index
    %c0_259 = arith.constant 0 : index
    %378 = vector.load %arg13[%c155, %c0_259] : memref<196x64xf32, #tpu.memory_space<vmem>>, vector<1x64xf32>
    %379 = arith.maximumf %377, %378 : vector<1x64xf32>
    %380 = arith.maximumf %376, %379 : vector<1x64xf32>
    %c0_260 = arith.constant 0 : index
    %c2240 = arith.constant 2240 : index
    %381 = vector.load %arg14[%c0_260, %c2240] : memref<1x3136xf32, #tpu.memory_space<vmem>>, vector<1x64xf32>
    tpu.vector_store %arg14[%c0_260, %c2240], %380 {strides = array<i32>} : memref<1x3136xf32, #tpu.memory_space<vmem>>, vector<1x64xf32>,
    %c142 = arith.constant 142 : index
    %c0_261 = arith.constant 0 : index
    %382 = vector.load %arg13[%c142, %c0_261] : memref<196x64xf32, #tpu.memory_space<vmem>>, vector<1x64xf32>
    %c143 = arith.constant 143 : index
    %c0_262 = arith.constant 0 : index
    %383 = vector.load %arg13[%c143, %c0_262] : memref<196x64xf32, #tpu.memory_space<vmem>>, vector<1x64xf32>
    %384 = arith.maximumf %382, %383 : vector<1x64xf32>
    %c156 = arith.constant 156 : index
    %c0_263 = arith.constant 0 : index
    %385 = vector.load %arg13[%c156, %c0_263] : memref<196x64xf32, #tpu.memory_space<vmem>>, vector<1x64xf32>
    %c157 = arith.constant 157 : index
    %c0_264 = arith.constant 0 : index
    %386 = vector.load %arg13[%c157, %c0_264] : memref<196x64xf32, #tpu.memory_space<vmem>>, vector<1x64xf32>
    %387 = arith.maximumf %385, %386 : vector<1x64xf32>
    %388 = arith.maximumf %384, %387 : vector<1x64xf32>
    %c0_265 = arith.constant 0 : index
    %c2304 = arith.constant 2304 : index
    %389 = vector.load %arg14[%c0_265, %c2304] : memref<1x3136xf32, #tpu.memory_space<vmem>>, vector<1x64xf32>
    tpu.vector_store %arg14[%c0_265, %c2304], %388 {strides = array<i32>} : memref<1x3136xf32, #tpu.memory_space<vmem>>, vector<1x64xf32>,
    %c144 = arith.constant 144 : index
    %c0_266 = arith.constant 0 : index
    %390 = vector.load %arg13[%c144, %c0_266] : memref<196x64xf32, #tpu.memory_space<vmem>>, vector<1x64xf32>
    %c145 = arith.constant 145 : index
    %c0_267 = arith.constant 0 : index
    %391 = vector.load %arg13[%c145, %c0_267] : memref<196x64xf32, #tpu.memory_space<vmem>>, vector<1x64xf32>
    %392 = arith.maximumf %390, %391 : vector<1x64xf32>
    %c158 = arith.constant 158 : index
    %c0_268 = arith.constant 0 : index
    %393 = vector.load %arg13[%c158, %c0_268] : memref<196x64xf32, #tpu.memory_space<vmem>>, vector<1x64xf32>
    %c159 = arith.constant 159 : index
    %c0_269 = arith.constant 0 : index
    %394 = vector.load %arg13[%c159, %c0_269] : memref<196x64xf32, #tpu.memory_space<vmem>>, vector<1x64xf32>
    %395 = arith.maximumf %393, %394 : vector<1x64xf32>
    %396 = arith.maximumf %392, %395 : vector<1x64xf32>
    %c0_270 = arith.constant 0 : index
    %c2368 = arith.constant 2368 : index
    %397 = vector.load %arg14[%c0_270, %c2368] : memref<1x3136xf32, #tpu.memory_space<vmem>>, vector<1x64xf32>
    tpu.vector_store %arg14[%c0_270, %c2368], %396 {strides = array<i32>} : memref<1x3136xf32, #tpu.memory_space<vmem>>, vector<1x64xf32>,
    %c146 = arith.constant 146 : index
    %c0_271 = arith.constant 0 : index
    %398 = vector.load %arg13[%c146, %c0_271] : memref<196x64xf32, #tpu.memory_space<vmem>>, vector<1x64xf32>
    %c147 = arith.constant 147 : index
    %c0_272 = arith.constant 0 : index
    %399 = vector.load %arg13[%c147, %c0_272] : memref<196x64xf32, #tpu.memory_space<vmem>>, vector<1x64xf32>
    %400 = arith.maximumf %398, %399 : vector<1x64xf32>
    %c160 = arith.constant 160 : index
    %c0_273 = arith.constant 0 : index
    %401 = vector.load %arg13[%c160, %c0_273] : memref<196x64xf32, #tpu.memory_space<vmem>>, vector<1x64xf32>
    %c161 = arith.constant 161 : index
    %c0_274 = arith.constant 0 : index
    %402 = vector.load %arg13[%c161, %c0_274] : memref<196x64xf32, #tpu.memory_space<vmem>>, vector<1x64xf32>
    %403 = arith.maximumf %401, %402 : vector<1x64xf32>
    %404 = arith.maximumf %400, %403 : vector<1x64xf32>
    %c0_275 = arith.constant 0 : index
    %c2432 = arith.constant 2432 : index
    %405 = vector.load %arg14[%c0_275, %c2432] : memref<1x3136xf32, #tpu.memory_space<vmem>>, vector<1x64xf32>
    tpu.vector_store %arg14[%c0_275, %c2432], %404 {strides = array<i32>} : memref<1x3136xf32, #tpu.memory_space<vmem>>, vector<1x64xf32>,
    %c148 = arith.constant 148 : index
    %c0_276 = arith.constant 0 : index
    %406 = vector.load %arg13[%c148, %c0_276] : memref<196x64xf32, #tpu.memory_space<vmem>>, vector<1x64xf32>
    %c149 = arith.constant 149 : index
    %c0_277 = arith.constant 0 : index
    %407 = vector.load %arg13[%c149, %c0_277] : memref<196x64xf32, #tpu.memory_space<vmem>>, vector<1x64xf32>
    %408 = arith.maximumf %406, %407 : vector<1x64xf32>
    %c162 = arith.constant 162 : index
    %c0_278 = arith.constant 0 : index
    %409 = vector.load %arg13[%c162, %c0_278] : memref<196x64xf32, #tpu.memory_space<vmem>>, vector<1x64xf32>
    %c163 = arith.constant 163 : index
    %c0_279 = arith.constant 0 : index
    %410 = vector.load %arg13[%c163, %c0_279] : memref<196x64xf32, #tpu.memory_space<vmem>>, vector<1x64xf32>
    %411 = arith.maximumf %409, %410 : vector<1x64xf32>
    %412 = arith.maximumf %408, %411 : vector<1x64xf32>
    %c0_280 = arith.constant 0 : index
    %c2496 = arith.constant 2496 : index
    %413 = vector.load %arg14[%c0_280, %c2496] : memref<1x3136xf32, #tpu.memory_space<vmem>>, vector<1x64xf32>
    tpu.vector_store %arg14[%c0_280, %c2496], %412 {strides = array<i32>} : memref<1x3136xf32, #tpu.memory_space<vmem>>, vector<1x64xf32>,
    %c150 = arith.constant 150 : index
    %c0_281 = arith.constant 0 : index
    %414 = vector.load %arg13[%c150, %c0_281] : memref<196x64xf32, #tpu.memory_space<vmem>>, vector<1x64xf32>
    %c151 = arith.constant 151 : index
    %c0_282 = arith.constant 0 : index
    %415 = vector.load %arg13[%c151, %c0_282] : memref<196x64xf32, #tpu.memory_space<vmem>>, vector<1x64xf32>
    %416 = arith.maximumf %414, %415 : vector<1x64xf32>
    %c164 = arith.constant 164 : index
    %c0_283 = arith.constant 0 : index
    %417 = vector.load %arg13[%c164, %c0_283] : memref<196x64xf32, #tpu.memory_space<vmem>>, vector<1x64xf32>
    %c165 = arith.constant 165 : index
    %c0_284 = arith.constant 0 : index
    %418 = vector.load %arg13[%c165, %c0_284] : memref<196x64xf32, #tpu.memory_space<vmem>>, vector<1x64xf32>
    %419 = arith.maximumf %417, %418 : vector<1x64xf32>
    %420 = arith.maximumf %416, %419 : vector<1x64xf32>
    %c0_285 = arith.constant 0 : index
    %c2560 = arith.constant 2560 : index
    %421 = vector.load %arg14[%c0_285, %c2560] : memref<1x3136xf32, #tpu.memory_space<vmem>>, vector<1x64xf32>
    tpu.vector_store %arg14[%c0_285, %c2560], %420 {strides = array<i32>} : memref<1x3136xf32, #tpu.memory_space<vmem>>, vector<1x64xf32>,
    %c152 = arith.constant 152 : index
    %c0_286 = arith.constant 0 : index
    %422 = vector.load %arg13[%c152, %c0_286] : memref<196x64xf32, #tpu.memory_space<vmem>>, vector<1x64xf32>
    %c153 = arith.constant 153 : index
    %c0_287 = arith.constant 0 : index
    %423 = vector.load %arg13[%c153, %c0_287] : memref<196x64xf32, #tpu.memory_space<vmem>>, vector<1x64xf32>
    %424 = arith.maximumf %422, %423 : vector<1x64xf32>
    %c166 = arith.constant 166 : index
    %c0_288 = arith.constant 0 : index
    %425 = vector.load %arg13[%c166, %c0_288] : memref<196x64xf32, #tpu.memory_space<vmem>>, vector<1x64xf32>
    %c167 = arith.constant 167 : index
    %c0_289 = arith.constant 0 : index
    %426 = vector.load %arg13[%c167, %c0_289] : memref<196x64xf32, #tpu.memory_space<vmem>>, vector<1x64xf32>
    %427 = arith.maximumf %425, %426 : vector<1x64xf32>
    %428 = arith.maximumf %424, %427 : vector<1x64xf32>
    %c0_290 = arith.constant 0 : index
    %c2624 = arith.constant 2624 : index
    %429 = vector.load %arg14[%c0_290, %c2624] : memref<1x3136xf32, #tpu.memory_space<vmem>>, vector<1x64xf32>
    tpu.vector_store %arg14[%c0_290, %c2624], %428 {strides = array<i32>} : memref<1x3136xf32, #tpu.memory_space<vmem>>, vector<1x64xf32>,
    %c168 = arith.constant 168 : index
    %c0_291 = arith.constant 0 : index
    %430 = vector.load %arg13[%c168, %c0_291] : memref<196x64xf32, #tpu.memory_space<vmem>>, vector<1x64xf32>
    %c169 = arith.constant 169 : index
    %c0_292 = arith.constant 0 : index
    %431 = vector.load %arg13[%c169, %c0_292] : memref<196x64xf32, #tpu.memory_space<vmem>>, vector<1x64xf32>
    %432 = arith.maximumf %430, %431 : vector<1x64xf32>
    %c182 = arith.constant 182 : index
    %c0_293 = arith.constant 0 : index
    %433 = vector.load %arg13[%c182, %c0_293] : memref<196x64xf32, #tpu.memory_space<vmem>>, vector<1x64xf32>
    %c183 = arith.constant 183 : index
    %c0_294 = arith.constant 0 : index
    %434 = vector.load %arg13[%c183, %c0_294] : memref<196x64xf32, #tpu.memory_space<vmem>>, vector<1x64xf32>
    %435 = arith.maximumf %433, %434 : vector<1x64xf32>
    %436 = arith.maximumf %432, %435 : vector<1x64xf32>
    %c0_295 = arith.constant 0 : index
    %c2688 = arith.constant 2688 : index
    %437 = vector.load %arg14[%c0_295, %c2688] : memref<1x3136xf32, #tpu.memory_space<vmem>>, vector<1x64xf32>
    tpu.vector_store %arg14[%c0_295, %c2688], %436 {strides = array<i32>} : memref<1x3136xf32, #tpu.memory_space<vmem>>, vector<1x64xf32>,
    %c170 = arith.constant 170 : index
    %c0_296 = arith.constant 0 : index
    %438 = vector.load %arg13[%c170, %c0_296] : memref<196x64xf32, #tpu.memory_space<vmem>>, vector<1x64xf32>
    %c171 = arith.constant 171 : index
    %c0_297 = arith.constant 0 : index
    %439 = vector.load %arg13[%c171, %c0_297] : memref<196x64xf32, #tpu.memory_space<vmem>>, vector<1x64xf32>
    %440 = arith.maximumf %438, %439 : vector<1x64xf32>
    %c184 = arith.constant 184 : index
    %c0_298 = arith.constant 0 : index
    %441 = vector.load %arg13[%c184, %c0_298] : memref<196x64xf32, #tpu.memory_space<vmem>>, vector<1x64xf32>
    %c185 = arith.constant 185 : index
    %c0_299 = arith.constant 0 : index
    %442 = vector.load %arg13[%c185, %c0_299] : memref<196x64xf32, #tpu.memory_space<vmem>>, vector<1x64xf32>
    %443 = arith.maximumf %441, %442 : vector<1x64xf32>
    %444 = arith.maximumf %440, %443 : vector<1x64xf32>
    %c0_300 = arith.constant 0 : index
    %c2752 = arith.constant 2752 : index
    %445 = vector.load %arg14[%c0_300, %c2752] : memref<1x3136xf32, #tpu.memory_space<vmem>>, vector<1x64xf32>
    tpu.vector_store %arg14[%c0_300, %c2752], %444 {strides = array<i32>} : memref<1x3136xf32, #tpu.memory_space<vmem>>, vector<1x64xf32>,
    %c172 = arith.constant 172 : index
    %c0_301 = arith.constant 0 : index
    %446 = vector.load %arg13[%c172, %c0_301] : memref<196x64xf32, #tpu.memory_space<vmem>>, vector<1x64xf32>
    %c173 = arith.constant 173 : index
    %c0_302 = arith.constant 0 : index
    %447 = vector.load %arg13[%c173, %c0_302] : memref<196x64xf32, #tpu.memory_space<vmem>>, vector<1x64xf32>
    %448 = arith.maximumf %446, %447 : vector<1x64xf32>
    %c186 = arith.constant 186 : index
    %c0_303 = arith.constant 0 : index
    %449 = vector.load %arg13[%c186, %c0_303] : memref<196x64xf32, #tpu.memory_space<vmem>>, vector<1x64xf32>
    %c187 = arith.constant 187 : index
    %c0_304 = arith.constant 0 : index
    %450 = vector.load %arg13[%c187, %c0_304] : memref<196x64xf32, #tpu.memory_space<vmem>>, vector<1x64xf32>
    %451 = arith.maximumf %449, %450 : vector<1x64xf32>
    %452 = arith.maximumf %448, %451 : vector<1x64xf32>
    %c0_305 = arith.constant 0 : index
    %c2816 = arith.constant 2816 : index
    %453 = vector.load %arg14[%c0_305, %c2816] : memref<1x3136xf32, #tpu.memory_space<vmem>>, vector<1x64xf32>
    tpu.vector_store %arg14[%c0_305, %c2816], %452 {strides = array<i32>} : memref<1x3136xf32, #tpu.memory_space<vmem>>, vector<1x64xf32>,
    %c174 = arith.constant 174 : index
    %c0_306 = arith.constant 0 : index
    %454 = vector.load %arg13[%c174, %c0_306] : memref<196x64xf32, #tpu.memory_space<vmem>>, vector<1x64xf32>
    %c175 = arith.constant 175 : index
    %c0_307 = arith.constant 0 : index
    %455 = vector.load %arg13[%c175, %c0_307] : memref<196x64xf32, #tpu.memory_space<vmem>>, vector<1x64xf32>
    %456 = arith.maximumf %454, %455 : vector<1x64xf32>
    %c188 = arith.constant 188 : index
    %c0_308 = arith.constant 0 : index
    %457 = vector.load %arg13[%c188, %c0_308] : memref<196x64xf32, #tpu.memory_space<vmem>>, vector<1x64xf32>
    %c189 = arith.constant 189 : index
    %c0_309 = arith.constant 0 : index
    %458 = vector.load %arg13[%c189, %c0_309] : memref<196x64xf32, #tpu.memory_space<vmem>>, vector<1x64xf32>
    %459 = arith.maximumf %457, %458 : vector<1x64xf32>
    %460 = arith.maximumf %456, %459 : vector<1x64xf32>
    %c0_310 = arith.constant 0 : index
    %c2880 = arith.constant 2880 : index
    %461 = vector.load %arg14[%c0_310, %c2880] : memref<1x3136xf32, #tpu.memory_space<vmem>>, vector<1x64xf32>
    tpu.vector_store %arg14[%c0_310, %c2880], %460 {strides = array<i32>} : memref<1x3136xf32, #tpu.memory_space<vmem>>, vector<1x64xf32>,
    %c176 = arith.constant 176 : index
    %c0_311 = arith.constant 0 : index
    %462 = vector.load %arg13[%c176, %c0_311] : memref<196x64xf32, #tpu.memory_space<vmem>>, vector<1x64xf32>
    %c177 = arith.constant 177 : index
    %c0_312 = arith.constant 0 : index
    %463 = vector.load %arg13[%c177, %c0_312] : memref<196x64xf32, #tpu.memory_space<vmem>>, vector<1x64xf32>
    %464 = arith.maximumf %462, %463 : vector<1x64xf32>
    %c190 = arith.constant 190 : index
    %c0_313 = arith.constant 0 : index
    %465 = vector.load %arg13[%c190, %c0_313] : memref<196x64xf32, #tpu.memory_space<vmem>>, vector<1x64xf32>
    %c191 = arith.constant 191 : index
    %c0_314 = arith.constant 0 : index
    %466 = vector.load %arg13[%c191, %c0_314] : memref<196x64xf32, #tpu.memory_space<vmem>>, vector<1x64xf32>
    %467 = arith.maximumf %465, %466 : vector<1x64xf32>
    %468 = arith.maximumf %464, %467 : vector<1x64xf32>
    %c0_315 = arith.constant 0 : index
    %c2944 = arith.constant 2944 : index
    %469 = vector.load %arg14[%c0_315, %c2944] : memref<1x3136xf32, #tpu.memory_space<vmem>>, vector<1x64xf32>
    tpu.vector_store %arg14[%c0_315, %c2944], %468 {strides = array<i32>} : memref<1x3136xf32, #tpu.memory_space<vmem>>, vector<1x64xf32>,
    %c178 = arith.constant 178 : index
    %c0_316 = arith.constant 0 : index
    %470 = vector.load %arg13[%c178, %c0_316] : memref<196x64xf32, #tpu.memory_space<vmem>>, vector<1x64xf32>
    %c179 = arith.constant 179 : index
    %c0_317 = arith.constant 0 : index
    %471 = vector.load %arg13[%c179, %c0_317] : memref<196x64xf32, #tpu.memory_space<vmem>>, vector<1x64xf32>
    %472 = arith.maximumf %470, %471 : vector<1x64xf32>
    %c192_318 = arith.constant 192 : index
    %c0_319 = arith.constant 0 : index
    %473 = vector.load %arg13[%c192_318, %c0_319] : memref<196x64xf32, #tpu.memory_space<vmem>>, vector<1x64xf32>
    %c193 = arith.constant 193 : index
    %c0_320 = arith.constant 0 : index
    %474 = vector.load %arg13[%c193, %c0_320] : memref<196x64xf32, #tpu.memory_space<vmem>>, vector<1x64xf32>
    %475 = arith.maximumf %473, %474 : vector<1x64xf32>
    %476 = arith.maximumf %472, %475 : vector<1x64xf32>
    %c0_321 = arith.constant 0 : index
    %c3008 = arith.constant 3008 : index
    %477 = vector.load %arg14[%c0_321, %c3008] : memref<1x3136xf32, #tpu.memory_space<vmem>>, vector<1x64xf32>
    tpu.vector_store %arg14[%c0_321, %c3008], %476 {strides = array<i32>} : memref<1x3136xf32, #tpu.memory_space<vmem>>, vector<1x64xf32>,
    %c180 = arith.constant 180 : index
    %c0_322 = arith.constant 0 : index
    %478 = vector.load %arg13[%c180, %c0_322] : memref<196x64xf32, #tpu.memory_space<vmem>>, vector<1x64xf32>
    %c181 = arith.constant 181 : index
    %c0_323 = arith.constant 0 : index
    %479 = vector.load %arg13[%c181, %c0_323] : memref<196x64xf32, #tpu.memory_space<vmem>>, vector<1x64xf32>
    %480 = arith.maximumf %478, %479 : vector<1x64xf32>
    %c194 = arith.constant 194 : index
    %c0_324 = arith.constant 0 : index
    %481 = vector.load %arg13[%c194, %c0_324] : memref<196x64xf32, #tpu.memory_space<vmem>>, vector<1x64xf32>
    %c195 = arith.constant 195 : index
    %c0_325 = arith.constant 0 : index
    %482 = vector.load %arg13[%c195, %c0_325] : memref<196x64xf32, #tpu.memory_space<vmem>>, vector<1x64xf32>
    %483 = arith.maximumf %481, %482 : vector<1x64xf32>
    %484 = arith.maximumf %480, %483 : vector<1x64xf32>
    %c0_326 = arith.constant 0 : index
    %c3072 = arith.constant 3072 : index
    %485 = vector.load %arg14[%c0_326, %c3072] : memref<1x3136xf32, #tpu.memory_space<vmem>>, vector<1x64xf32>
    tpu.vector_store %arg14[%c0_326, %c3072], %484 {strides = array<i32>} : memref<1x3136xf32, #tpu.memory_space<vmem>>, vector<1x64xf32>,
    %c0_327 = arith.constant 0 : index
    %c0_328 = arith.constant 0 : index
    %486 = vector.load %arg14[%c0_327, %c0_328] : memref<1x3136xf32, #tpu.memory_space<vmem>>, vector<1x3136xf32>
    %cst_329 = arith.constant 0.000000e+00 : f32
    %487 = vector.broadcast %cst_329 : f32 to vector<1x3136xf32>
    %488 = arith.maximumf %486, %487 : vector<1x3136xf32>
    %489 = arith.truncf %488 : vector<1x3136xf32> to vector<1x3136xbf16>
    %c0_330 = arith.constant 0 : index
    %c0_331 = arith.constant 0 : index
    %490 = vector.load %arg7[%c0_330, %c0_331] : memref<3136x128xbf16, #tpu.memory_space<vmem>>, vector<3136x128xbf16>
    %cst_332 = arith.constant dense<0.000000e+00> : vector<1x128xf32>
    %491 = tpu.matmul %489, %490, %cst_332 {dimension_numbers = #tpu.dot_dimension_numbers<[1], [0], [0], [1], [0, 0, 1, 1], [], []>} : vector<1x3136xbf16>, vector<3136x128xbf16>, vector<1x128xf32> -> vector<1x128xf32>
    %c0_333 = arith.constant 0 : index
    %c0_334 = arith.constant 0 : index
    %492 = vector.load %arg8[%c0_333, %c0_334] : memref<1x128xf32, #tpu.memory_space<vmem>>, vector<1x128xf32>
    %493 = arith.addf %491, %492 : vector<1x128xf32>
    %cst_335 = arith.constant 0.000000e+00 : f32
    %494 = vector.broadcast %cst_335 : f32 to vector<1x128xf32>
    %495 = arith.maximumf %493, %494 : vector<1x128xf32>
    %496 = arith.truncf %495 : vector<1x128xf32> to vector<1x128xbf16>
    %c0_336 = arith.constant 0 : index
    %c0_337 = arith.constant 0 : index
    %497 = vector.load %arg9[%c0_336, %c0_337] : memref<128x128xbf16, #tpu.memory_space<vmem>>, vector<128x128xbf16>
    %cst_338 = arith.constant dense<0.000000e+00> : vector<1x128xf32>
    %498 = tpu.matmul %496, %497, %cst_338 {dimension_numbers = #tpu.dot_dimension_numbers<[1], [0], [0], [1], [0, 0, 1, 1], [], []>} : vector<1x128xbf16>, vector<128x128xbf16>, vector<1x128xf32> -> vector<1x128xf32>
    %c0_339 = arith.constant 0 : index
    %c0_340 = arith.constant 0 : index
    %499 = vector.load %arg10[%c0_339, %c0_340] : memref<1x128xf32, #tpu.memory_space<vmem>>, vector<1x128xf32>
    %500 = arith.addf %498, %499 : vector<1x128xf32>
    %c0_341 = arith.constant 0 : index
    %c0_342 = arith.constant 0 : index
    %c0_343 = arith.constant 0 : index
    %501 = vector.load %arg11[%c0_341, %c0_342, %c0_343] : memref<1x1x128xf32, #tpu.memory_space<vmem>>, vector<1x1x128xf32>
    %502 = vector.shape_cast %501 : vector<1x1x128xf32> to vector<1x128xf32>
    %503 = vector.shape_cast %500 : vector<1x128xf32> to vector<1x1x128xf32>
    tpu.vector_store %arg11[%c0_341, %c0_342, %c0_343], %503 {strides = array<i32>} : memref<1x1x128xf32, #tpu.memory_space<vmem>>, vector<1x1x128xf32>,
    return
  }
  func.func @transform_0(%arg0: i32) -> (i32, i32, i32) {
    %c0_i32 = arith.constant 0 : i32
    %c0_i32_0 = arith.constant 0 : i32
    %c0_i32_1 = arith.constant 0 : i32
    return %arg0, %c0_i32, %c0_i32_0 : i32, i32, i32
  }
  func.func @transform_1(%arg0: i32) -> (i32, i32) {
    %c0_i32 = arith.constant 0 : i32
    %c0_i32_0 = arith.constant 0 : i32
    %c0_i32_1 = arith.constant 0 : i32
    return %c0_i32, %c0_i32_0 : i32, i32
  }
  func.func @transform_2(%arg0: i32) -> (i32, i32) {
    %c0_i32 = arith.constant 0 : i32
    %c0_i32_0 = arith.constant 0 : i32
    %c0_i32_1 = arith.constant 0 : i32
    return %c0_i32, %c0_i32_0 : i32, i32
  }
  func.func @transform_3(%arg0: i32) -> (i32, i32, i32) {
    %c0_i32 = arith.constant 0 : i32
    %c0_i32_0 = arith.constant 0 : i32
    %c0_i32_1 = arith.constant 0 : i32
    %c0_i32_2 = arith.constant 0 : i32
    return %c0_i32, %c0_i32_0, %c0_i32_1 : i32, i32, i32
  }
  func.func @transform_4(%arg0: i32) -> (i32, i32) {
    %c0_i32 = arith.constant 0 : i32
    %c0_i32_0 = arith.constant 0 : i32
    %c0_i32_1 = arith.constant 0 : i32
    return %c0_i32, %c0_i32_0 : i32, i32
  }
  func.func @transform_5(%arg0: i32) -> (i32, i32) {
    %c0_i32 = arith.constant 0 : i32
    %c0_i32_0 = arith.constant 0 : i32
    %c0_i32_1 = arith.constant 0 : i32
    return %c0_i32, %c0_i32_0 : i32, i32
  }
  func.func @transform_6(%arg0: i32) -> (i32, i32) {
    %c0_i32 = arith.constant 0 : i32
    %c0_i32_0 = arith.constant 0 : i32
    %c0_i32_1 = arith.constant 0 : i32
    return %c0_i32, %c0_i32_0 : i32, i32
  }
  func.func @transform_7(%arg0: i32) -> (i32, i32) {
    %c0_i32 = arith.constant 0 : i32
    %c0_i32_0 = arith.constant 0 : i32
    %c0_i32_1 = arith.constant 0 : i32
    return %c0_i32, %c0_i32_0 : i32, i32
  }
  func.func @transform_8(%arg0: i32) -> (i32, i32) {
    %c0_i32 = arith.constant 0 : i32
    %c0_i32_0 = arith.constant 0 : i32
    %c0_i32_1 = arith.constant 0 : i32
    return %c0_i32, %c0_i32_0 : i32, i32
  }
  func.func @transform_9(%arg0: i32) -> (i32, i32) {
    %c0_i32 = arith.constant 0 : i32
    %c0_i32_0 = arith.constant 0 : i32
    %c0_i32_1 = arith.constant 0 : i32
    return %c0_i32, %c0_i32_0 : i32, i32
  }
  func.func @transform_10(%arg0: i32) -> (i32, i32, i32) {
    %c0_i32 = arith.constant 0 : i32
    %c0_i32_0 = arith.constant 0 : i32
    %c0_i32_1 = arith.constant 0 : i32
    return %arg0, %c0_i32, %c0_i32_0 : i32, i32, i32
  }
}

</mosaic_0001>

<bundles_post_ra>
// kernel: mnist_cnn_forward.1
= control target key start
LH: loop header
LB: loop body
LE: loop exit
PB: predicated region body
PF: predicated region fallthrough
CT: control target
= control target key end

     0   :  { %s11240_s0 = inlined_call_operand.vmem [shape: bf16[2,784,9], index: 0, kind: input, shape index: {}]   ;;  %s11241_s1 = inlined_call_operand.vmem [shape: bf16[9,32], index: 1, kind: input, shape index: {}]   ;;  %s11242_s2 = inlined_call_operand.vmem [shape: f32[1,32], index: 2, kind: input, shape index: {}]   ;;  %s11243_s3 = inlined_call_operand.vmem [shape: bf16[9,32,64], index: 3, kind: input, shape index: {}]   ;;  %s11244_s4 = inlined_call_operand.vmem [shape: f32[1,64], index: 4, kind: input, shape index: {}]   ;;  %s11245_s5 = inlined_call_operand.vmem [shape: bf16[196,2], index: 5, kind: input, shape index: {}]   ;;  %s11246_s6 = inlined_call_operand.vmem [shape: bf16[3136,128], index: 6, kind: input, shape index: {}]   ;;  %s11247_s7 = inlined_call_operand.vmem [shape: f32[1,128], index: 7, kind: input, shape index: {}]   ;;  %s11248_s8 = inlined_call_operand.vmem [shape: bf16[128,128], index: 8, kind: input, shape index: {}]   ;;  %s11249_s9 = inlined_call_operand.vmem [shape: f32[1,128], index: 9, kind: input, shape index: {}]   ;;  %s11250_s10 = inlined_call_operand.hbm [shape: f32[2,1,128], index: 10, kind: output, shape index: {}]  }
   0x1   :  { %11339 = sst [smem:[#allocation78_spill]] %s11240_s0 }
   0x2   :  { %15 = vsyncpa [#allocation6], 0 }
   0x3   :  { %17 = vsyncpa [#allocation6 + $0x1], 0  ;;  %s8555_s13 = smov 0   ;;  %s8557_s14 = smov 0  }
   0x4   :  { %s8559_s15 = smov 0   ;;  %s8561_s16 = smov 0  }
   0x5 LB: > { %s8576_s17 = sadd.s32 4294967295, %s8492_s16   ;;  %s6786_s18 = sadd.s32 4294967294, %s8492_s16   ;;  %s8492_s16 = sphi %s8561_s16, %s11629_s16   ;;  %s8488_s15 = sphi %s8559_s15, %s11628_s15   ;;  %s8484_s14 = sphi %s8557_s14, %s11627_s14   ;;  %s8480_s13 = sphi %s8555_s13, %s11626_s13  }
   0x6   : > { %s8580_s19 = sadd.s32 1, %s8492_s16   ;;  %s245_s20 = sadd.s32 1, %s8488_s15 }
   0x7   : > { %s242_s21 = ssub.s32 %s8492_s16, %s8580_s19  ;;  %p255_p0 = scmp.ne.s32.totalorder %s8488_s15, %s8484_s14 }
   0x8   : > { %p243_p1 = scmp.eq.s32.totalorder %s242_s21, 0  ;;  %p256_p2 = scmp.eq.s32.totalorder %s8576_s17, 1 }
   0x9   : > { %p261_p3 = scmp.ne.s32.totalorder %s8484_s14, %s8480_s13  ;;  %p262_p4 = scmp.eq.s32.totalorder %s6786_s18, 1 }
   0xa   : > { %s8591_s22 = scalar_select %p243_p1, %s8488_s15, %s245_s20  }
   0xb   : > { %p8593_p5 = por %p256_p2, %p255_p0  ;;  %p8597_p6 = por %p262_p4, %p261_p3 }
   0xc   : > { %p6789_p7 = scmp.ge.s32.totalorder %s8492_s16, 1  ;;  %p315_p8 = scmp.lt.s32.totalorder %s8492_s16, 3 }
   0xe   : > { %p316_p9 = pnand %p6789_p7, %p315_p8 }
  0x10   : > { %319 = sbr.rel (%p316_p9) target bundleno = 1983 (0x7bf), region = 60 }
  0x15   : > { %v6989_v0 = vld [vmem:[%s11241_s1] sm:$0xf]  ;;  %v8129_v1 = vld [vmem:[%s11241_s1] sm:$0x10]  ;;  %vm856_vm0 = vcmask 1043456   ;;  %vm857_vm1 = vcmask 1044480   ;;  %s6727_s11 = scalar_lea.hbm %s11250_s10, %s8576_s17 }
  0x16   : > { %v6990_v2 = vor.u32 %v8129_v1, %v6989_v0  ;;  %p352_p10 = scmp.lt.s32.totalorder %s8576_s17, 1  ;;  %v8494_v3 = vmov 65535   ;;  %s11342_s0 = sld [smem:[#allocation78_spill]]  ;;  %vm708_vm2 = vcmask 72704   ;;  %vm1444_vm3 = vcmask 261120  }
  0x17   : > { %v858_v4 = vsel %vm856_vm0, 4294967295, %v8494_v3  ;;  %vm1473_vm4 = vcmask 257024   ;;  %vm4131_vm5 = vcmask 523264   ;;  %vm4156_vm10 = vcmask 519168   ;;  %s350_s28 = sand.u32 1, %s8484_s14   ;;  %s6731_s25 = sshll.u32 %s6727_s11, 4  ;;  %s6732_s25 = int_to_ptr.hbm [resolvable:$true] %s6731_s25 }
  0x18   : > { %v859_v5 = vsel %vm857_vm1, %v858_v4, 0  ;;  %s353_s29 = scalar_select %p352_p10, %s8576_s17, 1 }
  0x19   : > { %v861_v6 = vand.u32 %v6990_v2, %v859_v5  ;;  %s6719_s26 = scalar_lea.sflag [#allocation6], %s350_s28  ;;  %s8444_s27 = sshra.s32 %s6732_s25, 4  ;;  %s8445_s27 = int_to_ptr.hbm [resolvable:$true] %s8444_s27 }
  0x1a   : > { %s8352_s30 = smul.u32 392, %s353_s29  ;;  %s8499_s29 = smov 64  }
  0x1b   : > { %870 = vmatpush.bf16.msra.mxu0 %v861_v6  ;;  %p8451_p0 = scmp.lt.s32.totalorder %s8445_s27, %s11250_s10 }
  0x1c   : > { %s8615_s18 = scalar_lea.vmem %s11342_s0, %s8352_s30  ;;  %s8446_s0 = scalar_lea.hbm %s8445_s27, 1 }
  0x1d   : > { %v8080_v7 = vld [vmem:[%s8615_s18] sm:$0xff]  ;;  %v8081_v8 = vld [vmem:[%s8615_s18 + $0x8] sm:$0xff]  ;;  %v8082_v9 = vld [vmem:[%s8615_s18 + $0x10] sm:$0xff]  ;;  %p8447_p11 = scmp.ne.s32.totalorder %s8445_s27, %s8446_s0 }
  0x1e   : > { %6991 = vmatmul.msk.bf16.vlgmr.msra.gmra.mxu0 %vm708_vm2, %v8080_v7  ;;  %v8083_v10 = vld [vmem:[%s8615_s18 + $0x18] sm:$0xff]  ;;  %v8084_v11 = vld [vmem:[%s8615_s18 + $0x20] sm:$0xff]  ;;  %v8085_v12 = vld [vmem:[%s8615_s18 + $0x28] sm:$0xff] }
  0x1f   : > { %v8086_v13 = vld [vmem:[%s8615_s18 + $0x30] sm:$0xff]  ;;  %v8087_v14 = vld [vmem:[%s8615_s18 + $0x38] sm:$0xff]  ;;  %v8088_v15 = vld [vmem:[%s8615_s18 + $0x40] sm:$0xff]  ;;  %p8448_p12 = pnand %p8447_p11, %p8593_p5 }
  0x20   : > { %v8089_v18 = vld [vmem:[%s8615_s18 + $0x48] sm:$0xff]  ;;  %v8090_v21 = vld [vmem:[%s8615_s18 + $0x50] sm:$0xff]  ;;  %v8091_v24 = vld [vmem:[%s8615_s18 + $0x58] sm:$0xff] }
  0x21   : > { %v8092_v27 = vld [vmem:[%s8615_s18 + $0x60] sm:$0xff]  ;;  %v8093_v30 = vld [vmem:[%s8615_s18 + $0x68] sm:$0xff]  ;;  %v8094_v33 = vld [vmem:[%s8615_s18 + $0x70] sm:$0xff]  ;;  %p8449_p13 = pneg %p8448_p12 }
  0x22   : > { %v8095_v36 = vld [vmem:[%s8615_s18 + $0x78] sm:$0xff]  ;;  %v8096_v39 = vld [vmem:[%s8615_s18 + $0x80] sm:$0xff]  ;;  %v8097_v42 = vld [vmem:[%s8615_s18 + $0x88] sm:$0xff] }
  0x23   : > { %v8098_v45 = vld [vmem:[%s8615_s18 + $0x90] sm:$0xff]  ;;  %v8099_v48 = vld [vmem:[%s8615_s18 + $0x98] sm:$0xff]  ;;  %v8100_v51 = vld [vmem:[%s8615_s18 + $0xa0] sm:$0xff] }
  0x24   : > { %v8101_v54 = vld [vmem:[%s8615_s18 + $0xa8] sm:$0xff]  ;;  %v8102_v62 = vld [vmem:[%s8615_s18 + $0xb0] sm:$0xff]  ;;  %v8103_v5 = vld [vmem:[%s8615_s18 + $0xb8] sm:$0xff] }
  0x2e   : > { %6992 = vmatmul.msk.bf16.gmra.mxu0 %vm708_vm2, %v8081_v8 }
  0x3e   : > { %6993 = vmatmul.msk.bf16.gmra.mxu0 %vm708_vm2, %v8082_v9 }
  0x4e   : > { %6994 = vmatmul.msk.bf16.gmra.mxu0 %vm708_vm2, %v8083_v10 }
  0x5e   : > { %6995 = vmatmul.msk.bf16.gmra.mxu0 %vm708_vm2, %v8084_v11 }
  0x6e   : > { %6996 = vmatmul.msk.bf16.gmra.mxu0 %vm708_vm2, %v8085_v12  ;;  %v8104_v12 = vld [vmem:[%s8615_s18 + $0xc0] sm:$0xff] }
  0x7e   : > { %6997 = vmatmul.msk.bf16.gmra.mxu0 %vm708_vm2, %v8086_v13 }
  0x8e   : > { %6998 = vmatmul.msk.bf16.gmra.mxu0 %vm708_vm2, %v8087_v14 }
  0x9b   : > { %v8634_v16 = vpop.f32.mrf.mxu0 }
  0x9e   : > { %6999 = vmatmul.msk.bf16.gmra.mxu0 %vm708_vm2, %v8088_v15 }
  0xa3   : > { %v8637_v17 = vpop.f32.mrf.mxu0 }
  0xab   : > { %v8640_v19 = vpop.f32.mrf.mxu0 }
  0xae   : > { %7000 = vmatmul.msk.bf16.gmra.mxu0 %vm708_vm2, %v8089_v18 }
  0xb3   : > { %v8643_v20 = vpop.f32.mrf.mxu0 }
  0xbb   : > { %v8646_v22 = vpop.f32.mrf.mxu0 }
  0xbe   : > { %7001 = vmatmul.msk.bf16.gmra.mxu0 %vm708_vm2, %v8090_v21 }
  0xc3   : > { %v8649_v23 = vpop.f32.mrf.mxu0 }
  0xcb   : > { %v8652_v25 = vpop.f32.mrf.mxu0 }
  0xce   : > { %7002 = vmatmul.msk.bf16.gmra.mxu0 %vm708_vm2, %v8091_v24 }
  0xd3   : > { %v8655_v26 = vpop.f32.mrf.mxu0 }
  0xdb   : > { %v8658_v28 = vpop.f32.mrf.mxu0 }
  0xde   : > { %7003 = vmatmul.msk.bf16.gmra.mxu0 %vm708_vm2, %v8092_v27  ;;  %v8105_v27 = vld [vmem:[%s8615_s18 + $0xc8] sm:$0xff] }
  0xe3   : > { %v8661_v29 = vpop.f32.mrf.mxu0 }
  0xeb   : > { %v8664_v31 = vpop.f32.mrf.mxu0 }
  0xee   : > { %7004 = vmatmul.msk.bf16.gmra.mxu0 %vm708_vm2, %v8093_v30 }
  0xf3   : > { %v8667_v32 = vpop.f32.mrf.mxu0 }
  0xfb   : > { %v8670_v34 = vpop.f32.mrf.mxu0 }
  0xfe   : > { %7005 = vmatmul.msk.bf16.gmra.mxu0 %vm708_vm2, %v8094_v33 }
 0x103   : > { %v8673_v35 = vpop.f32.mrf.mxu0 }
 0x104   : > { %11343 = vst [vmem:[#allocation8_spill] sm:$0xff] %v8673_v35 }
 0x10b   : > { %v8676_v37 = vpop.f32.mrf.mxu0 }
 0x10c   : > { %11344 = vst [vmem:[#allocation9_spill] sm:$0xff] %v8676_v37 }
 0x10e   : > { %7006 = vmatmul.msk.bf16.gmra.mxu0 %vm708_vm2, %v8095_v36 }
 0x113   : > { %v8679_v38 = vpop.f32.mrf.mxu0 }
 0x114   : > { %11345 = vst [vmem:[#allocation10_spill] sm:$0xff] %v8679_v38 }
 0x11b   : > { %v8682_v40 = vpop.f32.mrf.mxu0 }
 0x11c   : > { %11346 = vst [vmem:[#allocation11_spill] sm:$0xff] %v8682_v40 }
 0x11e   : > { %7007 = vmatmul.msk.bf16.gmra.mxu0 %vm708_vm2, %v8096_v39 }
 0x123   : > { %v8685_v41 = vpop.f32.mrf.mxu0 }
 0x124   : > { %11347 = vst [vmem:[#allocation12_spill] sm:$0xff] %v8685_v41 }
 0x12b   : > { %v8688_v43 = vpop.f32.mrf.mxu0 }
 0x12c   : > { %11348 = vst [vmem:[#allocation13_spill] sm:$0xff] %v8688_v43  ;;  %v1485_v43 = vld [vmem:[%s11245_s5 + $0x28] sm:$0xf] }
 0x12e   : > { %7008 = vmatmul.msk.bf16.gmra.mxu0 %vm708_vm2, %v8097_v42 }
 0x133   : > { %v8691_v44 = vpop.f32.mrf.mxu0 }
 0x134   : > { %11349 = vst [vmem:[#allocation14_spill] sm:$0xff] %v8691_v44  ;;  %v1484_v44 = vld [vmem:[%s11245_s5 + $0x24] sm:$0xf] }
 0x13b   : > { %v8694_v46 = vpop.f32.mrf.mxu0 }
 0x13c   : > { %11350 = vst [vmem:[#allocation15_spill] sm:$0xff] %v8694_v46 }
 0x13e   : > { %7009 = vmatmul.msk.bf16.gmra.mxu0 %vm708_vm2, %v8098_v45 }
 0x143   : > { %v8697_v47 = vpop.f32.mrf.mxu0 }
 0x144   : > { %11351 = vst [vmem:[#allocation16_spill] sm:$0xff] %v8697_v47  ;;  %v1479_v47 = vld [vmem:[%s11245_s5 + $0x10] sm:$0xf] }
 0x14b   : > { %v8700_v49 = vpop.f32.mrf.mxu0 }
 0x14c   : > { %11352 = vst [vmem:[#allocation17_spill] sm:$0xff] %v8700_v49 }
 0x14e   : > { %7010 = vmatmul.msk.bf16.gmra.mxu0 %vm708_vm2, %v8099_v48  ;;  %v8106_v48 = vld [vmem:[%s8615_s18 + $0xd0] sm:$0xff] }
 0x153   : > { %v8703_v50 = vpop.f32.mrf.mxu0 }
 0x154   : > { %11353 = vst [vmem:[#allocation18_spill] sm:$0xff] %v8703_v50 }
 0x15b   : > { %v8706_v52 = vpop.f32.mrf.mxu0 }
 0x15c   : > { %11354 = vst [vmem:[#allocation19_spill] sm:$0xff] %v8706_v52 }
 0x15e   : > { %7011 = vmatmul.msk.bf16.gmra.mxu0 %vm708_vm2, %v8100_v51 }
 0x163   : > { %v8709_v53 = vpop.f32.mrf.mxu0 }
 0x164   : > { %v11252_v56 = vrot.slane %v8709_v53, 4 }
 0x16b   : > { %v937_v55 = vpop.f32.mrf.mxu0 }
 0x16c   : > { %v1145_v57 = vrot.slane %v937_v55, 4 }
 0x16e   : > { %v8716_v58 = vsel %vm856_vm0, %v11252_v56, %v1145_v57  ;;  %7012 = vmatmul.msk.bf16.gmra.mxu0 %vm708_vm2, %v8101_v54 }
 0x173   : > { %v939_v59 = vpop.f32.mrf.mxu0 }
 0x174   : > { %v1147_v60 = vrot.slane %v939_v59, 4 }
 0x176   : > { %v8720_v61 = vsel %vm856_vm0, %v1145_v57, %v1147_v60 }
 0x17b   : > { %v942_v63 = vpop.f32.mrf.mxu0 }
 0x17c   : > { %v1149_v0 = vrot.slane %v942_v63, 4 }
 0x17e   : > { %v8724_v1 = vsel %vm856_vm0, %v1147_v60, %v1149_v0  ;;  %7013 = vmatmul.msk.bf16.gmra.mxu0 %vm708_vm2, %v8102_v62  ;;  %v8107_v62 = vld [vmem:[%s8615_s18 + $0xd8] sm:$0xff] }
 0x183   : > { %v944_v2 = vpop.f32.mrf.mxu0 }
 0x184   : > { %v1151_v3 = vrot.slane %v944_v2, 4 }
 0x186   : > { %v8728_v4 = vsel %vm856_vm0, %v1149_v0, %v1151_v3 }
 0x18b   : > { %v947_v6 = vpop.f32.mrf.mxu0 }
 0x18c   : > { %v1153_v7 = vrot.slane %v947_v6, 4 }
 0x18e   : > { %v8732_v8 = vsel %vm856_vm0, %v1151_v3, %v1153_v7  ;;  %7014 = vmatmul.msk.bf16.gmra.mxu0 %vm708_vm2, %v8103_v5 }
 0x193   : > { %v949_v9 = vpop.f32.mrf.mxu0 }
 0x194   : > { %v1155_v10 = vrot.slane %v949_v9, 4 }
 0x196   : > { %v8736_v11 = vsel %vm856_vm0, %v1153_v7, %v1155_v10  ;;  %v8108_v7 = vld [vmem:[%s8615_s18 + $0xe0] sm:$0xff] }
 0x19b   : > { %v952_v13 = vpop.f32.mrf.mxu0 }
 0x19c   : > { %v1157_v14 = vrot.slane %v952_v13, 4 }
 0x19e   : > { %v8740_v15 = vsel %vm856_vm0, %v1155_v10, %v1157_v14  ;;  %7015 = vmatmul.msk.bf16.gmra.mxu0 %vm708_vm2, %v8104_v12 }
 0x1a3   : > { %v954_v18 = vpop.f32.mrf.mxu0 }
 0x1a4   : > { %v1159_v21 = vrot.slane %v954_v18, 4 }
 0x1a6   : > { %v8744_v24 = vsel %vm856_vm0, %v1157_v14, %v1159_v21 }
 0x1ab   : > { %v957_v30 = vpop.f32.mrf.mxu0 }
 0x1ac   : > { %v1161_v33 = vrot.slane %v957_v30, 4 }
 0x1ae   : > { %v8748_v36 = vsel %vm856_vm0, %v1159_v21, %v1161_v33  ;;  %7016 = vmatmul.msk.bf16.gmra.mxu0 %vm708_vm2, %v8105_v27  ;;  %v8109_v21 = vld [vmem:[%s8615_s18 + $0xe8] sm:$0xff] }
 0x1b3   : > { %v959_v39 = vpop.f32.mrf.mxu0 }
 0x1b4   : > { %v1163_v42 = vrot.slane %v959_v39, 4 }
 0x1b6   : > { %v8752_v45 = vsel %vm856_vm0, %v1161_v33, %v1163_v42 }
 0x1bb   : > { %v962_v51 = vpop.f32.mrf.mxu0 }
 0x1bc   : > { %v1165_v54 = vrot.slane %v962_v51, 4  ;;  %v8110_v51 = vld [vmem:[%s8615_s18 + $0xf0] sm:$0xff] }
 0x1be   : > { %v8756_v55 = vsel %vm856_vm0, %v1163_v42, %v1165_v54  ;;  %7017 = vmatmul.msk.bf16.gmra.mxu0 %vm708_vm2, %v8106_v48 }
 0x1c3   : > { %v964_v57 = vpop.f32.mrf.mxu0 }
 0x1c4   : > { %v1167_v59 = vrot.slane %v964_v57, 4 }
 0x1c6   : > { %v8760_v60 = vsel %vm856_vm0, %v1165_v54, %v1167_v59 }
 0x1cb   : > { %v967_v63 = vpop.f32.mrf.mxu0 }
 0x1cc   : > { %v1169_v0 = vrot.slane %v967_v63, 4 }
 0x1ce   : > { %v8764_v2 = vsel %vm856_vm0, %v1167_v59, %v1169_v0  ;;  %7018 = vmatmul.msk.bf16.gmra.mxu0 %vm708_vm2, %v8107_v62 }
 0x1d3   : > { %v969_v3 = vpop.f32.mrf.mxu0 }
 0x1d4   : > { %v1171_v5 = vrot.slane %v969_v3, 4  ;;  %v8111_v3 = vld [vmem:[%s8615_s18 + $0xf8] sm:$0xff] }
 0x1d6   : > { %v8768_v6 = vsel %vm856_vm0, %v1169_v0, %v1171_v5 }
 0x1d7   : > { %11355 = vst [vmem:[#allocation20_spill] sm:$0xff] %v8768_v6 }
 0x1db   : > { %v972_v9 = vpop.f32.mrf.mxu0 }
 0x1dc   : > { %v1173_v10 = vrot.slane %v972_v9, 4 }
 0x1de   : > { %v8772_v12 = vsel %vm856_vm0, %v1171_v5, %v1173_v10  ;;  %7019 = vmatmul.msk.bf16.gmra.mxu0 %vm708_vm2, %v8108_v7 }
 0x1df   : > { %11356 = vst [vmem:[#allocation21_spill] sm:$0xff] %v8772_v12 }
 0x1e3   : > { %v974_v13 = vpop.f32.mrf.mxu0 }
 0x1e4   : > { %v1175_v14 = vrot.slane %v974_v13, 4 }
 0x1e6   : > { %v8776_v18 = vsel %vm856_vm0, %v1173_v10, %v1175_v14 }
 0x1e7   : > { %11357 = vst [vmem:[#allocation22_spill] sm:$0xff] %v8776_v18 }
 0x1eb   : > { %v977_v27 = vpop.f32.mrf.mxu0 }
 0x1ec   : > { %v1177_v30 = vrot.slane %v977_v27, 4 }
 0x1ee   : > { %v8780_v33 = vsel %vm856_vm0, %v1175_v14, %v1177_v30  ;;  %7020 = vmatmul.msk.bf16.gmra.mxu0 %vm708_vm2, %v8109_v21  ;;  %v8112_v21 = vld [vmem:[%s8615_s18 + $0x100] sm:$0xff] }
 0x1ef   : > { %11358 = vst [vmem:[#allocation23_spill] sm:$0xff] %v8780_v33  ;;  %v11382_v33 = vrot.slane %v8709_v53, 4  ;;  %v9004_v53 = vld [vmem:[%s11242_s2] ss:$0 sm:$0xff] }
 0x1f3   : > { %v979_v39 = vpop.f32.mrf.mxu0 }
 0x1f4   : > { %v1179_v42 = vrot.slane %v979_v39, 4 }
 0x1f6   : > { %v8784_v48 = vsel %vm856_vm0, %v1177_v30, %v1179_v42 }
 0x1f7   : > { %11359 = vst [vmem:[#allocation24_spill] sm:$0xff] %v8784_v48  ;;  %v8130_v48 = vld [vmem:[%s11243_s3] sm:$0xff] }
 0x1fb   : > { %v982_v54 = vpop.f32.mrf.mxu0 }
 0x1fc   : > { %v1181_v57 = vrot.slane %v982_v54, 4 }
 0x1fe   : > { %v8788_v59 = vsel %vm856_vm0, %v1179_v42, %v1181_v57  ;;  %7021 = vmatmul.msk.bf16.gmra.mxu0 %vm708_vm2, %v8110_v51  ;;  %v8113_v51 = vld [vmem:[%s8615_s18 + $0x108] sm:$0xff] }
 0x1ff   : > { %11360 = vst [vmem:[#allocation25_spill] sm:$0xff] %v8788_v59 }
 0x203   : > { %v984_v62 = vpop.f32.mrf.mxu0 }
 0x204   : > { %v1183_v63 = vrot.slane %v984_v62, 4  ;;  %v8114_v62 = vld [vmem:[%s8615_s18 + $0x110] sm:$0xff] }
 0x206   : > { %v8792_v0 = vsel %vm856_vm0, %v1181_v57, %v1183_v63 }
 0x207   : > { %11361 = vst [vmem:[#allocation26_spill] sm:$0xff] %v8792_v0  ;;  %v1483_v0 = vld [vmem:[%s11245_s5 + $0x20] sm:$0xf] }
 0x20b   : > { %v987_v5 = vpop.f32.mrf.mxu0 }
 0x20c   : > { %v1185_v7 = vrot.slane %v987_v5, 4  ;;  %v8115_v5 = vld [vmem:[%s8615_s18 + $0x118] sm:$0xff] }
 0x20e   : > { %v8796_v9 = vsel %vm856_vm0, %v1183_v63, %v1185_v7  ;;  %7022 = vmatmul.msk.bf16.gmra.mxu0 %vm708_vm2, %v8111_v3 }
 0x20f   : > { %11362 = vst [vmem:[#allocation27_spill] sm:$0xff] %v8796_v9 }
 0x213   : > { %v989_v10 = vpop.f32.mrf.mxu0 }
 0x214   : > { %v1187_v13 = vrot.slane %v989_v10, 4 }
 0x216   : > { %v8800_v14 = vsel %vm856_vm0, %v1185_v7, %v1187_v13 }
 0x217   : > { %11363 = vst [vmem:[#allocation28_spill] sm:$0xff] %v8800_v14  ;;  %v11369_v14 = vmov 1  }
 0x21b   : > { %v8803_v27 = vpop.f32.mrf.mxu0 }
 0x21c   : > { %11364 = vst [vmem:[#allocation29_spill] sm:$0xff] %v8803_v27  ;;  %v11251_v30 = vrot.slane %v8803_v27, 4  ;;  %v8118_v27 = vld [vmem:[%s8615_s18 + $0x130] sm:$0xff] }
 0x21e   : > { %v8809_v39 = vsel %vm856_vm0, %v1187_v13, %v11251_v30  ;;  %7023 = vmatmul.msk.bf16.gmra.mxu0 %vm708_vm2, %v8112_v21  ;;  %v1475_v13 = vld [vmem:[%s11245_s5] sm:$0xf]  ;;  %v11257_v21 = vmov 1  }
 0x21f   : > { %11365 = vst [vmem:[#allocation30_spill] sm:$0xff] %v8809_v39  ;;  %8399 = vset.pattern.permute.xlu1 %v11257_v21  ;;  %v1477_v39 = vld [vmem:[%s11245_s5 + $0x8] sm:$0xf] }
 0x220   : > { %2209 = vperm.xlu1 %8399, %v1475_v13  }
 0x223   : > { %v8812_v42 = vpop.f32.mrf.mxu0 }
 0x22b   : > { %v8815_v54 = vpop.f32.mrf.mxu0 }
 0x22e   : > { %7024 = vmatmul.msk.bf16.gmra.mxu0 %vm708_vm2, %v8113_v51  ;;  %v11253_v51 = vmov 0  }
 0x22f   : > { %8398 = vset.pattern.permute.xlu0 %v11253_v51  ;;  %8400 = vset.pattern.permute.xlu2 %v11253_v51  ;;  %v8117_v51 = vld [vmem:[%s8615_s18 + $0x128] sm:$0xff] }
 0x230   : > { %1552 = vperm.xlu0 %8398, %v1475_v13   ;;  %v1478_v13 = vld [vmem:[%s11245_s5 + $0xc] sm:$0xf]  ;;  %1570 = vperm.xlu2 %8400, %v1477_v39  }
 0x233   : > { %v8818_v57 = vpop.f32.mrf.mxu0 }
 0x238   : > { %1579 = vperm.xlu2 %8400, %v1478_v13  }
 0x23b   : > { %v8821_v63 = vpop.f32.mrf.mxu0 }
 0x23e   : > { %7025 = vmatmul.msk.bf16.gmra.mxu0 %vm708_vm2, %v8114_v62  ;;  %v8116_v62 = vld [vmem:[%s8615_s18 + $0x120] sm:$0xff] }
 0x240   : > { %1588 = vperm.xlu2 %8400, %v1479_v47  }
 0x243   : > { %v8824_v3 = vpop.f32.mrf.mxu0 }
 0x248   : > { %8403 = vset.pattern.permute.xlu2 %v11369_v14 }
 0x249   : > { %2241 = vperm.xlu2 %8403, %v1479_v47   ;;  %v8121_v47 = vld [vmem:[%s8615_s18 + $0x148] sm:$0xff] }
 0x24b   : > { %v8827_v7 = vpop.f32.mrf.mxu0 }
 0x24e   : > { %7026 = vmatmul.msk.bf16.gmra.mxu0 %vm708_vm2, %v8115_v5  ;;  %v1476_v5 = vld [vmem:[%s11245_s5 + $0x4] sm:$0xf] }
 0x24f   : > { %2217 = vperm.xlu1 %8399, %v1476_v5   ;;  %1561 = vperm.xlu0 %8398, %v1476_v5  }
 0x253   : > { %v8830_v10 = vpop.f32.mrf.mxu0 }
 0x257   : > { %2233 = vperm.xlu1 %8399, %v1478_v13   ;;  %8401 = vset.pattern.permute.xlu0 %v11257_v21  ;;  %v1480_v21 = vld [vmem:[%s11245_s5 + $0x14] sm:$0xf]  ;;  %v8119_v13 = vld [vmem:[%s8615_s18 + $0x138] sm:$0xff] }
 0x258   : > { %2225 = vperm.xlu0 %8401, %v1477_v39   ;;  %v1481_v39 = vld [vmem:[%s11245_s5 + $0x18] sm:$0xf] }
 0x25b   : > { %v8839_v30 = vpop.f32.mrf.mxu0 }
 0x25e   : > { %7027 = vmatmul.msk.bf16.gmra.mxu0 %vm708_vm2, %v8116_v62  ;;  %v11366_v62 = vmov 0  }
 0x25f   : > { %8402 = vset.pattern.permute.xlu1 %v11366_v62  ;;  %8404 = vset.pattern.permute.xlu2 %v11366_v62 }
 0x260   : > { %2249 = vperm.xlu0 %8401, %v1480_v21   ;;  %1597 = vperm.xlu1 %8402, %v1480_v21  }
 0x263   : > { %v8845_v56 = vpop.f32.mrf.mxu0 }
 0x268   : > { %2257 = vperm.xlu0 %8401, %v1481_v39   ;;  %1606 = vperm.xlu1 %8402, %v1481_v39   ;;  %v8120_v39 = vld [vmem:[%s8615_s18 + $0x140] sm:$0xff] }
 0x26b   : > { %v8852_v50 = vpop.f32.mrf.mxu0 }
 0x26e   : > { %7028 = vmatmul.msk.bf16.gmra.mxu0 %vm708_vm2, %v8117_v51 }
 0x270   : > { %8406 = vset.pattern.permute.xlu0 %v11366_v62  ;;  %8405 = vset.pattern.permute.xlu1 %v11369_v14 }
 0x271   : > { %1633 = vperm.xlu0 %8406, %v1484_v44  }
 0x273   : > { %v8859_v5 = vpop.f32.mrf.mxu0 }
 0x279   : > { %8410 = vset.pattern.permute.xlu0 %v11369_v14 }
 0x27a   : > { %2289 = vperm.xlu0 %8410, %v1485_v43  }
 0x27b   : > { %v8865_v49 = vpop.f32.mrf.mxu0 }
 0x27c   : > { %11367 = vst [vmem:[#allocation31_spill] sm:$0xff] %v8865_v49 }
 0x27e   : > { %7029 = vmatmul.msk.bf16.gmra.mxu0 %vm708_vm2, %v8118_v27  ;;  %v1482_v27 = vld [vmem:[%s11245_s5 + $0x1c] sm:$0xf] }
 0x27f   : > { %2265 = vperm.xlu1 %8405, %v1482_v27   ;;  %1615 = vperm.xlu2 %8404, %v1482_v27  }
 0x283   : > { %v8871_v51 = vpop.f32.mrf.mxu0 }
 0x284   : > { %11368 = vst [vmem:[#allocation32_spill] sm:$0xff] %v8871_v51 }
 0x287   : > { %2273 = vperm.xlu1 %8405, %v1483_v0   ;;  %1624 = vperm.xlu2 %8404, %v1483_v0   ;;  %v1488_v0 = vld [vmem:[%s11245_s5 + $0x34] sm:$0xf] }
 0x288   : > { %2313 = vperm.xlu0 %8410, %v1488_v0  }
 0x28b   : > { %v8876_v21 = vpop.f32.mrf.mxu0 }
 0x28c   : > { %11370 = vst [vmem:[#allocation33_spill] sm:$0xff] %v8876_v21  ;;  %v1494_v21 = vld [vmem:[%s11245_s5 + $0x4c] sm:$0xf] }
 0x28e   : > { %7030 = vmatmul.msk.bf16.gmra.mxu0 %vm708_vm2, %v8119_v13 }
 0x28f   : > { %8408 = vset.pattern.permute.xlu1 %v11366_v62  ;;  %8407 = vset.pattern.permute.xlu2 %v11369_v14 }
 0x290   : > { %1642 = vperm.xlu1 %8408, %v1485_v43   ;;  %2281 = vperm.xlu2 %8407, %v1484_v44   ;;  %v8122_v43 = vld [vmem:[%s8615_s18 + $0x150] sm:$0xff] }
 0x293   : > { %v8882_v9 = vpop.f32.mrf.mxu0 }
 0x294   : > { %11371 = vst [vmem:[#allocation34_spill] sm:$0xff] %v8882_v9 }
 0x298   : > { %8411 = vset.pattern.permute.xlu1 %v11369_v14  ;;  %8409 = vset.pattern.permute.xlu2 %v11366_v62 }
 0x29b   : > { %v8889_v46 = vpop.f32.mrf.mxu0 }
 0x29c   : > { %11372 = vst [vmem:[#allocation35_spill] sm:$0xff] %v8889_v46  ;;  %v9015_v46 = vld [vmem:[%s11245_s5 + $0x58] sm:$0xf] }
 0x29e   : > { %7031 = vmatmul.msk.bf16.gmra.mxu0 %vm708_vm2, %v8120_v39  ;;  %v1486_v39 = vld [vmem:[%s11245_s5 + $0x2c] sm:$0xf] }
 0x29f   : > { %2297 = vperm.xlu1 %8411, %v1486_v39   ;;  %1651 = vperm.xlu2 %8409, %v1486_v39   ;;  %v8123_v39 = vld [vmem:[%s8615_s18 + $0x158] sm:$0xff] }
 0x2a3   : > { %v8896_v13 = vpop.f32.mrf.mxu0 }
 0x2a4   : > { %11373 = vst [vmem:[#allocation36_spill] sm:$0xff] %v8896_v13  ;;  %v1491_v13 = vld [vmem:[%s11245_s5 + $0x40] sm:$0xf] }
 0x2a7   : > { %8412 = vset.pattern.permute.xlu1 %v11366_v62 }
 0x2a8   : > { %1669 = vperm.xlu1 %8412, %v1488_v0   ;;  %v1487_v0 = vld [vmem:[%s11245_s5 + $0x30] sm:$0xf] }
 0x2a9   : > { %1660 = vperm.xlu2 %8409, %v1487_v0  }
 0x2ab   : > { %v8903_v59 = vpop.f32.mrf.mxu0 }
 0x2ac   : > { %11374 = vst [vmem:[#allocation37_spill] sm:$0xff] %v8903_v59  ;;  %v8497_v59 = vmov 0.0  }
 0x2ad   : > { %1445 = vst.msk [vmem:[#allocation2] sm:$0xff] %vm1444_vm3, %v8497_v59 }
 0x2ae   : > { %7032 = vmatmul.msk.bf16.gmra.mxu0 %vm708_vm2, %v8121_v47  ;;  %v1489_v47 = vld [vmem:[%s11245_s5 + $0x38] sm:$0xf]  ;;  %1446 = vst.msk [vmem:[#allocation2 + $0x8] sm:$0xff] %vm1444_vm3, %v8497_v59 }
 0x2af   : > { %2321 = vperm.xlu0 %8410, %v1489_v47   ;;  %1447 = vst.msk [vmem:[#allocation2 + $0xd4] sm:$0xff] %vm1444_vm3, %v8497_v59 }
 0x2b0   : > { %1678 = vperm.xlu1 %8412, %v1489_v47   ;;  %1448 = vst.msk [vmem:[#allocation2 + $0xdc] sm:$0xff] %vm1444_vm3, %v8497_v59  ;;  %v1490_v47 = vld [vmem:[%s11245_s5 + $0x3c] sm:$0xf] }
 0x2b1   : > { %v8133_v59 = vld [vmem:[%s11243_s3 + $0x18] sm:$0xff]  ;;  %8413 = vset.pattern.permute.xlu2 %v11369_v14 }
 0x2b2   : > { %1967 = vmatpush.bf16.msra.mxu1 %v8133_v59  ;;  %2305 = vperm.xlu2 %8413, %v1487_v0   ;;  %v8131_v0 = vld [vmem:[%s11243_s3 + $0x8] sm:$0xff] }
 0x2b3   : > { %v8911_v27 = vpop.f32.mrf.mxu0  ;;  %v8135_v59 = vld [vmem:[%s11243_s3 + $0x28] sm:$0xff]  ;;  %2091 = vmatpush.bf16.msra.mxu2 %v8131_v0  ;;  %v1142_v0 = vrot.slane %v8706_v52, 4 }
 0x2b4   : > { %11375 = vst [vmem:[#allocation38_spill] sm:$0xff] %v8911_v27  ;;  %2558 = vmatpush.bf16.msra.mxu3 %v8135_v59  ;;  %v8125_v59 = vld [vmem:[%s8615_s18 + $0x168] sm:$0xff] }
 0x2b7   : > { %8416 = vset.pattern.permute.xlu0 %v11366_v62  ;;  %2092 = vmatpush.bf16.msra.mxu2 %v8130_v48  ;;  %v1144_v48 = vsel %vm856_vm0, %v1142_v0, %v11382_v33  ;;  %v8498_v0 = vmov 839922192  }
 0x2b8   : > { %8415 = vset.pattern.permute.xlu1 %v11369_v14 }
 0x2b9   : > { %2329 = vperm.xlu1 %8415, %v1490_v47  }
 0x2ba   : > { %8414 = vset.pattern.permute.xlu2 %v11366_v62 }
 0x2bb   : > { %v8922_v44 = vpop.f32.mrf.mxu0  ;;  %1687 = vperm.xlu2 %8414, %v1490_v47   ;;  %v8997_v47 = vld [vmem:[%s11245_s5 + $0x54] sm:$0xf] }
 0x2bc   : > { %11376 = vst [vmem:[#allocation39_spill] sm:$0xff] %v8922_v44 }
 0x2be   : > { %7033 = vmatmul.msk.bf16.gmra.mxu0 %vm708_vm2, %v8122_v43 }
 0x2c1   : > { %2337 = vperm.xlu1 %8415, %v1491_v13  }
 0x2c3   : > { %v8929_v27 = vpop.f32.mrf.mxu0  ;;  %1696 = vperm.xlu2 %8414, %v1491_v13  }
 0x2c4   : > { %11377 = vst [vmem:[#allocation40_spill] sm:$0xff] %v8929_v27  ;;  %v8132_v27 = vld [vmem:[%s11243_s3 + $0x10] sm:$0xff] }
 0x2c5   : > { %1968 = vmatpush.bf16.msra.mxu1 %v8132_v27  ;;  %v8134_v27 = vld [vmem:[%s11243_s3 + $0x20] sm:$0xff] }
 0x2c6   : > { %2559 = vmatpush.bf16.msra.mxu3 %v8134_v27 }
 0x2c9   : > { %8418 = vset.pattern.permute.xlu1 %v11366_v62 }
 0x2cb   : > { %v8937_v44 = vpop.f32.mrf.mxu0  ;;  %8417 = vset.pattern.permute.xlu2 %v11369_v14 }
 0x2cc   : > { %11378 = vst [vmem:[#allocation41_spill] sm:$0xff] %v8937_v44  ;;  %v8124_v44 = vld [vmem:[%s8615_s18 + $0x160] sm:$0xff] }
 0x2ce   : > { %7034 = vmatmul.msk.bf16.gmra.mxu0 %vm708_vm2, %v8123_v39 }
 0x2d3   : > { %v8944_v43 = vpop.f32.mrf.mxu0 }
 0x2d4   : > { %11379 = vst [vmem:[#allocation42_spill] sm:$0xff] %v8944_v43  ;;  %v1492_v43 = vld [vmem:[%s11245_s5 + $0x44] sm:$0xf] }
 0x2d5   : > { %1705 = vperm.xlu0 %8416, %v1492_v43   ;;  %2345 = vperm.xlu2 %8417, %v1492_v43   ;;  %v8141_v43 = vld [vmem:[%s11243_s3 + $0x58] sm:$0xff] }
 0x2d6   : > { %3284 = vmatpush.bf16.msrb.mxu3 %v8141_v43 }
 0x2db   : > { %v8953_v39 = vpop.f32.mrf.mxu0 }
 0x2dc   : > { %11380 = vst [vmem:[#allocation43_spill] sm:$0xff] %v8953_v39 }
 0x2dd   : > { %8420 = vset.pattern.permute.xlu0 %v11369_v14  ;;  %8419 = vset.pattern.permute.xlu2 %v11366_v62 }
 0x2de   : > { %7035 = vmatmul.msk.bf16.gmra.mxu0 %vm708_vm2, %v8124_v44  ;;  %v1493_v44 = vld [vmem:[%s11245_s5 + $0x48] sm:$0xf]  ;;  %1723 = vperm.xlu2 %8419, %v1494_v21  }
 0x2df   : > { %2353 = vperm.xlu0 %8420, %v1493_v44   ;;  %1714 = vperm.xlu1 %8418, %v1493_v44   ;;  %v1216_v44 = vmax.f32 %v8634_v16, %v1144_v48 }
 0x2e3   : > { %v8972_v39 = vpop.f32.mrf.mxu0 }
 0x2e4   : > { %11381 = vst [vmem:[#allocation44_spill] sm:$0xff] %v8972_v39  ;;  %v1266_v27 = vrot.slane %v8972_v39, 4 }
 0x2e7   : > { %2377 = vperm.xlu0 %8420, %v8997_v47   ;;  %8421 = vset.pattern.permute.xlu1 %v11369_v14 }
 0x2e8   : > { %2361 = vperm.xlu1 %8421, %v1494_v21  }
 0x2eb   : > { %v1057_v41 = vpop.f32.mrf.mxu0 }
 0x2ec   : > { %v1267_v40 = vrot.slane %v1057_v41, 4  ;;  %v1553_v41 = vpop.permute.xlu0 %1552 }
 0x2ee   : > { %v1268_v18 = vsel %vm856_vm0, %v1266_v27, %v1267_v40  ;;  %7036 = vmatmul.msk.bf16.gmra.mxu0 %vm708_vm2, %v8125_v59  ;;  %v1556_v59 = vunpack.c.l.s4 %v8498_v0  ;;  %v2210_v27 = vpop.permute.xlu1 %2209  ;;  %v9022_v0 = vpop.permute.xlu2 %1570 }
 0x2ef   : > { %v1340_v52 = vmax.f32 %v8812_v42, %v1268_v18  ;;  %2385 = vperm.xlu0 %8420, %v9015_v46  }
 0x2f0   : > { %v9009_v18 = vunpack.c.0.s8 %v1556_v59  ;;  %8422 = vset.pattern.permute.xlu1 %v11366_v62 }
 0x2f1   : > { %v1365_v33 = vmax.f32 %v1216_v44, %v1340_v52  ;;  %v1217_v52 = vmax.f32 %v8637_v17, %v8716_v58  ;;  %v2158_v44 = vld [vmem:[#allocation2 + $0x3] sm:$0xff]  ;;  %v8126_v17 = vld [vmem:[%s8615_s18 + $0x170] sm:$0xff]  ;;  %1741 = vperm.xlu1 %8422, %v8997_v47  }
 0x2f2   : > { %v2183_v38 = vpack.c.bf16 %v2158_v44, %v2158_v44  ;;  %v1558_v9 = vperm.slane %v1553_v41, %v9009_v18 }
 0x2f3   : > { %v1394_v13 = vadd.f32 %v9004_v53, %v1365_v33  ;;  %v1059_v39 = vpop.f32.mrf.mxu0 }
 0x2f4   : > { %v1269_v16 = vrot.slane %v1059_v39, 4  ;;  %v1500_v39 = vld [vmem:[#allocation2 + $0x1] sm:$0xff]  ;;  %v2408_v51 = vunpack.c.l.bf16 %v2183_v38  ;;  %v9045_v6 = vunpack.c.l.bf16 %v1558_v9 }
 0x2f5   : > { %v1419_v48 = vmax.f32 %v1394_v13, 0.0  ;;  %v1562_v13 = vpop.permute.xlu0 %1561  ;;  %v1525_v12 = vpack.c.bf16 %v1500_v39, %v1500_v39 }
 0x2f6   : > { %v1270_v42 = vsel %vm856_vm0, %v1267_v40, %v1269_v16  ;;  %v2215_v40 = vperm.slane %v2210_v27, %v9009_v18  ;;  %v8137_v27 = vld [vmem:[%s11243_s3 + $0x38] sm:$0xff]  ;;  %v9063_v43 = vpop.permute.xlu2 %1579 }
 0x2f7   : > { %1449 = vst.msk [vmem:[#allocation2 + $0x10] sm:$0xff] %vm1444_vm3, %v1419_v48  ;;  %v1341_v33 = vmax.f32 %v8815_v54, %v1270_v42  ;;  %v8139_v54 = vld [vmem:[%s11243_s3 + $0x48] sm:$0xff]  ;;  %v2218_v42 = vpop.permute.xlu1 %2217  ;;  %v1775_v37 = vunpack.c.l.bf16 %v1525_v12  ;;  %2825 = vmatpush.bf16.msrb.mxu1 %v8137_v27  ;;  %v9056_v12 = vld [vmem:[%s11245_s5 + $0x60] sm:$0x3] }
 0x2f8   : > { %v9039_v44 = vunpack.c.l.bf16 %v2215_v40  ;;  %v2223_v39 = vperm.slane %v2218_v42, %v9009_v18  ;;  %3017 = vmatpush.bf16.msrb.mxu2 %v8139_v54  ;;  %v1218_v40 = vmax.f32 %v8640_v19, %v8720_v61  ;;  %2401 = vperm.xlu0 %8420, %v9056_v12  }
 0x2f9   : > { %v1366_v59 = vmax.f32 %v1217_v52, %v1341_v33  ;;  %v1567_v52 = vperm.slane %v1562_v13, %v9009_v18  ;;  %v1825_v27 = vmul.f32 %v9045_v6, %v1775_v37  ;;  %v1219_v37 = vmax.f32 %v8643_v20, %v8724_v1  ;;  %1750 = vperm.xlu1 %8422, %v9015_v46  }
 0x2fa   : > { %11383 = vst [vmem:[#allocation45_spill] sm:$0xff] %v9039_v44 }
 0x2fb   : > { %v1395_v58 = vadd.f32 %v9004_v53, %v1366_v59  ;;  %v1062_v48 = vpop.f32.mrf.mxu0  ;;  %v1867_v59 = vld [vmem:[#allocation2 + $0x2] sm:$0xff] }
 0x2fc   : > { %v1271_v41 = vrot.slane %v1062_v48, 4 }
 0x2fd   : > { %v1420_v33 = vmax.f32 %v1395_v58, 0.0 }
 0x2fe   : > { %v2159_v49 = vld [vmem:[#allocation2 + $0xb] sm:$0xff]  ;;  %v1272_v13 = vsel %vm856_vm0, %v1269_v16, %v1271_v41  ;;  %7037 = vmatmul.msk.bf16.gmra.mxu0 %vm708_vm2, %v8126_v17  ;;  %v9058_v16 = vunpack.c.l.bf16 %v1567_v52 }
 0x2ff   : > { %v1501_v35 = vld [vmem:[#allocation2 + $0x9] sm:$0xff]  ;;  %v2184_v58 = vpack.c.bf16 %v2159_v49, %v2159_v49  ;;  %1450 = vst.msk [vmem:[#allocation2 + $0x18] sm:$0xff] %vm1444_vm3, %v1420_v33  ;;  %v1342_v54 = vmax.f32 %v8818_v57, %v1272_v13  ;;  %v9061_v49 = vunpack.c.l.bf16 %v2223_v39  ;;  %v2458_v57 = vmul.f32 %v9039_v44, %v2408_v51 }
 0x300   : > { %v1526_v48 = vpack.c.bf16 %v1501_v35, %v1501_v35  ;;  %v1868_v38 = vld [vmem:[#allocation2 + $0xa] sm:$0xff] }
 0x301   : > { %v2650_v9 = vld [vmem:[#allocation2 + $0xf] sm:$0xff]  ;;  %v1892_v17 = vpack.c.bf16 %v1868_v38, %v1867_v59  ;;  %v2409_v19 = vunpack.c.l.bf16 %v2184_v58  ;;  %v1367_v35 = vmax.f32 %v1218_v40, %v1342_v54  ;;  %8425 = vset.pattern.permute.xlu1 %v11369_v14 }
 0x302   : > { %v1776_v61 = vunpack.c.l.bf16 %v1526_v48  ;;  %v2675_v42 = vpack.c.bf16 %v2650_v9, %v2650_v9 }
 0x303   : > { %7052 = vmatmul.msk.bf16.vlgmr.msra.gmra.mxu1 %vm1444_vm3, %v1892_v17  ;;  %v2459_v52 = vmul.f32 %v9061_v49, %v2409_v19  ;;  %v1396_v39 = vadd.f32 %v9004_v53, %v1367_v35  ;;  %v1064_v59 = vpop.f32.mrf.mxu0  ;;  %v2234_v35 = vpop.permute.xlu1 %2233 }
 0x304   : > { %v1826_v33 = vmul.f32 %v9058_v16, %v1776_v61  ;;  %v1273_v13 = vrot.slane %v1064_v59, 4  ;;  %v2700_v38 = vunpack.c.l.bf16 %v2675_v42  ;;  %v1576_v61 = vperm.slane %v9022_v0, %v9009_v18 }
 0x305   : > { %v1421_v40 = vmax.f32 %v1396_v39, 0.0  ;;  %v2483_v48 = vpack.c.bf16 %v2459_v52, %v2458_v57  ;;  %v2226_v57 = vpop.permute.xlu0 %2225  ;;  %v8127_v52 = vld [vmem:[%s8615_s18 + $0x178] sm:$0xff]  ;;  %v1589_v39 = vpop.permute.xlu2 %1588 }
 0x306   : > { %v1850_v58 = vpack.c.bf16 %v1826_v33, %v1825_v27  ;;  %v2651_v54 = vld [vmem:[#allocation2 + $0x17] sm:$0xff]  ;;  %v1274_v51 = vsel %vm856_vm0, %v1271_v41, %v1273_v13  ;;  %v2231_v42 = vperm.slane %v2226_v57, %v9009_v18 }
 0x307   : > { %v1502_v21 = vld [vmem:[#allocation2 + $0x11] sm:$0xff]  ;;  %v2676_v9 = vpack.c.bf16 %v2651_v54, %v2651_v54  ;;  %1451 = vst.msk [vmem:[#allocation2 + $0x20] sm:$0xff] %vm1444_vm3, %v1421_v40  ;;  %v1343_v19 = vmax.f32 %v8821_v63, %v1274_v51  ;;  %7098 = vmatmul.msk.bf16.vlgmr.msra.gmra.mxu3 %vm1444_vm3, %v2483_v48  ;;  %v9086_v63 = vmul.f32 %v2700_v38, %v9045_v6  ;;  %v9095_v54 = vunpack.c.l.bf16 %v1576_v61 }
 0x308   : > { %v2160_v17 = vld [vmem:[#allocation2 + $0x13] sm:$0xff]  ;;  %7073 = vmatmul.msk.bf16.vlgmr.msra.gmra.mxu2 %vm1444_vm3, %v1850_v58  ;;  %v1527_v1 = vpack.c.bf16 %v1502_v21, %v1502_v21  ;;  %v1220_v40 = vmax.f32 %v8646_v22, %v8728_v4  ;;  %v2239_v58 = vperm.slane %v2234_v35, %v9009_v18  ;;  %v1585_v51 = vperm.slane %v9063_v43, %v9009_v18 }
 0x309   : > { %v2701_v41 = vunpack.c.l.bf16 %v2676_v9  ;;  %v1368_v20 = vmax.f32 %v1219_v37, %v1343_v19  ;;  %v2185_v27 = vpack.c.bf16 %v2160_v17, %v2160_v17  ;;  %v1869_v38 = vld [vmem:[#allocation2 + $0x12] sm:$0xff]  ;;  %v9101_v19 = vunpack.c.l.bf16 %v2231_v42 }
 0x30a   : > { %v1777_v21 = vunpack.c.l.bf16 %v1527_v1 }
 0x30b   : > { %v9089_v33 = vmul.f32 %v2701_v41, %v9058_v16  ;;  %v1397_v0 = vadd.f32 %v9004_v53, %v1368_v20  ;;  %v1067_v59 = vpop.f32.mrf.mxu0  ;;  %v2410_v17 = vunpack.c.l.bf16 %v2185_v27  ;;  %v9107_v20 = vunpack.c.l.bf16 %v2239_v58 }
 0x30c   : > { %v1275_v48 = vrot.slane %v1067_v59, 4  ;;  %v9109_v27 = vunpack.c.l.bf16 %v1585_v51 }
 0x30d   : > { %v1422_v37 = vmax.f32 %v1397_v0, 0.0 }
 0x30e   : > { %v1503_v9 = vld [vmem:[#allocation2 + $0x19] sm:$0xff]  ;;  %v1276_v22 = vsel %vm856_vm0, %v1273_v13, %v1275_v48  ;;  %7038 = vmatmul.msk.bf16.gmra.mxu0 %vm708_vm2, %v8127_v52  ;;  %v1827_v13 = vmul.f32 %v9095_v54, %v1777_v21  ;;  %v2460_v52 = vmul.f32 %v9101_v19, %v2410_v17  ;;  %v1594_v17 = vperm.slane %v1589_v39, %v9009_v18  ;;  %v2250_v39 = vpop.permute.xlu0 %2249 }
 0x30f   : > { %v1870_v4 = vld [vmem:[#allocation2 + $0x1a] sm:$0xff]  ;;  %v1528_v41 = vpack.c.bf16 %v1503_v9, %v1503_v9  ;;  %1452 = vst.msk [vmem:[#allocation2 + $0x28] sm:$0xff] %vm1444_vm3, %v1422_v37  ;;  %v1344_v35 = vmax.f32 %v8824_v3, %v1276_v22 }
 0x310   : > { %v2161_v61 = vld [vmem:[#allocation2 + $0x1b] sm:$0xff]  ;;  %v1893_v57 = vpack.c.bf16 %v1870_v4, %v1869_v38  ;;  %v2242_v38 = vpop.permute.xlu2 %2241  ;;  %v1598_v4 = vpop.permute.xlu1 %1597 }
 0x311   : > { %v2186_v43 = vpack.c.bf16 %v2161_v61, %v2161_v61  ;;  %v2652_v1 = vld [vmem:[#allocation2 + $0x1f] sm:$0xff]  ;;  %v1778_v0 = vunpack.c.l.bf16 %v1528_v41  ;;  %v1369_v42 = vmax.f32 %v1220_v40, %v1344_v35  ;;  %v1495_v40 = vld [vmem:[%s11245_s5 + $0x50] sm:$0xf] }
 0x312   : > { %v2677_v21 = vpack.c.bf16 %v2652_v1, %v2652_v1  ;;  %v3376_v9 = vld [vmem:[#allocation2 + $0x1d] sm:$0xff]  ;;  %1732 = vperm.xlu2 %8419, %v1495_v40   ;;  %v1221_v1 = vmax.f32 %v8649_v23, %v8732_v8 }
 0x313   : > { %v2411_v59 = vunpack.c.l.bf16 %v2186_v43  ;;  %7053 = vmatmul.msk.bf16.gmra.mxu1 %vm1444_vm3, %v1893_v57  ;;  %v1828_v3 = vmul.f32 %v9109_v27, %v1778_v0  ;;  %v1398_v37 = vadd.f32 %v9004_v53, %v1369_v42  ;;  %v9117_v58 = vpop.f32.mrf.mxu0  ;;  %v2247_v0 = vperm.slane %v2242_v38, %v9009_v18 }
 0x314   : > { %v1277_v22 = vrot.slane %v9117_v58, 4  ;;  %v1603_v42 = vperm.slane %v1598_v4, %v9009_v18 }
 0x315   : > { %v2461_v51 = vmul.f32 %v9107_v20, %v2411_v59  ;;  %v1423_v46 = vmax.f32 %v1398_v37, 0.0  ;;  %v1851_v61 = vpack.c.bf16 %v1828_v3, %v1827_v13  ;;  %v3401_v59 = vpack.c.bf16 %v3376_v9, %v3376_v9 }
 0x316   : > { %v1504_v35 = vld [vmem:[#allocation2 + $0x21] sm:$0xff]  ;;  %v1278_v57 = vsel %vm856_vm0, %v1275_v48, %v1277_v22  ;;  %v2702_v13 = vunpack.c.l.bf16 %v2677_v21  ;;  %v1222_v48 = vmax.f32 %v8652_v25, %v8736_v11  ;;  %v2255_v3 = vperm.slane %v2250_v39, %v9009_v18 }
 0x317   : > { %v2484_v41 = vpack.c.bf16 %v2461_v51, %v2460_v52  ;;  %v2162_v43 = vld [vmem:[#allocation2 + $0x23] sm:$0xff]  ;;  %1453 = vst.msk [vmem:[#allocation2 + $0x30] sm:$0xff] %vm1444_vm3, %v1423_v46  ;;  %v1345_v37 = vmax.f32 %v8827_v7, %v1278_v57  ;;  %v9134_v52 = vunpack.c.l.bf16 %v1594_v17  ;;  %v1529_v38 = vpack.c.bf16 %v1504_v35, %v1504_v35 }
 0x318   : > { %v2653_v58 = vld [vmem:[#allocation2 + $0x27] sm:$0xff]  ;;  %7074 = vmatmul.msk.bf16.gmra.mxu2 %vm1444_vm3, %v1851_v61  ;;  %v2187_v9 = vpack.c.bf16 %v2162_v43, %v2162_v43  ;;  %v9139_v4 = vunpack.c.l.bf16 %v2247_v0  ;;  %v9141_v21 = vunpack.c.l.bf16 %v1603_v42  ;;  %v3426_v17 = vunpack.c.l.bf16 %v3401_v59  ;;  %v1498_v42 = vld [vmem:[%s11245_s5 + $0x5c] sm:$0xf] }
 0x319   : > { %7099 = vmatmul.msk.bf16.gmra.mxu3 %vm1444_vm3, %v2484_v41  ;;  %v2678_v23 = vpack.c.bf16 %v2653_v58, %v2653_v58  ;;  %v3377_v8 = vld [vmem:[#allocation2 + $0x25] sm:$0xff]  ;;  %v1370_v51 = vmax.f32 %v1221_v1, %v1345_v37  ;;  %v9149_v41 = vmul.f32 %v2702_v13, %v9095_v54  ;;  %v9152_v43 = vmul.f32 %v2702_v13, %v9039_v44 }
 0x31a   : > { %v3111_v7 = vld [vmem:[#allocation2 + $0x21] sm:$0xff]  ;;  %v3402_v46 = vpack.c.bf16 %v3377_v8, %v3377_v8  ;;  %8423 = vset.pattern.permute.xlu2 %v11369_v14  ;;  %v1779_v37 = vunpack.c.l.bf16 %v1529_v38  ;;  %2393 = vperm.xlu1 %8425, %v1498_v42   ;;  %v9173_v38 = vmul.f32 %v3426_v17, %v9045_v6  ;;  %v9181_v17 = vpop.permute.xlu1 %1606 }
 0x31b   : > { %v8128_v25 = vld [vmem:[%s8615_s18 + $0x180] sm:$0xff]  ;;  %v2703_v11 = vunpack.c.l.bf16 %v2678_v23  ;;  %v1399_v61 = vadd.f32 %v9004_v53, %v1370_v51  ;;  %v9146_v57 = vpop.f32.mrf.mxu0  ;;  %11384 = vst [vmem:[#allocation46_spill] sm:$0xff] %v9149_v41  ;;  %v3136_v1 = vpack.c.bf16 %v3111_v7, %v3111_v7  ;;  %v2412_v23 = vunpack.c.l.bf16 %v2187_v9  ;;  %2369 = vperm.xlu2 %8423, %v1495_v40   ;;  %s8450_s18 = scalar_lea.hbm %s11250_s10, 2 }
 0x31c   : > { %v3427_v35 = vunpack.c.l.bf16 %v3402_v46  ;;  %11385 = vst [vmem:[#allocation47_spill] sm:$0xff] %v9152_v43  ;;  %v1279_v0 = vrot.slane %v9146_v57, 4  ;;  %v1871_v13 = vld [vmem:[#allocation2 + $0x22] sm:$0xff]  ;;  %v1225_v40 = vmax.f32 %v8661_v29, %v8748_v36  ;;  %p8452_p1 = scmp.lt.s32.totalorder %s8450_s18, %s8446_s0 }
 0x31d   : > { %v9160_v59 = vmul.f32 %v2703_v11, %v9109_v27  ;;  %v9163_v39 = vmul.f32 %v2703_v11, %v9061_v49  ;;  %v1424_v58 = vmax.f32 %v1399_v61, 0.0  ;;  %11389 = vst [vmem:[#allocation51_spill] sm:$0xff] %v9173_v38  ;;  %v3161_v44 = vunpack.c.l.bf16 %v3136_v1 }
 0x31e   : > { %v9166_v8 = vmul.f32 %v3427_v35, %v9058_v16  ;;  %v1505_v14 = vld [vmem:[#allocation2 + $0x29] sm:$0xff]  ;;  %v1280_v51 = vsel %vm856_vm0, %v1277_v22, %v1279_v0  ;;  %7039 = vmatmul.msk.bf16.gmra.mxu0 %vm708_vm2, %v8128_v25  ;;  %v9179_v35 = vunpack.c.l.bf16 %v2255_v3  ;;  %v2462_v3 = vmul.f32 %v9139_v4, %v2412_v23  ;;  %p8453_p2 = por %p8452_p1, %p8451_p0 }
 0x31f   : > { %11386 = vst [vmem:[#allocation48_spill] sm:$0xff] %v9160_v59  ;;  %v1872_v46 = vld [vmem:[#allocation2 + $0x2a] sm:$0xff]  ;;  %v1530_v16 = vpack.c.bf16 %v1505_v14, %v1505_v14  ;;  %v1346_v9 = vmax.f32 %v8830_v10, %v1280_v51  ;;  %v1829_v14 = vmul.f32 %v9134_v52, %v1779_v37 }
 0x320   : > { %11387 = vst [vmem:[#allocation49_spill] sm:$0xff] %v9163_v39  ;;  %v2163_v57 = vld [vmem:[#allocation2 + $0x2b] sm:$0xff]  ;;  %v1894_v11 = vpack.c.bf16 %v1872_v46, %v1871_v13  ;;  %p8454_p3 = pnand %p8453_p2, %p8449_p13 }
 0x321   : > { %11388 = vst [vmem:[#allocation50_spill] sm:$0xff] %v9166_v8  ;;  %v2188_v22 = vpack.c.bf16 %v2163_v57, %v2163_v57  ;;  %v3112_v61 = vld [vmem:[#allocation2 + $0x29] sm:$0xff]  ;;  %v1780_v41 = vunpack.c.l.bf16 %v1530_v16  ;;  %v1371_v6 = vmax.f32 %v1222_v48, %v1346_v9  ;;  %v1616_v16 = vpop.permute.xlu2 %1615  ;;  %v9192_v9 = vmul.f32 %v3161_v44, %v9101_v19 }
 0x322   : > { %1454 = vst.msk [vmem:[#allocation2 + $0x38] sm:$0xff] %vm1444_vm3, %v1424_v58  ;;  %v2654_v25 = vld [vmem:[#allocation2 + $0x2f] sm:$0xff]  ;;  %v3137_v47 = vpack.c.bf16 %v3112_v61, %v3112_v61  ;;  %v1223_v61 = vmax.f32 %v8655_v26, %v8740_v15  ;;  %v2266_v26 = vpop.permute.xlu1 %2265 }
 0x323   : > { %v2679_v7 = vpack.c.bf16 %v2654_v25, %v2654_v25  ;;  %v2413_v59 = vunpack.c.l.bf16 %v2188_v22  ;;  %7054 = vmatmul.msk.bf16.gmra.mxu1 %vm1444_vm3, %v1894_v11  ;;  %v1830_v51 = vmul.f32 %v9141_v21, %v1780_v41  ;;  %v1400_v1 = vadd.f32 %v9004_v53, %v1371_v6  ;;  %v1074_v46 = vpop.f32.mrf.mxu0  ;;  %8424 = vset.pattern.permute.xlu2 %v11366_v62 }
 0x324   : > { %v3162_v10 = vunpack.c.l.bf16 %v3137_v47  ;;  %v1281_v57 = vrot.slane %v1074_v46, 4  ;;  %1759 = vperm.xlu2 %8424, %v1498_v42   ;;  %v2271_v15 = vperm.slane %v2266_v26, %v9009_v18 }
 0x325   : > { %v2704_v13 = vunpack.c.l.bf16 %v2679_v7  ;;  %v2463_v48 = vmul.f32 %v9179_v35, %v2413_v59  ;;  %v1425_v7 = vmax.f32 %v1400_v1, 0.0  ;;  %v1852_v23 = vpack.c.bf16 %v1830_v51, %v1829_v14 }
 0x326   : > { %v9195_v37 = vmul.f32 %v3162_v10, %v9107_v20  ;;  %v1282_v59 = vsel %vm856_vm0, %v1279_v0, %v1281_v57  ;;  %v3378_v10 = vld [vmem:[#allocation2 + $0x2d] sm:$0xff]  ;;  %v2258_v0 = vpop.permute.xlu0 %2257  ;;  %v1621_v1 = vperm.slane %v1616_v16, %v9009_v18 }
 0x327   : > { %v9198_v47 = vmul.f32 %v2704_v13, %v9101_v19  ;;  %v2485_v11 = vpack.c.bf16 %v2463_v48, %v2462_v3  ;;  %1455 = vst.msk [vmem:[#allocation2 + $0x40] sm:$0xff] %vm1444_vm3, %v1425_v7  ;;  %v1347_v19 = vmax.f32 %v8839_v30, %v1282_v59  ;;  %v3403_v48 = vpack.c.bf16 %v3378_v10, %v3378_v10 }
 0x328   : > { %7075 = vmatmul.msk.bf16.gmra.mxu2 %vm1444_vm3, %v1852_v23  ;;  %v2263_v16 = vperm.slane %v2258_v0, %v9009_v18  ;;  %v1612_v59 = vperm.slane %v9181_v17, %v9009_v18 }
 0x329   : > { %11390 = vst [vmem:[#allocation52_spill] sm:$0xff] %v9198_v47  ;;  %v3113_v41 = vld [vmem:[#allocation2 + $0x31] sm:$0xff]  ;;  %7100 = vmatmul.msk.bf16.gmra.mxu3 %vm1444_vm3, %v2485_v11  ;;  %v1372_v51 = vmax.f32 %v1223_v61, %v1347_v19  ;;  %v3428_v17 = vunpack.c.l.bf16 %v3403_v48 }
 0x32a   : > { %v2655_v22 = vld [vmem:[#allocation2 + $0x37] sm:$0xff]  ;;  %v3138_v25 = vpack.c.bf16 %v3113_v41, %v3113_v41 }
 0x32b   : > { %v2680_v6 = vpack.c.bf16 %v2655_v22, %v2655_v22  ;;  %v2164_v14 = vld [vmem:[#allocation2 + $0x33] sm:$0xff]  ;;  %v1401_v23 = vadd.f32 %v9004_v53, %v1372_v51  ;;  %v1077_v11 = vpop.f32.mrf.mxu0  ;;  %v9220_v22 = vmul.f32 %v2704_v13, %v9134_v52  ;;  %v1625_v51 = vpop.permute.xlu2 %1624  ;;  %v9250_v29 = vmul.f32 %v3428_v17, %v9095_v54 }
 0x32c   : > { %v3379_v62 = vld [vmem:[#allocation2 + $0x35] sm:$0xff]  ;;  %v3163_v42 = vunpack.c.l.bf16 %v3138_v25  ;;  %v2189_v46 = vpack.c.bf16 %v2164_v14, %v2164_v14  ;;  %v1283_v61 = vrot.slane %v1077_v11, 4  ;;  %v1224_v25 = vmax.f32 %v8658_v28, %v8744_v24  ;;  %1768 = vperm.xlu2 %8424, %v9056_v12  }
 0x32d   : > { %v2705_v3 = vunpack.c.l.bf16 %v2680_v6  ;;  %v3404_v7 = vpack.c.bf16 %v3379_v62, %v3379_v62  ;;  %v1426_v6 = vmax.f32 %v1401_v23, 0.0  ;;  %v9229_v62 = vunpack.c.l.bf16 %v1621_v1  ;;  %v3838_v1 = vld [vmem:[#allocation2 + $0x37] sm:$0xff]  ;;  %11392 = vst [vmem:[#allocation54_spill] sm:$0xff] %v9250_v29 }
 0x32e   : > { %v9213_v30 = vmul.f32 %v3163_v42, %v9139_v4  ;;  %v1507_v10 = vld [vmem:[#allocation2 + $0x39] sm:$0xff]  ;;  %v1284_v13 = vsel %vm856_vm0, %v1281_v57, %v1283_v61  ;;  %v2414_v0 = vunpack.c.l.bf16 %v2189_v46  ;;  %v9234_v24 = vunpack.c.l.bf16 %v2271_v15 }
 0x32f   : > { %v9216_v41 = vmul.f32 %v2705_v3, %v9141_v21  ;;  %v3429_v14 = vunpack.c.l.bf16 %v3404_v7  ;;  %v2165_v3 = vld [vmem:[#allocation2 + $0x3b] sm:$0xff]  ;;  %1456 = vst.msk [vmem:[#allocation2 + $0x48] sm:$0xff] %vm1444_vm3, %v1426_v6  ;;  %v1532_v26 = vpack.c.bf16 %v1507_v10, %v1507_v10  ;;  %v1348_v23 = vmax.f32 %v8845_v56, %v1284_v13  ;;  %v1873_v7 = vld [vmem:[#allocation2 + $0x32] sm:$0xff] }
 0x330   : > { %v2190_v28 = vpack.c.bf16 %v2165_v3, %v2165_v3  ;;  %v1874_v11 = vld [vmem:[#allocation2 + $0x3a] sm:$0xff]  ;;  %v9239_v57 = vunpack.c.l.bf16 %v2263_v16  ;;  %v9241_v46 = vunpack.c.l.bf16 %v1612_v59  ;;  %v3863_v36 = vpack.c.bf16 %v3838_v1, %v3838_v1 }
 0x331   : > { %v2656_v12 = vld [vmem:[#allocation2 + $0x3f] sm:$0xff]  ;;  %v1895_v48 = vpack.c.bf16 %v1874_v11, %v1873_v7  ;;  %v1782_v58 = vunpack.c.l.bf16 %v1532_v26  ;;  %v1373_v10 = vmax.f32 %v1224_v25, %v1348_v23  ;;  %v9244_v15 = vmul.f32 %v3429_v14, %v9109_v27  ;;  %v2274_v14 = vpop.permute.xlu1 %2273 }
 0x332   : > { %v2415_v6 = vunpack.c.l.bf16 %v2190_v28  ;;  %v3114_v3 = vld [vmem:[#allocation2 + $0x39] sm:$0xff]  ;;  %v1831_v56 = vmul.f32 %v3163_v42, %v9241_v46  ;;  %v2464_v13 = vmul.f32 %v9239_v57, %v2414_v0  ;;  %v2681_v16 = vpack.c.bf16 %v2656_v12, %v2656_v12  ;;  %v1634_v0 = vpop.permute.xlu0 %1633 }
 0x333   : > { %11391 = vst [vmem:[#allocation53_spill] sm:$0xff] %v9244_v15  ;;  %7055 = vmatmul.msk.bf16.gmra.mxu1 %vm1444_vm3, %v1895_v48  ;;  %v1832_v59 = vmul.f32 %v9229_v62, %v1782_v58  ;;  %v1402_v25 = vadd.f32 %v9004_v53, %v1373_v10  ;;  %v1079_v28 = vpop.f32.mrf.mxu0  ;;  %v1630_v42 = vperm.slane %v1625_v51, %v9009_v18  ;;  %v2282_v19 = vpop.permute.xlu2 %2281  ;;  %v3888_v44 = vunpack.c.l.bf16 %v3863_v36 }
 0x334   : > { %v2465_v26 = vmul.f32 %v9234_v24, %v2415_v6  ;;  %v1285_v23 = vrot.slane %v1079_v28, 4  ;;  %v3139_v7 = vpack.c.bf16 %v3114_v3, %v3114_v3  ;;  %v2706_v28 = vunpack.c.l.bf16 %v2681_v16 }
 0x335   : > { %v1427_v54 = vmax.f32 %v1402_v25, 0.0  ;;  %v1853_v17 = vpack.c.bf16 %v1832_v59, %v1831_v56  ;;  %v2279_v3 = vperm.slane %v2274_v14, %v9009_v18  ;;  %v9268_v25 = vunpack.c.l.bf16 %v1630_v42 }
 0x336   : > { %v2486_v11 = vpack.c.bf16 %v2465_v26, %v2464_v13  ;;  %v2657_v12 = vld [vmem:[#allocation2 + $0x47] sm:$0xff]  ;;  %v1286_v10 = vsel %vm856_vm0, %v1283_v61, %v1285_v23  ;;  %v3164_v51 = vunpack.c.l.bf16 %v3139_v7  ;;  %v1639_v14 = vperm.slane %v1634_v0, %v9009_v18 }
 0x337   : > { %v1508_v48 = vld [vmem:[#allocation2 + $0x41] sm:$0xff]  ;;  %v2682_v27 = vpack.c.bf16 %v2657_v12, %v2657_v12  ;;  %1457 = vst.msk [vmem:[#allocation2 + $0x50] sm:$0xff] %vm1444_vm3, %v1427_v54  ;;  %v1349_v56 = vmax.f32 %v8852_v50, %v1286_v10  ;;  %v2287_v54 = vperm.slane %v2282_v19, %v9009_v18 }
 0x338   : > { %v2166_v6 = vld [vmem:[#allocation2 + $0x43] sm:$0xff]  ;;  %v1533_v26 = vpack.c.bf16 %v1508_v48, %v1508_v48  ;;  %7076 = vmatmul.msk.bf16.gmra.mxu2 %vm1444_vm3, %v1853_v17  ;;  %v9273_v61 = vmul.f32 %v3164_v51, %v9179_v35  ;;  %v9280_v48 = vmul.f32 %v3888_v44, %v9107_v20  ;;  %v9283_v17 = vmul.f32 %v2706_v28, %v9241_v46 }
 0x339   : > { %v3115_v13 = vld [vmem:[#allocation2 + $0x41] sm:$0xff]  ;;  %7101 = vmatmul.msk.bf16.gmra.mxu3 %vm1444_vm3, %v2486_v11  ;;  %v2707_v36 = vunpack.c.l.bf16 %v2682_v27  ;;  %v2191_v16 = vpack.c.bf16 %v2166_v6, %v2166_v6  ;;  %v1374_v7 = vmax.f32 %v1225_v40, %v1349_v56  ;;  %v9288_v27 = vunpack.c.l.bf16 %v2279_v3 }
 0x33a   : > { %v3380_v50 = vld [vmem:[#allocation2 + $0x3d] sm:$0xff]  ;;  %v3140_v42 = vpack.c.bf16 %v3115_v13, %v3115_v13  ;;  %11393 = vst [vmem:[#allocation55_spill] sm:$0xff] %v9280_v48  ;;  %v3381_v6 = vld [vmem:[#allocation2 + $0x45] sm:$0xff]  ;;  %v1783_v19 = vunpack.c.l.bf16 %v1533_v26  ;;  %v9293_v13 = vunpack.c.l.bf16 %v1639_v14  ;;  %v2290_v12 = vpop.permute.xlu0 %2289  ;;  %v9300_v26 = vpop.permute.xlu1 %1642 }
 0x33b   : > { %11394 = vst [vmem:[#allocation56_spill] sm:$0xff] %v9283_v17  ;;  %v9286_v11 = vmul.f32 %v2707_v36, %v9229_v62  ;;  %v1403_v40 = vadd.f32 %v9004_v53, %v1374_v7  ;;  %v1082_v0 = vpop.f32.mrf.mxu0  ;;  %v3405_v56 = vpack.c.bf16 %v3380_v50, %v3380_v50  ;;  %v2416_v20 = vunpack.c.l.bf16 %v2191_v16  ;;  %v3839_v51 = vld [vmem:[#allocation2 + $0x3f] sm:$0xff]  ;;  %v9306_v29 = vpop.permute.xlu2 %1651 }
 0x33c   : > { %v1287_v10 = vrot.slane %v1082_v0, 4  ;;  %v9298_v7 = vunpack.c.l.bf16 %v2287_v54  ;;  %v3165_v0 = vunpack.c.l.bf16 %v3140_v42  ;;  %v3406_v59 = vpack.c.bf16 %v3381_v6, %v3381_v6  ;;  %v1875_v28 = vld [vmem:[#allocation2 + $0x42] sm:$0xff] }
 0x33d   : > { %v1428_v44 = vmax.f32 %v1403_v40, 0.0  ;;  %v2295_v40 = vperm.slane %v2290_v12, %v9009_v18  ;;  %v1833_v54 = vmul.f32 %v9268_v25, %v1783_v19  ;;  %v3430_v6 = vunpack.c.l.bf16 %v3405_v56 }
 0x33e   : > { %v1509_v36 = vld [vmem:[#allocation2 + $0x49] sm:$0xff]  ;;  %v1288_v3 = vsel %vm856_vm0, %v1285_v23, %v1287_v10  ;;  %v2466_v15 = vmul.f32 %v9288_v27, %v2416_v20  ;;  %v3431_v19 = vunpack.c.l.bf16 %v3406_v59 }
 0x33f   : > { %v2167_v58 = vld [vmem:[#allocation2 + $0x4b] sm:$0xff]  ;;  %1458 = vst.msk [vmem:[#allocation2 + $0x58] sm:$0xff] %vm1444_vm3, %v1428_v44  ;;  %v1534_v16 = vpack.c.bf16 %v1509_v36, %v1509_v36  ;;  %v1350_v14 = vmax.f32 %v8859_v5, %v1288_v3  ;;  %v11395_v5 = vmax.f32 %v8664_v31, %v8752_v45  ;;  %v9314_v3 = vmul.f32 %v3165_v0, %v9239_v57 }
 0x340   : > { %v2192_v50 = vpack.c.bf16 %v2167_v58, %v2167_v58  ;;  %v1876_v1 = vld [vmem:[#allocation2 + $0x4a] sm:$0xff]  ;;  %v9326_v0 = vmul.f32 %v3431_v19, %v9141_v21 }
 0x341   : > { %v3116_v23 = vld [vmem:[#allocation2 + $0x49] sm:$0xff]  ;;  %v1896_v48 = vpack.c.bf16 %v1876_v1, %v1875_v28  ;;  %v1784_v44 = vunpack.c.l.bf16 %v1534_v16  ;;  %v1375_v58 = vmax.f32 %v11395_v5, %v1350_v14  ;;  %11396 = vst [vmem:[#allocation57_spill] sm:$0xff] %v9314_v3  ;;  %v3864_v28 = vpack.c.bf16 %v3839_v51, %v3839_v51 }
 0x342   : > { %v2658_v47 = vld [vmem:[#allocation2 + $0x4f] sm:$0xff]  ;;  %v3141_v42 = vpack.c.bf16 %v3116_v23, %v3116_v23  ;;  %v2417_v36 = vunpack.c.l.bf16 %v2192_v50  ;;  %v3840_v1 = vld [vmem:[#allocation2 + $0x47] sm:$0xff]  ;;  %11399 = vst [vmem:[#allocation60_spill] sm:$0xff] %v9326_v0 }
 0x343   : > { %7056 = vmatmul.msk.bf16.gmra.mxu1 %vm1444_vm3, %v1896_v48  ;;  %v2683_v43 = vpack.c.bf16 %v2658_v47, %v2658_v47  ;;  %v1834_v56 = vmul.f32 %v9293_v13, %v1784_v44  ;;  %v1404_v20 = vadd.f32 %v9004_v53, %v1375_v58  ;;  %v1084_v23 = vpop.f32.mrf.mxu0  ;;  %v9323_v48 = vmul.f32 %v3430_v6, %v9134_v52  ;;  %v11400_v52 = vld [vmem:[#allocation8_spill] sm:$0xff]  ;;  %v9350_v6 = vpop.permute.xlu2 %1660 }
 0x344   : > { %v3166_v12 = vunpack.c.l.bf16 %v3141_v42  ;;  %v2467_v16 = vmul.f32 %v9298_v7, %v2417_v36  ;;  %v1289_v31 = vrot.slane %v1084_v23, 4  ;;  %v3865_v14 = vpack.c.bf16 %v3840_v1, %v3840_v1 }
 0x345   : > { %11398 = vst [vmem:[#allocation59_spill] sm:$0xff] %v9323_v48  ;;  %v1429_v59 = vmax.f32 %v1404_v20, 0.0  ;;  %v1854_v51 = vpack.c.bf16 %v1834_v56, %v1833_v54  ;;  %v3889_v36 = vunpack.c.l.bf16 %v3864_v28  ;;  %v2708_v21 = vunpack.c.l.bf16 %v2683_v43  ;;  %v11402_v56 = vld [vmem:[#allocation20_spill] sm:$0xff]  ;;  %v2298_v43 = vpop.permute.xlu1 %2297 }
 0x346   : > { %v9320_v45 = vmul.f32 %v3166_v12, %v9234_v24  ;;  %v2487_v47 = vpack.c.bf16 %v2467_v16, %v2466_v15  ;;  %v2659_v50 = vld [vmem:[#allocation2 + $0x57] sm:$0xff]  ;;  %v1290_v44 = vsel %vm856_vm0, %v1287_v10, %v1289_v31  ;;  %v11401_v15 = vld [vmem:[#allocation31_spill] sm:$0xff]  ;;  %v9339_v16 = vunpack.c.l.bf16 %v2295_v40  ;;  %v3382_v40 = vld [vmem:[#allocation2 + $0x4d] sm:$0xff] }
 0x347   : > { %v2168_v42 = vld [vmem:[#allocation2 + $0x53] sm:$0xff]  ;;  %v2684_v12 = vpack.c.bf16 %v2659_v50, %v2659_v50  ;;  %1459 = vst.msk [vmem:[#allocation2 + $0x60] sm:$0xff] %vm1444_vm3, %v1429_v59  ;;  %v1351_v54 = vmax.f32 %v11401_v15, %v1290_v44  ;;  %v1648_v23 = vperm.slane %v9300_v26, %v9009_v18  ;;  %v3890_v28 = vunpack.c.l.bf16 %v3865_v14 }
 0x348   : > { %11397 = vst [vmem:[#allocation58_spill] sm:$0xff] %v9320_v45  ;;  %v1510_v19 = vld [vmem:[#allocation2 + $0x51] sm:$0xff]  ;;  %7077 = vmatmul.msk.bf16.gmra.mxu2 %vm1444_vm3, %v1854_v51  ;;  %v2193_v59 = vpack.c.bf16 %v2168_v42, %v2168_v42  ;;  %v11404_v44 = vmax.f32 %v8667_v32, %v8756_v55  ;;  %v1657_v58 = vperm.slane %v9306_v29, %v9009_v18 }
 0x349   : > { %v3117_v1 = vld [vmem:[#allocation2 + $0x51] sm:$0xff]  ;;  %7102 = vmatmul.msk.bf16.gmra.mxu3 %vm1444_vm3, %v2487_v47  ;;  %v2709_v50 = vunpack.c.l.bf16 %v2684_v12  ;;  %v1535_v20 = vpack.c.bf16 %v1510_v19, %v1510_v19  ;;  %v9353_v51 = vmul.f32 %v3889_v36, %v9139_v4  ;;  %v9356_v47 = vmul.f32 %v3890_v28, %v9179_v35 }
 0x34a   : > { %v11403_v10 = vld [vmem:[#allocation9_spill] sm:$0xff]  ;;  %v1376_v15 = vmax.f32 %v11404_v44, %v1351_v54  ;;  %v3142_v26 = vpack.c.bf16 %v3117_v1, %v3117_v1  ;;  %v9359_v14 = vmul.f32 %v2708_v21, %v9268_v25  ;;  %v2303_v42 = vperm.slane %v2298_v43, %v9009_v18 }
 0x34b   : > { %v3383_v5 = vld [vmem:[#allocation2 + $0x55] sm:$0xff]  ;;  %11405 = vst [vmem:[#allocation8_spill] sm:$0xff] %v9353_v51  ;;  %v9362_v32 = vmul.f32 %v2709_v50, %v9293_v13  ;;  %v1087_v29 = vpop.f32.mrf.mxu0  ;;  %v3407_v4 = vpack.c.bf16 %v3382_v40, %v3382_v40  ;;  %v9368_v35 = vunpack.c.l.bf16 %v1648_v23  ;;  %v2418_v50 = vunpack.c.l.bf16 %v2193_v59  ;;  %v11409_v23 = vld [vmem:[#allocation32_spill] sm:$0xff] }
 0x34c   : > { %11406 = vst [vmem:[#allocation31_spill] sm:$0xff] %v9356_v47  ;;  %v1405_v55 = vadd.f32 %v9004_v53, %v1376_v15  ;;  %v1291_v12 = vrot.slane %v1087_v29, 4  ;;  %v3408_v36 = vpack.c.bf16 %v3383_v5, %v3383_v5  ;;  %v1785_v44 = vunpack.c.l.bf16 %v1535_v20  ;;  %v3841_v48 = vld [vmem:[#allocation2 + $0x4f] sm:$0xff]  ;;  %v3842_v47 = vld [vmem:[#allocation2 + $0x57] sm:$0xff] }
 0x34d   : > { %11407 = vst [vmem:[#allocation20_spill] sm:$0xff] %v9359_v14  ;;  %v3167_v29 = vunpack.c.l.bf16 %v3142_v26  ;;  %v9376_v5 = vunpack.c.l.bf16 %v1657_v58  ;;  %v1877_v21 = vld [vmem:[#allocation2 + $0x52] sm:$0xff]  ;;  %v9379_v0 = vunpack.c.l.bf16 %v2303_v42  ;;  %v3432_v59 = vunpack.c.l.bf16 %v3407_v4 }
 0x34e   : > { %11408 = vst [vmem:[#allocation9_spill] sm:$0xff] %v9362_v32  ;;  %v1430_v19 = vmax.f32 %v1405_v55, 0.0  ;;  %v3118_v28 = vld [vmem:[#allocation2 + $0x59] sm:$0xff]  ;;  %v1292_v43 = vsel %vm856_vm0, %v1289_v31, %v1291_v12  ;;  %v3433_v31 = vunpack.c.l.bf16 %v3408_v36  ;;  %v11410_v26 = vmax.f32 %v8670_v34, %v8760_v60 }
 0x34f   : > { %v2169_v15 = vld [vmem:[#allocation2 + $0x5b] sm:$0xff]  ;;  %v3143_v54 = vpack.c.bf16 %v3118_v28, %v3118_v28  ;;  %v1352_v40 = vmax.f32 %v11409_v23, %v1292_v43  ;;  %v3866_v58 = vpack.c.bf16 %v3841_v48, %v3841_v48  ;;  %v2468_v38 = vmul.f32 %v9339_v16, %v2418_v50 }
 0x350   : > { %1460 = vst.msk [vmem:[#allocation2 + $0x68] sm:$0xff] %vm1444_vm3, %v1430_v19  ;;  %v2194_v55 = vpack.c.bf16 %v2169_v15, %v2169_v15  ;;  %v1878_v51 = vld [vmem:[#allocation2 + $0x5a] sm:$0xff]  ;;  %v1835_v43 = vmul.f32 %v9368_v35, %v1785_v44  ;;  %v9388_v15 = vmul.f32 %v3167_v29, %v9288_v27  ;;  %v3867_v42 = vpack.c.bf16 %v3842_v47, %v3842_v47  ;;  %v2306_v47 = vpop.permute.xlu2 %2305  ;;  %v1670_v29 = vpop.permute.xlu1 %1669 }
 0x351   : > { %v2660_v1 = vld [vmem:[#allocation2 + $0x5f] sm:$0xff]  ;;  %v1897_v20 = vpack.c.bf16 %v1878_v51, %v1877_v21  ;;  %v3168_v39 = vunpack.c.l.bf16 %v3143_v54  ;;  %v1377_v28 = vmax.f32 %v11410_v26, %v1352_v40  ;;  %v9397_v21 = vmul.f32 %v3432_v59, %v9241_v46 }
 0x352   : > { %v2419_v19 = vunpack.c.l.bf16 %v2194_v55  ;;  %11411 = vst [vmem:[#allocation32_spill] sm:$0xff] %v9388_v15  ;;  %v2685_v4 = vpack.c.bf16 %v2660_v1, %v2660_v1  ;;  %v9400_v50 = vmul.f32 %v3433_v31, %v9229_v62  ;;  %v3891_v1 = vunpack.c.l.bf16 %v3866_v58  ;;  %v11415_v58 = vld [vmem:[#allocation33_spill] sm:$0xff] }
 0x353   : > { %7057 = vmatmul.msk.bf16.gmra.mxu1 %vm1444_vm3, %v1897_v20  ;;  %v9391_v51 = vmul.f32 %v3168_v39, %v9298_v7  ;;  %v1836_v54 = vmul.f32 %v3168_v39, %v9376_v5  ;;  %v1406_v34 = vadd.f32 %v9004_v53, %v1377_v28  ;;  %v1089_v60 = vpop.f32.mrf.mxu0  ;;  %11413 = vst [vmem:[#allocation62_spill] sm:$0xff] %v9397_v21  ;;  %v9404_v53 = vpop.permute.xlu0 %2313  ;;  %v3892_v59 = vunpack.c.l.bf16 %v3867_v42 }
 0x354   : > { %v2469_v48 = vmul.f32 %v9379_v0, %v2419_v19  ;;  %v1293_v36 = vrot.slane %v1089_v60, 4  ;;  %11414 = vst [vmem:[#allocation63_spill] sm:$0xff] %v9400_v50  ;;  %v2710_v28 = vunpack.c.l.bf16 %v2685_v4  ;;  %v2319_v19 = vperm.slane %v9404_v53, %v9009_v18 }
 0x355   : > { %11412 = vst [vmem:[#allocation61_spill] sm:$0xff] %v9391_v51  ;;  %v1431_v44 = vmax.f32 %v1406_v34, 0.0  ;;  %v1855_v23 = vpack.c.bf16 %v1836_v54, %v1835_v43  ;;  %v3384_v34 = vld [vmem:[#allocation2 + $0x5d] sm:$0xff] }
 0x356   : > { %v1294_v20 = vsel %vm856_vm0, %v1291_v12, %v1293_v36  ;;  %v2488_v46 = vpack.c.bf16 %v2469_v48, %v2468_v38  ;;  %v2311_v12 = vperm.slane %v2306_v47, %v9009_v18  ;;  %v1675_v38 = vperm.slane %v1670_v29, %v9009_v18 }
 0x357   : > { %v2661_v40 = vld [vmem:[#allocation2 + $0x67] sm:$0xff]  ;;  %1461 = vst.msk [vmem:[#allocation2 + $0x70] sm:$0xff] %vm1444_vm3, %v1431_v44  ;;  %v1353_v43 = vmax.f32 %v11415_v58, %v1294_v20  ;;  %v11416_v48 = vmax.f32 %v11400_v52, %v8764_v2  ;;  %v9421_v20 = vmul.f32 %v3891_v1, %v9239_v57  ;;  %v3409_v47 = vpack.c.bf16 %v3384_v34, %v3384_v34  ;;  %v9440_v57 = vld [vmem:[%s11242_s2] ss:$0 sm:$0xff] }
 0x358   : > { %v1512_v55 = vld [vmem:[#allocation2 + $0x61] sm:$0xff]  ;;  %v2686_v31 = vpack.c.bf16 %v2661_v40, %v2661_v40  ;;  %7078 = vmatmul.msk.bf16.gmra.mxu2 %vm1444_vm3, %v1855_v23  ;;  %v11421_v2 = vperm.slane %v9350_v6, %v9009_v18 }
 0x359   : > { %v2170_v26 = vld [vmem:[#allocation2 + $0x63] sm:$0xff]  ;;  %v1537_v60 = vpack.c.bf16 %v1512_v55, %v1512_v55  ;;  %7103 = vmatmul.msk.bf16.gmra.mxu3 %vm1444_vm3, %v2488_v46  ;;  %v1378_v40 = vmax.f32 %v11416_v48, %v1353_v43  ;;  %11417 = vst [vmem:[#allocation33_spill] sm:$0xff] %v9421_v20  ;;  %v9424_v55 = vmul.f32 %v3892_v59, %v9234_v24 }
 0x35a   : > { %v3119_v54 = vld [vmem:[#allocation2 + $0x61] sm:$0xff]  ;;  %v2711_v4 = vunpack.c.l.bf16 %v2686_v31  ;;  %v2195_v44 = vpack.c.bf16 %v2170_v26, %v2170_v26  ;;  %v9430_v46 = vmul.f32 %v2710_v28, %v9368_v35  ;;  %v9435_v52 = vunpack.c.l.bf16 %v11421_v2 }
 0x35b   : > { %v3385_v42 = vld [vmem:[#allocation2 + $0x65] sm:$0xff]  ;;  %v3144_v53 = vpack.c.bf16 %v3119_v54, %v3119_v54  ;;  %11418 = vst [vmem:[#allocation64_spill] sm:$0xff] %v9424_v55  ;;  %v1407_v24 = vadd.f32 %v9440_v57, %v1378_v40  ;;  %v9443_v1 = vpop.f32.mrf.mxu0  ;;  %v9445_v26 = vunpack.c.l.bf16 %v2311_v12  ;;  %v3434_v28 = vunpack.c.l.bf16 %v3409_v47 }
 0x35c   : > { %v3410_v29 = vpack.c.bf16 %v3385_v42, %v3385_v42  ;;  %v9427_v23 = vmul.f32 %v2711_v4, %v9376_v5  ;;  %11420 = vst [vmem:[#allocation66_spill] sm:$0xff] %v9430_v46  ;;  %v1295_v59 = vrot.slane %v9443_v1, 4  ;;  %v1787_v6 = vunpack.c.l.bf16 %v1537_v60  ;;  %v3843_v34 = vld [vmem:[#allocation2 + $0x5f] sm:$0xff]  ;;  %v3844_v42 = vld [vmem:[#allocation2 + $0x67] sm:$0xff] }
 0x35d   : > { %v1432_v58 = vmax.f32 %v1407_v24, 0.0  ;;  %v2420_v48 = vunpack.c.l.bf16 %v2195_v44  ;;  %v9452_v40 = vunpack.c.l.bf16 %v1675_v38  ;;  %v1879_v2 = vld [vmem:[#allocation2 + $0x62] sm:$0xff]  ;;  %v3169_v62 = vunpack.c.l.bf16 %v3144_v53  ;;  %v9457_v24 = vpop.permute.xlu1 %1678 }
 0x35e   : > { %11419 = vst [vmem:[#allocation65_spill] sm:$0xff] %v9427_v23  ;;  %v3435_v54 = vunpack.c.l.bf16 %v3410_v29  ;;  %v3120_v4 = vld [vmem:[#allocation2 + $0x69] sm:$0xff]  ;;  %v1296_v12 = vsel %vm856_vm0, %v1293_v36, %v1295_v59  ;;  %v11422_v60 = vld [vmem:[#allocation34_spill] sm:$0xff]  ;;  %v9460_v43 = vmul.f32 %v3434_v28, %v9268_v25  ;;  %v3868_v36 = vpack.c.bf16 %v3843_v34, %v3843_v34 }
 0x35f   : > { %v1880_v1 = vld [vmem:[#allocation2 + $0x6a] sm:$0xff]  ;;  %v3145_v39 = vpack.c.bf16 %v3120_v4, %v3120_v4  ;;  %1462 = vst.msk [vmem:[#allocation2 + $0x78] sm:$0xff] %vm1444_vm3, %v1432_v58  ;;  %v1354_v47 = vmax.f32 %v11422_v60, %v1296_v12  ;;  %v3869_v55 = vpack.c.bf16 %v3844_v42, %v3844_v42  ;;  %v9465_v53 = vunpack.c.l.bf16 %v2319_v19 }
 0x360   : > { %v1898_v31 = vpack.c.bf16 %v1880_v1, %v1879_v2  ;;  %v2171_v29 = vld [vmem:[#allocation2 + $0x6b] sm:$0xff]  ;;  %11423 = vst [vmem:[#allocation34_spill] sm:$0xff] %v9460_v43  ;;  %v9463_v20 = vmul.f32 %v3435_v54, %v9293_v13  ;;  %v1837_v58 = vmul.f32 %v9435_v52, %v1787_v6  ;;  %v11425_v12 = vmax.f32 %v11403_v10, %v11402_v56  ;;  %v9471_v1 = vpop.permute.xlu2 %1687 }
 0x361   : > { %v2662_v44 = vld [vmem:[#allocation2 + $0x6f] sm:$0xff]  ;;  %v2196_v38 = vpack.c.bf16 %v2171_v29, %v2171_v29  ;;  %v3170_v4 = vunpack.c.l.bf16 %v3145_v39  ;;  %v2470_v25 = vmul.f32 %v9445_v26, %v2420_v48  ;;  %v9476_v13 = vmul.f32 %v3169_v62, %v9339_v16  ;;  %v8138_v62 = vld [vmem:[%s11243_s3 + $0x40] sm:$0xff] }
 0x362   : > { %11424 = vst [vmem:[#allocation67_spill] sm:$0xff] %v9463_v20  ;;  %v1379_v2 = vmax.f32 %v11425_v12, %v1354_v47  ;;  %v2687_v54 = vpack.c.bf16 %v2662_v44, %v2662_v44  ;;  %v8140_v34 = vld [vmem:[%s11243_s3 + $0x50] sm:$0xff]  ;;  %v3893_v47 = vunpack.c.l.bf16 %v3868_v36  ;;  %v3894_v29 = vunpack.c.l.bf16 %v3869_v55  ;;  %3018 = vmatpush.bf16.msrb.mxu2 %v8138_v62 }
 0x363   : > { %7058 = vmatmul.msk.bf16.gmra.mxu1 %vm1444_vm3, %v1898_v31  ;;  %v2421_v28 = vunpack.c.l.bf16 %v2196_v38  ;;  %11426 = vst [vmem:[#allocation68_spill] sm:$0xff] %v9476_v13  ;;  %v9481_v39 = vmul.f32 %v3170_v4, %v9379_v0  ;;  %v1838_v56 = vmul.f32 %v3170_v4, %v9452_v40  ;;  %v1094_v6 = vpop.f32.mrf.mxu0  ;;  %v8275_v31 = vld [vmem:[%s11246_s6 + $0x3f8] sm:$0xff]  ;;  %v8136_v60 = vld [vmem:[%s11243_s3 + $0x30] sm:$0xff]  ;;  %3285 = vmatpush.bf16.msrb.mxu3 %v8140_v34 }
 0x364   : > { %v1408_v10 = vadd.f32 %v9440_v57, %v1379_v2  ;;  %v1297_v42 = vrot.slane %v1094_v6, 4  ;;  %v11428_v44 = vld [vmem:[#allocation21_spill] sm:$0xff]  ;;  %v11429_v38 = vld [vmem:[#allocation10_spill] sm:$0xff]  ;;  %6507 = vmatpush.bf16.msrb.mxu0 %v8275_v31  ;;  %2826 = vmatpush.bf16.msrb.mxu1 %v8136_v60  ;;  %v9504_v36 = vmul.f32 %v3894_v29, %v9298_v7  ;;  %v2712_v55 = vunpack.c.l.bf16 %v2687_v54 }
 0x365   : > { %11427 = vst [vmem:[#allocation69_spill] sm:$0xff] %v9481_v39  ;;  %v2471_v48 = vmul.f32 %v9465_v53, %v2421_v28  ;;  %v1231_v4 = vmax.f32 %v11429_v38, %v11428_v44  ;;  %v1856_v2 = vpack.c.bf16 %v1838_v56, %v1837_v58  ;;  %v11431_v58 = vld [vmem:[#allocation35_spill] sm:$0xff] }
 0x366   : > { %v1433_v12 = vmax.f32 %v1408_v10, 0.0  ;;  %v3121_v43 = vld [vmem:[#allocation2 + $0x71] sm:$0xff]  ;;  %v1298_v28 = vsel %vm856_vm0, %v1295_v59, %v1297_v42  ;;  %11430 = vst [vmem:[#allocation21_spill] sm:$0xff] %v9504_v36  ;;  %v2330_v10 = vpop.permute.xlu1 %2329  ;;  %v9511_v59 = vmul.f32 %v3893_v47, %v9288_v27  ;;  %v9519_v29 = vmul.f32 %v2712_v55, %v9435_v52  ;;  %v11438_v55 = vld [vmem:[#allocation23_spill] sm:$0xff] }
 0x367   : > { %v2663_v6 = vld [vmem:[#allocation2 + $0x77] sm:$0xff]  ;;  %v2489_v20 = vpack.c.bf16 %v2471_v48, %v2470_v25  ;;  %v3146_v21 = vpack.c.bf16 %v3121_v43, %v3121_v43  ;;  %v1355_v56 = vmax.f32 %v11431_v58, %v1298_v28  ;;  %v2322_v25 = vpop.permute.xlu0 %2321  ;;  %v1693_v43 = vperm.slane %v9471_v1, %v9009_v18  ;;  %v3386_v36 = vld [vmem:[#allocation2 + $0x6d] sm:$0xff] }
 0x368   : > { %v2688_v44 = vpack.c.bf16 %v2663_v6, %v2663_v6  ;;  %1463 = vst.msk [vmem:[#allocation2 + $0x80] sm:$0xff] %vm1444_vm3, %v1433_v12  ;;  %v2172_v31 = vld [vmem:[#allocation2 + $0x73] sm:$0xff]  ;;  %7079 = vmatmul.msk.bf16.gmra.mxu2 %vm1444_vm3, %v1856_v2  ;;  %v2335_v54 = vperm.slane %v2330_v10, %v9009_v18  ;;  %v1697_v38 = vpop.permute.xlu2 %1696  ;;  %v2327_v1 = vperm.slane %v2322_v25, %v9009_v18  ;;  %v11436_v2 = vld [vmem:[#allocation22_spill] sm:$0xff]  ;;  %v11437_v6 = vld [vmem:[#allocation11_spill] sm:$0xff] }
 0x369   : > { %7104 = vmatmul.msk.bf16.gmra.mxu3 %vm1444_vm3, %v2489_v20  ;;  %11432 = vst [vmem:[#allocation10_spill] sm:$0xff] %v9511_v59  ;;  %v3171_v62 = vunpack.c.l.bf16 %v3146_v21  ;;  %v1380_v34 = vmax.f32 %v1231_v4, %v1355_v56  ;;  %v2197_v48 = vpack.c.bf16 %v2172_v31, %v2172_v31  ;;  %v1684_v4 = vperm.slane %v9457_v24, %v9009_v18  ;;  %v3387_v31 = vld [vmem:[#allocation2 + $0x75] sm:$0xff]  ;;  %v11442_v58 = vld [vmem:[#allocation36_spill] sm:$0xff] }
 0x36a   : > { %v2713_v7 = vunpack.c.l.bf16 %v2688_v44  ;;  %11433 = vst [vmem:[#allocation35_spill] sm:$0xff] %v9519_v29  ;;  %v1232_v28 = vmax.f32 %v11437_v6, %v11436_v2  ;;  %v11439_v44 = vld [vmem:[#allocation12_spill] sm:$0xff]  ;;  %v9539_v25 = vunpack.c.l.bf16 %v1693_v43  ;;  %v9546_v60 = vunpack.c.l.bf16 %v2327_v1 }
 0x36b   : > { %v9522_v20 = vmul.f32 %v3171_v62, %v9445_v26  ;;  %v1409_v21 = vadd.f32 %v9440_v57, %v1380_v34  ;;  %v1097_v47 = vpop.f32.mrf.mxu0  ;;  %v11441_v34 = vld [vmem:[#allocation13_spill] sm:$0xff]  ;;  %v9548_v43 = vunpack.c.l.bf16 %v1684_v4 }
 0x36c   : > { %v9525_v27 = vmul.f32 %v2713_v7, %v9452_v40  ;;  %v1299_v12 = vrot.slane %v1097_v47, 4  ;;  %v11440_v7 = vld [vmem:[#allocation24_spill] sm:$0xff]  ;;  %v2422_v47 = vunpack.c.l.bf16 %v2197_v48 }
 0x36d   : > { %11434 = vst [vmem:[#allocation70_spill] sm:$0xff] %v9522_v20  ;;  %v1434_v56 = vmax.f32 %v1409_v21, 0.0  ;;  %v9543_v21 = vunpack.c.l.bf16 %v2335_v54  ;;  %v1881_v50 = vld [vmem:[#allocation2 + $0x72] sm:$0xff]  ;;  %v1702_v54 = vperm.slane %v1697_v38, %v9009_v18 }
 0x36e   : > { %11435 = vst [vmem:[#allocation71_spill] sm:$0xff] %v9525_v27  ;;  %v1300_v24 = vsel %vm856_vm0, %v1297_v42, %v1299_v12  ;;  %v3412_v42 = vpack.c.bf16 %v3387_v31, %v3387_v31  ;;  %v2472_v1 = vmul.f32 %v9546_v60, %v2422_v47 }
 0x36f   : > { %v1515_v19 = vld [vmem:[#allocation2 + $0x79] sm:$0xff]  ;;  %1464 = vst.msk [vmem:[#allocation2 + $0x88] sm:$0xff] %vm1444_vm3, %v1434_v56  ;;  %v1356_v10 = vmax.f32 %v11442_v58, %v1300_v24  ;;  %v2338_v56 = vpop.permute.xlu1 %2337  ;;  %v1706_v58 = vpop.permute.xlu0 %1705  ;;  %v9559_v15 = vunpack.c.l.bf16 %v1702_v54 }
 0x370   : > { %v2173_v59 = vld [vmem:[#allocation2 + $0x7b] sm:$0xff]  ;;  %v1540_v2 = vpack.c.bf16 %v1515_v19, %v1515_v19  ;;  %v3411_v19 = vpack.c.bf16 %v3386_v36, %v3386_v36  ;;  %v2343_v36 = vperm.slane %v2338_v56, %v9009_v18  ;;  %v3437_v31 = vunpack.c.l.bf16 %v3412_v42  ;;  %v11443_v42 = vld [vmem:[#allocation37_spill] sm:$0xff] }
 0x371   : > { %v2198_v6 = vpack.c.bf16 %v2173_v59, %v2173_v59  ;;  %v1882_v8 = vld [vmem:[#allocation2 + $0x7a] sm:$0xff]  ;;  %v1381_v46 = vmax.f32 %v1232_v28, %v1356_v10  ;;  %v1839_v59 = vmul.f32 %v3171_v62, %v9548_v43  ;;  %v2346_v10 = vpop.permute.xlu2 %2345  ;;  %v1711_v62 = vperm.slane %v1706_v58, %v9009_v18 }
 0x372   : > { %v3122_v29 = vld [vmem:[#allocation2 + $0x79] sm:$0xff]  ;;  %v1899_v13 = vpack.c.bf16 %v1882_v8, %v1881_v50  ;;  %v1790_v48 = vunpack.c.l.bf16 %v1540_v2  ;;  %v3436_v47 = vunpack.c.l.bf16 %v3411_v19  ;;  %v9573_v54 = vmul.f32 %v3437_v31, %v9376_v5 }
 0x373   : > { %v2664_v27 = vld [vmem:[#allocation2 + $0x7f] sm:$0xff]  ;;  %v2423_v39 = vunpack.c.l.bf16 %v2198_v6  ;;  %v3147_v24 = vpack.c.bf16 %v3122_v29, %v3122_v29  ;;  %v1410_v50 = vadd.f32 %v9440_v57, %v1381_v46  ;;  %v1099_v28 = vpop.f32.mrf.mxu0  ;;  %v2351_v46 = vperm.slane %v2346_v10, %v9009_v18 }
 0x374   : > { %7059 = vmatmul.msk.bf16.gmra.mxu1 %vm1444_vm3, %v1899_v13  ;;  %v2689_v4 = vpack.c.bf16 %v2664_v27, %v2664_v27  ;;  %v1840_v23 = vmul.f32 %v9539_v25, %v1790_v48  ;;  %v1301_v38 = vrot.slane %v1099_v28, 4  ;;  %11445 = vst [vmem:[#allocation11_spill] sm:$0xff] %v9573_v54 }
 0x375   : > { %v2473_v8 = vmul.f32 %v9543_v21, %v2423_v39  ;;  %v1435_v2 = vmax.f32 %v1410_v50, 0.0  ;;  %v3172_v51 = vunpack.c.l.bf16 %v3147_v24 }
 0x376   : > { %v1857_v13 = vpack.c.bf16 %v1840_v23, %v1839_v59  ;;  %v2665_v29 = vld [vmem:[#allocation2 + $0x87] sm:$0xff]  ;;  %v1302_v39 = vsel %vm856_vm0, %v1299_v12, %v1301_v38  ;;  %v2714_v14 = vunpack.c.l.bf16 %v2689_v4  ;;  %v3845_v23 = vld [vmem:[#allocation2 + $0x6f] sm:$0xff]  ;;  %v3846_v59 = vld [vmem:[#allocation2 + $0x77] sm:$0xff]  ;;  %v9575_v4 = vunpack.c.l.bf16 %v1711_v62 }
 0x377   : > { %v2490_v6 = vpack.c.bf16 %v2473_v8, %v2472_v1  ;;  %v1516_v27 = vld [vmem:[#allocation2 + $0x81] sm:$0xff]  ;;  %v2690_v56 = vpack.c.bf16 %v2665_v29, %v2665_v29  ;;  %1465 = vst.msk [vmem:[#allocation2 + $0x90] sm:$0xff] %vm1444_vm3, %v1435_v2  ;;  %v1357_v50 = vmax.f32 %v11443_v42, %v1302_v39  ;;  %v9565_v1 = vunpack.c.l.bf16 %v2343_v36 }
 0x378   : > { %v2174_v48 = vld [vmem:[#allocation2 + $0x83] sm:$0xff]  ;;  %v1541_v58 = vpack.c.bf16 %v1516_v27, %v1516_v27  ;;  %7080 = vmatmul.msk.bf16.gmra.mxu2 %vm1444_vm3, %v1857_v13  ;;  %v9570_v12 = vmul.f32 %v3172_v51, %v9465_v53  ;;  %v11446_v8 = vmax.f32 %v11439_v44, %v11438_v55  ;;  %v9581_v36 = vmul.f32 %v3436_v47, %v9368_v35  ;;  %v9583_v13 = vpop.permute.xlu1 %1714  ;;  %v2354_v47 = vpop.permute.xlu0 %2353 }
 0x379   : > { %v2199_v19 = vpack.c.bf16 %v2174_v48, %v2174_v48  ;;  %7105 = vmatmul.msk.bf16.gmra.mxu3 %vm1444_vm3, %v2490_v6  ;;  %v2715_v24 = vunpack.c.l.bf16 %v2690_v56  ;;  %v3123_v10 = vld [vmem:[#allocation2 + $0x81] sm:$0xff]  ;;  %v3870_v6 = vpack.c.bf16 %v3845_v23, %v3845_v23  ;;  %v3871_v5 = vpack.c.bf16 %v3846_v59, %v3846_v59 }
 0x37a   : > { %11444 = vst [vmem:[#allocation22_spill] sm:$0xff] %v9570_v12  ;;  %v1382_v28 = vmax.f32 %v11446_v8, %v1357_v50  ;;  %v1791_v2 = vunpack.c.l.bf16 %v1541_v58  ;;  %v9588_v31 = vmul.f32 %v2714_v14, %v9548_v43  ;;  %v9594_v29 = vunpack.c.l.bf16 %v2351_v46  ;;  %v1883_v14 = vld [vmem:[#allocation2 + $0x82] sm:$0xff] }
 0x37b   : > { %11447 = vst [vmem:[#allocation23_spill] sm:$0xff] %v9581_v36  ;;  %v9591_v62 = vmul.f32 %v2715_v24, %v9539_v25  ;;  %v1102_v44 = vpop.f32.mrf.mxu0  ;;  %v2424_v35 = vunpack.c.l.bf16 %v2199_v19  ;;  %v3148_v48 = vpack.c.bf16 %v3123_v10, %v3123_v10  ;;  %v2359_v58 = vperm.slane %v2354_v47, %v9009_v18  ;;  %v3388_v23 = vld [vmem:[#allocation2 + $0x7d] sm:$0xff]  ;;  %v3389_v10 = vld [vmem:[#allocation2 + $0x85] sm:$0xff] }
 0x37c   : > { %11448 = vst [vmem:[#allocation12_spill] sm:$0xff] %v9588_v31  ;;  %v1411_v55 = vadd.f32 %v9440_v57, %v1382_v28  ;;  %v1303_v27 = vrot.slane %v1102_v44, 4  ;;  %v1720_v42 = vperm.slane %v9583_v13, %v9009_v18  ;;  %v1841_v46 = vmul.f32 %v9559_v15, %v1791_v2  ;;  %v11450_v47 = vld [vmem:[#allocation38_spill] sm:$0xff] }
 0x37d   : > { %11449 = vst [vmem:[#allocation24_spill] sm:$0xff] %v9591_v62  ;;  %v3895_v8 = vunpack.c.l.bf16 %v3870_v6  ;;  %v3896_v28 = vunpack.c.l.bf16 %v3871_v5  ;;  %v3173_v54 = vunpack.c.l.bf16 %v3148_v48  ;;  %v2474_v2 = vmul.f32 %v9565_v1, %v2424_v35 }
 0x37e   : > { %v1436_v56 = vmax.f32 %v1411_v55, 0.0  ;;  %v1517_v59 = vld [vmem:[#allocation2 + $0x89] sm:$0xff]  ;;  %v1304_v19 = vsel %vm856_vm0, %v1301_v38, %v1303_v27  ;;  %v9610_v38 = vpop.permute.xlu2 %1723  ;;  %v3413_v5 = vpack.c.bf16 %v3388_v23, %v3388_v23 }
 0x37f   : > { %v2175_v24 = vld [vmem:[#allocation2 + $0x8b] sm:$0xff]  ;;  %v1542_v44 = vpack.c.bf16 %v1517_v59, %v1517_v59  ;;  %v1358_v39 = vmax.f32 %v11450_v47, %v1304_v19  ;;  %v11451_v59 = vmax.f32 %v11441_v34, %v11440_v7  ;;  %v3414_v19 = vpack.c.bf16 %v3389_v10, %v3389_v10  ;;  %v11457_v10 = vld [vmem:[#allocation14_spill] sm:$0xff] }
 0x380   : > { %v2666_v55 = vld [vmem:[#allocation2 + $0x8f] sm:$0xff]  ;;  %1466 = vst.msk [vmem:[#allocation2 + $0x98] sm:$0xff] %vm1444_vm3, %v1436_v56  ;;  %v2200_v13 = vpack.c.bf16 %v2175_v24, %v2175_v24  ;;  %v9607_v51 = vpop.f32.mrf.mxu1  ;;  %v9617_v48 = vmul.f32 %v3895_v8, %v9339_v16  ;;  %v9620_v35 = vmul.f32 %v3896_v28, %v9379_v0  ;;  %v9628_v34 = vmul.f32 %v3173_v54, %v9546_v60 }
 0x381   : > { %v1884_v50 = vld [vmem:[#allocation2 + $0x8a] sm:$0xff]  ;;  %v1792_v62 = vunpack.c.l.bf16 %v1542_v44  ;;  %v1383_v56 = vmax.f32 %v11451_v59, %v1358_v39  ;;  %v2691_v24 = vpack.c.bf16 %v2666_v55, %v2666_v55  ;;  %v3438_v16 = vunpack.c.l.bf16 %v3413_v5  ;;  %v11456_v28 = vld [vmem:[#allocation25_spill] sm:$0xff] }
 0x382   : > { %v3124_v36 = vld [vmem:[#allocation2 + $0x89] sm:$0xff]  ;;  %v1900_v31 = vpack.c.bf16 %v1884_v50, %v1883_v14  ;;  %v2425_v20 = vunpack.c.l.bf16 %v2200_v13  ;;  %11452 = vst [vmem:[#allocation13_spill] sm:$0xff] %v9617_v48 }
 0x383   : > { %v3149_v6 = vpack.c.bf16 %v3124_v36, %v3124_v36  ;;  %11453 = vst [vmem:[#allocation36_spill] sm:$0xff] %v9620_v35  ;;  %v1842_v36 = vmul.f32 %v9575_v4, %v1792_v62  ;;  %v1412_v14 = vadd.f32 %v9440_v57, %v1383_v56  ;;  %v9625_v7 = vpop.f32.mrf.mxu0  ;;  %v2716_v59 = vunpack.c.l.bf16 %v2691_v24 }
 0x384   : > { %7060 = vmatmul.msk.bf16.gmra.mxu1 %vm1444_vm3, %v1900_v31  ;;  %v2475_v50 = vmul.f32 %v9594_v29, %v2425_v20  ;;  %11454 = vst [vmem:[#allocation37_spill] sm:$0xff] %v9628_v34  ;;  %v11308_v31 = vrot.slane %v9625_v7, 4  ;;  %v1235_v20 = vmax.f32 %v11457_v10, %v11456_v28  ;;  %v9643_v56 = vunpack.c.l.bf16 %v2359_v58 }
 0x385   : > { %v3174_v47 = vunpack.c.l.bf16 %v3149_v6  ;;  %v1437_v23 = vmax.f32 %v1412_v14, 0.0  ;;  %v1858_v62 = vpack.c.bf16 %v1842_v36, %v1841_v46  ;;  %v3439_v6 = vunpack.c.l.bf16 %v3414_v19  ;;  %v11458_v46 = vld [vmem:[#allocation39_spill] sm:$0xff] }
 0x386   : > { %v2491_v8 = vpack.c.bf16 %v2475_v50, %v2474_v2  ;;  %v1306_v54 = vsel %vm856_vm0, %v1303_v27, %v11308_v31  ;;  %v3847_v14 = vld [vmem:[#allocation2 + $0x7f] sm:$0xff]  ;;  %v3848_v50 = vld [vmem:[#allocation2 + $0x87] sm:$0xff]  ;;  %v9649_v28 = vunpack.c.l.bf16 %v1720_v42  ;;  %v2362_v27 = vpop.permute.xlu1 %2361  ;;  %v9654_v58 = vmul.f32 %v3438_v16, %v9435_v52  ;;  %v9661_v42 = vpop.permute.xlu2 %1732 }
 0x387   : > { %v9632_v39 = vmul.f32 %v3174_v47, %v9543_v21  ;;  %v2176_v55 = vld [vmem:[#allocation2 + $0x93] sm:$0xff]  ;;  %1467 = vst.msk [vmem:[#allocation2 + $0xa0] sm:$0xff] %vm1444_vm3, %v1437_v23  ;;  %v1359_v2 = vmax.f32 %v11458_v46, %v1306_v54  ;;  %v9657_v24 = vmul.f32 %v3439_v6, %v9452_v40  ;;  %v1729_v54 = vperm.slane %v9610_v38, %v9009_v18 }
 0x388   : > { %v1518_v44 = vld [vmem:[#allocation2 + $0x91] sm:$0xff]  ;;  %v9647_v47 = vpop.f32.mrf.mxu1  ;;  %7081 = vmatmul.msk.bf16.gmra.mxu2 %vm1444_vm3, %v1858_v62  ;;  %11459 = vst [vmem:[#allocation25_spill] sm:$0xff] %v9654_v58  ;;  %v2201_v23 = vpack.c.bf16 %v2176_v55, %v2176_v55  ;;  %v9668_v52 = vmul.f32 %v2716_v59, %v9559_v15  ;;  %v2367_v55 = vperm.slane %v2362_v27, %v9009_v18  ;;  %v11468_v58 = vld [vmem:[#allocation26_spill] sm:$0xff] }
 0x389   : > { %11455 = vst [vmem:[#allocation38_spill] sm:$0xff] %v9632_v39  ;;  %v1543_v5 = vpack.c.bf16 %v1518_v44, %v1518_v44  ;;  %v2667_v36 = vld [vmem:[#allocation2 + $0x97] sm:$0xff]  ;;  %7106 = vmatmul.msk.bf16.gmra.mxu3 %vm1444_vm3, %v2491_v8  ;;  %v1384_v10 = vmax.f32 %v1235_v20, %v1359_v2  ;;  %v3872_v8 = vpack.c.bf16 %v3847_v14, %v3847_v14  ;;  %v9684_v62 = vunpack.c.l.bf16 %v1729_v54 }
 0x38a   : > { %v2692_v19 = vpack.c.bf16 %v2667_v36, %v2667_v36  ;;  %11460 = vst [vmem:[#allocation14_spill] sm:$0xff] %v9657_v24  ;;  %v3873_v36 = vpack.c.bf16 %v3848_v50, %v3848_v50  ;;  %v2561_v20 = vpop.f32.mrf.mxu3  ;;  %v2426_v50 = vunpack.c.l.bf16 %v2201_v23  ;;  %v11467_v54 = vrot.slane %v9625_v7, 4 }
 0x38b   : > { %v1793_v44 = vunpack.c.l.bf16 %v1543_v5  ;;  %11461 = vst [vmem:[#allocation39_spill] sm:$0xff] %v9668_v52  ;;  %v1413_v40 = vadd.f32 %v9440_v57, %v1384_v10  ;;  %v2094_v16 = vpop.f32.mrf.mxu2  ;;  %v9676_v2 = vpop.f32.mrf.mxu0  ;;  %v3897_v14 = vunpack.c.l.bf16 %v3872_v8 }
 0x38c   : > { %v9663_v46 = vunpack.c.l.bf16 %v2692_v19  ;;  %v2095_v6 = vadd.f32 %v2094_v16, %v9607_v51  ;;  %v3898_v59 = vunpack.c.l.bf16 %v3873_v36  ;;  %v9682_v19 = vpop.permute.xlu0 %2377  ;;  %v1307_v27 = vrot.slane %v9676_v2, 4  ;;  %v1885_v2 = vld [vmem:[#allocation2 + $0x92] sm:$0xff] }
 0x38d   : > { %v9673_v38 = vmul.f32 %v9565_v1, %v1793_v44  ;;  %v1438_v10 = vmax.f32 %v1413_v40, 0.0  ;;  %v9692_v31 = vmul.f32 %v3897_v14, %v9445_v26  ;;  %v11469_v26 = vld [vmem:[#allocation15_spill] sm:$0xff]  ;;  %v2476_v35 = vmul.f32 %v9643_v56, %v2426_v50 }
 0x38e   : > { %v9680_v5 = vmul.f32 %v9663_v46, %v9575_v4  ;;  %v3126_v0 = vld [vmem:[#allocation2 + $0x99] sm:$0xff]  ;;  %v9687_v13 = vadd.f32 %v2561_v20, %v2095_v6  ;;  %v9695_v8 = vmul.f32 %v3898_v59, %v9465_v53  ;;  %v1308_v36 = vsel %vm856_vm0, %v11467_v54, %v1307_v27  ;;  %v11470_v53 = vld [vmem:[#allocation40_spill] sm:$0xff]  ;;  %v11471_v54 = vld [vmem:[#allocation27_spill] sm:$0xff] }
 0x38f   : > { %11462 = vst [vmem:[#allocation72_spill] sm:$0xff] %v9673_v38  ;;  %v2177_v51 = vld [vmem:[#allocation2 + $0x9b] sm:$0xff]  ;;  %v3151_v23 = vpack.c.bf16 %v3126_v0, %v3126_v0  ;;  %v9701_v20 = vunpack.c.l.bf16 %v2367_v55  ;;  %v1236_v14 = vmax.f32 %v11469_v26, %v11468_v58  ;;  %v1360_v59 = vmax.f32 %v11470_v53, %v1308_v36  ;;  %v11474_v26 = vld [vmem:[#allocation28_spill] sm:$0xff]  ;;  %v11475_v53 = vld [vmem:[#allocation17_spill] sm:$0xff] }
 0x390   : > { %11463 = vst [vmem:[#allocation73_spill] sm:$0xff] %v9680_v5  ;;  %v2202_v40 = vpack.c.bf16 %v2177_v51, %v2177_v51  ;;  %v9703_v6 = vpop.f32.mrf.mxu1  ;;  %v1886_v16 = vld [vmem:[#allocation2 + $0x9a] sm:$0xff]  ;;  %v11472_v51 = vld [vmem:[#allocation16_spill] sm:$0xff]  ;;  %v1843_v52 = vmul.f32 %v9649_v28, %v1793_v44 }
 0x391   : > { %11464 = vst [vmem:[#allocation74_spill] sm:$0xff] %v9687_v13  ;;  %v2668_v24 = vld [vmem:[#allocation2 + $0x9f] sm:$0xff]  ;;  %v1901_v0 = vpack.c.bf16 %v1886_v16, %v1885_v2  ;;  %v3176_v7 = vunpack.c.l.bf16 %v3151_v23  ;;  %v1237_v55 = vmax.f32 %v11472_v51, %v11471_v54  ;;  %v1385_v5 = vmax.f32 %v1236_v14, %v1360_v59  ;;  %v11476_v51 = vld [vmem:[#allocation29_spill] sm:$0xff] }
 0x392   : > { %11465 = vst [vmem:[#allocation75_spill] sm:$0xff] %v9692_v31  ;;  %v2427_v48 = vunpack.c.l.bf16 %v2202_v40  ;;  %v2693_v36 = vpack.c.bf16 %v2668_v24, %v2668_v24  ;;  %v2563_v40 = vpop.f32.mrf.mxu3  ;;  %v11477_v50 = vrot.slane %v11476_v51, 4  ;;  %v11479_v31 = vld [vmem:[#allocation30_spill] sm:$0xff]  ;;  %v2383_v54 = vperm.slane %v9682_v19, %v9009_v18 }
 0x393   : > { %11466 = vst [vmem:[#allocation76_spill] sm:$0xff] %v9695_v8  ;;  %v9716_v58 = vmul.f32 %v3176_v7, %v9594_v29  ;;  %v1844_v16 = vmul.f32 %v3176_v7, %v9684_v62  ;;  %v2096_v23 = vpop.f32.mrf.mxu2  ;;  %v1414_v14 = vadd.f32 %v9440_v57, %v1385_v5  ;;  %v11480_v7 = vld [vmem:[#allocation18_spill] sm:$0xff] }
 0x394   : > { %1468 = vst.msk [vmem:[#allocation2 + $0xa8] sm:$0xff] %vm1444_vm3, %v1438_v10  ;;  %7061 = vmatmul.msk.bf16.gmra.mxu1 %vm1444_vm3, %v1901_v0  ;;  %v2477_v2 = vmul.f32 %v9701_v20, %v2427_v48  ;;  %v11478_v10 = vld [vmem:[#allocation19_spill] sm:$0xff]  ;;  %v2097_v59 = vadd.f32 %v2096_v23, %v9647_v47  ;;  %v1109_v0 = vpop.f32.mrf.mxu0  ;;  %v2370_v48 = vpop.permute.xlu2 %2369  ;;  %v3390_v47 = vld [vmem:[#allocation2 + $0x8d] sm:$0xff]  ;;  %v3391_v19 = vld [vmem:[#allocation2 + $0x95] sm:$0xff]  ;;  %v9752_v3 = vunpack.c.l.bf16 %v2383_v54 }
 0x395   : > { %11473 = vst [vmem:[#allocation26_spill] sm:$0xff] %v9716_v58  ;;  %v9725_v44 = vmax.f32 %v11478_v10, %v11477_v50  ;;  %v1309_v8 = vrot.slane %v1109_v0, 4  ;;  %v1859_v13 = vpack.c.bf16 %v1844_v16, %v1843_v52  ;;  %v1439_v51 = vmax.f32 %v1414_v14, 0.0  ;;  %v9737_v32 = vpop.permute.xlu0 %2385  ;;  %v3392_v38 = vld [vmem:[#allocation2 + $0x9d] sm:$0xff] }
 0x396   : > { %v2492_v34 = vpack.c.bf16 %v2477_v2, %v2476_v35  ;;  %v1738_v10 = vperm.slane %v9661_v42, %v9009_v18  ;;  %v9735_v5 = vadd.f32 %v2563_v40, %v2097_v59  ;;  %v2718_v50 = vunpack.c.l.bf16 %v2693_v36  ;;  %v11482_v42 = vld [vmem:[#allocation41_spill] sm:$0xff] }
 0x397   : > { %v1310_v52 = vsel %vm856_vm0, %v1307_v27, %v1309_v8  ;;  %1469 = vst.msk [vmem:[#allocation2 + $0xb0] sm:$0xff] %vm1444_vm3, %v1439_v51  ;;  %v2375_v14 = vperm.slane %v2370_v48, %v9009_v18  ;;  %v3415_v59 = vpack.c.bf16 %v3390_v47, %v3390_v47  ;;  %v3416_v51 = vpack.c.bf16 %v3391_v19, %v3391_v19  ;;  %v3849_v19 = vld [vmem:[#allocation2 + $0x8f] sm:$0xff] }
 0x398   : > { %11481 = vst [vmem:[#allocation15_spill] sm:$0xff] %v9735_v5  ;;  %v9740_v16 = vpop.f32.mrf.mxu1  ;;  %v1361_v40 = vmax.f32 %v11482_v42, %v1310_v52  ;;  %7082 = vmatmul.msk.bf16.gmra.mxu2 %vm1444_vm3, %v1859_v13  ;;  %v9758_v13 = vmul.f32 %v2718_v50, %v9649_v28 }
 0x399   : > { %7107 = vmatmul.msk.bf16.gmra.mxu3 %vm1444_vm3, %v2492_v34  ;;  %v9760_v34 = vunpack.c.l.bf16 %v1738_v10  ;;  %v3440_v50 = vunpack.c.l.bf16 %v3415_v59  ;;  %v9781_v10 = vmul.f32 %v9663_v46, %v9543_v21 }
 0x39a   : > { %v1386_v24 = vmax.f32 %v1237_v55, %v1361_v40  ;;  %11484 = vst [vmem:[#allocation27_spill] sm:$0xff] %v9758_v13  ;;  %v9763_v55 = vunpack.c.l.bf16 %v2375_v14  ;;  %v3441_v14 = vunpack.c.l.bf16 %v3416_v51  ;;  %v11487_v51 = vld [vmem:[#allocation42_spill] sm:$0xff] }
 0x39b   : > { %v2669_v39 = vld [vmem:[#allocation2 + $0xa7] sm:$0xff]  ;;  %11486 = vst [vmem:[#allocation28_spill] sm:$0xff] %v9781_v10  ;;  %v9786_v13 = vmul.f32 %v3440_v50, %v9548_v43 }
 0x39c   : > { %v1520_v12 = vld [vmem:[#allocation2 + $0xa1] sm:$0xff]  ;;  %v2694_v23 = vpack.c.bf16 %v2669_v39, %v2669_v39  ;;  %v1742_v39 = vpop.permute.xlu1 %1741  ;;  %v1415_v47 = vadd.f32 %v9440_v57, %v1386_v24 }
 0x39d   : > { %v1545_v0 = vpack.c.bf16 %v1520_v12, %v1520_v12  ;;  %v2178_v35 = vld [vmem:[#allocation2 + $0xa3] sm:$0xff]  ;;  %v1747_v36 = vperm.slane %v1742_v39, %v9009_v18  ;;  %11488 = vst [vmem:[#allocation17_spill] sm:$0xff] %v9786_v13 }
 0x39e   : > { %v2719_v12 = vunpack.c.l.bf16 %v2694_v23  ;;  %v2203_v5 = vpack.c.bf16 %v2178_v35, %v2178_v35  ;;  %v2099_v23 = vpop.f32.mrf.mxu2  ;;  %v1112_v35 = vpop.f32.mrf.mxu0  ;;  %v1440_v39 = vmax.f32 %v1415_v47, 0.0  ;;  %v1887_v24 = vld [vmem:[#allocation2 + $0xa2] sm:$0xff] }
 0x39f   : > { %v1795_v27 = vunpack.c.l.bf16 %v1545_v0  ;;  %v2566_v0 = vpop.f32.mrf.mxu3  ;;  %v2100_v52 = vadd.f32 %v2099_v23, %v9703_v6  ;;  %v9769_v42 = vunpack.c.l.bf16 %v1747_v36  ;;  %v1311_v40 = vrot.slane %v1112_v35, 4  ;;  %v3128_v23 = vld [vmem:[#allocation2 + $0xa9] sm:$0xff] }
 0x3a0   : > { %v9755_v48 = vmul.f32 %v2719_v12, %v9684_v62  ;;  %v2428_v12 = vunpack.c.l.bf16 %v2203_v5  ;;  %v9777_v45 = vpop.f32.mrf.mxu1  ;;  %v1888_v36 = vld [vmem:[#allocation2 + $0xaa] sm:$0xff]  ;;  %v3874_v35 = vpack.c.bf16 %v3849_v19, %v3849_v19  ;;  %1470 = vst.msk [vmem:[#allocation2 + $0xb8] sm:$0xff] %vm1444_vm3, %v1440_v39 }
 0x3a1   : > { %v9767_v54 = vmul.f32 %v9643_v56, %v1795_v27  ;;  %v9773_v2 = vadd.f32 %v2566_v0, %v2100_v52  ;;  %v1845_v6 = vmul.f32 %v9760_v34, %v1795_v27  ;;  %v1312_v58 = vsel %vm856_vm0, %v1309_v8, %v1311_v40  ;;  %v3393_v59 = vld [vmem:[#allocation2 + $0xa5] sm:$0xff]  ;;  %v2670_v5 = vld [vmem:[#allocation2 + $0xaf] sm:$0xff] }
 0x3a2   : > { %11483 = vst [vmem:[#allocation40_spill] sm:$0xff] %v9755_v48  ;;  %v3153_v0 = vpack.c.bf16 %v3128_v23, %v3128_v23  ;;  %v1362_v47 = vmax.f32 %v11487_v51, %v1312_v58  ;;  %v1902_v52 = vpack.c.bf16 %v1888_v36, %v1887_v24  ;;  %v2179_v27 = vld [vmem:[#allocation2 + $0xab] sm:$0xff]  ;;  %v9789_v48 = vmul.f32 %v3441_v14, %v9539_v25 }
 0x3a3   : > { %11485 = vst [vmem:[#allocation16_spill] sm:$0xff] %v9773_v2  ;;  %v2204_v8 = vpack.c.bf16 %v2179_v27, %v2179_v27  ;;  %v3899_v19 = vunpack.c.l.bf16 %v3874_v35  ;;  %v3417_v2 = vpack.c.bf16 %v3392_v38, %v3392_v38  ;;  %v2478_v46 = vmul.f32 %v9763_v55, %v2428_v12 }
 0x3a4   : > { %11489 = vst [vmem:[#allocation29_spill] sm:$0xff] %v9789_v48  ;;  %v3178_v21 = vunpack.c.l.bf16 %v3153_v0  ;;  %v11490_v23 = vmax.f32 %v11475_v53, %v11474_v26  ;;  %v9795_v17 = vpop.permute.xlu1 %1750  ;;  %7062 = vmatmul.msk.bf16.gmra.mxu1 %vm1444_vm3, %v1902_v52  ;;  %v3418_v58 = vpack.c.bf16 %v3393_v59, %v3393_v59  ;;  %v2695_v43 = vpack.c.bf16 %v2670_v5, %v2670_v5 }
 0x3a5   : > { %v2429_v36 = vunpack.c.l.bf16 %v2204_v8  ;;  %v9801_v38 = vmul.f32 %v3899_v19, %v9546_v60  ;;  %v3442_v35 = vunpack.c.l.bf16 %v3417_v2 }
 0x3a6   : > { %v1387_v39 = vmax.f32 %v11490_v23, %v1362_v47  ;;  %v2101_v50 = vpop.f32.mrf.mxu2  ;;  %v9804_v12 = vmul.f32 %v3178_v21, %v9701_v20  ;;  %v1846_v26 = vmul.f32 %v3178_v21, %v9769_v42  ;;  %v1114_v14 = vpop.f32.mrf.mxu0  ;;  %v3443_v27 = vunpack.c.l.bf16 %v3418_v58  ;;  %v11492_v23 = vld [vmem:[#allocation44_spill] sm:$0xff] }
 0x3a7   : > { %v2568_v24 = vpop.f32.mrf.mxu3  ;;  %11491 = vst [vmem:[#allocation19_spill] sm:$0xff] %v9801_v38  ;;  %v2102_v59 = vadd.f32 %v2101_v50, %v9740_v16  ;;  %v1313_v5 = vrot.slane %v1114_v14, 4  ;;  %v2479_v0 = vmul.f32 %v9752_v3, %v2429_v36  ;;  %v3129_v8 = vld [vmem:[#allocation2 + $0xb1] sm:$0xff]  ;;  %v2720_v36 = vunpack.c.l.bf16 %v2695_v43 }
 0x3a8   : > { %v1416_v53 = vadd.f32 %v9440_v57, %v1387_v39  ;;  %v1860_v60 = vpack.c.bf16 %v1846_v26, %v1845_v6  ;;  %v2671_v19 = vld [vmem:[#allocation2 + $0xb7] sm:$0xff]  ;;  %v9818_v39 = vpop.f32.mrf.mxu1  ;;  %v3154_v14 = vpack.c.bf16 %v3129_v8, %v3129_v8  ;;  %v11493_v6 = vld [vmem:[#allocation43_spill] sm:$0xff] }
 0x3a9   : > { %v9814_v21 = vadd.f32 %v2568_v24, %v2102_v59  ;;  %v1314_v2 = vsel %vm856_vm0, %v1311_v40, %v1313_v5  ;;  %v1364_v16 = vmax.f32 %v11492_v23, %v1313_v5  ;;  %v2493_v50 = vpack.c.bf16 %v2479_v0, %v2478_v46  ;;  %v2180_v58 = vld [vmem:[#allocation2 + $0xb3] sm:$0xff]  ;;  %v3851_v24 = vld [vmem:[#allocation2 + $0x9f] sm:$0xff] }
 0x3aa   : > { %v1441_v47 = vmax.f32 %v1416_v53, 0.0  ;;  %v2696_v51 = vpack.c.bf16 %v2671_v19, %v2671_v19  ;;  %v1363_v26 = vmax.f32 %v11493_v6, %v1314_v2  ;;  %v1760_v53 = vpop.permute.xlu2 %1759  ;;  %7083 = vmatmul.msk.bf16.gmra.mxu2 %vm1444_vm3, %v1860_v60  ;;  %v1756_v40 = vperm.slane %v9795_v17, %v9009_v18 }
 0x3ab   : > { %v1389_v59 = vmax.f32 %v9725_v44, %v1364_v16  ;;  %v1765_v46 = vperm.slane %v1760_v53, %v9009_v18  ;;  %7108 = vmatmul.msk.bf16.gmra.mxu3 %vm1444_vm3, %v2493_v50  ;;  %v3179_v43 = vunpack.c.l.bf16 %v3154_v14  ;;  %v11494_v0 = vmax.f32 %v11480_v7, %v11479_v31  ;;  %v3852_v16 = vld [vmem:[#allocation2 + $0xa7] sm:$0xff] }
 0x3ac   : > { %1471 = vst.msk [vmem:[#allocation2 + $0xc0] sm:$0xff] %vm1444_vm3, %v1441_v47  ;;  %v2721_v5 = vunpack.c.l.bf16 %v2696_v51  ;;  %v2394_v8 = vpop.permute.xlu1 %2393  ;;  %v9832_v60 = vmul.f32 %v3443_v27, %v9575_v4  ;;  %v2205_v44 = vpack.c.bf16 %v2180_v58, %v2180_v58  ;;  %v9836_v23 = vmul.f32 %v3442_v35, %v9559_v15  ;;  %v3394_v35 = vld [vmem:[#allocation2 + $0xad] sm:$0xff] }
 0x3ad   : > { %v1388_v47 = vmax.f32 %v11494_v0, %v1363_v26  ;;  %v1418_v19 = vadd.f32 %v9440_v57, %v1389_v59  ;;  %v3876_v50 = vpack.c.bf16 %v3851_v24, %v3851_v24  ;;  %v9839_v51 = vmul.f32 %v2720_v36, %v9760_v34  ;;  %v2402_v59 = vpop.permute.xlu0 %2401  ;;  %v3399_v0 = vld [vmem:[#allocation2 + $0xd5] sm:$0xff] }
 0x3ae   : > { %11495 = vst [vmem:[#allocation30_spill] sm:$0xff] %v9832_v60  ;;  %v2104_v17 = vpop.f32.mrf.mxu2  ;;  %v9842_v31 = vmul.f32 %v3179_v43, %v9763_v55  ;;  %v9845_v7 = vmul.f32 %v2721_v5, %v9769_v42  ;;  %v2399_v6 = vperm.slane %v2394_v8, %v9009_v18  ;;  %v11497_v36 = vperm.slane %v9737_v32, %v9009_v18 }
 0x3af   : > { %v2571_v2 = vpop.f32.mrf.mxu3  ;;  %11496 = vst [vmem:[#allocation18_spill] sm:$0xff] %v9836_v23  ;;  %v1417_v4 = vadd.f32 %v9440_v57, %v1388_v47  ;;  %v1443_v27 = vmax.f32 %v1418_v19, 0.0  ;;  %v2105_v14 = vadd.f32 %v2104_v17, %v9777_v45  ;;  %v3877_v24 = vpack.c.bf16 %v3852_v16, %v3852_v16  ;;  %v3395_v57 = vld [vmem:[#allocation2 + $0xb5] sm:$0xff] }
 0x3b0   : > { %v9855_v26 = vunpack.c.l.bf16 %v11497_v36  ;;  %v9859_v5 = vunpack.c.l.bf16 %v1756_v40  ;;  %v9864_v8 = vpop.f32.mrf.mxu1  ;;  %v2430_v32 = vunpack.c.l.bf16 %v2205_v44  ;;  %v3901_v19 = vunpack.c.l.bf16 %v3876_v50  ;;  %v1889_v36 = vld [vmem:[#allocation2 + $0xb2] sm:$0xff] }
 0x3b1   : > { %v1442_v53 = vmax.f32 %v1417_v4, 0.0  ;;  %1474 = vst.msk [vmem:[#allocation2 + $0xd0] sm:$0xf] %vm1473_vm4, %v1443_v27  ;;  %v9862_v47 = vadd.f32 %v2571_v2, %v2105_v14  ;;  %v9867_v4 = vunpack.c.l.bf16 %v1765_v46  ;;  %v3902_v40 = vunpack.c.l.bf16 %v3877_v24 }
 0x3b2   : > { %v3419_v25 = vpack.c.bf16 %v3394_v35, %v3394_v35  ;;  %v9869_v52 = vunpack.c.l.bf16 %v2399_v6  ;;  %v3420_v14 = vpack.c.bf16 %v3395_v57, %v3395_v57  ;;  %v2407_v23 = vperm.slane %v2402_v59, %v9009_v18  ;;  %v8274_v6 = vld [vmem:[%s11246_s6 + $0x3f0] sm:$0xff]  ;;  %v1769_v59 = vpop.permute.xlu2 %1768 }
 0x3b3   : > { %v1523_v45 = vld [vmem:[#allocation2 + $0xb9] sm:$0xff]  ;;  %1472 = vst.msk [vmem:[#allocation2 + $0xc8] sm:$0xff] %vm1444_vm3, %v1442_v53  ;;  %v1847_v44 = vmul.f32 %v3179_v43, %v9859_v5  ;;  %v3424_v53 = vpack.c.bf16 %v3399_v0, %v3399_v0  ;;  %v2480_v24 = vmul.f32 %v9855_v26, %v2430_v32  ;;  %v9882_v35 = vmul.f32 %v3902_v40, %v9594_v29 }
 0x3b4   : > { %v1548_v17 = vpack.c.bf16 %v1523_v45, %v1523_v45  ;;  %v2181_v16 = vld [vmem:[#allocation2 + $0xbb] sm:$0xff]  ;;  %6508 = vmatpush.bf16.msrb.mxu0 %v8274_v6 }
 0x3b5   : > { %v1890_v15 = vld [vmem:[#allocation2 + $0xba] sm:$0xff]  ;;  %v2206_v27 = vpack.c.bf16 %v2181_v16, %v2181_v16  ;;  %11499 = vst [vmem:[#allocation42_spill] sm:$0xff] %v9882_v35 }
 0x3b6   : > { %v2672_v58 = vld [vmem:[#allocation2 + $0xbf] sm:$0xff]  ;;  %v1903_v2 = vpack.c.bf16 %v1890_v15, %v1889_v36  ;;  %v1798_v50 = vunpack.c.l.bf16 %v1548_v17  ;;  %v2106_v46 = vpop.f32.mrf.mxu2  ;;  %v9879_v15 = vmul.f32 %v3901_v19, %v9565_v1  ;;  %v3444_v17 = vunpack.c.l.bf16 %v3419_v25  ;;  %v3858_v29 = vld [vmem:[#allocation2 + $0xd7] sm:$0xff] }
 0x3b7   : > { %v2431_v45 = vunpack.c.l.bf16 %v2206_v27  ;;  %v2573_v60 = vpop.f32.mrf.mxu3  ;;  %v2697_v43 = vpack.c.bf16 %v2672_v58, %v2672_v58  ;;  %v2107_v0 = vadd.f32 %v2106_v46, %v9818_v39  ;;  %v3445_v19 = vunpack.c.l.bf16 %v3420_v14  ;;  %v1524_v36 = vld [vmem:[#allocation2 + $0xc1] sm:$0xf] }
 0x3b8   : > { %7063 = vmatmul.msk.bf16.gmra.mxu1 %vm1444_vm3, %v1903_v2  ;;  %11498 = vst [vmem:[#allocation41_spill] sm:$0xff] %v9879_v15  ;;  %v1848_v57 = vmul.f32 %v9867_v4, %v1798_v50  ;;  %v9888_v32 = vmul.f32 %v9752_v3, %v1798_v50  ;;  %v9894_v27 = vunpack.c.l.bf16 %v2407_v23  ;;  %v1774_v25 = vperm.slane %v1769_v59, %v9009_v18  ;;  %v2182_v50 = vld [vmem:[#allocation2 + $0xc3] sm:$0xf] }
 0x3b9   : > { %v2481_v16 = vmul.f32 %v9869_v52, %v2431_v45  ;;  %v9892_v40 = vadd.f32 %v2573_v60, %v2107_v0  ;;  %v9897_v45 = vpop.f32.mrf.mxu1  ;;  %v2722_v1 = vunpack.c.l.bf16 %v2697_v43  ;;  %v9901_v15 = vunpack.c.l.bf16 %v3424_v53 }
 0x3ba   : > { %v1861_v58 = vpack.c.bf16 %v1848_v57, %v1847_v44  ;;  %v2673_v2 = vld [vmem:[#allocation2 + $0xc7] sm:$0xff]  ;;  %v3853_v44 = vld [vmem:[#allocation2 + $0xaf] sm:$0xff]  ;;  %v3854_v57 = vld [vmem:[#allocation2 + $0xb7] sm:$0xff]  ;;  %v3883_v0 = vpack.c.bf16 %v3858_v29, %v3858_v29  ;;  %v9909_v59 = vmul.f32 %v3445_v19, %v9684_v62 }
 0x3bb   : > { %v3132_v39 = vld [vmem:[#allocation2 + $0xc9] sm:$0xff]  ;;  %v2494_v46 = vpack.c.bf16 %v2481_v16, %v2480_v24  ;;  %v2698_v14 = vpack.c.bf16 %v2673_v2, %v2673_v2  ;;  %v3131_v23 = vld [vmem:[#allocation2 + $0xc1] sm:$0xff]  ;;  %v9906_v24 = vmul.f32 %v3444_v17, %v9649_v28  ;;  %v1549_v16 = vpack.c.bf16 %v1524_v36, %v1524_v36 }
 0x3bc   : > { %v3157_v60 = vpack.c.bf16 %v3132_v39, %v3132_v39  ;;  %7084 = vmatmul.msk.bf16.gmra.mxu2 %vm1444_vm3, %v1861_v58  ;;  %v3156_v18 = vpack.c.bf16 %v3131_v23, %v3131_v23  ;;  %11501 = vst [vmem:[#allocation43_spill] sm:$0xff] %v9909_v59  ;;  %v2207_v2 = vpack.c.bf16 %v2182_v50, %v2182_v50  ;;  %v1891_v19 = vld [vmem:[#allocation2 + $0xc2] sm:$0xf]  ;;  %v9923_v36 = vunpack.c.l.bf16 %v1774_v25 }
 0x3bd   : > { %7109 = vmatmul.msk.bf16.gmra.mxu3 %vm1444_vm3, %v2494_v46  ;;  %11500 = vst [vmem:[#allocation44_spill] sm:$0xff] %v9906_v24  ;;  %v2723_v43 = vunpack.c.l.bf16 %v2698_v14  ;;  %v3878_v29 = vpack.c.bf16 %v3853_v44, %v3853_v44  ;;  %v3879_v38 = vpack.c.bf16 %v3854_v57, %v3854_v57  ;;  %v3396_v46 = vld [vmem:[#allocation2 + $0xbd] sm:$0xff]  ;;  %v9914_v23 = vmul.f32 %v2722_v1, %v9859_v5  ;;  %v3397_v44 = vld [vmem:[#allocation2 + $0xc5] sm:$0xff]  ;;  %v3857_v24 = vld [vmem:[#allocation2 + $0xcf] sm:$0xff] }
 0x3be   : > { %v3182_v53 = vunpack.c.l.bf16 %v3157_v60  ;;  %v2109_v39 = vpop.f32.mrf.mxu2  ;;  %v3181_v58 = vunpack.c.l.bf16 %v3156_v18  ;;  %v3855_v57 = vld [vmem:[#allocation2 + $0xbf] sm:$0xff]  ;;  %v3856_v1 = vld [vmem:[#allocation2 + $0xc7] sm:$0xff]  ;;  %v1799_v18 = vunpack.c.l.bf16 %v1549_v16  ;;  %v3908_v59 = vunpack.c.l.bf16 %v3883_v0 }
 0x3bf   : > { %v2576_v6 = vpop.f32.mrf.mxu3  ;;  %v9917_v28 = vmul.f32 %v2723_v43, %v9867_v4  ;;  %v2110_v17 = vadd.f32 %v2109_v39, %v9864_v8  ;;  %v3903_v14 = vunpack.c.l.bf16 %v3878_v29  ;;  %v3904_v60 = vunpack.c.l.bf16 %v3879_v38  ;;  %v8145_v43 = vld [vmem:[%s11243_s3 + $0x78] sm:$0xff]  ;;  %v8147_v8 = vld [vmem:[%s11243_s3 + $0x88] sm:$0xff] }
 0x3c0   : > { %v9920_v62 = vmul.f32 %v3182_v53, %v9869_v52  ;;  %v9926_v50 = vmul.f32 %v3181_v58, %v9855_v26  ;;  %v3421_v53 = vpack.c.bf16 %v3396_v46, %v3396_v46  ;;  %v3398_v39 = vld [vmem:[#allocation2 + $0xcd] sm:$0xff]  ;;  %v2432_v58 = vunpack.c.l.bf16 %v2207_v2  ;;  %3743 = vmatpush.bf16.msra.mxu2 %v8145_v43  ;;  %4010 = vmatpush.bf16.msra.mxu3 %v8147_v8 }
 0x3c1   : > { %v9928_v35 = vadd.f32 %v2576_v6, %v2110_v17  ;;  %v1990_v38 = vpop.f32.mrf.mxu1  ;;  %v8143_v6 = vld [vmem:[%s11243_s3 + $0x68] sm:$0xff]  ;;  %v9944_v29 = vmul.f32 %v3903_v14, %v9643_v56  ;;  %v9947_v17 = vmul.f32 %v3904_v60, %v9701_v20  ;;  %v3422_v46 = vpack.c.bf16 %v3397_v44, %v3397_v44 }
 0x3c2   : > { %11502 = vst [vmem:[#allocation77_spill] sm:$0xff] %v9926_v50  ;;  %v3446_v25 = vunpack.c.l.bf16 %v3421_v53  ;;  %v3880_v2 = vpack.c.bf16 %v3855_v57, %v3855_v57  ;;  %v1904_v10 = vpack.c.bf16 %v1891_v19, %v1891_v19  ;;  %3551 = vmatpush.bf16.msra.mxu1 %v8143_v6  ;;  %v3881_v48 = vpack.c.bf16 %v3856_v1, %v3856_v1 }
 0x3c3   : > { %v3944_v13 = vpack.c.bf16 %v9947_v17, %v9944_v29  ;;  %v3423_v16 = vpack.c.bf16 %v3398_v39, %v3398_v39  ;;  %v1849_v56 = vmul.f32 %v9923_v36, %v1799_v18  ;;  %v3447_v14 = vunpack.c.l.bf16 %v3422_v46 }
 0x3c4   : > { %v3905_v50 = vunpack.c.l.bf16 %v3880_v2  ;;  %v3882_v20 = vpack.c.bf16 %v3857_v24, %v3857_v24  ;;  %v9954_v0 = vmul.f32 %v9901_v15, %v9867_v4  ;;  %v2482_v19 = vmul.f32 %v9894_v27, %v2432_v58 }
 0x3c5   : > { %v3906_v57 = vunpack.c.l.bf16 %v3881_v48  ;;  %v3448_v43 = vunpack.c.l.bf16 %v3423_v16  ;;  %v9960_v8 = vmul.f32 %v3446_v25, %v9760_v34  ;;  %v9963_v18 = vmul.f32 %v3447_v14, %v9769_v42  ;;  %v3109_v25 = vld [vmem:[#allocation2 + $0x11] sm:$0xff] }
 0x3c6   : > { %v2111_v60 = vpop.f32.mrf.mxu2  ;;  %v3907_v24 = vunpack.c.l.bf16 %v3882_v20  ;;  %v9966_v4 = vmul.f32 %v3908_v59, %v9869_v52  ;;  %v2495_v59 = vpack.c.bf16 %v2482_v19, %v2482_v19  ;;  %v3134_v16 = vpack.c.bf16 %v3109_v25, %v3109_v25  ;;  %v2918_v19 = vld [vmem:[#allocation2 + $0x18] sm:$0xff] }
 0x3c7   : > { %v2578_v44 = vpop.f32.mrf.mxu3  ;;  %v2112_v1 = vadd.f32 %v2111_v60, %v9897_v45  ;;  %v9972_v15 = vmul.f32 %v3906_v57, %v9752_v3  ;;  %v9975_v48 = vmul.f32 %v3448_v43, %v9859_v5  ;;  %v1862_v45 = vpack.c.bf16 %v1849_v56, %v1849_v56  ;;  %v3110_v5 = vld [vmem:[#allocation2 + $0x19] sm:$0xff]  ;;  %v11549_v3 = vld [vmem:[#allocation40_spill] sm:$0xff] }
 0x3c8   : > { %7064 = vmatmul.msk.bf16.gmra.mxu1 %vm1444_vm3, %v1904_v10  ;;  %v9969_v10 = vmul.f32 %v3905_v50, %v9763_v55  ;;  %v3486_v34 = vpack.c.bf16 %v9963_v18, %v9960_v8  ;;  %v9982_v42 = vmul.f32 %v3907_v24, %v9855_v26  ;;  %v3135_v58 = vpack.c.bf16 %v3110_v5, %v3110_v5  ;;  %v11504_v24 = vld [vmem:[#allocation45_spill] sm:$0xff] }
 0x3c9   : > { %v9977_v53 = vadd.f32 %v2578_v44, %v2112_v1  ;;  %v1992_v52 = vpop.f32.mrf.mxu1  ;;  %v3159_v14 = vunpack.c.l.bf16 %v3134_v16  ;;  %v11503_v20 = vpack.c.bf16 %v9089_v33, %v9086_v63  ;;  %v2917_v1 = vld [vmem:[#allocation2 + $0x10] sm:$0xff] }
 0x3ca   : > { %v3160_v56 = vunpack.c.l.bf16 %v3135_v58  ;;  %v11541_v50 = vld [vmem:[#allocation73_spill] sm:$0xff] }
 0x3cc   : > { %7085 = vmatmul.msk.bf16.gmra.mxu2 %vm1444_vm3, %v1862_v45  ;;  %v3185_v57 = vmul.f32 %v3160_v56, %v9061_v49  ;;  %v11505_v49 = vld [vmem:[#allocation48_spill] sm:$0xff] }
 0x3cd   : > { %7110 = vmatmul.msk.bf16.gmra.mxu3 %vm1444_vm3, %v2495_v59  ;;  %v2942_v59 = vpack.c.bf16 %v2918_v19, %v2917_v1 }
 0x3ce   : > { %v2114_v39 = vpop.f32.mrf.mxu2 }
 0x3cf   : > { %v2581_v26 = vpop.f32.mrf.mxu3  ;;  %v2115_v6 = vadd.f32 %v2114_v39, %v1990_v38  ;;  %v3184_v38 = vmul.f32 %v3159_v14, %v11504_v24  ;;  %v2920_v14 = vld [vmem:[#allocation2 + $0x28] sm:$0xff] }
 0x3d1   : > { %v9992_v46 = vadd.f32 %v2581_v26, %v2115_v6  ;;  %v1995_v2 = vpop.f32.mrf.mxu1  ;;  %v3209_v25 = vpack.c.bf16 %v3185_v57, %v3184_v38 }
 0x3d6   : > { %v2116_v60 = vpop.f32.mrf.mxu2 }
 0x3d7   : > { %v2583_v44 = vpop.f32.mrf.mxu3  ;;  %v2117_v43 = vadd.f32 %v2116_v60, %v1992_v52  ;;  %v11506_v52 = vld [vmem:[#allocation46_spill] sm:$0xff] }
 0x3d8   : > { %7123 = vmatmul.msk.bf16.vlgmr.msrb.gmra.mxu1 %vm1444_vm3, %v11503_v20  ;;  %v11507_v6 = vpack.c.bf16 %v11505_v49, %v11506_v52  ;;  %v2919_v60 = vld [vmem:[#allocation2 + $0x20] sm:$0xff]  ;;  %v2921_v49 = vld [vmem:[#allocation2 + $0x30] sm:$0xff] }
 0x3d9   : > { %v10000_v45 = vadd.f32 %v2583_v44, %v2117_v43  ;;  %v1997_v5 = vpop.f32.mrf.mxu1  ;;  %v2943_v19 = vpack.c.bf16 %v2920_v14, %v2919_v60  ;;  %v11511_v14 = vld [vmem:[#allocation56_spill] sm:$0xff] }
 0x3dc   : > { %7148 = vmatmul.msk.bf16.vlgmr.msrb.gmra.mxu2 %vm1444_vm3, %v2942_v59 }
 0x3dd   : > { %7173 = vmatmul.msk.bf16.vlgmr.msrb.gmra.mxu3 %vm1444_vm3, %v3209_v25 }
 0x3de   : > { %v2119_v63 = vpop.f32.mrf.mxu2 }
 0x3df   : > { %v2586_v33 = vpop.f32.mrf.mxu3  ;;  %v2120_v39 = vadd.f32 %v2119_v63, %v1995_v2  ;;  %v11508_v2 = vpack.c.bf16 %v9195_v37, %v9192_v9 }
 0x3e1   : > { %v10004_v26 = vadd.f32 %v2586_v33, %v2120_v39  ;;  %v2000_v58 = vpop.f32.mrf.mxu1  ;;  %v2922_v33 = vld [vmem:[#allocation2 + $0x38] sm:$0xff] }
 0x3e2   : > { %v2944_v9 = vpack.c.bf16 %v2922_v33, %v2921_v49  ;;  %v11516_v49 = vld [vmem:[#allocation9_spill] sm:$0xff] }
 0x3e6   : > { %v2121_v16 = vpop.f32.mrf.mxu2 }
 0x3e7   : > { %v2588_v56 = vpop.f32.mrf.mxu3  ;;  %v2122_v20 = vadd.f32 %v2121_v16, %v1997_v5  ;;  %v11509_v5 = vpack.c.bf16 %v9216_v41, %v9220_v22 }
 0x3e8   : > { %7124 = vmatmul.msk.bf16.gmra.mxu1 %vm1444_vm3, %v11507_v6 }
 0x3e9   : > { %v10010_v44 = vadd.f32 %v2588_v56, %v2122_v20  ;;  %v2002_v57 = vpop.f32.mrf.mxu1  ;;  %v11512_v20 = vpack.c.bf16 %v9286_v11, %v11511_v14  ;;  %v2925_v14 = vld [vmem:[#allocation2 + $0x50] sm:$0xff] }
 0x3ec   : > { %7149 = vmatmul.msk.bf16.gmra.mxu2 %vm1444_vm3, %v2943_v19 }
 0x3ed   : > { %7174 = vmatmul.msk.bf16.gmra.mxu3 %vm1444_vm3, %v11508_v2 }
 0x3ee   : > { %v2124_v43 = vpop.f32.mrf.mxu2 }
 0x3ef   : > { %v2591_v1 = vpop.f32.mrf.mxu3  ;;  %v2125_v24 = vadd.f32 %v2124_v43, %v2000_v58  ;;  %v11510_v58 = vpack.c.bf16 %v9273_v61, %v9213_v30  ;;  %v2923_v43 = vld [vmem:[#allocation2 + $0x40] sm:$0xff] }
 0x3f1   : > { %v10017_v38 = vadd.f32 %v2591_v1, %v2125_v24  ;;  %v2005_v59 = vpop.f32.mrf.mxu1  ;;  %v11513_v24 = vld [vmem:[#allocation58_spill] sm:$0xff] }
 0x3f6   : > { %v2126_v25 = vpop.f32.mrf.mxu2 }
 0x3f7   : > { %v2593_v63 = vpop.f32.mrf.mxu3  ;;  %v2127_v39 = vadd.f32 %v2126_v25, %v2002_v57  ;;  %v2924_v57 = vld [vmem:[#allocation2 + $0x48] sm:$0xff] }
 0x3f8   : > { %7125 = vmatmul.msk.bf16.gmra.mxu1 %vm1444_vm3, %v11509_v5  ;;  %v2945_v30 = vpack.c.bf16 %v2924_v57, %v2923_v43  ;;  %v11519_v57 = vld [vmem:[#allocation61_spill] sm:$0xff] }
 0x3f9   : > { %v10023_v52 = vadd.f32 %v2593_v63, %v2127_v39  ;;  %v2007_v37 = vpop.f32.mrf.mxu1 }
 0x3fc   : > { %7150 = vmatmul.msk.bf16.gmra.mxu2 %vm1444_vm3, %v2944_v9  ;;  %v11517_v9 = vld [vmem:[#allocation20_spill] sm:$0xff] }
 0x3fd   : > { %7175 = vmatmul.msk.bf16.gmra.mxu3 %vm1444_vm3, %v11510_v58 }
 0x3fe   : > { %v2129_v6 = vpop.f32.mrf.mxu2 }
 0x3ff   : > { %v2596_v41 = vpop.f32.mrf.mxu3  ;;  %v2130_v22 = vadd.f32 %v2129_v6, %v2005_v59  ;;  %v11514_v59 = vld [vmem:[#allocation57_spill] sm:$0xff] }
 0x400   : > { %v11515_v5 = vpack.c.bf16 %v11513_v24, %v11514_v59 }
 0x401   : > { %v10030_v16 = vadd.f32 %v2596_v41, %v2130_v22  ;;  %v2010_v56 = vpop.f32.mrf.mxu1  ;;  %v2926_v41 = vld [vmem:[#allocation2 + $0x58] sm:$0xff] }
 0x406   : > { %v2131_v60 = vpop.f32.mrf.mxu2 }
 0x407   : > { %v2598_v19 = vpop.f32.mrf.mxu3  ;;  %v2132_v2 = vadd.f32 %v2131_v60, %v2007_v37  ;;  %v11518_v37 = vpack.c.bf16 %v11516_v49, %v11517_v9  ;;  %v2946_v60 = vpack.c.bf16 %v2926_v41, %v2925_v14  ;;  %v8146_v14 = vld [vmem:[%s11243_s3 + $0x80] sm:$0xff] }
 0x408   : > { %7126 = vmatmul.msk.bf16.gmra.mxu1 %vm1444_vm3, %v11512_v20  ;;  %4011 = vmatpush.bf16.msra.mxu3 %v8146_v14 }
 0x409   : > { %v10036_v1 = vadd.f32 %v2598_v19, %v2132_v2  ;;  %v2012_v61 = vpop.f32.mrf.mxu1  ;;  %v11520_v2 = vld [vmem:[#allocation32_spill] sm:$0xff] }
 0x40a   : > { %v11521_v43 = vpack.c.bf16 %v11519_v57, %v11520_v2  ;;  %v11526_v57 = vld [vmem:[#allocation68_spill] sm:$0xff] }
 0x40c   : > { %7151 = vmatmul.msk.bf16.gmra.mxu2 %vm1444_vm3, %v2945_v30 }
 0x40d   : > { %7176 = vmatmul.msk.bf16.gmra.mxu3 %vm1444_vm3, %v11515_v5 }
 0x40e   : > { %v2134_v25 = vpop.f32.mrf.mxu2 }
 0x40f   : > { %v2601_v11 = vpop.f32.mrf.mxu3  ;;  %v2135_v63 = vadd.f32 %v2134_v25, %v2010_v56  ;;  %v8273_v56 = vld [vmem:[%s11246_s6 + $0x3e8] sm:$0xff]  ;;  %v11522_v25 = vld [vmem:[#allocation65_spill] sm:$0xff] }
 0x410   : > { %6509 = vmatpush.bf16.msrb.mxu0 %v8273_v56  ;;  %v8142_v56 = vld [vmem:[%s11243_s3 + $0x60] sm:$0xff] }
 0x411   : > { %v10043_v33 = vadd.f32 %v2601_v11, %v2135_v63  ;;  %v2015_v39 = vpop.f32.mrf.mxu1  ;;  %v11523_v11 = vld [vmem:[#allocation66_spill] sm:$0xff]  ;;  %3552 = vmatpush.bf16.msra.mxu1 %v8142_v56 }
 0x412   : > { %v11524_v63 = vpack.c.bf16 %v11522_v25, %v11523_v11  ;;  %v11528_v11 = vld [vmem:[#allocation71_spill] sm:$0xff] }
 0x416   : > { %v2136_v58 = vpop.f32.mrf.mxu2 }
 0x417   : > { %v2603_v6 = vpop.f32.mrf.mxu3  ;;  %v2137_v22 = vadd.f32 %v2136_v58, %v2012_v61 }
 0x418   : > { %7127 = vmatmul.msk.bf16.gmra.mxu1 %vm1444_vm3, %v11518_v37  ;;  %v2928_v37 = vld [vmem:[#allocation2 + $0x68] sm:$0xff] }
 0x419   : > { %v10049_v20 = vadd.f32 %v2603_v6, %v2137_v22  ;;  %v2017_v19 = vpop.f32.mrf.mxu1  ;;  %v2927_v6 = vld [vmem:[#allocation2 + $0x60] sm:$0xff] }
 0x41a   : > { %v2947_v22 = vpack.c.bf16 %v2928_v37, %v2927_v6  ;;  %v2930_v37 = vld [vmem:[#allocation2 + $0x78] sm:$0xff] }
 0x41c   : > { %7152 = vmatmul.msk.bf16.gmra.mxu2 %vm1444_vm3, %v2946_v60 }
 0x41d   : > { %7177 = vmatmul.msk.bf16.gmra.mxu3 %vm1444_vm3, %v11521_v43 }
 0x41e   : > { %v2139_v30 = vpop.f32.mrf.mxu2 }
 0x41f   : > { %v2606_v24 = vpop.f32.mrf.mxu3  ;;  %v2140_v61 = vadd.f32 %v2139_v30, %v2015_v39  ;;  %v8144_v39 = vld [vmem:[%s11243_s3 + $0x70] sm:$0xff] }
 0x420   : > { %3744 = vmatpush.bf16.msra.mxu2 %v8144_v39 }
 0x421   : > { %v10059_v59 = vadd.f32 %v2606_v24, %v2140_v61  ;;  %v2020_v5 = vpop.f32.mrf.mxu1 }
 0x426   : > { %v2141_v49 = vpop.f32.mrf.mxu2 }
 0x427   : > { %v2608_v9 = vpop.f32.mrf.mxu3  ;;  %v2142_v58 = vadd.f32 %v2141_v49, %v2017_v19  ;;  %v11525_v19 = vld [vmem:[#allocation69_spill] sm:$0xff] }
 0x428   : > { %7128 = vmatmul.msk.bf16.gmra.mxu1 %vm1444_vm3, %v11524_v63  ;;  %v11527_v2 = vpack.c.bf16 %v11525_v19, %v11526_v57  ;;  %v11529_v63 = vld [vmem:[#allocation35_spill] sm:$0xff]  ;;  %v11532_v19 = vld [vmem:[#allocation70_spill] sm:$0xff] }
 0x429   : > { %v10065_v41 = vadd.f32 %v2608_v9, %v2142_v58  ;;  %v2022_v60 = vpop.f32.mrf.mxu1  ;;  %v11530_v49 = vpack.c.bf16 %v11528_v11, %v11529_v63  ;;  %v11535_v63 = vld [vmem:[#allocation12_spill] sm:$0xff] }
 0x42c   : > { %7153 = vmatmul.msk.bf16.gmra.mxu2 %vm1444_vm3, %v2947_v22  ;;  %v2929_v22 = vld [vmem:[#allocation2 + $0x70] sm:$0xff] }
 0x42d   : > { %7178 = vmatmul.msk.bf16.gmra.mxu3 %vm1444_vm3, %v11527_v2  ;;  %v2948_v39 = vpack.c.bf16 %v2930_v37, %v2929_v22  ;;  %v2932_v37 = vld [vmem:[#allocation2 + $0x88] sm:$0xff]  ;;  %v2931_v22 = vld [vmem:[#allocation2 + $0x80] sm:$0xff] }
 0x42e   : > { %v2144_v43 = vpop.f32.mrf.mxu2 }
 0x42f   : > { %v2145_v30 = vadd.f32 %v2144_v43, %v2020_v5  ;;  %v2611_v24 = vpop.f32.mrf.mxu3  ;;  %v11531_v5 = vld [vmem:[#allocation22_spill] sm:$0xff] }
 0x430   : > { %v11533_v57 = vpack.c.bf16 %v11531_v5, %v11532_v19  ;;  %v2949_v5 = vpack.c.bf16 %v2932_v37, %v2931_v22  ;;  %v2934_v22 = vld [vmem:[#allocation2 + $0x98] sm:$0xff] }
 0x431   : > { %v10081_v61 = vadd.f32 %v2611_v24, %v2145_v30 }
 0x435   : > { %v2025_v25 = vpop.f32.mrf.mxu1 }
 0x436   : > { %v2146_v9 = vpop.f32.mrf.mxu2 }
 0x437   : > { %v2147_v58 = vadd.f32 %v2146_v9, %v2022_v60  ;;  %v2613_v6 = vpop.f32.mrf.mxu3  ;;  %v11534_v60 = vld [vmem:[#allocation24_spill] sm:$0xff] }
 0x438   : > { %7129 = vmatmul.msk.bf16.gmra.mxu1 %vm1444_vm3, %v11530_v49  ;;  %v11536_v49 = vpack.c.bf16 %v11534_v60, %v11535_v63 }
 0x439   : > { %v10087_v14 = vadd.f32 %v2613_v6, %v2147_v58 }
 0x43c   : > { %7154 = vmatmul.msk.bf16.gmra.mxu2 %vm1444_vm3, %v2948_v39 }
 0x43d   : > { %v2027_v56 = vpop.f32.mrf.mxu1  ;;  %7179 = vmatmul.msk.bf16.gmra.mxu3 %vm1444_vm3, %v11533_v57  ;;  %v11538_v57 = vld [vmem:[#allocation37_spill] sm:$0xff] }
 0x43f   : > { %v2149_v2 = vpop.f32.mrf.mxu2 }
 0x440   : > { %v2150_v43 = vadd.f32 %v2149_v2, %v2025_v25  ;;  %v2616_v30 = vpop.f32.mrf.mxu3  ;;  %v11537_v25 = vld [vmem:[#allocation38_spill] sm:$0xff] }
 0x441   : > { %v11539_v2 = vpack.c.bf16 %v11537_v25, %v11538_v57 }
 0x442   : > { %v10094_v24 = vadd.f32 %v2616_v30, %v2150_v43 }
 0x445   : > { %v2030_v11 = vpop.f32.mrf.mxu1 }
 0x447   : > { %v2151_v9 = vpop.f32.mrf.mxu2 }
 0x448   : > { %7130 = vmatmul.msk.bf16.gmra.mxu1 %vm1444_vm3, %v11536_v49  ;;  %v2152_v58 = vadd.f32 %v2151_v9, %v2027_v56  ;;  %v2618_v6 = vpop.f32.mrf.mxu3  ;;  %v11540_v56 = vld [vmem:[#allocation74_spill] sm:$0xff] }
 0x44a   : > { %v10100_v39 = vadd.f32 %v2618_v6, %v2152_v58  ;;  %v11542_v58 = vld [vmem:[#allocation39_spill] sm:$0xff] }
 0x44b   : > { %v11543_v6 = vpack.c.bf16 %v11541_v50, %v11542_v58 }
 0x44c   : > { %7155 = vmatmul.msk.bf16.gmra.mxu2 %vm1444_vm3, %v2949_v5 }
 0x44d   : > { %v2032_v19 = vpop.f32.mrf.mxu1  ;;  %7180 = vmatmul.msk.bf16.gmra.mxu3 %vm1444_vm3, %v11539_v2 }
 0x44e   : > { %v2933_v19 = vld [vmem:[#allocation2 + $0x90] sm:$0xff] }
 0x44f   : > { %v2154_v43 = vpop.f32.mrf.mxu2  ;;  %v2950_v25 = vpack.c.bf16 %v2934_v22, %v2933_v19  ;;  %v11550_v22 = vld [vmem:[#allocation27_spill] sm:$0xff] }
 0x450   : > { %v2155_v30 = vadd.f32 %v2154_v43, %v2030_v11  ;;  %v2621_v60 = vpop.f32.mrf.mxu3  ;;  %v11544_v11 = vld [vmem:[#allocation15_spill] sm:$0xff]  ;;  %v11545_v43 = vld [vmem:[#allocation26_spill] sm:$0xff]  ;;  %v11551_v19 = vpack.c.bf16 %v11549_v3, %v11550_v22  ;;  %v11553_v22 = vpack.c.bf16 %v9845_v7, %v9839_v51  ;;  %v11554_v7 = vpack.c.bf16 %v9888_v32, %v9842_v31 }
 0x452   : > { %v10107_v63 = vadd.f32 %v2621_v60, %v2155_v30  ;;  %v11546_v30 = vld [vmem:[#allocation72_spill] sm:$0xff] }
 0x453   : > { %v11547_v60 = vpack.c.bf16 %v11545_v43, %v11546_v30  ;;  %v2935_v43 = vld [vmem:[#allocation2 + $0xa0] sm:$0xff] }
 0x455   : > { %v2828_v49 = vpop.f32.mrf.mxu1 }
 0x456   : > { %v2892_v9 = vadd.f32 %v2828_v49, %v11540_v56 }
 0x457   : > { %v2156_v37 = vpop.f32.mrf.mxu2 }
 0x458   : > { %7131 = vmatmul.msk.bf16.gmra.mxu1 %vm1444_vm3, %v11543_v6  ;;  %v2623_v5 = vpop.f32.mrf.mxu3  ;;  %v11548_v37 = vld [vmem:[#allocation16_spill] sm:$0xff] }
 0x45c   : > { %7156 = vmatmul.msk.bf16.gmra.mxu2 %vm1444_vm3, %v2950_v25 }
 0x45d   : > { %v2830_v57 = vpop.f32.mrf.mxu1  ;;  %7181 = vmatmul.msk.bf16.gmra.mxu3 %vm1444_vm3, %v11547_v60 }
 0x45e   : > { %v2893_v2 = vadd.f32 %v2830_v57, %v11544_v11  ;;  %v2936_v57 = vld [vmem:[#allocation2 + $0xa8] sm:$0xff] }
 0x45f   : > { %v3020_v49 = vpop.f32.mrf.mxu2  ;;  %v2951_v60 = vpack.c.bf16 %v2936_v57, %v2935_v43 }
 0x460   : > { %v3084_v56 = vadd.f32 %v3020_v49, %v2892_v9  ;;  %v3287_v50 = vpop.f32.mrf.mxu3 }
 0x462   : > { %v10120_v58 = vadd.f32 %v3287_v50, %v3084_v56  ;;  %v11552_v56 = vpack.c.bf16 %v9804_v12, %v9767_v54  ;;  %v2937_v54 = vld [vmem:[#allocation2 + $0xb0] sm:$0xff] }
 0x465   : > { %v2833_v6 = vpop.f32.mrf.mxu1 }
 0x466   : > { %v2894_v5 = vadd.f32 %v2833_v6, %v11548_v37 }
 0x467   : > { %v3022_v25 = vpop.f32.mrf.mxu2 }
 0x468   : > { %7132 = vmatmul.msk.bf16.gmra.mxu1 %vm1444_vm3, %v11551_v19  ;;  %v3085_v11 = vadd.f32 %v3022_v25, %v2893_v2  ;;  %v3289_v55 = vpop.f32.mrf.mxu3 }
 0x46a   : > { %v10127_v30 = vadd.f32 %v3289_v55, %v3085_v11 }
 0x46c   : > { %7157 = vmatmul.msk.bf16.gmra.mxu2 %vm1444_vm3, %v2951_v60 }
 0x46d   : > { %v2835_v9 = vpop.f32.mrf.mxu1  ;;  %7182 = vmatmul.msk.bf16.gmra.mxu3 %vm1444_vm3, %v11552_v56 }
 0x46e   : > { %v2895_v49 = vadd.f32 %v2835_v9, %v9814_v21  ;;  %v2938_v21 = vld [vmem:[#allocation2 + $0xb8] sm:$0xff] }
 0x46f   : > { %v3025_v3 = vpop.f32.mrf.mxu2  ;;  %v2952_v11 = vpack.c.bf16 %v2938_v21, %v2937_v54 }
 0x470   : > { %v3086_v50 = vadd.f32 %v3025_v3, %v2894_v5  ;;  %v3292_v6 = vpop.f32.mrf.mxu3  ;;  %v8272_v5 = vld [vmem:[%s11246_s6 + $0x3e0] sm:$0xff] }
 0x471   : > { %6510 = vmatpush.bf16.msrb.mxu0 %v8272_v5 }
 0x472   : > { %v10135_v37 = vadd.f32 %v3292_v6, %v3086_v50  ;;  %v2674_v50 = vld [vmem:[#allocation2 + $0xcf] sm:$0xf]  ;;  %v11555_v6 = vpack.c.bf16 %v9917_v28, %v9914_v23  ;;  %v11556_v23 = vld [vmem:[#allocation77_spill] sm:$0xff] }
 0x473   : > { %v2699_v32 = vpack.c.bf16 %v2674_v50, %v2674_v50  ;;  %v11557_v28 = vpack.c.bf16 %v9920_v62, %v11556_v23  ;;  %v11558_v23 = vld [vmem:[#allocation50_spill] sm:$0xff] }
 0x475   : > { %v2838_v2 = vpop.f32.mrf.mxu1 }
 0x476   : > { %v2896_v55 = vadd.f32 %v2838_v2, %v9862_v47  ;;  %v2940_v2 = vld [vmem:[#allocation2 + $0xc8] sm:$0xff] }
 0x477   : > { %v3027_v19 = vpop.f32.mrf.mxu2 }
 0x478   : > { %7133 = vmatmul.msk.bf16.gmra.mxu1 %vm1444_vm3, %v11553_v22  ;;  %v3087_v25 = vadd.f32 %v3027_v19, %v2895_v49  ;;  %v3294_v57 = vpop.f32.mrf.mxu3  ;;  %v2939_v19 = vld [vmem:[#allocation2 + $0xc0] sm:$0xff] }
 0x47a   : > { %v10142_v12 = vadd.f32 %v3294_v57, %v3087_v25  ;;  %v3133_v57 = vld [vmem:[#allocation2 + $0xd1] sm:$0xf] }
 0x47b   : > { %v3158_v5 = vpack.c.bf16 %v3133_v57, %v3133_v57 }
 0x47c   : > { %7158 = vmatmul.msk.bf16.gmra.mxu2 %vm1444_vm3, %v2952_v11 }
 0x47d   : > { %v2840_v43 = vpop.f32.mrf.mxu1  ;;  %7183 = vmatmul.msk.bf16.gmra.mxu3 %vm1444_vm3, %v11554_v7 }
 0x47e   : > { %v2897_v51 = vadd.f32 %v2840_v43, %v9892_v40 }
 0x47f   : > { %v3030_v47 = vpop.f32.mrf.mxu2 }
 0x480   : > { %v3088_v60 = vadd.f32 %v3030_v47, %v2896_v55  ;;  %v3297_v9 = vpop.f32.mrf.mxu3  ;;  %v2953_v55 = vpack.c.bf16 %v2940_v2, %v2939_v19 }
 0x482   : > { %v10153_v49 = vadd.f32 %v3297_v9, %v3088_v60  ;;  %v3183_v60 = vunpack.c.l.bf16 %v3158_v5 }
 0x484   : > { %v3208_v62 = vmul.f32 %v3183_v60, %v9894_v27 }
 0x485   : > { %v2843_v56 = vpop.f32.mrf.mxu1 }
 0x486   : > { %v2898_v3 = vadd.f32 %v2843_v56, %v9928_v35  ;;  %v2724_v35 = vunpack.c.l.bf16 %v2699_v32 }
 0x487   : > { %v3032_v40 = vpop.f32.mrf.mxu2 }
 0x488   : > { %7134 = vmatmul.msk.bf16.gmra.mxu1 %vm1444_vm3, %v11555_v6  ;;  %v3089_v22 = vadd.f32 %v3032_v40, %v2897_v51  ;;  %v3299_v31 = vpop.f32.mrf.mxu3  ;;  %v2749_v7 = vmul.f32 %v2724_v35, %v9923_v36  ;;  %v2941_v6 = vld [vmem:[#allocation2 + $0xd0] sm:$0xf] }
 0x48a   : > { %v10160_v21 = vadd.f32 %v3299_v31, %v3089_v22  ;;  %v2762_v56 = vpack.c.bf16 %v2749_v7, %v2749_v7  ;;  %v3221_v31 = vpack.c.bf16 %v3208_v62, %v3208_v62 }
 0x48c   : > { %7159 = vmatmul.msk.bf16.gmra.mxu2 %vm1444_vm3, %v2953_v55 }
 0x48d   : > { %v2845_v25 = vpop.f32.mrf.mxu1  ;;  %7184 = vmatmul.msk.bf16.gmra.mxu3 %vm1444_vm3, %v11557_v28  ;;  %v11559_v28 = vld [vmem:[#allocation51_spill] sm:$0xff] }
 0x48e   : > { %v2899_v54 = vadd.f32 %v2845_v25, %v9977_v53 }
 0x48f   : > { %v3035_v11 = vpop.f32.mrf.mxu2 }
 0x490   : > { %v3090_v43 = vadd.f32 %v3035_v11, %v2898_v3  ;;  %v3302_v51 = vpop.f32.mrf.mxu3  ;;  %v2954_v3 = vpack.c.bf16 %v2941_v6, %v2941_v6  ;;  %v11560_v11 = vpack.c.bf16 %v11558_v23, %v11559_v28  ;;  %v3645_v28 = vld [vmem:[#allocation2 + $0x2e] sm:$0xff] }
 0x492   : > { %v10169_v47 = vadd.f32 %v3302_v51, %v3090_v43  ;;  %v3644_v43 = vld [vmem:[#allocation2 + $0x26] sm:$0xff] }
 0x495   : > { %v2848_v9 = vpop.f32.mrf.mxu1 }
 0x496   : > { %v2900_v50 = vadd.f32 %v2848_v9, %v9992_v46 }
 0x497   : > { %v3037_v53 = vpop.f32.mrf.mxu2 }
 0x498   : > { %7135 = vmatmul.msk.bf16.gmra.mxu1 %vm1444_vm3, %v2762_v56  ;;  %v3091_v40 = vadd.f32 %v3037_v53, %v2899_v54  ;;  %v3304_v2 = vpop.f32.mrf.mxu3  ;;  %v11561_v53 = vld [vmem:[#allocation49_spill] sm:$0xff] }
 0x49a   : > { %v10174_v22 = vadd.f32 %v3304_v2, %v3091_v40 }
 0x49c   : > { %7160 = vmatmul.msk.bf16.gmra.mxu2 %vm1444_vm3, %v2954_v3 }
 0x49d   : > { %v2850_v32 = vpop.f32.mrf.mxu1  ;;  %7185 = vmatmul.msk.bf16.gmra.mxu3 %vm1444_vm3, %v3221_v31 }
 0x49e   : > { %v2901_v19 = vadd.f32 %v2850_v32, %v10000_v45  ;;  %v3643_v45 = vld [vmem:[#allocation2 + $0x1e] sm:$0xff] }
 0x49f   : > { %v3040_v46 = vpop.f32.mrf.mxu2  ;;  %v3668_v9 = vpack.c.bf16 %v3644_v43, %v3643_v45 }
 0x4a0   : > { %v3092_v55 = vadd.f32 %v3040_v46, %v2900_v50  ;;  %v3307_v25 = vpop.f32.mrf.mxu3  ;;  %v11565_v46 = vld [vmem:[#allocation54_spill] sm:$0xff] }
 0x4a2   : > { %v10179_v57 = vadd.f32 %v3307_v25, %v3092_v55 }
 0x4a5   : > { %v2853_v35 = vpop.f32.mrf.mxu1 }
 0x4a6   : > { %v2902_v54 = vadd.f32 %v2853_v35, %v10004_v26  ;;  %v11562_v26 = vld [vmem:[#allocation47_spill] sm:$0xff] }
 0x4a7   : > { %v3042_v5 = vpop.f32.mrf.mxu2  ;;  %v11563_v6 = vpack.c.bf16 %v11561_v53, %v11562_v26 }
 0x4a8   : > { %7198 = vmatmul.msk.bf16.vlgmr.msra.gmra.mxu1 %vm1444_vm3, %v11560_v11  ;;  %v3093_v51 = vadd.f32 %v3042_v5, %v2901_v19  ;;  %v3309_v7 = vpop.f32.mrf.mxu3  ;;  %v11564_v19 = vld [vmem:[#allocation53_spill] sm:$0xff] }
 0x4a9   : > { %v11566_v55 = vpack.c.bf16 %v11564_v19, %v11565_v46  ;;  %v3647_v46 = vld [vmem:[#allocation2 + $0x3e] sm:$0xff] }
 0x4aa   : > { %v10186_v60 = vadd.f32 %v3309_v7, %v3093_v51  ;;  %v11567_v51 = vld [vmem:[#allocation55_spill] sm:$0xff] }
 0x4ac   : > { %7223 = vmatmul.msk.bf16.vlgmr.msra.gmra.mxu2 %vm1444_vm3, %v3668_v9 }
 0x4ad   : > { %v2855_v56 = vpop.f32.mrf.mxu1  ;;  %7248 = vmatmul.msk.bf16.vlgmr.msra.gmra.mxu3 %vm1444_vm3, %v11563_v6  ;;  %v11570_v6 = vld [vmem:[#allocation60_spill] sm:$0xff] }
 0x4ae   : > { %v2903_v50 = vadd.f32 %v2855_v56, %v10010_v44  ;;  %v3646_v44 = vld [vmem:[#allocation2 + $0x36] sm:$0xff] }
 0x4af   : > { %v3045_v62 = vpop.f32.mrf.mxu2  ;;  %v3669_v5 = vpack.c.bf16 %v3646_v44, %v3645_v28 }
 0x4b0   : > { %v3094_v40 = vadd.f32 %v3045_v62, %v2902_v54  ;;  %v3312_v2 = vpop.f32.mrf.mxu3  ;;  %v11571_v62 = vld [vmem:[#allocation59_spill] sm:$0xff] }
 0x4b2   : > { %v10194_v3 = vadd.f32 %v3312_v2, %v3094_v40  ;;  %v11572_v40 = vpack.c.bf16 %v11570_v6, %v11571_v62  ;;  %v3649_v62 = vld [vmem:[#allocation2 + $0x4e] sm:$0xff] }
 0x4b5   : > { %v2858_v31 = vpop.f32.mrf.mxu1 }
 0x4b6   : > { %v2904_v32 = vadd.f32 %v2858_v31, %v10017_v38  ;;  %v11568_v38 = vld [vmem:[#allocation52_spill] sm:$0xff] }
 0x4b7   : > { %v3047_v25 = vpop.f32.mrf.mxu2  ;;  %v11569_v7 = vpack.c.bf16 %v11567_v51, %v11568_v38 }
 0x4b8   : > { %7199 = vmatmul.msk.bf16.gmra.mxu1 %vm1444_vm3, %v11566_v55  ;;  %v3095_v35 = vadd.f32 %v3047_v25, %v2903_v50  ;;  %v3314_v23 = vpop.f32.mrf.mxu3 }
 0x4ba   : > { %v10201_v11 = vadd.f32 %v3314_v23, %v3095_v35  ;;  %v11573_v35 = vld [vmem:[#allocation31_spill] sm:$0xff] }
 0x4bc   : > { %7224 = vmatmul.msk.bf16.gmra.mxu2 %vm1444_vm3, %v3669_v5 }
 0x4bd   : > { %v2860_v54 = vpop.f32.mrf.mxu1  ;;  %7249 = vmatmul.msk.bf16.gmra.mxu3 %vm1444_vm3, %v11569_v7  ;;  %v11576_v7 = vld [vmem:[#allocation63_spill] sm:$0xff] }
 0x4be   : > { %v2905_v43 = vadd.f32 %v2860_v54, %v10023_v52  ;;  %v3648_v52 = vld [vmem:[#allocation2 + $0x46] sm:$0xff] }
 0x4bf   : > { %v3050_v45 = vpop.f32.mrf.mxu2  ;;  %v3670_v25 = vpack.c.bf16 %v3648_v52, %v3647_v46  ;;  %v8271_v46 = vld [vmem:[%s11246_s6 + $0x3d8] sm:$0xff] }
 0x4c0   : > { %v3096_v9 = vadd.f32 %v3050_v45, %v2904_v32  ;;  %v3317_v56 = vpop.f32.mrf.mxu3  ;;  %v11577_v45 = vld [vmem:[#allocation62_spill] sm:$0xff]  ;;  %6511 = vmatpush.bf16.msrb.mxu0 %v8271_v46  ;;  %v11588_v46 = vld [vmem:[#allocation11_spill] sm:$0xff] }
 0x4c2   : > { %v10209_v53 = vadd.f32 %v3317_v56, %v3096_v9  ;;  %v11578_v9 = vpack.c.bf16 %v11576_v7, %v11577_v45 }
 0x4c5   : > { %v2863_v50 = vpop.f32.mrf.mxu1 }
 0x4c6   : > { %v2906_v26 = vadd.f32 %v2863_v50, %v10030_v16  ;;  %v11574_v16 = vld [vmem:[#allocation8_spill] sm:$0xff] }
 0x4c7   : > { %v3052_v2 = vpop.f32.mrf.mxu2  ;;  %v11575_v23 = vpack.c.bf16 %v11573_v35, %v11574_v16 }
 0x4c8   : > { %7200 = vmatmul.msk.bf16.gmra.mxu1 %vm1444_vm3, %v11572_v40  ;;  %v3097_v31 = vadd.f32 %v3052_v2, %v2905_v43  ;;  %v3319_v19 = vpop.f32.mrf.mxu3 }
 0x4ca   : > { %v10216_v55 = vadd.f32 %v3319_v19, %v3097_v31  ;;  %v11579_v31 = vld [vmem:[#allocation64_spill] sm:$0xff] }
 0x4cc   : > { %7225 = vmatmul.msk.bf16.gmra.mxu2 %vm1444_vm3, %v3670_v25 }
 0x4cd   : > { %v2865_v32 = vpop.f32.mrf.mxu1  ;;  %7250 = vmatmul.msk.bf16.gmra.mxu3 %vm1444_vm3, %v11575_v23 }
 0x4ce   : > { %v2907_v44 = vadd.f32 %v2865_v32, %v10036_v1  ;;  %v3650_v1 = vld [vmem:[#allocation2 + $0x56] sm:$0xff] }
 0x4cf   : > { %v3055_v28 = vpop.f32.mrf.mxu2  ;;  %v3671_v2 = vpack.c.bf16 %v3650_v1, %v3649_v62 }
 0x4d0   : > { %v3098_v5 = vadd.f32 %v3055_v28, %v2906_v26  ;;  %v3322_v54 = vpop.f32.mrf.mxu3  ;;  %v11582_v28 = vld [vmem:[#allocation67_spill] sm:$0xff] }
 0x4d2   : > { %v10224_v51 = vadd.f32 %v3322_v54, %v3098_v5 }
 0x4d5   : > { %v2868_v43 = vpop.f32.mrf.mxu1 }
 0x4d6   : > { %v2908_v38 = vadd.f32 %v2868_v43, %v10043_v33  ;;  %v11580_v33 = vld [vmem:[#allocation33_spill] sm:$0xff]  ;;  %v3652_v43 = vld [vmem:[#allocation2 + $0x66] sm:$0xff] }
 0x4d7   : > { %v3057_v56 = vpop.f32.mrf.mxu2  ;;  %v11581_v19 = vpack.c.bf16 %v11579_v31, %v11580_v33 }
 0x4d8   : > { %7201 = vmatmul.msk.bf16.gmra.mxu1 %vm1444_vm3, %v11578_v9  ;;  %v3099_v50 = vadd.f32 %v3057_v56, %v2907_v44  ;;  %v3324_v6 = vpop.f32.mrf.mxu3  ;;  %v3651_v9 = vld [vmem:[#allocation2 + $0x5e] sm:$0xff] }
 0x4d9   : > { %v3672_v1 = vpack.c.bf16 %v3652_v43, %v3651_v9 }
 0x4da   : > { %v10231_v40 = vadd.f32 %v3324_v6, %v3099_v50  ;;  %v11585_v6 = vld [vmem:[#allocation21_spill] sm:$0xff] }
 0x4dc   : > { %7226 = vmatmul.msk.bf16.gmra.mxu2 %vm1444_vm3, %v3671_v2 }
 0x4dd   : > { %v2870_v26 = vpop.f32.mrf.mxu1  ;;  %7251 = vmatmul.msk.bf16.gmra.mxu3 %vm1444_vm3, %v11581_v19 }
 0x4de   : > { %v2909_v52 = vadd.f32 %v2870_v26, %v10049_v20  ;;  %v11583_v20 = vld [vmem:[#allocation34_spill] sm:$0xff] }
 0x4df   : > { %v3060_v25 = vpop.f32.mrf.mxu2  ;;  %v11584_v5 = vpack.c.bf16 %v11582_v28, %v11583_v20  ;;  %v3653_v20 = vld [vmem:[#allocation2 + $0x6e] sm:$0xff] }
 0x4e0   : > { %v3100_v32 = vadd.f32 %v3060_v25, %v2908_v38  ;;  %v3327_v44 = vpop.f32.mrf.mxu3  ;;  %v11589_v25 = vld [vmem:[#allocation23_spill] sm:$0xff] }
 0x4e2   : > { %v10242_v35 = vadd.f32 %v3327_v44, %v3100_v32  ;;  %v11590_v32 = vpack.c.bf16 %v11588_v46, %v11589_v25  ;;  %v3655_v25 = vld [vmem:[#allocation2 + $0x7e] sm:$0xff] }
 0x4e5   : > { %v2873_v16 = vpop.f32.mrf.mxu1 }
 0x4e6   : > { %v2910_v23 = vadd.f32 %v2873_v16, %v10059_v59  ;;  %v11586_v59 = vld [vmem:[#allocation10_spill] sm:$0xff] }
 0x4e7   : > { %v3062_v54 = vpop.f32.mrf.mxu2  ;;  %v11587_v62 = vpack.c.bf16 %v11585_v6, %v11586_v59 }
 0x4e8   : > { %7202 = vmatmul.msk.bf16.gmra.mxu1 %vm1444_vm3, %v11584_v5  ;;  %v3101_v7 = vadd.f32 %v3062_v54, %v2909_v52  ;;  %v3329_v45 = vpop.f32.mrf.mxu3 }
 0x4ea   : > { %v10249_v56 = vadd.f32 %v3329_v45, %v3101_v7  ;;  %v11591_v7 = vld [vmem:[#allocation36_spill] sm:$0xff] }
 0x4ec   : > { %7227 = vmatmul.msk.bf16.gmra.mxu2 %vm1444_vm3, %v3672_v1 }
 0x4ed   : > { %v2875_v38 = vpop.f32.mrf.mxu1  ;;  %7252 = vmatmul.msk.bf16.gmra.mxu3 %vm1444_vm3, %v11587_v62  ;;  %v11594_v62 = vld [vmem:[#allocation14_spill] sm:$0xff] }
 0x4ee   : > { %v2911_v50 = vadd.f32 %v2875_v38, %v10065_v41  ;;  %v3654_v41 = vld [vmem:[#allocation2 + $0x76] sm:$0xff] }
 0x4ef   : > { %v3065_v2 = vpop.f32.mrf.mxu2  ;;  %v3673_v54 = vpack.c.bf16 %v3654_v41, %v3653_v20 }
 0x4f0   : > { %v3102_v26 = vadd.f32 %v3065_v2, %v2910_v23  ;;  %v3332_v31 = vpop.f32.mrf.mxu3  ;;  %v11595_v2 = vld [vmem:[#allocation25_spill] sm:$0xff] }
 0x4f2   : > { %v10257_v33 = vadd.f32 %v3332_v31, %v3102_v26  ;;  %v11596_v26 = vpack.c.bf16 %v11594_v62, %v11595_v2  ;;  %v3657_v2 = vld [vmem:[#allocation2 + $0x8e] sm:$0xff] }
 0x4f5   : > { %v2878_v52 = vpop.f32.mrf.mxu1 }
 0x4f6   : > { %v2912_v19 = vadd.f32 %v2878_v52, %v10081_v61  ;;  %v11592_v61 = vld [vmem:[#allocation13_spill] sm:$0xff] }
 0x4f7   : > { %v3067_v44 = vpop.f32.mrf.mxu2  ;;  %v11593_v45 = vpack.c.bf16 %v11591_v7, %v11592_v61 }
 0x4f8   : > { %7203 = vmatmul.msk.bf16.gmra.mxu1 %vm1444_vm3, %v11590_v32  ;;  %v3103_v16 = vadd.f32 %v3067_v44, %v2911_v50  ;;  %v3334_v28 = vpop.f32.mrf.mxu3 }
 0x4fa   : > { %v10264_v5 = vadd.f32 %v3334_v28, %v3103_v16  ;;  %v11597_v16 = vld [vmem:[#allocation76_spill] sm:$0xff] }
 0x4fc   : > { %7228 = vmatmul.msk.bf16.gmra.mxu2 %vm1444_vm3, %v3673_v54 }
 0x4fd   : > { %v2880_v23 = vpop.f32.mrf.mxu1  ;;  %7253 = vmatmul.msk.bf16.gmra.mxu3 %vm1444_vm3, %v11593_v45  ;;  %v11600_v45 = vld [vmem:[#allocation29_spill] sm:$0xff] }
 0x4fe   : > { %v2913_v43 = vadd.f32 %v2880_v23, %v10087_v14  ;;  %v3656_v14 = vld [vmem:[#allocation2 + $0x86] sm:$0xff] }
 0x4ff   : > { %v3070_v9 = vpop.f32.mrf.mxu2  ;;  %v3674_v44 = vpack.c.bf16 %v3656_v14, %v3655_v25  ;;  %v11603_v14 = vld [vmem:[#allocation28_spill] sm:$0xff] }
 0x500   : > { %v3104_v1 = vadd.f32 %v3070_v9, %v2912_v19  ;;  %v3337_v38 = vpop.f32.mrf.mxu3  ;;  %v11601_v9 = vld [vmem:[#allocation17_spill] sm:$0xff] }
 0x502   : > { %v10272_v6 = vadd.f32 %v3337_v38, %v3104_v1  ;;  %v11602_v1 = vpack.c.bf16 %v11600_v45, %v11601_v9 }
 0x505   : > { %v2883_v50 = vpop.f32.mrf.mxu1 }
 0x506   : > { %v2914_v59 = vadd.f32 %v2883_v50, %v10094_v24  ;;  %v11598_v24 = vld [vmem:[#allocation75_spill] sm:$0xff] }
 0x507   : > { %v3072_v31 = vpop.f32.mrf.mxu2  ;;  %v11599_v28 = vpack.c.bf16 %v11597_v16, %v11598_v24  ;;  %v11607_v24 = vld [vmem:[#allocation18_spill] sm:$0xff] }
 0x508   : > { %7204 = vmatmul.msk.bf16.gmra.mxu1 %vm1444_vm3, %v11596_v26  ;;  %v3105_v52 = vadd.f32 %v3072_v31, %v2913_v43  ;;  %v3339_v46 = vpop.f32.mrf.mxu3 }
 0x50a   : > { %v10279_v32 = vadd.f32 %v3339_v46, %v3105_v52  ;;  %v11604_v52 = vld [vmem:[#allocation19_spill] sm:$0xff] }
 0x50b   : > { %v11605_v46 = vpack.c.bf16 %v11603_v14, %v11604_v52 }
 0x50c   : > { %7229 = vmatmul.msk.bf16.gmra.mxu2 %vm1444_vm3, %v3674_v44 }
 0x50d   : > { %v2885_v19 = vpop.f32.mrf.mxu1  ;;  %7254 = vmatmul.msk.bf16.gmra.mxu3 %vm1444_vm3, %v11599_v28 }
 0x50e   : > { %v2915_v41 = vadd.f32 %v2885_v19, %v10100_v39  ;;  %v3658_v39 = vld [vmem:[#allocation2 + $0x96] sm:$0xff] }
 0x50f   : > { %v3075_v20 = vpop.f32.mrf.mxu2  ;;  %v3675_v31 = vpack.c.bf16 %v3658_v39, %v3657_v2 }
 0x510   : > { %v3106_v54 = vadd.f32 %v3075_v20, %v2914_v59  ;;  %v3342_v23 = vpop.f32.mrf.mxu3 }
 0x512   : > { %v10287_v7 = vadd.f32 %v3342_v23, %v3106_v54  ;;  %v3660_v54 = vld [vmem:[#allocation2 + $0xa6] sm:$0xff] }
 0x515   : > { %v2888_v43 = vpop.f32.mrf.mxu1 }
 0x516   : > { %v2916_v61 = vadd.f32 %v2888_v43, %v10107_v63  ;;  %v3659_v43 = vld [vmem:[#allocation2 + $0x9e] sm:$0xff] }
 0x517   : > { %v3077_v38 = vpop.f32.mrf.mxu2  ;;  %v3676_v45 = vpack.c.bf16 %v3660_v54, %v3659_v43 }
 0x518   : > { %7205 = vmatmul.msk.bf16.gmra.mxu1 %vm1444_vm3, %v11602_v1  ;;  %v3107_v50 = vadd.f32 %v3077_v38, %v2915_v41  ;;  %v3344_v62 = vpop.f32.mrf.mxu3  ;;  %v11606_v41 = vld [vmem:[#allocation30_spill] sm:$0xff]  ;;  %v11610_v38 = vld [vmem:[#allocation41_spill] sm:$0xff] }
 0x519   : > { %v11608_v28 = vpack.c.bf16 %v11606_v41, %v11607_v24  ;;  %v11609_v1 = vld [vmem:[#allocation42_spill] sm:$0xff] }
 0x51a   : > { %v10294_v26 = vadd.f32 %v3344_v62, %v3107_v50 }
 0x51c   : > { %7230 = vmatmul.msk.bf16.gmra.mxu2 %vm1444_vm3, %v3675_v31  ;;  %v10316_v31 = vld [vmem:[%s11244_s4] ss:$0 sm:$0xff] }
 0x51d   : > { %v2890_v59 = vpop.f32.mrf.mxu1  ;;  %7255 = vmatmul.msk.bf16.gmra.mxu3 %vm1444_vm3, %v11605_v46 }
 0x51f   : > { %v3080_v63 = vpop.f32.mrf.mxu2 }
 0x520   : > { %v3108_v25 = vadd.f32 %v3080_v63, %v2916_v61  ;;  %v3347_v44 = vpop.f32.mrf.mxu3  ;;  %v11611_v61 = vpack.c.bf16 %v11609_v1, %v11610_v38  ;;  %v11612_v63 = vld [vmem:[#allocation43_spill] sm:$0xff] }
 0x522   : > { %v10301_v19 = vadd.f32 %v3347_v44, %v3108_v25  ;;  %v11613_v25 = vld [vmem:[#allocation44_spill] sm:$0xff] }
 0x525   : > { %v3554_v16 = vpop.f32.mrf.mxu1 }
 0x526   : > { %v3618_v39 = vadd.f32 %v3554_v16, %v10120_v58  ;;  %v11614_v58 = vpack.c.bf16 %v11612_v63, %v11613_v25  ;;  %v3662_v16 = vld [vmem:[#allocation2 + $0xb6] sm:$0xff] }
 0x527   : > { %v3082_v20 = vpop.f32.mrf.mxu2 }
 0x528   : > { %7206 = vmatmul.msk.bf16.gmra.mxu1 %vm1444_vm3, %v11608_v28  ;;  %v3349_v23 = vpop.f32.mrf.mxu3  ;;  %v3661_v28 = vld [vmem:[#allocation2 + $0xae] sm:$0xff] }
 0x529   : > { %v3677_v54 = vpack.c.bf16 %v3662_v16, %v3661_v28 }
 0x52c   : > { %7231 = vmatmul.msk.bf16.gmra.mxu2 %vm1444_vm3, %v3676_v45  ;;  %v8270_v45 = vld [vmem:[%s11246_s6 + $0x3d0] sm:$0xff] }
 0x52d   : > { %v3556_v9 = vpop.f32.mrf.mxu1  ;;  %7256 = vmatmul.msk.bf16.gmra.mxu3 %vm1444_vm3, %v11611_v61  ;;  %6512 = vmatpush.bf16.msrb.mxu0 %v8270_v45  ;;  %v11617_v45 = vpack.c.bf16 %v9972_v15, %v9969_v10  ;;  %v8171_v15 = vld [vmem:[%s11246_s6 + $0xb8] sm:$0xff] }
 0x52e   : > { %v3619_v46 = vadd.f32 %v3556_v9, %v10127_v30  ;;  %6338 = vmatpush.bf16.msrb.mxu3 %v8171_v15 }
 0x52f   : > { %v3746_v50 = vpop.f32.mrf.mxu2 }
 0x530   : > { %v3810_v62 = vadd.f32 %v3746_v50, %v3618_v39  ;;  %v4013_v2 = vpop.f32.mrf.mxu3 }
 0x532   : > { %v4077_v59 = vadd.f32 %v4013_v2, %v3810_v62 }
 0x534   : > { %v4106_v14 = vadd.f32 %v10316_v31, %v4077_v59 }
 0x535   : > { %v3559_v52 = vpop.f32.mrf.mxu1 }
 0x536   : > { %4132 = vst.msk [vmem:[#allocation3] sm:$0xff] %vm4131_vm5, %v4106_v14  ;;  %v3620_v30 = vadd.f32 %v3559_v52, %v10135_v37  ;;  %v4165_v37 = vlaneseq  ;;  %v3664_v14 = vld [vmem:[#allocation2 + $0xc6] sm:$0xff]  ;;  %v8155_v52 = vld [vmem:[%s11246_s6 + $0x38] sm:$0xff] }
 0x537   : > { %v3748_v44 = vpop.f32.mrf.mxu2  ;;  %6312 = vmatpush.bf16.msrb.mxu1 %v8155_v52 }
 0x538   : > { %7207 = vmatmul.msk.bf16.gmra.mxu1 %vm1444_vm3, %v11614_v58  ;;  %v3811_v41 = vadd.f32 %v3748_v44, %v3619_v46  ;;  %v4015_v24 = vpop.f32.mrf.mxu3  ;;  %vm10347_vm6 = vcmp.lt.s32.totalorder %v4165_v37, 64  ;;  %v3663_v44 = vld [vmem:[#allocation2 + $0xbe] sm:$0xff]  ;;  %vm10470_vm7 = vcmp.ge.s32.totalorder %v4165_v37, 64  ;;  %vm10475_vm8 = vcmp.lt.s32.totalorder %v4165_v37, 128 }
 0x539   : > { %vm10492_vm9 = vmand %vm10470_vm7, %vm10475_vm8 }
 0x53a   : > { %v4078_v20 = vadd.f32 %v4015_v24, %v3811_v41 }
 0x53c   : > { %v4107_v23 = vadd.f32 %v10316_v31, %v4078_v20  ;;  %7232 = vmatmul.msk.bf16.gmra.mxu2 %vm1444_vm3, %v3677_v54 }
 0x53d   : > { %v3561_v43 = vpop.f32.mrf.mxu1  ;;  %7257 = vmatmul.msk.bf16.gmra.mxu3 %vm1444_vm3, %v3944_v13  ;;  %v4158_v62 = vld [vmem:[#allocation3] sm:$0x1]  ;;  %v4159_v29 = vld [vmem:[#allocation3 + $0x1] sm:$0x1]  ;;  %v4193_v16 = vld [vmem:[#allocation3 + $0x6] sm:$0x1] }
 0x53e   : > { %4133 = vst.msk [vmem:[#allocation3 + $0x8] sm:$0xff] %vm4131_vm5, %v4107_v23  ;;  %v3621_v13 = vadd.f32 %v3561_v43, %v10142_v12  ;;  %v4160_v46 = vmax.f32 %v4158_v62, %v4159_v29  ;;  %v4194_v41 = vld [vmem:[#allocation3 + $0x7] sm:$0x1]  ;;  %v4170_v24 = vld [vmem:[#allocation3 + $0x2] sm:$0x1] }
 0x53f   : > { %v3751_v9 = vpop.f32.mrf.mxu2  ;;  %v4171_v28 = vld [vmem:[#allocation3 + $0x3] sm:$0x1]  ;;  %v4185_v23 = vld [vmem:[#allocation3 + $0x4] sm:$0x1]  ;;  %v4186_v43 = vld [vmem:[#allocation3 + $0x5] sm:$0x1] }
 0x540   : > { %v3812_v1 = vadd.f32 %v3751_v9, %v3620_v30  ;;  %v4018_v38 = vpop.f32.mrf.mxu3 }
 0x542   : > { %v4079_v61 = vadd.f32 %v4018_v38, %v3812_v1 }
 0x544   : > { %v4108_v39 = vadd.f32 %v10316_v31, %v4079_v61 }
 0x545   : > { %v3564_v50 = vpop.f32.mrf.mxu1  ;;  %v4161_v17 = vld [vmem:[#allocation3 + $0xe] sm:$0x1]  ;;  %v4162_v2 = vld [vmem:[#allocation3 + $0xf] sm:$0x1]  ;;  %v4205_v30 = vld [vmem:[#allocation3 + $0x8] sm:$0x1] }
 0x546   : > { %4134 = vst.msk [vmem:[#allocation3 + $0x10] sm:$0xff] %vm4131_vm5, %v4108_v39  ;;  %v4163_v63 = vmax.f32 %v4161_v17, %v4162_v2  ;;  %v3622_v61 = vadd.f32 %v3564_v50, %v10153_v49  ;;  %v4195_v39 = vmax.f32 %v4193_v16, %v4194_v41  ;;  %v8163_v17 = vld [vmem:[%s11246_s6 + $0x78] sm:$0xff] }
 0x547   : > { %v3753_v59 = vpop.f32.mrf.mxu2  ;;  %6325 = vmatpush.bf16.msrb.mxu2 %v8163_v17 }
 0x548   : > { %7208 = vmatmul.msk.bf16.gmra.mxu1 %vm1444_vm3, %v3486_v34  ;;  %v3813_v25 = vadd.f32 %v3753_v59, %v3621_v13  ;;  %v4020_v58 = vpop.f32.mrf.mxu3  ;;  %v4164_v8 = vmax.f32 %v4160_v46, %v4163_v63  ;;  %v3678_v34 = vpack.c.bf16 %v3664_v14, %v3663_v44  ;;  %v4206_v13 = vld [vmem:[#allocation3 + $0x9] sm:$0x1]  ;;  %v4172_v59 = vmax.f32 %v4170_v24, %v4171_v28  ;;  %v4213_v24 = vld [vmem:[#allocation3 + $0xa] sm:$0x1]  ;;  %v4214_v28 = vld [vmem:[#allocation3 + $0xb] sm:$0x1] }
 0x549   : > { %v4187_v63 = vmax.f32 %v4185_v23, %v4186_v43  ;;  %v3400_v43 = vld [vmem:[#allocation2 + $0xdd] sm:$0xf] }
 0x54a   : > { %v4080_v18 = vadd.f32 %v4020_v58, %v3813_v25  ;;  %4169 = vst.msk [vmem:[#allocation4] sm:$0x1] %vm10347_vm6, %v4164_v8 }
 0x54c   : > { %v4109_v20 = vadd.f32 %v10316_v31, %v4080_v18  ;;  %7233 = vmatmul.msk.bf16.gmra.mxu2 %vm1444_vm3, %v3678_v34  ;;  %v4207_v18 = vmax.f32 %v4205_v30, %v4206_v13  ;;  %v3665_v13 = vld [vmem:[#allocation2 + $0xce] sm:$0xff] }
 0x54d   : > { %v3566_v54 = vpop.f32.mrf.mxu1  ;;  %7258 = vmatmul.msk.bf16.gmra.mxu3 %vm1444_vm3, %v11617_v45  ;;  %v4196_v9 = vld [vmem:[#allocation3 + $0x14] sm:$0x1]  ;;  %v4197_v1 = vld [vmem:[#allocation3 + $0x15] sm:$0x1]  ;;  %v4173_v38 = vld [vmem:[#allocation3 + $0x10] sm:$0x1] }
 0x54e   : > { %4135 = vst.msk [vmem:[#allocation3 + $0x18] sm:$0xff] %vm4131_vm5, %v4109_v20  ;;  %v4198_v62 = vmax.f32 %v4196_v9, %v4197_v1  ;;  %v4174_v29 = vld [vmem:[#allocation3 + $0x11] sm:$0x1]  ;;  %v4188_v14 = vld [vmem:[#allocation3 + $0x12] sm:$0x1]  ;;  %v3623_v1 = vadd.f32 %v3566_v54, %v10160_v21 }
 0x54f   : > { %v3756_v2 = vpop.f32.mrf.mxu2  ;;  %v4175_v10 = vmax.f32 %v4173_v38, %v4174_v29  ;;  %v4189_v52 = vld [vmem:[#allocation3 + $0x13] sm:$0x1]  ;;  %v4208_v58 = vld [vmem:[#allocation3 + $0x16] sm:$0x1]  ;;  %v4209_v44 = vld [vmem:[#allocation3 + $0x17] sm:$0x1]  ;;  %v4215_v38 = vmax.f32 %v4213_v24, %v4214_v28  ;;  %v11618_v29 = vpack.c.bf16 %v9954_v0, %v9975_v48 }
 0x550   : > { %v3814_v49 = vadd.f32 %v3756_v2, %v3622_v61  ;;  %v4023_v50 = vpop.f32.mrf.mxu3  ;;  %v4199_v46 = vmax.f32 %v4195_v39, %v4198_v62  ;;  %v4190_v25 = vmax.f32 %v4188_v14, %v4189_v52  ;;  %v4210_v34 = vmax.f32 %v4208_v58, %v4209_v44  ;;  %v4225_v39 = vld [vmem:[#allocation3 + $0xc] sm:$0x1]  ;;  %v4226_v62 = vld [vmem:[#allocation3 + $0xd] sm:$0x1]  ;;  %v3666_v2 = vld [vmem:[#allocation2 + $0xd6] sm:$0xff] }
 0x551   : > { %v4176_v8 = vmax.f32 %v4172_v59, %v4175_v10  ;;  %v3425_v14 = vpack.c.bf16 %v3400_v43, %v3400_v43  ;;  %v4227_v52 = vmax.f32 %v4225_v39, %v4226_v62  ;;  %v3679_v0 = vpack.c.bf16 %v3666_v2, %v3665_v13  ;;  %v8154_v13 = vld [vmem:[%s11246_s6 + $0x30] sm:$0xff] }
 0x552   : > { %v4081_v16 = vadd.f32 %v4023_v50, %v3814_v49  ;;  %4201 = vrot.lane.b32.xlu2 %v4199_v46, %s8499_s29  ;;  %v4191_v41 = vmax.f32 %v4187_v63, %v4190_v25  ;;  %v4211_v20 = vmax.f32 %v4207_v18, %v4210_v34  ;;  %v3859_v46 = vld [vmem:[#allocation2 + $0xdf] sm:$0xf]  ;;  %v11619_v44 = vpack.c.bf16 %v9966_v4, %v9982_v42 }
 0x553   : > { %4178 = vrot.lane.b32.xlu1 %v4176_v8, %s8499_s29  ;;  %v3450_v58 = vunpack.c.l.bf16 %v3425_v14  ;;  %v3884_v18 = vpack.c.bf16 %v3859_v46, %v3859_v46  ;;  %v3667_v4 = vld [vmem:[#allocation2 + $0xde] sm:$0xf]  ;;  %6313 = vmatpush.bf16.msrb.mxu1 %v8154_v13 }
 0x554   : > { %v4110_v45 = vadd.f32 %v10316_v31, %v4081_v16  ;;  %4192 = vst.msk [vmem:[#allocation4 + $0x1] sm:$0x1] %vm10347_vm6, %v4191_v41 }
 0x555   : > { %v3569_v23 = vpop.f32.mrf.mxu1  ;;  %v4216_v9 = vld [vmem:[#allocation3 + $0x18] sm:$0x1]  ;;  %v4217_v30 = vld [vmem:[#allocation3 + $0x19] sm:$0x1]  ;;  %4212 = vst.msk [vmem:[#allocation4 + $0x2] sm:$0x1] %vm10347_vm6, %v4211_v20  ;;  %v3475_v24 = vmul.f32 %v3450_v58, %v9923_v36  ;;  %v3909_v20 = vunpack.c.l.bf16 %v3884_v18 }
 0x556   : > { %4136 = vst.msk [vmem:[#allocation3 + $0x20] sm:$0xff] %vm4131_vm5, %v4110_v45  ;;  %v4218_v61 = vmax.f32 %v4216_v9, %v4217_v30  ;;  %v4228_v59 = vld [vmem:[#allocation3 + $0x1a] sm:$0x1]  ;;  %v4229_v15 = vld [vmem:[#allocation3 + $0x1b] sm:$0x1]  ;;  %v3624_v8 = vadd.f32 %v3569_v23, %v10169_v47 }
 0x557   : > { %v3758_v17 = vpop.f32.mrf.mxu2  ;;  %v4230_v49 = vmax.f32 %v4228_v59, %v4229_v15  ;;  %v4233_v47 = vld [vmem:[#allocation3 + $0x1c] sm:$0x1]  ;;  %v4234_v23 = vld [vmem:[#allocation3 + $0x1d] sm:$0x1]  ;;  %v4245_v30 = vld [vmem:[#allocation3 + $0x1e] sm:$0x1]  ;;  %v3934_v59 = vmul.f32 %v3909_v20, %v9894_v27 }
 0x558   : > { %7209 = vmatmul.msk.bf16.gmra.mxu1 %vm1444_vm3, %v11618_v29  ;;  %v3815_v10 = vadd.f32 %v3758_v17, %v3623_v1  ;;  %v4025_v21 = vpop.f32.mrf.mxu3  ;;  %v4219_v54 = vmax.f32 %v4215_v38, %v4218_v61  ;;  %v3488_v1 = vpack.c.bf16 %v3475_v24, %v3475_v24  ;;  %v4246_v2 = vld [vmem:[#allocation3 + $0x1f] sm:$0x1]  ;;  %v8170_v15 = vld [vmem:[%s11246_s6 + $0xb0] sm:$0xff] }
 0x559   : > { %v4231_v48 = vmax.f32 %v4227_v52, %v4230_v49  ;;  %6339 = vmatpush.bf16.msrb.mxu3 %v8170_v15  ;;  %v4247_v46 = vmax.f32 %v4245_v30, %v4246_v2 }
 0x55a   : > { %v4082_v50 = vadd.f32 %v4025_v21, %v3815_v10  ;;  %4221 = vrot.lane.b32.xlu0 %v4219_v54, %s8499_s29  ;;  %v4235_v21 = vmax.f32 %v4233_v47, %v4234_v23 }
 0x55b   : > { %4232 = vst.msk [vmem:[#allocation4 + $0x3] sm:$0x1] %vm10347_vm6, %v4231_v48 }
 0x55c   : > { %v4111_v63 = vadd.f32 %v10316_v31, %v4082_v50  ;;  %7234 = vmatmul.msk.bf16.gmra.mxu2 %vm1444_vm3, %v3679_v0  ;;  %v3680_v50 = vpack.c.bf16 %v3667_v4, %v3667_v4 }
 0x55d   : > { %v3571_v25 = vpop.f32.mrf.mxu1  ;;  %7259 = vmatmul.msk.bf16.gmra.mxu3 %vm1444_vm3, %v11619_v44  ;;  %v4253_v45 = vld [vmem:[#allocation3 + $0x20] sm:$0x1]  ;;  %v4254_v43 = vld [vmem:[#allocation3 + $0x21] sm:$0x1]  ;;  %v4273_v58 = vld [vmem:[#allocation3 + $0x24] sm:$0x1] }
 0x55e   : > { %4137 = vst.msk [vmem:[#allocation3 + $0x28] sm:$0xff] %vm4131_vm5, %v4111_v63  ;;  %v3625_v62 = vadd.f32 %v3571_v25, %v10174_v22  ;;  %v4255_v36 = vmax.f32 %v4253_v45, %v4254_v43  ;;  %v8162_v22 = vld [vmem:[%s11246_s6 + $0x70] sm:$0xff]  ;;  %v4274_v44 = vld [vmem:[#allocation3 + $0x25] sm:$0x1]  ;;  %v4286_v20 = vld [vmem:[#allocation3 + $0x27] sm:$0x1] }
 0x55f   : > { %v3761_v34 = vpop.f32.mrf.mxu2  ;;  %6326 = vmatpush.bf16.msrb.mxu2 %v8162_v22  ;;  %v4265_v45 = vld [vmem:[#allocation3 + $0x22] sm:$0x1]  ;;  %v4266_v43 = vld [vmem:[#allocation3 + $0x23] sm:$0x1] }
 0x560   : > { %v3816_v16 = vadd.f32 %v3761_v34, %v3624_v8  ;;  %v4028_v41 = vpop.f32.mrf.mxu3  ;;  %v3947_v8 = vpack.c.bf16 %v3934_v59, %v3934_v59 }
 0x562   : > { %v4083_v28 = vadd.f32 %v4028_v41, %v3816_v16  ;;  %v4285_v41 = vld [vmem:[#allocation3 + $0x26] sm:$0x1] }
 0x564   : > { %v4112_v42 = vadd.f32 %v10316_v31, %v4083_v28 }
 0x565   : > { %v3574_v9 = vpop.f32.mrf.mxu1  ;;  %v4256_v38 = vld [vmem:[#allocation3 + $0x2e] sm:$0x1]  ;;  %v4257_v61 = vld [vmem:[#allocation3 + $0x2f] sm:$0x1]  ;;  %v4236_v39 = vld [vmem:[#allocation3 + $0x2a] sm:$0x1] }
 0x566   : > { %4138 = vst.msk [vmem:[#allocation3 + $0x30] sm:$0xff] %vm4131_vm5, %v4112_v42  ;;  %v4258_v29 = vmax.f32 %v4256_v38, %v4257_v61  ;;  %v4237_v17 = vld [vmem:[#allocation3 + $0x2b] sm:$0x1]  ;;  %v4248_v0 = vld [vmem:[#allocation3 + $0x2c] sm:$0x1]  ;;  %v3626_v23 = vadd.f32 %v3574_v9, %v10179_v57 }
 0x567   : > { %v3763_v10 = vpop.f32.mrf.mxu2  ;;  %v4238_v54 = vmax.f32 %v4236_v39, %v4237_v17  ;;  %v4249_v27 = vld [vmem:[#allocation3 + $0x2d] sm:$0x1]  ;;  %v4293_v18 = vld [vmem:[#allocation3 + $0x28] sm:$0x1]  ;;  %v4294_v34 = vld [vmem:[#allocation3 + $0x29] sm:$0x1] }
 0x568   : > { %7210 = vmatmul.msk.bf16.gmra.mxu1 %vm1444_vm3, %v3488_v1  ;;  %v3817_v14 = vadd.f32 %v3763_v10, %v3625_v62  ;;  %v4030_v52 = vpop.f32.mrf.mxu3  ;;  %v4259_v49 = vmax.f32 %v4255_v36, %v4258_v29  ;;  %v4250_v63 = vmax.f32 %v4248_v0, %v4249_v27  ;;  %v4295_v30 = vmax.f32 %v4293_v18, %v4294_v34 }
 0x569   : > { %v4239_v48 = vmax.f32 %v4235_v21, %v4238_v54  ;;  %v4275_v62 = vmax.f32 %v4273_v58, %v4274_v44  ;;  %v4287_v10 = vmax.f32 %v4285_v41, %v4286_v20  ;;  %v4267_v54 = vmax.f32 %v4265_v45, %v4266_v43 }
 0x56a   : > { %v4084_v25 = vadd.f32 %v4030_v52, %v3817_v14  ;;  %4261 = vrot.lane.b32.xlu2 %v4259_v49, %s8499_s29  ;;  %v4251_v16 = vmax.f32 %v4247_v46, %v4250_v63 }
 0x56b   : > { %4241 = vrot.lane.b32.xlu1 %v4239_v48, %s8499_s29 }
 0x56c   : > { %v4113_v24 = vadd.f32 %v10316_v31, %v4084_v25  ;;  %7235 = vmatmul.msk.bf16.gmra.mxu2 %vm1444_vm3, %v3680_v50  ;;  %4252 = vst.msk [vmem:[#allocation4 + $0x4] sm:$0x1] %vm10347_vm6, %v4251_v16  ;;  %v8161_v16 = vld [vmem:[%s11246_s6 + $0x68] sm:$0xff] }
 0x56d   : > { %v3576_v28 = vpop.f32.mrf.mxu1  ;;  %7260 = vmatmul.msk.bf16.gmra.mxu3 %vm1444_vm3, %v3947_v8  ;;  %v4296_v4 = vld [vmem:[#allocation3 + $0x36] sm:$0x1]  ;;  %v4297_v42 = vld [vmem:[#allocation3 + $0x37] sm:$0x1]  ;;  %v4276_v47 = vld [vmem:[#allocation3 + $0x32] sm:$0x1]  ;;  %6327 = vmatpush.bf16.msrb.mxu2 %v8161_v16 }
 0x56e   : > { %4139 = vst.msk [vmem:[#allocation3 + $0x38] sm:$0xff] %vm4131_vm5, %v4113_v24  ;;  %v4298_v1 = vmax.f32 %v4296_v4, %v4297_v42  ;;  %v4277_v38 = vld [vmem:[#allocation3 + $0x33] sm:$0x1]  ;;  %v4288_v61 = vld [vmem:[#allocation3 + $0x34] sm:$0x1]  ;;  %v3627_v0 = vadd.f32 %v3576_v28, %v10186_v60  ;;  %v8153_v60 = vld [vmem:[%s11246_s6 + $0x28] sm:$0xff] }
 0x56f   : > { %v3766_v39 = vpop.f32.mrf.mxu2  ;;  %v4278_v36 = vmax.f32 %v4276_v47, %v4277_v38  ;;  %v4289_v29 = vld [vmem:[#allocation3 + $0x35] sm:$0x1]  ;;  %v4268_v17 = vld [vmem:[#allocation3 + $0x30] sm:$0x1]  ;;  %v4269_v57 = vld [vmem:[#allocation3 + $0x31] sm:$0x1]  ;;  %6314 = vmatpush.bf16.msrb.mxu1 %v8153_v60 }
 0x570   : > { %v3818_v13 = vadd.f32 %v3766_v39, %v3626_v23  ;;  %v4033_v2 = vpop.f32.mrf.mxu3  ;;  %v4299_v59 = vmax.f32 %v4295_v30, %v4298_v1  ;;  %v4290_v21 = vmax.f32 %v4288_v61, %v4289_v29  ;;  %v4270_v22 = vmax.f32 %v4268_v17, %v4269_v57  ;;  %v8169_v57 = vld [vmem:[%s11246_s6 + $0xa8] sm:$0xff] }
 0x571   : > { %v4279_v9 = vmax.f32 %v4275_v62, %v4278_v36  ;;  %6340 = vmatpush.bf16.msrb.mxu3 %v8169_v57 }
 0x572   : > { %v4085_v15 = vadd.f32 %v4033_v2, %v3818_v13  ;;  %v4291_v14 = vmax.f32 %v4287_v10, %v4290_v21  ;;  %v4271_v52 = vmax.f32 %v4267_v54, %v4270_v22 }
 0x573   : > { %4301 = vrot.lane.b32.xlu1 %v4299_v59, %s8499_s29  ;;  %4281 = vrot.lane.b32.xlu0 %v4279_v9, %s8499_s29 }
 0x574   : > { %v4114_v49 = vadd.f32 %v10316_v31, %v4085_v15  ;;  %4292 = vst.msk [vmem:[#allocation4 + $0x6] sm:$0x1] %vm10347_vm6, %v4291_v14 }
 0x575   : > { %v3579_v50 = vpop.f32.mrf.mxu1  ;;  %4272 = vst.msk [vmem:[#allocation4 + $0x5] sm:$0x1] %vm10347_vm6, %v4271_v52  ;;  %v4305_v44 = vld [vmem:[#allocation3 + $0x38] sm:$0x1]  ;;  %v4306_v8 = vld [vmem:[#allocation3 + $0x39] sm:$0x1] }
 0x576   : > { %4140 = vst.msk [vmem:[#allocation3 + $0x40] sm:$0xff] %vm4131_vm5, %v4114_v49  ;;  %v3628_v34 = vadd.f32 %v3579_v50, %v10194_v3  ;;  %v4307_v28 = vmax.f32 %v4305_v44, %v4306_v8  ;;  %v4333_v42 = vld [vmem:[#allocation3 + $0x3e] sm:$0x1]  ;;  %v4334_v47 = vld [vmem:[#allocation3 + $0x3f] sm:$0x1] }
 0x577   : > { %v3768_v27 = vpop.f32.mrf.mxu2  ;;  %v4313_v23 = vld [vmem:[#allocation3 + $0x3a] sm:$0x1]  ;;  %v4314_v30 = vld [vmem:[#allocation3 + $0x3b] sm:$0x1]  ;;  %v4325_v1 = vld [vmem:[#allocation3 + $0x3c] sm:$0x1]  ;;  %v4335_v59 = vmax.f32 %v4333_v42, %v4334_v47 }
 0x578   : > { %v3819_v48 = vadd.f32 %v3768_v27, %v3627_v0  ;;  %v4035_v46 = vpop.f32.mrf.mxu3  ;;  %v4326_v39 = vld [vmem:[#allocation3 + $0x3d] sm:$0x1]  ;;  %v4315_v22 = vmax.f32 %v4313_v23, %v4314_v30 }
 0x579   : > { %v4327_v14 = vmax.f32 %v4325_v1, %v4326_v39 }
 0x57a   : > { %v4086_v63 = vadd.f32 %v4035_v46, %v3819_v48 }
 0x57c   : > { %v4115_v25 = vadd.f32 %v10316_v31, %v4086_v63 }
 0x57d   : > { %v3581_v58 = vpop.f32.mrf.mxu1  ;;  %v4308_v18 = vld [vmem:[#allocation3 + $0x46] sm:$0x1]  ;;  %v4309_v41 = vld [vmem:[#allocation3 + $0x47] sm:$0x1]  ;;  %v4345_v62 = vld [vmem:[#allocation3 + $0x40] sm:$0x1] }
 0x57e   : > { %4141 = vst.msk [vmem:[#allocation3 + $0x48] sm:$0xff] %vm4131_vm5, %v4115_v25  ;;  %v4310_v20 = vmax.f32 %v4308_v18, %v4309_v41  ;;  %v4346_v36 = vld [vmem:[#allocation3 + $0x41] sm:$0x1]  ;;  %v3629_v2 = vadd.f32 %v3581_v58, %v10201_v11  ;;  %v4353_v8 = vld [vmem:[#allocation3 + $0x42] sm:$0x1] }
 0x57f   : > { %v3771_v24 = vpop.f32.mrf.mxu2  ;;  %v4347_v25 = vmax.f32 %v4345_v62, %v4346_v36  ;;  %v4354_v18 = vld [vmem:[#allocation3 + $0x43] sm:$0x1]  ;;  %v4365_v41 = vld [vmem:[#allocation3 + $0x44] sm:$0x1] }
 0x580   : > { %v3820_v45 = vadd.f32 %v3771_v24, %v3628_v34  ;;  %v4038_v43 = vpop.f32.mrf.mxu3  ;;  %v4311_v4 = vmax.f32 %v4307_v28, %v4310_v20  ;;  %v4366_v20 = vld [vmem:[#allocation3 + $0x45] sm:$0x1] }
 0x582   : > { %v4087_v3 = vadd.f32 %v4038_v43, %v3820_v45  ;;  %4312 = vst.msk [vmem:[#allocation4 + $0x7] sm:$0x1] %vm10347_vm6, %v4311_v4  ;;  %v4355_v43 = vmax.f32 %v4353_v8, %v4354_v18 }
 0x584   : > { %v4116_v38 = vadd.f32 %v10316_v31, %v4087_v3 }
 0x585   : > { %v3584_v61 = vpop.f32.mrf.mxu1  ;;  %v4336_v29 = vld [vmem:[#allocation3 + $0x4c] sm:$0x1]  ;;  %v4337_v17 = vld [vmem:[#allocation3 + $0x4d] sm:$0x1]  ;;  %v4316_v13 = vld [vmem:[#allocation3 + $0x48] sm:$0x1] }
 0x586   : > { %4142 = vst.msk [vmem:[#allocation3 + $0x50] sm:$0xff] %vm4131_vm5, %v4116_v38  ;;  %v4338_v10 = vmax.f32 %v4336_v29, %v4337_v17  ;;  %v4317_v21 = vld [vmem:[#allocation3 + $0x49] sm:$0x1]  ;;  %v4328_v9 = vld [vmem:[#allocation3 + $0x4a] sm:$0x1]  ;;  %v3630_v45 = vadd.f32 %v3584_v61, %v10209_v53  ;;  %v4367_v38 = vmax.f32 %v4365_v41, %v4366_v20  ;;  %v8152_v17 = vld [vmem:[%s11246_s6 + $0x20] sm:$0xff] }
 0x587   : > { %v3773_v54 = vpop.f32.mrf.mxu2  ;;  %v4318_v15 = vmax.f32 %v4316_v13, %v4317_v21  ;;  %v4329_v52 = vld [vmem:[#allocation3 + $0x4b] sm:$0x1]  ;;  %v4348_v49 = vld [vmem:[#allocation3 + $0x4e] sm:$0x1]  ;;  %v4349_v50 = vld [vmem:[#allocation3 + $0x4f] sm:$0x1]  ;;  %6315 = vmatpush.bf16.msrb.mxu1 %v8152_v17 }
 0x588   : > { %v3821_v0 = vadd.f32 %v3773_v54, %v3629_v2  ;;  %v4040_v27 = vpop.f32.mrf.mxu3  ;;  %v4339_v11 = vmax.f32 %v4335_v59, %v4338_v10  ;;  %v4330_v48 = vmax.f32 %v4328_v9, %v4329_v52  ;;  %v4350_v46 = vmax.f32 %v4348_v49, %v4349_v50 }
 0x589   : > { %v4319_v63 = vmax.f32 %v4315_v22, %v4318_v15 }
 0x58a   : > { %v4088_v58 = vadd.f32 %v4040_v27, %v3821_v0  ;;  %4341 = vrot.lane.b32.xlu0 %v4339_v11, %s8499_s29  ;;  %v4331_v44 = vmax.f32 %v4327_v14, %v4330_v48  ;;  %v4351_v34 = vmax.f32 %v4347_v25, %v4350_v46  ;;  %v8160_v48 = vld [vmem:[%s11246_s6 + $0x60] sm:$0xff] }
 0x58b   : > { %4321 = vrot.lane.b32.xlu2 %v4319_v63, %s8499_s29  ;;  %6328 = vmatpush.bf16.msrb.mxu2 %v8160_v48 }
 0x58c   : > { %v4117_v60 = vadd.f32 %v10316_v31, %v4088_v58  ;;  %4332 = vst.msk [vmem:[#allocation4 + $0x8] sm:$0x1] %vm10347_vm6, %v4331_v44  ;;  %v8168_v44 = vld [vmem:[%s11246_s6 + $0xa0] sm:$0xff] }
 0x58d   : > { %v3586_v16 = vpop.f32.mrf.mxu1  ;;  %v4356_v24 = vld [vmem:[#allocation3 + $0x50] sm:$0x1]  ;;  %v4357_v28 = vld [vmem:[#allocation3 + $0x51] sm:$0x1]  ;;  %v4368_v42 = vld [vmem:[#allocation3 + $0x52] sm:$0x1]  ;;  %6341 = vmatpush.bf16.msrb.mxu3 %v8168_v44 }
 0x58e   : > { %4143 = vst.msk [vmem:[#allocation3 + $0x58] sm:$0xff] %vm4131_vm5, %v4117_v60  ;;  %v4358_v4 = vmax.f32 %v4356_v24, %v4357_v28  ;;  %v4369_v47 = vld [vmem:[#allocation3 + $0x53] sm:$0x1]  ;;  %v3631_v29 = vadd.f32 %v3586_v16, %v10216_v55  ;;  %v4373_v22 = vld [vmem:[#allocation3 + $0x54] sm:$0x1] }
 0x58f   : > { %v3776_v3 = vpop.f32.mrf.mxu2  ;;  %4352 = vst.msk [vmem:[#allocation4 + $0x9] sm:$0x1] %vm10347_vm6, %v4351_v34  ;;  %v4370_v39 = vmax.f32 %v4368_v42, %v4369_v47  ;;  %v4374_v15 = vld [vmem:[#allocation3 + $0x55] sm:$0x1]  ;;  %v4385_v14 = vld [vmem:[#allocation3 + $0x56] sm:$0x1] }
 0x590   : > { %v3822_v23 = vadd.f32 %v3776_v3, %v3630_v45  ;;  %v4043_v30 = vpop.f32.mrf.mxu3  ;;  %v4359_v1 = vmax.f32 %v4355_v43, %v4358_v4  ;;  %v4386_v46 = vld [vmem:[#allocation3 + $0x57] sm:$0x1]  ;;  %v4375_v25 = vmax.f32 %v4373_v22, %v4374_v15  ;;  %v8149_v4 = vld [vmem:[%s11246_s6 + $0x8] sm:$0xff] }
 0x591   : > { %v4371_v36 = vmax.f32 %v4367_v38, %v4370_v39  ;;  %v4387_v41 = vmax.f32 %v4385_v14, %v4386_v46 }
 0x592   : > { %v4089_v62 = vadd.f32 %v4043_v30, %v3822_v23  ;;  %4361 = vrot.lane.b32.xlu1 %v4359_v1, %s8499_s29 }
 0x593   : > { %4372 = vst.msk [vmem:[#allocation4 + $0xa] sm:$0x1] %vm10347_vm6, %v4371_v36 }
 0x594   : > { %v4118_v53 = vadd.f32 %v10316_v31, %v4089_v62 }
 0x595   : > { %v3589_v61 = vpop.f32.mrf.mxu1  ;;  %v4393_v21 = vld [vmem:[#allocation3 + $0x58] sm:$0x1]  ;;  %v4394_v57 = vld [vmem:[#allocation3 + $0x59] sm:$0x1]  ;;  %v4413_v20 = vld [vmem:[#allocation3 + $0x5c] sm:$0x1] }
 0x596   : > { %4144 = vst.msk [vmem:[#allocation3 + $0x60] sm:$0xff] %vm4131_vm5, %v4118_v53  ;;  %v3632_v50 = vadd.f32 %v3589_v61, %v10224_v51  ;;  %v4395_v0 = vmax.f32 %v4393_v21, %v4394_v57  ;;  %v4414_v45 = vld [vmem:[#allocation3 + $0x5d] sm:$0x1]  ;;  %v4425_v47 = vld [vmem:[#allocation3 + $0x5e] sm:$0x1] }
 0x597   : > { %v3778_v13 = vpop.f32.mrf.mxu2  ;;  %v4426_v38 = vld [vmem:[#allocation3 + $0x5f] sm:$0x1]  ;;  %v4405_v39 = vld [vmem:[#allocation3 + $0x5a] sm:$0x1]  ;;  %v4406_v62 = vld [vmem:[#allocation3 + $0x5b] sm:$0x1]  ;;  %v4415_v21 = vmax.f32 %v4413_v20, %v4414_v45 }
 0x598   : > { %v3823_v2 = vadd.f32 %v3778_v13, %v3631_v29  ;;  %v4045_v59 = vpop.f32.mrf.mxu3  ;;  %v4427_v14 = vmax.f32 %v4425_v47, %v4426_v38 }
 0x59a   : > { %v4090_v10 = vadd.f32 %v4045_v59, %v3823_v2  ;;  %v8269_v2 = vld [vmem:[%s11246_s6 + $0x3c8] sm:$0xff] }
 0x59b   : > { %6513 = vmatpush.bf16.msrb.mxu0 %v8269_v2 }
 0x59c   : > { %v4119_v9 = vadd.f32 %v10316_v31, %v4090_v10 }
 0x59d   : > { %v3591_v54 = vpop.f32.mrf.mxu1  ;;  %v4396_v55 = vld [vmem:[#allocation3 + $0x66] sm:$0x1]  ;;  %v4397_v52 = vld [vmem:[#allocation3 + $0x67] sm:$0x1]  ;;  %v4376_v49 = vld [vmem:[#allocation3 + $0x62] sm:$0x1] }
 0x59e   : > { %4145 = vst.msk [vmem:[#allocation3 + $0x68] sm:$0xff] %vm4131_vm5, %v4119_v9  ;;  %v4398_v27 = vmax.f32 %v4396_v55, %v4397_v52  ;;  %v4377_v11 = vld [vmem:[#allocation3 + $0x63] sm:$0x1]  ;;  %v4388_v8 = vld [vmem:[#allocation3 + $0x64] sm:$0x1]  ;;  %v3633_v37 = vadd.f32 %v3591_v54, %v10231_v40 }
 0x59f   : > { %v3781_v63 = vpop.f32.mrf.mxu2  ;;  %v4378_v58 = vmax.f32 %v4376_v49, %v4377_v11  ;;  %v4389_v60 = vld [vmem:[#allocation3 + $0x65] sm:$0x1]  ;;  %v4433_v3 = vld [vmem:[#allocation3 + $0x60] sm:$0x1]  ;;  %v4434_v42 = vld [vmem:[#allocation3 + $0x61] sm:$0x1] }
 0x5a0   : > { %v3824_v18 = vadd.f32 %v3781_v63, %v3632_v50  ;;  %v4048_v51 = vpop.f32.mrf.mxu3  ;;  %v4399_v34 = vmax.f32 %v4395_v0, %v4398_v27  ;;  %v4390_v24 = vmax.f32 %v4388_v8, %v4389_v60  ;;  %v4435_v29 = vmax.f32 %v4433_v3, %v4434_v42  ;;  %v8151_v8 = vld [vmem:[%s11246_s6 + $0x18] sm:$0xff]  ;;  %v8157_v3 = vld [vmem:[%s11246_s6 + $0x48] sm:$0xff] }
 0x5a1   : > { %v4379_v16 = vmax.f32 %v4375_v25, %v4378_v58  ;;  %v4407_v50 = vmax.f32 %v4405_v39, %v4406_v62  ;;  %6316 = vmatpush.bf16.msrb.mxu1 %v8151_v8  ;;  %v8167_v42 = vld [vmem:[%s11246_s6 + $0x98] sm:$0xff]  ;;  %v8156_v39 = vld [vmem:[%s11246_s6 + $0x40] sm:$0xff] }
 0x5a2   : > { %v4091_v28 = vadd.f32 %v4048_v51, %v3824_v18  ;;  %4401 = vrot.lane.b32.xlu0 %v4399_v34, %s8499_s29  ;;  %v4391_v23 = vmax.f32 %v4387_v41, %v4390_v24  ;;  %v8159_v51 = vld [vmem:[%s11246_s6 + $0x58] sm:$0xff]  ;;  %6342 = vmatpush.bf16.msrb.mxu3 %v8167_v42 }
 0x5a3   : > { %4381 = vrot.lane.b32.xlu2 %v4379_v16, %s8499_s29  ;;  %6329 = vmatpush.bf16.msrb.mxu2 %v8159_v51  ;;  %v8158_v16 = vld [vmem:[%s11246_s6 + $0x50] sm:$0xff]  ;;  %v8311_v11 = vld [vmem:[%s11246_s6 + $0x518] sm:$0xff] }
 0x5a4   : > { %v4120_v30 = vadd.f32 %v10316_v31, %v4091_v28  ;;  %4392 = vst.msk [vmem:[#allocation4 + $0xb] sm:$0x1] %vm10347_vm6, %v4391_v23 }
 0x5a5   : > { %v3594_v1 = vpop.f32.mrf.mxu1  ;;  %v4436_v36 = vld [vmem:[#allocation3 + $0x6e] sm:$0x1]  ;;  %v4437_v53 = vld [vmem:[#allocation3 + $0x6f] sm:$0x1]  ;;  %v4416_v61 = vld [vmem:[#allocation3 + $0x6a] sm:$0x1] }
 0x5a6   : > { %4146 = vst.msk [vmem:[#allocation3 + $0x70] sm:$0xff] %vm4131_vm5, %v4120_v30  ;;  %v4438_v17 = vmax.f32 %v4436_v36, %v4437_v53  ;;  %v4417_v13 = vld [vmem:[#allocation3 + $0x6b] sm:$0x1]  ;;  %v4428_v59 = vld [vmem:[#allocation3 + $0x6c] sm:$0x1]  ;;  %v3634_v44 = vadd.f32 %v3594_v1, %v10242_v35 }
 0x5a7   : > { %v3783_v10 = vpop.f32.mrf.mxu2  ;;  %v4418_v57 = vmax.f32 %v4416_v61, %v4417_v13  ;;  %v4429_v9 = vld [vmem:[#allocation3 + $0x6d] sm:$0x1]  ;;  %v4408_v22 = vld [vmem:[#allocation3 + $0x68] sm:$0x1]  ;;  %v4409_v52 = vld [vmem:[#allocation3 + $0x69] sm:$0x1]  ;;  %6330 = vmatpush.bf16.msrb.mxu2 %v8158_v16 }
 0x5a8   : > { %v3825_v15 = vadd.f32 %v3783_v10, %v3633_v37  ;;  %v4050_v40 = vpop.f32.mrf.mxu3  ;;  %v4439_v54 = vmax.f32 %v4435_v29, %v4438_v17  ;;  %v4430_v55 = vmax.f32 %v4428_v59, %v4429_v9  ;;  %v4410_v0 = vmax.f32 %v4408_v22, %v4409_v52  ;;  %v8150_v35 = vld [vmem:[%s11246_s6 + $0x10] sm:$0xff]  ;;  %v8187_v52 = vld [vmem:[%s11246_s6 + $0x138] sm:$0xff] }
 0x5a9   : > { %v4419_v49 = vmax.f32 %v4415_v21, %v4418_v57  ;;  %6317 = vmatpush.bf16.msrb.mxu1 %v8150_v35 }
 0x5aa   : > { %v4092_v27 = vadd.f32 %v4050_v40, %v3825_v15  ;;  %v4431_v48 = vmax.f32 %v4427_v14, %v4430_v55  ;;  %v4411_v46 = vmax.f32 %v4407_v50, %v4410_v0  ;;  %v8179_v55 = vld [vmem:[%s11246_s6 + $0xf8] sm:$0xff] }
 0x5ab   : > { %4441 = vrot.lane.b32.xlu2 %v4439_v54, %s8499_s29  ;;  %4421 = vrot.lane.b32.xlu1 %v4419_v49, %s8499_s29 }
 0x5ac   : > { %v4121_v63 = vadd.f32 %v10316_v31, %v4092_v27  ;;  %v4202_v58 = vpop.permute.xlu2 %4201  ;;  %4432 = vst.msk [vmem:[#allocation4 + $0xd] sm:$0x1] %vm10347_vm6, %v4431_v48  ;;  %6331 = vmatpush.bf16.msrb.mxu2 %v8157_v3 }
 0x5ad   : > { %v3596_v25 = vpop.f32.mrf.mxu1  ;;  %4204 = vst.msk [vmem:[#allocation4 + $0x1] sm:$0x1] %vm10492_vm9, %v4202_v58  ;;  %v4445_v20 = vld [vmem:[#allocation3 + $0x70] sm:$0x1]  ;;  %v4446_v45 = vld [vmem:[#allocation3 + $0x71] sm:$0x1]  ;;  %6318 = vmatpush.bf16.msrb.mxu1 %v8149_v4 }
 0x5ae   : > { %4147 = vst.msk [vmem:[#allocation3 + $0x78] sm:$0xff] %vm4131_vm5, %v4121_v63  ;;  %v3635_v43 = vadd.f32 %v3596_v25, %v10249_v56  ;;  %v8148_v56 = vld [vmem:[%s11246_s6] sm:$0xff]  ;;  %v4447_v62 = vmax.f32 %v4445_v20, %v4446_v45  ;;  %v4473_v61 = vld [vmem:[#allocation3 + $0x76] sm:$0x1]  ;;  %v4474_v37 = vld [vmem:[#allocation3 + $0x77] sm:$0x1] }
 0x5af   : > { %v3786_v18 = vpop.f32.mrf.mxu2  ;;  %4412 = vst.msk [vmem:[#allocation4 + $0xc] sm:$0x1] %vm10347_vm6, %v4411_v46  ;;  %v4453_v2 = vld [vmem:[#allocation3 + $0x72] sm:$0x1]  ;;  %v4454_v59 = vld [vmem:[#allocation3 + $0x73] sm:$0x1]  ;;  %v4475_v40 = vmax.f32 %v4473_v61, %v4474_v37 }
 0x5b0   : > { %v3826_v34 = vadd.f32 %v3786_v18, %v3634_v44  ;;  %v4053_v60 = vpop.f32.mrf.mxu3  ;;  %6332 = vmatpush.bf16.msrb.mxu2 %v8156_v39  ;;  %v4465_v49 = vld [vmem:[#allocation3 + $0x74] sm:$0x1]  ;;  %v4466_v50 = vld [vmem:[#allocation3 + $0x75] sm:$0x1]  ;;  %v4455_v27 = vmax.f32 %v4453_v2, %v4454_v59  ;;  %v8178_v46 = vld [vmem:[%s11246_s6 + $0xf0] sm:$0xff] }
 0x5b1   : > { %6319 = vmatpush.bf16.msrb.mxu1 %v8148_v56  ;;  %v8186_v63 = vld [vmem:[%s11246_s6 + $0x130] sm:$0xff]  ;;  %v4467_v45 = vmax.f32 %v4465_v49, %v4466_v50  ;;  %v10574_v59 = vld [vmem:[%s11244_s4] ss:$0 sm:$0xff] }
 0x5b2   : > { %v4093_v41 = vadd.f32 %v4053_v60, %v3826_v34  ;;  %v8176_v49 = vld [vmem:[%s11246_s6 + $0xe0] sm:$0xff] }
 0x5b3   : > { %v8184_v50 = vld [vmem:[%s11246_s6 + $0x120] sm:$0xff] }
 0x5b4   : > { %v4122_v24 = vadd.f32 %v10316_v31, %v4093_v41  ;;  %6364 = vmatpush.bf16.msra.mxu2 %v8187_v52 }
 0x5b5   : > { %v3599_v28 = vpop.f32.mrf.mxu1  ;;  %v4448_v1 = vld [vmem:[#allocation3 + $0x7e] sm:$0x1]  ;;  %v4449_v38 = vld [vmem:[#allocation3 + $0x7f] sm:$0x1]  ;;  %v4485_v9 = vld [vmem:[#allocation3 + $0x78] sm:$0x1]  ;;  %6351 = vmatpush.bf16.msra.mxu1 %v8179_v55 }
 0x5b6   : > { %4148 = vst.msk [vmem:[#allocation3 + $0x80] sm:$0xff] %vm4131_vm5, %v4122_v24  ;;  %v4450_v36 = vmax.f32 %v4448_v1, %v4449_v38  ;;  %v4486_v22 = vld [vmem:[#allocation3 + $0x79] sm:$0x1]  ;;  %v3636_v15 = vadd.f32 %v3599_v28, %v10257_v33  ;;  %v8166_v33 = vld [vmem:[%s11246_s6 + $0x90] sm:$0xff]  ;;  %v4493_v28 = vld [vmem:[#allocation3 + $0x7a] sm:$0x1] }
 0x5b7   : > { %v3788_v47 = vpop.f32.mrf.mxu2  ;;  %6343 = vmatpush.bf16.msrb.mxu3 %v8166_v33  ;;  %v4487_v41 = vmax.f32 %v4485_v9, %v4486_v22  ;;  %v4494_v20 = vld [vmem:[#allocation3 + $0x7b] sm:$0x1] }
 0x5b8   : > { %v3827_v23 = vadd.f32 %v3788_v47, %v3635_v43  ;;  %v4055_v30 = vpop.f32.mrf.mxu3  ;;  %v4451_v29 = vmax.f32 %v4447_v62, %v4450_v36  ;;  %6365 = vmatpush.bf16.msra.mxu2 %v8186_v63  ;;  %v4495_v38 = vmax.f32 %v4493_v28, %v4494_v20  ;;  %v4505_v62 = vld [vmem:[#allocation3 + $0x7c] sm:$0x1]  ;;  %v4506_v36 = vld [vmem:[#allocation3 + $0x7d] sm:$0x1] }
 0x5b9   : > { %6352 = vmatpush.bf16.msra.mxu1 %v8178_v46  ;;  %v4507_v2 = vmax.f32 %v4505_v62, %v4506_v36 }
 0x5ba   : > { %v4094_v53 = vadd.f32 %v4055_v30, %v3827_v23  ;;  %4452 = vst.msk [vmem:[#allocation4 + $0xe] sm:$0x1] %vm10347_vm6, %v4451_v29 }
 0x5bc   : > { %v4123_v17 = vadd.f32 %v10316_v31, %v4094_v53 }
 0x5bd   : > { %v3601_v13 = vpop.f32.mrf.mxu1  ;;  %v4476_v10 = vld [vmem:[#allocation3 + $0x84] sm:$0x1]  ;;  %v4477_v21 = vld [vmem:[#allocation3 + $0x85] sm:$0x1]  ;;  %v4456_v57 = vld [vmem:[#allocation3 + $0x80] sm:$0x1] }
 0x5be   : > { %4149 = vst.msk [vmem:[#allocation3 + $0x88] sm:$0xff] %vm4131_vm5, %v4123_v17  ;;  %v4478_v54 = vmax.f32 %v4476_v10, %v4477_v21  ;;  %v4457_v14 = vld [vmem:[#allocation3 + $0x81] sm:$0x1]  ;;  %v4488_v8 = vld [vmem:[#allocation3 + $0x86] sm:$0x1]  ;;  %v3637_v1 = vadd.f32 %v3601_v13, %v10264_v5 }
 0x5bf   : > { %v3791_v0 = vpop.f32.mrf.mxu2  ;;  %v4458_v48 = vmax.f32 %v4456_v57, %v4457_v14  ;;  %v4489_v18 = vld [vmem:[#allocation3 + $0x87] sm:$0x1]  ;;  %v4468_v51 = vld [vmem:[#allocation3 + $0x82] sm:$0x1]  ;;  %v4469_v35 = vld [vmem:[#allocation3 + $0x83] sm:$0x1] }
 0x5c0   : > { %v3828_v25 = vadd.f32 %v3791_v0, %v3636_v15  ;;  %v4058_v58 = vpop.f32.mrf.mxu3  ;;  %v4479_v44 = vmax.f32 %v4475_v40, %v4478_v54  ;;  %v4490_v60 = vmax.f32 %v4488_v8, %v4489_v18  ;;  %v4470_v24 = vmax.f32 %v4468_v51, %v4469_v35  ;;  %v8165_v15 = vld [vmem:[%s11246_s6 + $0x88] sm:$0xff]  ;;  %v8195_v0 = vld [vmem:[%s11246_s6 + $0x178] sm:$0xff] }
 0x5c1   : > { %v4459_v34 = vmax.f32 %v4455_v27, %v4458_v48  ;;  %v8177_v40 = vld [vmem:[%s11246_s6 + $0xe8] sm:$0xff]  ;;  %6344 = vmatpush.bf16.msrb.mxu3 %v8165_v15  ;;  %v8175_v18 = vld [vmem:[%s11246_s6 + $0xd8] sm:$0xff] }
 0x5c2   : > { %v4095_v16 = vadd.f32 %v4058_v58, %v3828_v25  ;;  %4481 = vrot.lane.b32.xlu1 %v4479_v44, %s8499_s29  ;;  %v4491_v42 = vmax.f32 %v4487_v41, %v4490_v60  ;;  %v4471_v56 = vmax.f32 %v4467_v45, %v4470_v24  ;;  %v8185_v54 = vld [vmem:[%s11246_s6 + $0x128] sm:$0xff]  ;;  %6353 = vmatpush.bf16.msra.mxu1 %v8177_v40  ;;  %v8183_v51 = vld [vmem:[%s11246_s6 + $0x118] sm:$0xff] }
 0x5c3   : > { %4461 = vrot.lane.b32.xlu0 %v4459_v34, %s8499_s29  ;;  %6366 = vmatpush.bf16.msra.mxu2 %v8185_v54  ;;  %v8194_v34 = vld [vmem:[%s11246_s6 + $0x170] sm:$0xff] }
 0x5c4   : > { %v4124_v43 = vadd.f32 %v10316_v31, %v4095_v16  ;;  %v4262_v3 = vpop.permute.xlu2 %4261  ;;  %4492 = vst.msk [vmem:[#allocation4 + $0x10] sm:$0x1] %vm10347_vm6, %v4491_v42 }
 0x5c5   : > { %v3604_v4 = vpop.f32.mrf.mxu1  ;;  %v4179_v47 = vpop.permute.xlu1 %4178  ;;  %4264 = vst.msk [vmem:[#allocation4 + $0x4] sm:$0x1] %vm10492_vm9, %v4262_v3  ;;  %v4496_v23 = vld [vmem:[#allocation3 + $0x88] sm:$0x1]  ;;  %v4497_v30 = vld [vmem:[#allocation3 + $0x89] sm:$0x1] }
 0x5c6   : > { %4150 = vst.msk [vmem:[#allocation3 + $0x90] sm:$0xff] %vm4131_vm5, %v4124_v43  ;;  %v4498_v39 = vmax.f32 %v4496_v23, %v4497_v30  ;;  %v4508_v29 = vld [vmem:[#allocation3 + $0x8a] sm:$0x1]  ;;  %v4509_v17 = vld [vmem:[#allocation3 + $0x8b] sm:$0x1]  ;;  %v3638_v22 = vadd.f32 %v3604_v4, %v10272_v6  ;;  %v8164_v6 = vld [vmem:[%s11246_s6 + $0x80] sm:$0xff]  ;;  %6354 = vmatpush.bf16.msra.mxu1 %v8176_v49 }
 0x5c7   : > { %4184 = vst.msk [vmem:[#allocation4] sm:$0x1] %vm10492_vm9, %v4179_v47  ;;  %v3793_v31 = vpop.f32.mrf.mxu2  ;;  %v4510_v5 = vmax.f32 %v4508_v29, %v4509_v17  ;;  %v4513_v48 = vld [vmem:[#allocation3 + $0x8c] sm:$0x1]  ;;  %v4514_v33 = vld [vmem:[#allocation3 + $0x8d] sm:$0x1]  ;;  %6345 = vmatpush.bf16.msrb.mxu3 %v8164_v6  ;;  %6367 = vmatpush.bf16.msra.mxu2 %v8184_v50 }
 0x5c8   : > { %v3829_v53 = vadd.f32 %v3793_v31, %v3637_v1  ;;  %v4060_v61 = vpop.f32.mrf.mxu3  ;;  %v4499_v37 = vmax.f32 %v4495_v38, %v4498_v39  ;;  %4472 = vst.msk [vmem:[#allocation4 + $0xf] sm:$0x1] %vm10347_vm6, %v4471_v56  ;;  %v4525_v25 = vld [vmem:[#allocation3 + $0x8e] sm:$0x1]  ;;  %v4526_v58 = vld [vmem:[#allocation3 + $0x8f] sm:$0x1]  ;;  %v4515_v43 = vmax.f32 %v4513_v48, %v4514_v33 }
 0x5c9   : > { %v4511_v9 = vmax.f32 %v4507_v2, %v4510_v5  ;;  %v8174_v56 = vld [vmem:[%s11246_s6 + $0xd0] sm:$0xff]  ;;  %v4527_v1 = vmax.f32 %v4525_v25, %v4526_v58  ;;  %v8193_v31 = vld [vmem:[%s11246_s6 + $0x168] sm:$0xff] }
 0x5ca   : > { %v4096_v13 = vadd.f32 %v4060_v61, %v3829_v53  ;;  %4501 = vrot.lane.b32.xlu2 %v4499_v37, %s8499_s29  ;;  %6355 = vmatpush.bf16.msra.mxu1 %v8175_v18  ;;  %v8182_v39 = vld [vmem:[%s11246_s6 + $0x110] sm:$0xff] }
 0x5cb   : > { %4512 = vst.msk [vmem:[#allocation4 + $0x11] sm:$0x1] %vm10347_vm6, %v4511_v9  ;;  %6377 = vmatpush.bf16.msra.mxu3 %v8195_v0  ;;  %6368 = vmatpush.bf16.msra.mxu2 %v8183_v51  ;;  %v8173_v51 = vld [vmem:[%s11246_s6 + $0xc8] sm:$0xff] }
 0x5cc   : > { %v4125_v10 = vadd.f32 %v10574_v59, %v4096_v13  ;;  %v4222_v57 = vpop.permute.xlu0 %4221 }
 0x5cd   : > { %v3606_v21 = vpop.f32.mrf.mxu1  ;;  %4224 = vst.msk [vmem:[#allocation4 + $0x2] sm:$0x1] %vm10492_vm9, %v4222_v57  ;;  %v4533_v46 = vld [vmem:[#allocation3 + $0x90] sm:$0x1]  ;;  %v4534_v63 = vld [vmem:[#allocation3 + $0x91] sm:$0x1] }
 0x5ce   : > { %4151 = vst.msk [vmem:[#allocation3 + $0x98] sm:$0xff] %vm4131_vm5, %v4125_v10  ;;  %v3639_v41 = vadd.f32 %v3606_v21, %v10279_v32  ;;  %v4535_v24 = vmax.f32 %v4533_v46, %v4534_v63  ;;  %v4553_v36 = vld [vmem:[#allocation3 + $0x94] sm:$0x1]  ;;  %v4554_v53 = vld [vmem:[#allocation3 + $0x95] sm:$0x1]  ;;  %6356 = vmatpush.bf16.msra.mxu1 %v8174_v56 }
 0x5cf   : > { %v3796_v14 = vpop.f32.mrf.mxu2  ;;  %6378 = vmatpush.bf16.msra.mxu3 %v8194_v34  ;;  %v4545_v17 = vld [vmem:[#allocation3 + $0x92] sm:$0x1]  ;;  %v4546_v5 = vld [vmem:[#allocation3 + $0x93] sm:$0x1]  ;;  %v4565_v10 = vld [vmem:[#allocation3 + $0x96] sm:$0x1]  ;;  %6369 = vmatpush.bf16.msra.mxu2 %v8182_v39  ;;  %v4555_v49 = vmax.f32 %v4553_v36, %v4554_v53 }
 0x5d0   : > { %v3830_v55 = vadd.f32 %v3796_v14, %v3638_v22  ;;  %v4063_v52 = vpop.f32.mrf.mxu3  ;;  %v4566_v21 = vld [vmem:[#allocation3 + $0x97] sm:$0x1]  ;;  %v4547_v63 = vmax.f32 %v4545_v17, %v4546_v5  ;;  %v8181_v34 = vld [vmem:[%s11246_s6 + $0x108] sm:$0xff] }
 0x5d2   : > { %v4097_v27 = vadd.f32 %v4063_v52, %v3830_v55  ;;  %6357 = vmatpush.bf16.msra.mxu1 %v8173_v51 }
 0x5d3   : > { %6379 = vmatpush.bf16.msra.mxu3 %v8193_v31  ;;  %6370 = vmatpush.bf16.msra.mxu2 %v8181_v34 }
 0x5d4   : > { %v4126_v44 = vadd.f32 %v10574_v59, %v4097_v27 }
 0x5d5   : > { %v3609_v8 = vpop.f32.mrf.mxu1  ;;  %v4536_v60 = vld [vmem:[#allocation3 + $0x9e] sm:$0x1]  ;;  %v4537_v35 = vld [vmem:[#allocation3 + $0x9f] sm:$0x1]  ;;  %v4516_v16 = vld [vmem:[#allocation3 + $0x9a] sm:$0x1] }
 0x5d6   : > { %4152 = vst.msk [vmem:[#allocation3 + $0xa0] sm:$0xff] %vm4131_vm5, %v4126_v44  ;;  %v4538_v28 = vmax.f32 %v4536_v60, %v4537_v35  ;;  %v4517_v20 = vld [vmem:[#allocation3 + $0x9b] sm:$0x1]  ;;  %v4528_v3 = vld [vmem:[#allocation3 + $0x9c] sm:$0x1]  ;;  %v3640_v40 = vadd.f32 %v3609_v8, %v10287_v7  ;;  %v4567_v44 = vmax.f32 %v4565_v10, %v4566_v21 }
 0x5d7   : > { %v3798_v45 = vpop.f32.mrf.mxu2  ;;  %v4518_v4 = vmax.f32 %v4516_v16, %v4517_v20  ;;  %v4529_v42 = vld [vmem:[#allocation3 + $0x9d] sm:$0x1]  ;;  %v4573_v37 = vld [vmem:[#allocation3 + $0x98] sm:$0x1]  ;;  %v4574_v29 = vld [vmem:[#allocation3 + $0x99] sm:$0x1] }
 0x5d8   : > { %v3831_v47 = vadd.f32 %v3798_v45, %v3639_v41  ;;  %v4065_v23 = vpop.f32.mrf.mxu3  ;;  %v4539_v30 = vmax.f32 %v4535_v24, %v4538_v28  ;;  %v4530_v32 = vmax.f32 %v4528_v3, %v4529_v42  ;;  %v4575_v54 = vmax.f32 %v4573_v37, %v4574_v29  ;;  %v8192_v60 = vld [vmem:[%s11246_s6 + $0x160] sm:$0xff] }
 0x5d9   : > { %v4519_v38 = vmax.f32 %v4515_v43, %v4518_v4  ;;  %v8172_v28 = vld [vmem:[%s11246_s6 + $0xc0] sm:$0xff]  ;;  %6380 = vmatpush.bf16.msra.mxu3 %v8192_v60  ;;  %v8191_v4 = vld [vmem:[%s11246_s6 + $0x158] sm:$0xff] }
 0x5da   : > { %v4098_v62 = vadd.f32 %v4065_v23, %v3831_v47  ;;  %4541 = vrot.lane.b32.xlu1 %v4539_v30, %s8499_s29  ;;  %v4531_v61 = vmax.f32 %v4527_v1, %v4530_v32  ;;  %v8180_v20 = vld [vmem:[%s11246_s6 + $0x100] sm:$0xff]  ;;  %6358 = vmatpush.bf16.msra.mxu1 %v8172_v28 }
 0x5db   : > { %4521 = vrot.lane.b32.xlu0 %v4519_v38, %s8499_s29  ;;  %6371 = vmatpush.bf16.msra.mxu2 %v8180_v20  ;;  %v8189_v38 = vld [vmem:[%s11246_s6 + $0x148] sm:$0xff]  ;;  %v8188_v21 = vld [vmem:[%s11246_s6 + $0x140] sm:$0xff] }
 0x5dc   : > { %v4127_v13 = vadd.f32 %v10574_v59, %v4098_v62  ;;  %4532 = vst.msk [vmem:[#allocation4 + $0x12] sm:$0x1] %vm10347_vm6, %v4531_v61 }
 0x5dd   : > { %v3611_v2 = vpop.f32.mrf.mxu1  ;;  %v4242_v57 = vpop.permute.xlu1 %4241  ;;  %v4576_v9 = vld [vmem:[#allocation3 + $0xa6] sm:$0x1]  ;;  %v4577_v22 = vld [vmem:[#allocation3 + $0xa7] sm:$0x1]  ;;  %v4556_v15 = vld [vmem:[#allocation3 + $0xa2] sm:$0x1]  ;;  %6381 = vmatpush.bf16.msra.mxu3 %v8191_v4 }
 0x5de   : > { %4153 = vst.msk [vmem:[#allocation3 + $0xa8] sm:$0xff] %vm4131_vm5, %v4127_v13  ;;  %v4578_v14 = vmax.f32 %v4576_v9, %v4577_v22  ;;  %v4557_v55 = vld [vmem:[#allocation3 + $0xa3] sm:$0x1]  ;;  %v4548_v52 = vld [vmem:[#allocation3 + $0xa0] sm:$0x1]  ;;  %v3641_v3 = vadd.f32 %v3611_v2, %v10294_v26  ;;  %v8190_v26 = vld [vmem:[%s11246_s6 + $0x150] sm:$0xff] }
 0x5df   : > { %4244 = vst.msk [vmem:[#allocation4 + $0x3] sm:$0x1] %vm10492_vm9, %v4242_v57  ;;  %v3801_v6 = vpop.f32.mrf.mxu2  ;;  %v4558_v50 = vmax.f32 %v4556_v15, %v4557_v55  ;;  %v4549_v0 = vld [vmem:[#allocation3 + $0xa1] sm:$0x1]  ;;  %v4568_v27 = vld [vmem:[#allocation3 + $0xa4] sm:$0x1] }
 0x5e0   : > { %v3832_v48 = vadd.f32 %v3801_v6, %v3640_v40  ;;  %v4068_v33 = vpop.f32.mrf.mxu3  ;;  %v4579_v46 = vmax.f32 %v4575_v54, %v4578_v14  ;;  %v4550_v25 = vmax.f32 %v4548_v52, %v4549_v0  ;;  %v4569_v7 = vld [vmem:[#allocation3 + $0xa5] sm:$0x1]  ;;  %v8203_v55 = vld [vmem:[%s11246_s6 + $0x1b8] sm:$0xff]  ;;  %v8218_v4 = vld [vmem:[%s11246_s6 + $0x230] sm:$0xff] }
 0x5e1   : > { %v4559_v58 = vmax.f32 %v4555_v49, %v4558_v50  ;;  %v4570_v8 = vmax.f32 %v4568_v27, %v4569_v7  ;;  %6382 = vmatpush.bf16.msra.mxu3 %v8190_v26  ;;  %v8211_v49 = vld [vmem:[%s11246_s6 + $0x1f8] sm:$0xff] }
 0x5e2   : > { %v4099_v18 = vadd.f32 %v4068_v33, %v3832_v48  ;;  %v4551_v35 = vmax.f32 %v4547_v63, %v4550_v25  ;;  %v8219_v50 = vld [vmem:[%s11246_s6 + $0x238] sm:$0xff] }
 0x5e3   : > { %4581 = vrot.lane.b32.xlu0 %v4579_v46, %s8499_s29  ;;  %4561 = vrot.lane.b32.xlu2 %v4559_v58, %s8499_s29  ;;  %v4571_v16 = vmax.f32 %v4567_v44, %v4570_v8 }
 0x5e4   : > { %v4128_v41 = vadd.f32 %v10574_v59, %v4099_v18  ;;  %4552 = vst.msk [vmem:[#allocation4 + $0x13] sm:$0x1] %vm10347_vm6, %v4551_v35  ;;  %v8202_v35 = vld [vmem:[%s11246_s6 + $0x1b0] sm:$0xff] }
 0x5e5   : > { %v3614_v24 = vpop.f32.mrf.mxu1  ;;  %v4302_v45 = vpop.permute.xlu1 %4301  ;;  %4572 = vst.msk [vmem:[#allocation4 + $0x14] sm:$0x1] %vm10347_vm6, %v4571_v16  ;;  %v4585_v39 = vld [vmem:[#allocation3 + $0xa8] sm:$0x1]  ;;  %v4586_v31 = vld [vmem:[#allocation3 + $0xa9] sm:$0x1]  ;;  %6383 = vmatpush.bf16.msra.mxu3 %v8189_v38 }
 0x5e6   : > { %v4282_v43 = vpop.permute.xlu0 %4281  ;;  %4154 = vst.msk [vmem:[#allocation3 + $0xb0] sm:$0xff] %vm4131_vm5, %v4128_v41  ;;  %v4322_v42 = vpop.permute.xlu2 %4321  ;;  %v3642_v62 = vadd.f32 %v3614_v24, %v10301_v19  ;;  %v4587_v5 = vmax.f32 %v4585_v39, %v4586_v31  ;;  %v4613_v10 = vld [vmem:[#allocation3 + $0xae] sm:$0x1]  ;;  %v4614_v57 = vld [vmem:[#allocation3 + $0xaf] sm:$0x1]  ;;  %v8209_v39 = vld [vmem:[%s11246_s6 + $0x1e8] sm:$0xff] }
 0x5e7   : > { %4304 = vst.msk [vmem:[#allocation4 + $0x6] sm:$0x1] %vm10492_vm9, %v4302_v45  ;;  %v3803_v47 = vpop.f32.mrf.mxu2  ;;  %v4593_v9 = vld [vmem:[#allocation3 + $0xaa] sm:$0x1]  ;;  %v4594_v22 = vld [vmem:[#allocation3 + $0xab] sm:$0x1] }
 0x5e8   : > { %4284 = vst.msk [vmem:[#allocation4 + $0x5] sm:$0x1] %vm10492_vm9, %v4282_v43  ;;  %v3833_v23 = vadd.f32 %v3803_v47, %v3641_v3  ;;  %v4070_v30 = vpop.f32.mrf.mxu3  ;;  %v4605_v52 = vld [vmem:[#allocation3 + $0xac] sm:$0x1]  ;;  %v4606_v0 = vld [vmem:[#allocation3 + $0xad] sm:$0x1]  ;;  %v4595_v8 = vmax.f32 %v4593_v9, %v4594_v22 }
 0x5e9   : > { %4324 = vst.msk [vmem:[#allocation4 + $0x7] sm:$0x1] %vm10492_vm9, %v4322_v42  ;;  %6384 = vmatpush.bf16.msra.mxu3 %v8188_v21  ;;  %v4607_v41 = vmax.f32 %v4605_v52, %v4606_v0  ;;  %v8210_v45 = vld [vmem:[%s11246_s6 + $0x1f0] sm:$0xff]  ;;  %v8201_v3 = vld [vmem:[%s11246_s6 + $0x1a8] sm:$0xff]  ;;  %v8268_v9 = vld [vmem:[%s11246_s6 + $0x3c0] sm:$0xff] }
 0x5ea   : > { %v4100_v56 = vadd.f32 %v4070_v30, %v3833_v23  ;;  %v8208_v22 = vld [vmem:[%s11246_s6 + $0x1e0] sm:$0xff]  ;;  %6514 = vmatpush.bf16.msrb.mxu0 %v8268_v9  ;;  %v8199_v52 = vld [vmem:[%s11246_s6 + $0x198] sm:$0xff] }
 0x5eb   : > { %v8207_v0 = vld [vmem:[%s11246_s6 + $0x1d8] sm:$0xff] }
 0x5ec   : > { %v4129_v1 = vadd.f32 %v10574_v59, %v4100_v56  ;;  %v8307_v9 = vld [vmem:[%s11246_s6 + $0x4f8] sm:$0xff] }
 0x5ed   : > { %v3616_v32 = vpop.f32.mrf.mxu1  ;;  %v4588_v53 = vld [vmem:[#allocation3 + $0xb6] sm:$0x1]  ;;  %v4589_v61 = vld [vmem:[#allocation3 + $0xb7] sm:$0x1]  ;;  %v4625_v28 = vld [vmem:[#allocation3 + $0xb0] sm:$0x1] }
 0x5ee   : > { %4155 = vst.msk [vmem:[#allocation3 + $0xb8] sm:$0xff] %vm4131_vm5, %v4129_v1  ;;  %v4590_v13 = vmax.f32 %v4588_v53, %v4589_v61  ;;  %v4626_v20 = vld [vmem:[#allocation3 + $0xb1] sm:$0x1]  ;;  %v4645_v30 = vld [vmem:[#allocation3 + $0xb4] sm:$0x1]  ;;  %6559 = vmatpush.bf16.msra.mxu0 %v8307_v9  ;;  %v8298_v9 = vld [vmem:[%s11246_s6 + $0x4b0] sm:$0xff] }
 0x5ef   : > { %v3806_v36 = vpop.f32.mrf.mxu2  ;;  %v4646_v26 = vld [vmem:[#allocation3 + $0xb5] sm:$0x1]  ;;  %v4633_v56 = vld [vmem:[#allocation3 + $0xb2] sm:$0x1]  ;;  %v4627_v1 = vmax.f32 %v4625_v28, %v4626_v20  ;;  %v4634_v31 = vld [vmem:[#allocation3 + $0xb3] sm:$0x1] }
 0x5f0   : > { %v4653_v37 = vld [vmem:[#allocation4] sm:$0xff]  ;;  %v3834_v29 = vadd.f32 %v3806_v36, %v3642_v62  ;;  %v4073_v17 = vpop.f32.mrf.mxu3  ;;  %v4591_v15 = vmax.f32 %v4587_v5, %v4590_v13  ;;  %v8217_v62 = vld [vmem:[%s11246_s6 + $0x228] sm:$0xff] }
 0x5f1   : > { %v10676_v2 = vmax.f32 %v4653_v37, 0.0  ;;  %v8234_v28 = vld [vmem:[%s11246_s6 + $0x2b0] sm:$0xff] }
 0x5f2   : > { %v4101_v19 = vadd.f32 %v4073_v17, %v3834_v29  ;;  %4592 = vst.msk [vmem:[#allocation4 + $0x15] sm:$0x1] %vm10347_vm6, %v4591_v15  ;;  %v4647_v29 = vmax.f32 %v4645_v30, %v4646_v26  ;;  %v8242_v20 = vld [vmem:[%s11246_s6 + $0x2f0] sm:$0xff]  ;;  %v8223_v30 = vld [vmem:[%s11246_s6 + $0x258] sm:$0xff] }
 0x5f3   : > { %v4665_v40 = vperm.slane %v10676_v2, 0  ;;  %v4666_v54 = vperm.slane %v10676_v2, 1  ;;  %v4667_v14 = vperm.slane %v10676_v2, 2  ;;  %v8231_v26 = vld [vmem:[%s11246_s6 + $0x298] sm:$0xff] }
 0x5f4   : > { %v4130_v6 = vadd.f32 %v10574_v59, %v4101_v19  ;;  %v4615_v59 = vmax.f32 %v4613_v10, %v4614_v57  ;;  %v4635_v10 = vmax.f32 %v4633_v56, %v4634_v31  ;;  %v8200_v57 = vld [vmem:[%s11246_s6 + $0x1a0] sm:$0xff]  ;;  %v8239_v56 = vld [vmem:[%s11246_s6 + $0x2d8] sm:$0xff]  ;;  %v8221_v31 = vld [vmem:[%s11246_s6 + $0x248] sm:$0xff] }
 0x5f5   : > { %v4715_v27 = vpack.c.bf16 %v4665_v40, %v4665_v40  ;;  %v4716_v48 = vpack.c.bf16 %v4666_v54, %v4666_v54  ;;  %v4717_v33 = vpack.c.bf16 %v4667_v14, %v4667_v14  ;;  %v4616_v46 = vld [vmem:[#allocation3 + $0xbc] sm:$0x1]  ;;  %v4617_v63 = vld [vmem:[#allocation3 + $0xbd] sm:$0x1]  ;;  %v4596_v25 = vld [vmem:[#allocation3 + $0xb8] sm:$0x1] }
 0x5f6   : > { %4157 = vst.msk [vmem:[#allocation3 + $0xc0] sm:$0xf] %vm4156_vm10, %v4130_v6  ;;  %v4618_v7 = vmax.f32 %v4616_v46, %v4617_v63  ;;  %v4597_v58 = vld [vmem:[#allocation3 + $0xb9] sm:$0x1]  ;;  %v4608_v51 = vld [vmem:[#allocation3 + $0xba] sm:$0x1] }
 0x5f7   : > { %6320 = vmatmul.bf16.vlgmr.msrb.gmra.mxu1 %v4715_v27  ;;  %6333 = vmatmul.bf16.vlgmr.msrb.gmra.mxu2 %v4716_v48  ;;  %v3808_v44 = vpop.f32.mrf.mxu2  ;;  %v4598_v18 = vmax.f32 %v4596_v25, %v4597_v58  ;;  %v4609_v34 = vld [vmem:[#allocation3 + $0xbb] sm:$0x1]  ;;  %v4628_v47 = vld [vmem:[#allocation3 + $0xbe] sm:$0x1]  ;;  %v4629_v23 = vld [vmem:[#allocation3 + $0xbf] sm:$0x1] }
 0x5f8   : > { %6346 = vmatmul.bf16.vlgmr.msrb.gmra.mxu3 %v4717_v33  ;;  %6390 = vmatpush.bf16.msrb.mxu1 %v8203_v55  ;;  %v4075_v60 = vpop.f32.mrf.mxu3  ;;  %v4619_v16 = vmax.f32 %v4615_v59, %v4618_v7  ;;  %v4610_v24 = vmax.f32 %v4608_v51, %v4609_v34  ;;  %v4630_v32 = vmax.f32 %v4628_v47, %v4629_v23  ;;  %v4668_v40 = vperm.slane %v10676_v2, 3  ;;  %v8216_v14 = vld [vmem:[%s11246_s6 + $0x220] sm:$0xff]  ;;  %v8215_v27 = vld [vmem:[%s11246_s6 + $0x218] sm:$0xff]  ;;  %v8198_v33 = vld [vmem:[%s11246_s6 + $0x190] sm:$0xff] }
 0x5f9   : > { %6403 = vmatpush.bf16.msrb.mxu2 %v8211_v49  ;;  %v4599_v43 = vmax.f32 %v4595_v8, %v4598_v18  ;;  %6416 = vmatpush.bf16.msrb.mxu3 %v8219_v50  ;;  %v4669_v54 = vperm.slane %v10676_v2, 4  ;;  %v4670_v55 = vperm.slane %v10676_v2, 5  ;;  %v8206_v46 = vld [vmem:[%s11246_s6 + $0x1d0] sm:$0xff]  ;;  %v8197_v25 = vld [vmem:[%s11246_s6 + $0x188] sm:$0xff]  ;;  %v8196_v58 = vld [vmem:[%s11246_s6 + $0x180] sm:$0xff]  ;;  %v4671_v8 = vperm.slane %v10676_v2, 6 }
 0x5fa   : > { %4621 = vrot.lane.b32.xlu2 %v4619_v16, %s8499_s29  ;;  %v4611_v42 = vmax.f32 %v4607_v41, %v4610_v24  ;;  %v4631_v37 = vmax.f32 %v4627_v1, %v4630_v32  ;;  %v4718_v49 = vpack.c.bf16 %v4668_v40, %v4668_v40  ;;  %v8214_v63 = vld [vmem:[%s11246_s6 + $0x210] sm:$0xff]  ;;  %v8205_v59 = vld [vmem:[%s11246_s6 + $0x1c8] sm:$0xff]  ;;  %v8204_v44 = vld [vmem:[%s11246_s6 + $0x1c0] sm:$0xff]  ;;  %v4672_v51 = vperm.slane %v10676_v2, 7 }
 0x5fb   : > { %4601 = vrot.lane.b32.xlu1 %v4599_v43, %s8499_s29  ;;  %v4719_v50 = vpack.c.bf16 %v4669_v54, %v4669_v54  ;;  %v4720_v48 = vpack.c.bf16 %v4670_v55, %v4670_v55  ;;  %v8213_v7 = vld [vmem:[%s11246_s6 + $0x208] sm:$0xff]  ;;  %v8227_v18 = vld [vmem:[%s11246_s6 + $0x278] sm:$0xff]  ;;  %v8212_v60 = vld [vmem:[%s11246_s6 + $0x200] sm:$0xff]  ;;  %v4721_v41 = vpack.c.bf16 %v4671_v8, %v4671_v8 }
 0x5fc   : > { %6391 = vmatpush.bf16.msrb.mxu1 %v8202_v35  ;;  %v4342_v38 = vpop.permute.xlu0 %4341  ;;  %4612 = vst.msk [vmem:[#allocation4 + $0x16] sm:$0x1] %vm10347_vm6, %v4611_v42  ;;  %v8235_v34 = vld [vmem:[%s11246_s6 + $0x2b8] sm:$0xff]  ;;  %v8226_v2 = vld [vmem:[%s11246_s6 + $0x270] sm:$0xff]  ;;  %v4722_v24 = vpack.c.bf16 %v4672_v51, %v4672_v51  ;;  %v8233_v43 = vld [vmem:[%s11246_s6 + $0x2a8] sm:$0xff] }
 0x5fd   : > { %v4648_v36 = vld [vmem:[#allocation3 + $0xc2] sm:$0x1]  ;;  %v4649_v53 = vld [vmem:[#allocation3 + $0xc3] sm:$0x1]  ;;  %6404 = vmatpush.bf16.msrb.mxu2 %v8210_v45  ;;  %4344 = vst.msk [vmem:[#allocation4 + $0x8] sm:$0x1] %vm10492_vm9, %v4342_v38  ;;  %v4382_v61 = vpop.permute.xlu2 %4381  ;;  %6417 = vmatpush.bf16.msrb.mxu3 %v8218_v4 }
 0x5fe   : > { %v4650_v17 = vmax.f32 %v4648_v36, %v4649_v53  ;;  %4384 = vst.msk [vmem:[#allocation4 + $0xa] sm:$0x1] %vm10492_vm9, %v4382_v61  ;;  %v4636_v5 = vld [vmem:[#allocation3 + $0xc0] sm:$0x1]  ;;  %v4637_v13 = vld [vmem:[#allocation3 + $0xc1] sm:$0x1] }
 0x5ff   : > { %v4638_v21 = vmax.f32 %v4636_v5, %v4637_v13  ;;  %4632 = vst.msk [vmem:[#allocation4 + $0x17] sm:$0x1] %vm10347_vm6, %v4631_v37  ;;  %v8243_v35 = vld [vmem:[%s11246_s6 + $0x2f8] sm:$0xff]  ;;  %v8225_v45 = vld [vmem:[%s11246_s6 + $0x268] sm:$0xff]  ;;  %v8224_v42 = vld [vmem:[%s11246_s6 + $0x260] sm:$0xff] }
 0x600   : > { %v4651_v19 = vmax.f32 %v4647_v29, %v4650_v17  ;;  %6392 = vmatpush.bf16.msrb.mxu1 %v8201_v3  ;;  %v8241_v4 = vld [vmem:[%s11246_s6 + $0x2e8] sm:$0xff]  ;;  %v8232_v47 = vld [vmem:[%s11246_s6 + $0x2a0] sm:$0xff]  ;;  %v8222_v32 = vld [vmem:[%s11246_s6 + $0x250] sm:$0xff] }
 0x601   : > { %6405 = vmatpush.bf16.msrb.mxu2 %v8209_v39  ;;  %v4639_v15 = vmax.f32 %v4635_v10, %v4638_v21  ;;  %6418 = vmatpush.bf16.msrb.mxu3 %v8217_v62  ;;  %v8240_v23 = vld [vmem:[%s11246_s6 + $0x2e0] sm:$0xff]  ;;  %v8230_v38 = vld [vmem:[%s11246_s6 + $0x290] sm:$0xff]  ;;  %v8229_v62 = vld [vmem:[%s11246_s6 + $0x288] sm:$0xff] }
 0x602   : > { %4652 = vst.msk [vmem:[#allocation4 + $0x18] sm:$0x1] %vm10347_vm6, %v4651_v19  ;;  %v8238_v39 = vld [vmem:[%s11246_s6 + $0x2d0] sm:$0xff]  ;;  %v8237_v36 = vld [vmem:[%s11246_s6 + $0x2c8] sm:$0xff]  ;;  %v8220_v53 = vld [vmem:[%s11246_s6 + $0x240] sm:$0xff] }
 0x603   : > { %4641 = vrot.lane.b32.xlu0 %v4639_v15, %s8499_s29  ;;  %v8228_v61 = vld [vmem:[%s11246_s6 + $0x280] sm:$0xff]  ;;  %v8251_v37 = vld [vmem:[%s11246_s6 + $0x338] sm:$0xff]  ;;  %v8250_v5 = vld [vmem:[%s11246_s6 + $0x330] sm:$0xff]  ;;  %s351_s29 = scalar_lea.vmem [#allocation5], %s350_s28 }
 0x604   : > { %6393 = vmatpush.bf16.msrb.mxu1 %v8200_v57  ;;  %v4362_v6 = vpop.permute.xlu1 %4361  ;;  %v8259_v29 = vld [vmem:[%s11246_s6 + $0x378] sm:$0xff]  ;;  %v8236_v17 = vld [vmem:[%s11246_s6 + $0x2c0] sm:$0xff]  ;;  %v8258_v13 = vld [vmem:[%s11246_s6 + $0x370] sm:$0xff]  ;;  %s6729_s21 = sshll.u32 %s351_s29, 4  ;;  %s6730_s21 = int_to_ptr.vmem [resolvable:$true] %s6729_s21 }
 0x605   : > { %6406 = vmatpush.bf16.msrb.mxu2 %v8208_v22  ;;  %4364 = vst.msk [vmem:[#allocation4 + $0x9] sm:$0x1] %vm10492_vm9, %v4362_v6  ;;  %v4442_v12 = vpop.permute.xlu2 %4441  ;;  %6419 = vmatpush.bf16.msrb.mxu3 %v8216_v14  ;;  %v8249_v19 = vld [vmem:[%s11246_s6 + $0x328] sm:$0xff]  ;;  %v8248_v22 = vld [vmem:[%s11246_s6 + $0x320] sm:$0xff]  ;;  %v8247_v55 = vld [vmem:[%s11246_s6 + $0x318] sm:$0xff] }
 0x606   : > { %4444 = vst.msk [vmem:[#allocation4 + $0xd] sm:$0x1] %vm10492_vm9, %v4442_v12  ;;  %v8257_v57 = vld [vmem:[%s11246_s6 + $0x368] sm:$0xff]  ;;  %v8256_v15 = vld [vmem:[%s11246_s6 + $0x360] sm:$0xff]  ;;  %v8255_v6 = vld [vmem:[%s11246_s6 + $0x358] sm:$0xff] }
 0x607   : > { %6359 = vmatmul.bf16.vlgmr.msra.gmra.mxu1 %v4718_v49  ;;  %6372 = vmatmul.bf16.vlgmr.msra.gmra.mxu2 %v4719_v50  ;;  %v8253_v8 = vld [vmem:[%s11246_s6 + $0x348] sm:$0xff] }
 0x608   : > { %6385 = vmatmul.bf16.vlgmr.msra.gmra.mxu3 %v4720_v48  ;;  %6394 = vmatpush.bf16.msrb.mxu1 %v8199_v52  ;;  %v8306_v52 = vld [vmem:[%s11246_s6 + $0x4f0] sm:$0xff]  ;;  %v8265_v51 = vld [vmem:[%s11246_s6 + $0x3a8] sm:$0xff] }
 0x609   : > { %6407 = vmatpush.bf16.msrb.mxu2 %v8207_v0  ;;  %6420 = vmatpush.bf16.msrb.mxu3 %v8215_v27  ;;  %v8267_v27 = vld [vmem:[%s11246_s6 + $0x3b8] sm:$0xff] }
 0x60a   : > { %6560 = vmatpush.bf16.msra.mxu0 %v8306_v52  ;;  %v8336_v52 = vld [vmem:[%s11246_s6 + $0x5e0] sm:$0xff] }
 0x60c   : > { %6395 = vmatpush.bf16.msrb.mxu1 %v8198_v33 }
 0x60d   : > { %6408 = vmatpush.bf16.msrb.mxu2 %v8206_v46  ;;  %6421 = vmatpush.bf16.msrb.mxu3 %v8214_v63 }
 0x610   : > { %6396 = vmatpush.bf16.msrb.mxu1 %v8197_v25  ;;  %v8246_v25 = vld [vmem:[%s11246_s6 + $0x310] sm:$0xff] }
 0x611   : > { %6409 = vmatpush.bf16.msrb.mxu2 %v8205_v59  ;;  %6422 = vmatpush.bf16.msrb.mxu3 %v8213_v7  ;;  %v8254_v59 = vld [vmem:[%s11246_s6 + $0x350] sm:$0xff]  ;;  %v8305_v7 = vld [vmem:[%s11246_s6 + $0x4e8] sm:$0xff] }
 0x612   : > { %6561 = vmatpush.bf16.msra.mxu0 %v8305_v7  ;;  %v8321_v7 = vld [vmem:[%s11246_s6 + $0x568] sm:$0xff] }
 0x614   : > { %6397 = vmatpush.bf16.msrb.mxu1 %v8196_v58  ;;  %v4402_v16 = vpop.permute.xlu0 %4401  ;;  %v8266_v58 = vld [vmem:[%s11246_s6 + $0x3b0] sm:$0xff] }
 0x615   : > { %6410 = vmatpush.bf16.msrb.mxu2 %v8204_v44  ;;  %4404 = vst.msk [vmem:[#allocation4 + $0xb] sm:$0x1] %vm10492_vm9, %v4402_v16  ;;  %6423 = vmatpush.bf16.msrb.mxu3 %v8212_v60  ;;  %v8245_v44 = vld [vmem:[%s11246_s6 + $0x308] sm:$0xff]  ;;  %v8252_v60 = vld [vmem:[%s11246_s6 + $0x340] sm:$0xff] }
 0x617   : > { %6398 = vmatmul.bf16.vlgmr.msrb.gmra.mxu1 %v4721_v41  ;;  %v8291_v41 = vld [vmem:[%s11246_s6 + $0x478] sm:$0xff] }
 0x618   : > { %6429 = vmatpush.bf16.msra.mxu1 %v8227_v18  ;;  %6411 = vmatmul.bf16.vlgmr.msrb.gmra.mxu2 %v4722_v24  ;;  %v8304_v18 = vld [vmem:[%s11246_s6 + $0x4e0] sm:$0xff] }
 0x619   : > { %6442 = vmatpush.bf16.msra.mxu2 %v8235_v34  ;;  %6455 = vmatpush.bf16.msra.mxu3 %v8243_v35  ;;  %v8244_v34 = vld [vmem:[%s11246_s6 + $0x300] sm:$0xff]  ;;  %v8283_v35 = vld [vmem:[%s11246_s6 + $0x438] sm:$0xff] }
 0x61a   : > { %6562 = vmatpush.bf16.msra.mxu0 %v8304_v18 }
 0x61c   : > { %6430 = vmatpush.bf16.msra.mxu1 %v8226_v2  ;;  %v8303_v2 = vld [vmem:[%s11246_s6 + $0x4d8] sm:$0xff] }
 0x61d   : > { %6443 = vmatpush.bf16.msra.mxu2 %v8234_v28  ;;  %6456 = vmatpush.bf16.msra.mxu3 %v8242_v20  ;;  %v4422_v3 = vpop.permute.xlu1 %4421  ;;  %v8264_v28 = vld [vmem:[%s11246_s6 + $0x3a0] sm:$0xff] }
 0x61e   : > { %4424 = vst.msk [vmem:[#allocation4 + $0xc] sm:$0x1] %vm10492_vm9, %v4422_v3  ;;  %6563 = vmatpush.bf16.msra.mxu0 %v8303_v2  ;;  %v8263_v3 = vld [vmem:[%s11246_s6 + $0x398] sm:$0xff]  ;;  %v8292_v2 = vld [vmem:[%s11246_s6 + $0x480] sm:$0xff] }
 0x620   : > { %6431 = vmatpush.bf16.msra.mxu1 %v8225_v45 }
 0x621   : > { %6444 = vmatpush.bf16.msra.mxu2 %v8233_v43  ;;  %6457 = vmatpush.bf16.msra.mxu3 %v8241_v4  ;;  %v8282_v4 = vld [vmem:[%s11246_s6 + $0x430] sm:$0xff] }
 0x624   : > { %6432 = vmatpush.bf16.msra.mxu1 %v8224_v42  ;;  %v4502_v1 = vpop.permute.xlu2 %4501 }
 0x625   : > { %6445 = vmatpush.bf16.msra.mxu2 %v8232_v47  ;;  %6458 = vmatpush.bf16.msra.mxu3 %v8240_v23  ;;  %4504 = vst.msk [vmem:[#allocation4 + $0x10] sm:$0x1] %vm10492_vm9, %v4502_v1  ;;  %v8290_v23 = vld [vmem:[%s11246_s6 + $0x470] sm:$0xff] }
 0x628   : > { %6433 = vmatpush.bf16.msra.mxu1 %v8223_v30  ;;  %v8302_v30 = vld [vmem:[%s11246_s6 + $0x4d0] sm:$0xff] }
 0x629   : > { %6446 = vmatpush.bf16.msra.mxu2 %v8231_v26  ;;  %6459 = vmatpush.bf16.msra.mxu3 %v8239_v56  ;;  %v8281_v56 = vld [vmem:[%s11246_s6 + $0x428] sm:$0xff] }
 0x62a   : > { %6564 = vmatpush.bf16.msra.mxu0 %v8302_v30  ;;  %v8318_v30 = vld [vmem:[%s11246_s6 + $0x550] sm:$0xff] }
 0x62c   : > { %6434 = vmatpush.bf16.msra.mxu1 %v8222_v32 }
 0x62d   : > { %6447 = vmatpush.bf16.msra.mxu2 %v8230_v38  ;;  %6460 = vmatpush.bf16.msra.mxu3 %v8238_v39  ;;  %v8262_v38 = vld [vmem:[%s11246_s6 + $0x390] sm:$0xff]  ;;  %v8289_v39 = vld [vmem:[%s11246_s6 + $0x468] sm:$0xff] }
 0x630   : > { %6435 = vmatpush.bf16.msra.mxu1 %v8221_v31  ;;  %v8301_v31 = vld [vmem:[%s11246_s6 + $0x4c8] sm:$0xff] }
 0x631   : > { %6448 = vmatpush.bf16.msra.mxu2 %v8229_v62  ;;  %6461 = vmatpush.bf16.msra.mxu3 %v8237_v36  ;;  %v8280_v62 = vld [vmem:[%s11246_s6 + $0x420] sm:$0xff]  ;;  %v8261_v36 = vld [vmem:[%s11246_s6 + $0x388] sm:$0xff] }
 0x632   : > { %6565 = vmatpush.bf16.msra.mxu0 %v8301_v31 }
 0x634   : > { %6436 = vmatpush.bf16.msra.mxu1 %v8220_v53  ;;  %v4482_v10 = vpop.permute.xlu1 %4481  ;;  %v8288_v53 = vld [vmem:[%s11246_s6 + $0x460] sm:$0xff] }
 0x635   : > { %6449 = vmatpush.bf16.msra.mxu2 %v8228_v61  ;;  %6462 = vmatpush.bf16.msra.mxu3 %v8236_v17  ;;  %4484 = vst.msk [vmem:[#allocation4 + $0xf] sm:$0x1] %vm10492_vm9, %v4482_v10  ;;  %v4462_v21 = vpop.permute.xlu0 %4461  ;;  %v8300_v61 = vld [vmem:[%s11246_s6 + $0x4c0] sm:$0xff]  ;;  %v8287_v10 = vld [vmem:[%s11246_s6 + $0x458] sm:$0xff] }
 0x636   : > { %4464 = vst.msk [vmem:[#allocation4 + $0xe] sm:$0x1] %vm10492_vm9, %v4462_v21  ;;  %v8260_v17 = vld [vmem:[%s11246_s6 + $0x380] sm:$0xff]  ;;  %6566 = vmatpush.bf16.msra.mxu0 %v8300_v61  ;;  %v8278_v21 = vld [vmem:[%s11246_s6 + $0x410] sm:$0xff] }
 0x638   : > { %6468 = vmatpush.bf16.msrb.mxu1 %v8251_v37  ;;  %v8279_v37 = vld [vmem:[%s11246_s6 + $0x418] sm:$0xff] }
 0x639   : > { %6481 = vmatpush.bf16.msrb.mxu2 %v8259_v29  ;;  %v8339_v29 = vld [vmem:[%s11246_s6 + $0x5f8] sm:$0xff] }
 0x63c   : > { %6469 = vmatpush.bf16.msrb.mxu1 %v8250_v5  ;;  %v8299_v5 = vld [vmem:[%s11246_s6 + $0x4b8] sm:$0xff] }
 0x63d   : > { %6482 = vmatpush.bf16.msrb.mxu2 %v8258_v13  ;;  %v4654_v40 = vld [vmem:[#allocation4 + $0x8] sm:$0xff]  ;;  %v4562_v54 = vpop.permute.xlu2 %4561 }
 0x63e   : > { %v10894_v14 = vmax.f32 %v4654_v40, 0.0  ;;  %4564 = vst.msk [vmem:[#allocation4 + $0x13] sm:$0x1] %vm10492_vm9, %v4562_v54  ;;  %v8337_v40 = vld [vmem:[%s11246_s6 + $0x5e8] sm:$0xff] }
 0x63f   : > { %v8297_v54 = vld [vmem:[%s11246_s6 + $0x4a8] sm:$0xff] }
 0x640   : > { %6470 = vmatpush.bf16.msrb.mxu1 %v8249_v19  ;;  %v4673_v49 = vperm.slane %v10894_v14, 0  ;;  %v4674_v50 = vperm.slane %v10894_v14, 1  ;;  %v4675_v0 = vperm.slane %v10894_v14, 2  ;;  %v4680_v12 = vperm.slane %v10894_v14, 7  ;;  %v8338_v19 = vld [vmem:[%s11246_s6 + $0x5f0] sm:$0xff] }
 0x641   : > { %6483 = vmatpush.bf16.msrb.mxu2 %v8257_v57  ;;  %v4676_v20 = vperm.slane %v10894_v14, 3  ;;  %v4677_v45 = vperm.slane %v10894_v14, 4  ;;  %v4678_v43 = vperm.slane %v10894_v14, 5  ;;  %v4679_v13 = vperm.slane %v10894_v14, 6  ;;  %v8285_v14 = vld [vmem:[%s11246_s6 + $0x448] sm:$0xff] }
 0x642   : > { %v4723_v48 = vpack.c.bf16 %v4673_v49, %v4673_v49  ;;  %v4724_v33 = vpack.c.bf16 %v4674_v50, %v4674_v50  ;;  %v4725_v46 = vpack.c.bf16 %v4675_v0, %v4675_v0  ;;  %v4730_v63 = vpack.c.bf16 %v4680_v12, %v4680_v12  ;;  %v8296_v49 = vld [vmem:[%s11246_s6 + $0x4a0] sm:$0xff]  ;;  %v8323_v0 = vld [vmem:[%s11246_s6 + $0x578] sm:$0xff] }
 0x643   : > { %v4726_v42 = vpack.c.bf16 %v4676_v20, %v4676_v20  ;;  %v4727_v47 = vpack.c.bf16 %v4677_v45, %v4677_v45  ;;  %v4728_v26 = vpack.c.bf16 %v4678_v43, %v4678_v43  ;;  %v4729_v57 = vpack.c.bf16 %v4679_v13, %v4679_v13  ;;  %v8284_v50 = vld [vmem:[%s11246_s6 + $0x440] sm:$0xff]  ;;  %v8335_v12 = vld [vmem:[%s11246_s6 + $0x5d8] sm:$0xff] }
 0x644   : > { %6471 = vmatpush.bf16.msrb.mxu1 %v8248_v22  ;;  %6424 = vmatmul.bf16.vlgmr.msrb.gmra.mxu3 %v4723_v48  ;;  %v8286_v22 = vld [vmem:[%s11246_s6 + $0x450] sm:$0xff]  ;;  %v8331_v20 = vld [vmem:[%s11246_s6 + $0x5b8] sm:$0xff]  ;;  %v8308_v13 = vld [vmem:[%s11246_s6 + $0x500] sm:$0xff] }
 0x645   : > { %6484 = vmatpush.bf16.msrb.mxu2 %v8256_v15  ;;  %6437 = vmatmul.bf16.vlgmr.msra.gmra.mxu1 %v4724_v33  ;;  %v8277_v15 = vld [vmem:[%s11246_s6 + $0x408] sm:$0xff]  ;;  %v8295_v33 = vld [vmem:[%s11246_s6 + $0x498] sm:$0xff] }
 0x646   : > { %6450 = vmatmul.bf16.vlgmr.msra.gmra.mxu2 %v4725_v46  ;;  %6494 = vmatpush.bf16.msrb.mxu3 %v8267_v27  ;;  %v8314_v27 = vld [vmem:[%s11246_s6 + $0x530] sm:$0xff]  ;;  %v8319_v45 = vld [vmem:[%s11246_s6 + $0x558] sm:$0xff] }
 0x647   : > { %6515 = vmatmul.bf16.vlgmr.msrb.gmra.mxu0 %v4730_v63  ;;  %v8322_v46 = vld [vmem:[%s11246_s6 + $0x570] sm:$0xff] }
 0x648   : > { %6472 = vmatpush.bf16.msrb.mxu1 %v8247_v55  ;;  %6611 = vmatpush.bf16.msrb.mxu0 %v8339_v29  ;;  %v8276_v55 = vld [vmem:[%s11246_s6 + $0x400] sm:$0xff]  ;;  %v8334_v63 = vld [vmem:[%s11246_s6 + $0x5d0] sm:$0xff]  ;;  %v8317_v29 = vld [vmem:[%s11246_s6 + $0x548] sm:$0xff] }
 0x649   : > { %6485 = vmatpush.bf16.msrb.mxu2 %v8255_v6  ;;  %v8315_v6 = vld [vmem:[%s11246_s6 + $0x538] sm:$0xff] }
 0x64a   : > { %6495 = vmatpush.bf16.msrb.mxu3 %v8266_v58  ;;  %v8333_v58 = vld [vmem:[%s11246_s6 + $0x5c8] sm:$0xff] }
 0x64c   : > { %6473 = vmatpush.bf16.msrb.mxu1 %v8246_v25  ;;  %v4542_v16 = vpop.permute.xlu1 %4541  ;;  %6612 = vmatpush.bf16.msrb.mxu0 %v8338_v19  ;;  %v8313_v25 = vld [vmem:[%s11246_s6 + $0x528] sm:$0xff]  ;;  %v8343_v19 = vld [vmem:[%s11246_s6 + $0x618] sm:$0xff] }
 0x64d   : > { %6486 = vmatpush.bf16.msrb.mxu2 %v8254_v59  ;;  %4544 = vst.msk [vmem:[#allocation4 + $0x12] sm:$0x1] %vm10492_vm9, %v4542_v16  ;;  %v4522_v24 = vpop.permute.xlu0 %4521  ;;  %v8294_v59 = vld [vmem:[%s11246_s6 + $0x490] sm:$0xff] }
 0x64e   : > { %6496 = vmatpush.bf16.msrb.mxu3 %v8265_v51  ;;  %4524 = vst.msk [vmem:[#allocation4 + $0x11] sm:$0x1] %vm10492_vm9, %v4522_v24  ;;  %v5132_v51 = vld [vmem:[%s11247_s7] sm:$0x1] }
 0x650   : > { %6474 = vmatpush.bf16.msrb.mxu1 %v8245_v44  ;;  %6613 = vmatpush.bf16.msrb.mxu0 %v8337_v40 }
 0x651   : > { %6487 = vmatpush.bf16.msrb.mxu2 %v8253_v8  ;;  %v8312_v8 = vld [vmem:[%s11246_s6 + $0x520] sm:$0xff] }
 0x652   : > { %6497 = vmatpush.bf16.msrb.mxu3 %v8264_v28 }
 0x654   : > { %6475 = vmatpush.bf16.msrb.mxu1 %v8244_v34  ;;  %6463 = vmatmul.bf16.vlgmr.msra.gmra.mxu3 %v4726_v42  ;;  %v4622_v1 = vpop.permute.xlu2 %4621  ;;  %v8293_v34 = vld [vmem:[%s11246_s6 + $0x488] sm:$0xff] }
 0x655   : > { %6488 = vmatpush.bf16.msrb.mxu2 %v8252_v60  ;;  %v4582_v32 = vpop.permute.xlu0 %4581  ;;  %4624 = vst.msk [vmem:[#allocation4 + $0x16] sm:$0x1] %vm10492_vm9, %v4622_v1  ;;  %6614 = vmatpush.bf16.msrb.mxu0 %v8336_v52  ;;  %v8320_v60 = vld [vmem:[%s11246_s6 + $0x560] sm:$0xff] }
 0x656   : > { %6498 = vmatpush.bf16.msrb.mxu3 %v8263_v3  ;;  %4584 = vst.msk [vmem:[#allocation4 + $0x14] sm:$0x1] %vm10492_vm9, %v4582_v32 }
 0x657   : > { %6476 = vmatmul.bf16.vlgmr.msrb.gmra.mxu1 %v4727_v47 }
 0x658   : > { %6520 = vmatpush.bf16.msra.mxu1 %v8283_v35  ;;  %6489 = vmatmul.bf16.vlgmr.msrb.gmra.mxu2 %v4728_v26  ;;  %v8332_v35 = vld [vmem:[%s11246_s6 + $0x5c0] sm:$0xff] }
 0x659   : > { %6533 = vmatpush.bf16.msra.mxu2 %v8291_v41  ;;  %6615 = vmatpush.bf16.msrb.mxu0 %v8335_v12 }
 0x65a   : > { %6499 = vmatpush.bf16.msrb.mxu3 %v8262_v38 }
 0x65c   : > { %6521 = vmatpush.bf16.msra.mxu1 %v8282_v4  ;;  %v8310_v4 = vld [vmem:[%s11246_s6 + $0x510] sm:$0xff] }
 0x65d   : > { %6534 = vmatpush.bf16.msra.mxu2 %v8290_v23  ;;  %6616 = vmatpush.bf16.msrb.mxu0 %v8334_v63  ;;  %v8330_v23 = vld [vmem:[%s11246_s6 + $0x5b0] sm:$0xff] }
 0x65e   : > { %6500 = vmatpush.bf16.msrb.mxu3 %v8261_v36 }
 0x660   : > { %6522 = vmatpush.bf16.msra.mxu1 %v8281_v56 }
 0x661   : > { %6535 = vmatpush.bf16.msra.mxu2 %v8289_v39  ;;  %6617 = vmatpush.bf16.msrb.mxu0 %v8333_v58  ;;  %v4656_v58 = vld [vmem:[#allocation4 + $0x18] sm:$0x1] }
 0x662   : > { %6501 = vmatpush.bf16.msrb.mxu3 %v8260_v17 }
 0x664   : > { %6523 = vmatpush.bf16.msra.mxu1 %v8280_v62 }
 0x665   : > { %6536 = vmatpush.bf16.msra.mxu2 %v8288_v53  ;;  %6502 = vmatmul.bf16.vlgmr.msrb.gmra.mxu3 %v4729_v57  ;;  %v8309_v53 = vld [vmem:[%s11246_s6 + $0x508] sm:$0xff] }
 0x666   : > { %6546 = vmatpush.bf16.msra.mxu3 %v8299_v5  ;;  %6618 = vmatpush.bf16.msrb.mxu0 %v8332_v35 }
 0x668   : > { %6524 = vmatpush.bf16.msra.mxu1 %v8279_v37  ;;  %v8329_v37 = vld [vmem:[%s11246_s6 + $0x5a8] sm:$0xff] }
 0x669   : > { %6537 = vmatpush.bf16.msra.mxu2 %v8287_v10  ;;  %v8328_v10 = vld [vmem:[%s11246_s6 + $0x5a0] sm:$0xff] }
 0x66a   : > { %6547 = vmatpush.bf16.msra.mxu3 %v8298_v9 }
 0x66c   : > { %6525 = vmatpush.bf16.msra.mxu1 %v8278_v21  ;;  %v8316_v21 = vld [vmem:[%s11246_s6 + $0x540] sm:$0xff] }
 0x66d   : > { %6538 = vmatpush.bf16.msra.mxu2 %v8286_v22  ;;  %v4602_v48 = vpop.permute.xlu1 %4601 }
 0x66e   : > { %6548 = vmatpush.bf16.msra.mxu3 %v8297_v54  ;;  %4604 = vst.msk [vmem:[#allocation4 + $0x15] sm:$0x1] %vm10492_vm9, %v4602_v48  ;;  %v8342_v54 = vld [vmem:[%s11246_s6 + $0x610] sm:$0xff] }
 0x670   : > { %6526 = vmatpush.bf16.msra.mxu1 %v8277_v15  ;;  %v8327_v15 = vld [vmem:[%s11246_s6 + $0x598] sm:$0xff] }
 0x671   : > { %6539 = vmatpush.bf16.msra.mxu2 %v8285_v14 }
 0x672   : > { %6549 = vmatpush.bf16.msra.mxu3 %v8296_v49 }
 0x674   : > { %6527 = vmatpush.bf16.msra.mxu1 %v8276_v55  ;;  %v6321_v44 = vpop.f32.mrf.mxu1 }
 0x675   : > { %6540 = vmatpush.bf16.msra.mxu2 %v8284_v50  ;;  %v4642_v18 = vpop.permute.xlu0 %4641  ;;  %v6322_v16 = vadd.f32 %v6321_v44, %v5132_v51  ;;  %v8341_v50 = vld [vmem:[%s11246_s6 + $0x608] sm:$0xff] }
 0x676   : > { %6550 = vmatpush.bf16.msra.mxu3 %v8295_v33  ;;  %4644 = vst.msk [vmem:[#allocation4 + $0x17] sm:$0x1] %vm10492_vm9, %v4642_v18 }
 0x678   : > { %6572 = vmatpush.bf16.msrb.mxu1 %v8315_v6  ;;  %v8326_v6 = vld [vmem:[%s11246_s6 + $0x590] sm:$0xff] }
 0x679   : > { %6585 = vmatpush.bf16.msrb.mxu2 %v8323_v0 }
 0x67a   : > { %6551 = vmatpush.bf16.msra.mxu3 %v8294_v59  ;;  %v6334_v41 = vpop.f32.mrf.mxu2  ;;  %v8340_v59 = vld [vmem:[%s11246_s6 + $0x600] sm:$0xff] }
 0x67b   : > { %v6335_v24 = vadd.f32 %v6334_v41, %v6322_v16  ;;  %v6347_v28 = vpop.f32.mrf.mxu3 }
 0x67c   : > { %6573 = vmatpush.bf16.msrb.mxu1 %v8314_v27  ;;  %v6323_v43 = vpop.f32.mrf.mxu1 }
 0x67d   : > { %6586 = vmatpush.bf16.msrb.mxu2 %v8322_v46  ;;  %v4655_v3 = vld [vmem:[#allocation4 + $0x10] sm:$0xff]  ;;  %v6348_v42 = vadd.f32 %v6347_v28, %v6335_v24  ;;  %v8325_v46 = vld [vmem:[%s11246_s6 + $0x588] sm:$0xff] }
 0x67e   : > { %6552 = vmatpush.bf16.msra.mxu3 %v8293_v34  ;;  %v11122_v47 = vmax.f32 %v4655_v3, 0.0 }
 0x680   : > { %6574 = vmatpush.bf16.msrb.mxu1 %v8313_v25  ;;  %v4681_v26 = vperm.slane %v11122_v47, 0  ;;  %v4682_v56 = vperm.slane %v11122_v47, 1  ;;  %v4683_v1 = vperm.slane %v11122_v47, 2  ;;  %v4684_v32 = vperm.slane %v11122_v47, 3 }
 0x681   : > { %6587 = vmatpush.bf16.msrb.mxu2 %v8321_v7  ;;  %v4685_v55 = vperm.slane %v11122_v47, 4  ;;  %v4686_v52 = vperm.slane %v11122_v47, 5  ;;  %v4688_v49 = vperm.slane %v11122_v47, 7  ;;  %v8324_v7 = vld [vmem:[%s11246_s6 + $0x580] sm:$0xff]  ;;  %v4687_v44 = vperm.slane %v11122_v47, 6 }
 0x682   : > { %6553 = vmatpush.bf16.msra.mxu3 %v8292_v2  ;;  %v6336_v38 = vpop.f32.mrf.mxu2  ;;  %v4731_v39 = vpack.c.bf16 %v4681_v26, %v4681_v26  ;;  %v4732_v31 = vpack.c.bf16 %v4682_v56, %v4682_v56  ;;  %v4733_v62 = vpack.c.bf16 %v4683_v1, %v4683_v1  ;;  %v4734_v36 = vpack.c.bf16 %v4684_v32, %v4684_v32 }
 0x683   : > { %v6349_v61 = vpop.f32.mrf.mxu3  ;;  %v4735_v12 = vpack.c.bf16 %v4685_v55, %v4685_v55  ;;  %v4736_v27 = vpack.c.bf16 %v4686_v52, %v4686_v52  ;;  %v4738_v33 = vpack.c.bf16 %v4688_v49, %v4688_v49 }
 0x684   : > { %6575 = vmatpush.bf16.msrb.mxu1 %v8312_v8  ;;  %v6360_v17 = vpop.f32.mrf.mxu1  ;;  %6541 = vmatmul.bf16.vlgmr.msra.gmra.mxu2 %v4732_v31  ;;  %v4660_v8 = vmax.f32 %v4656_v58, 0.0  ;;  %v8351_v61 = vld [vmem:[%s11248_s8 + $0x38] sm:$0xff] }
 0x685   : > { %6588 = vmatpush.bf16.msrb.mxu2 %v8320_v60  ;;  %6528 = vmatmul.bf16.vlgmr.msra.gmra.mxu1 %v4731_v39  ;;  %v6361_v5 = vadd.f32 %v6360_v17, %v6348_v42  ;;  %v4737_v60 = vpack.c.bf16 %v4687_v44, %v4687_v44  ;;  %v8349_v17 = vld [vmem:[%s11248_s8 + $0x28] sm:$0xff] }
 0x686   : > { %6598 = vmatpush.bf16.msrb.mxu3 %v8331_v20  ;;  %6567 = vmatmul.bf16.vlgmr.msra.gmra.mxu0 %v4734_v36  ;;  %v4689_v35 = vperm.slane %v4660_v8, 0 }
 0x687   : > { %6554 = vmatmul.bf16.vlgmr.msra.gmra.mxu3 %v4733_v62 }
 0x688   : > { %6576 = vmatpush.bf16.msrb.mxu1 %v8311_v11  ;;  %v4739_v11 = vpack.c.bf16 %v4689_v35, %v4689_v35  ;;  %v6655_v35 = vld [vmem:[%s11249_s9] sm:$0x1] }
 0x689   : > { %6589 = vmatpush.bf16.msrb.mxu2 %v8319_v45 }
 0x68a   : > { %6599 = vmatpush.bf16.msrb.mxu3 %v8330_v23  ;;  %v6373_v57 = vpop.f32.mrf.mxu2 }
 0x68b   : > { %v6374_v9 = vadd.f32 %v6373_v57, %v6361_v5  ;;  %v6386_v22 = vpop.f32.mrf.mxu3  ;;  %v8348_v5 = vld [vmem:[%s11248_s8 + $0x20] sm:$0xff] }
 0x68c   : > { %6577 = vmatpush.bf16.msrb.mxu1 %v8310_v4  ;;  %v6362_v40 = vpop.f32.mrf.mxu1 }
 0x68d   : > { %6590 = vmatpush.bf16.msrb.mxu2 %v8318_v30  ;;  %v6387_v14 = vadd.f32 %v6386_v22, %v6374_v9  ;;  %v8345_v40 = vld [vmem:[%s11248_s8 + $0x8] sm:$0xff] }
 0x68e   : > { %6600 = vmatpush.bf16.msrb.mxu3 %v8329_v37 }
 0x690   : > { %6578 = vmatpush.bf16.msrb.mxu1 %v8309_v53 }
 0x691   : > { %6591 = vmatpush.bf16.msrb.mxu2 %v8317_v29  ;;  %v8350_v29 = vld [vmem:[%s11248_s8 + $0x30] sm:$0xff] }
 0x692   : > { %6601 = vmatpush.bf16.msrb.mxu3 %v8328_v10  ;;  %v6375_v0 = vpop.f32.mrf.mxu2 }
 0x693   : > { %v6388_v48 = vpop.f32.mrf.mxu3 }
 0x694   : > { %6579 = vmatpush.bf16.msrb.mxu1 %v8308_v13  ;;  %v6399_v63 = vpop.f32.mrf.mxu1  ;;  %v8347_v13 = vld [vmem:[%s11248_s8 + $0x18] sm:$0xff] }
 0x695   : > { %6592 = vmatpush.bf16.msrb.mxu2 %v8316_v21  ;;  %v6400_v25 = vadd.f32 %v6399_v63, %v6387_v14 }
 0x696   : > { %6602 = vmatpush.bf16.msrb.mxu3 %v8327_v15  ;;  %6619 = vmatmul.bf16.vlgmr.msrb.gmra.mxu0 %v4738_v33 }
 0x697   : > { %6580 = vmatmul.bf16.vlgmr.msrb.gmra.mxu1 %v4735_v12 }
 0x698   : > { %6628 = vmatpush.bf16.msra.mxu1 %v8343_v19  ;;  %6593 = vmatmul.bf16.vlgmr.msrb.gmra.mxu2 %v4736_v27  ;;  %v8346_v19 = vld [vmem:[%s11248_s8 + $0x10] sm:$0xff] }
 0x699   : > { %6704 = vmatpush.bf16.msra.mxu2 %v8351_v61 }
 0x69a   : > { %6603 = vmatpush.bf16.msrb.mxu3 %v8326_v6 }
 0x69b   : > { %v6412_v18 = vpop.f32.mrf.mxu2 }
 0x69c   : > { %6629 = vmatpush.bf16.msra.mxu1 %v8342_v54  ;;  %v6413_v51 = vadd.f32 %v6412_v18, %v6400_v25  ;;  %v6401_v34 = vpop.f32.mrf.mxu1  ;;  %v8344_v54 = vld [vmem:[%s11248_s8] sm:$0xff] }
 0x69d   : > { %6705 = vmatpush.bf16.msra.mxu2 %v8350_v29 }
 0x69e   : > { %6604 = vmatpush.bf16.msrb.mxu3 %v8325_v46 }
 0x6a0   : > { %6630 = vmatpush.bf16.msra.mxu1 %v8341_v50 }
 0x6a1   : > { %6706 = vmatpush.bf16.msra.mxu2 %v8349_v17 }
 0x6a2   : > { %6605 = vmatpush.bf16.msrb.mxu3 %v8324_v7 }
 0x6a3   : > { %v6414_v16 = vpop.f32.mrf.mxu2 }
 0x6a4   : > { %6631 = vmatpush.bf16.msra.mxu1 %v8340_v59 }
 0x6a5   : > { %6606 = vmatmul.bf16.vlgmr.msrb.gmra.mxu3 %v4737_v60  ;;  %6707 = vmatpush.bf16.msra.mxu2 %v8348_v5 }
 0x6a7   : > { %8045 = vmatmul.msk.bf16.vlgmr.msra.gmra.mxu1 %vm4131_vm5, %v4739_v11 }
 0x6a9   : > { %6708 = vmatpush.bf16.msra.mxu2 %v8347_v13 }
 0x6ad   : > { %6709 = vmatpush.bf16.msra.mxu2 %v8346_v19 }
 0x6b1   : > { %6710 = vmatpush.bf16.msra.mxu2 %v8345_v40 }
 0x6b5   : > { %6711 = vmatpush.bf16.msra.mxu2 %v8344_v54 }
 0x6c2   : > { %v6438_v41 = vpop.f32.mrf.mxu1 }
 0x6c4   : > { %v6516_v2 = vpop.f32.mrf.mxu0 }
 0x6c7   : > { %v6425_v24 = vpop.f32.mrf.mxu3 }
 0x6c8   : > { %v6426_v28 = vadd.f32 %v6425_v24, %v6413_v51 }
 0x6c9   : > { %v6451_v20 = vpop.f32.mrf.mxu2 }
 0x6ca   : > { %v6440_v45 = vpop.f32.mrf.mxu1  ;;  %v6439_v43 = vadd.f32 %v6438_v41, %v6426_v28 }
 0x6cc   : > { %v6518_v4 = vpop.f32.mrf.mxu0  ;;  %v6452_v3 = vadd.f32 %v6451_v20, %v6439_v43 }
 0x6cf   : > { %v6427_v42 = vpop.f32.mrf.mxu3 }
 0x6d1   : > { %v6453_v47 = vpop.f32.mrf.mxu2 }
 0x6d4   : > { %v6477_v23 = vpop.f32.mrf.mxu1 }
 0x6d7   : > { %v6464_v30 = vpop.f32.mrf.mxu3 }
 0x6d8   : > { %v6465_v1 = vadd.f32 %v6464_v30, %v6452_v3 }
 0x6da   : > { %v6478_v39 = vadd.f32 %v6477_v23, %v6465_v1 }
 0x6db   : > { %v6490_v26 = vpop.f32.mrf.mxu2 }
 0x6dc   : > { %v6479_v56 = vpop.f32.mrf.mxu1  ;;  %v6491_v31 = vadd.f32 %v6490_v26, %v6478_v39 }
 0x6df   : > { %v6466_v32 = vpop.f32.mrf.mxu3 }
 0x6e3   : > { %v6492_v38 = vpop.f32.mrf.mxu2 }
 0x6e8   : > { %v6503_v62 = vpop.f32.mrf.mxu3 }
 0x6e9   : > { %v6504_v36 = vadd.f32 %v6503_v62, %v6491_v31 }
 0x6eb   : > { %v6517_v53 = vadd.f32 %v6516_v2, %v6504_v36 }
 0x6f0   : > { %v6505_v37 = vpop.f32.mrf.mxu3 }
 0x702   : > { %v6529_v10 = vpop.f32.mrf.mxu1 }
 0x703   : > { %v6568_v21 = vpop.f32.mrf.mxu0  ;;  %v6530_v6 = vadd.f32 %v6529_v10, %v6517_v53 }
 0x707   : > { %v6542_v57 = vpop.f32.mrf.mxu2 }
 0x708   : > { %v6543_v50 = vadd.f32 %v6542_v57, %v6530_v6 }
 0x70a   : > { %v6555_v9 = vpop.f32.mrf.mxu3  ;;  %v6531_v22 = vpop.f32.mrf.mxu1 }
 0x70b   : > { %v6570_v15 = vpop.f32.mrf.mxu0  ;;  %v6556_v12 = vadd.f32 %v6555_v9, %v6543_v50 }
 0x70d   : > { %v6569_v33 = vadd.f32 %v6568_v21, %v6556_v12 }
 0x70f   : > { %v6544_v14 = vpop.f32.mrf.mxu2 }
 0x712   : > { %v6557_v55 = vpop.f32.mrf.mxu3 }
 0x713   : > { %v6620_v49 = vpop.f32.mrf.mxu0 }
 0x714   : > { %v6581_v52 = vpop.f32.mrf.mxu1 }
 0x715   : > { %v6582_v46 = vadd.f32 %v6581_v52, %v6569_v33 }
 0x71b   : > { %v6594_v0 = vpop.f32.mrf.mxu2  ;;  %v6622_v48 = vpop.f32.mrf.mxu0 }
 0x71c   : > { %v6583_v27 = vpop.f32.mrf.mxu1  ;;  %v6595_v25 = vadd.f32 %v6594_v0, %v6582_v46 }
 0x723   : > { %v6596_v63 = vpop.f32.mrf.mxu2 }
 0x724   : > { %v6633_v7 = vpop.f32.mrf.mxu1 }
 0x728   : > { %v6607_v59 = vpop.f32.mrf.mxu3 }
 0x729   : > { %v6608_v58 = vadd.f32 %v6607_v59, %v6595_v25 }
 0x72b   : > { %v6621_v44 = vadd.f32 %v6620_v49, %v6608_v58 }
 0x72c   : > { %v6635_v34 = vpop.f32.mrf.mxu1 }
 0x72d   : > { %v6634_v8 = vadd.f32 %v6633_v7, %v6621_v44 }
 0x72f   : > { %v6637_v18 = vmax.f32 %v6634_v8, 0.0 }
 0x730   : > { %v6609_v51 = vpop.f32.mrf.mxu3 }
 0x731   : > { %v6638_v60 = vpack.c.bf16 %v6637_v18, %v6637_v18 }
 0x733   : > { %6712 = vmatmul.bf16.vlgmr.msra.gmra.mxu2 %v6638_v60 }
 0x7b6   : > { %v6713_v11 = vpop.f32.mrf.mxu2 }
 0x7b7   : > { %v6714_v16 = vadd.f32 %v6713_v11, %v6655_v35 }
 0x7b9   : > { %6717 = vst [vmem:[%s351_s29] sm:$0x1] %v6714_v16 }
 0x7ba   : > { %8457 = shalt.err (!%p8454_p3)
}
 0x7bb   : > { %8353 = dma.vmem_to_hbm [thread:$0]  (%p8593_p5), %s6730_s21, 16, %s6732_s25, %s6719_s26  }
 0x7be   : > { %v6715_v41 = vpop.f32.mrf.mxu2 }
 0x7bf PF: > { %p8359_p4 = scmp.ge.s32.totalorder %s8492_s16, 2  ;;  %s6743_s28 = sand.u32 1, %s8480_s13  }
 0x7c0   : > { %s6744_s11 = scalar_lea.sflag [#allocation6], %s6743_s28 }
 0x7c1   : > { %p8356_p7 = pnand %p8359_p4, %p8597_p6 }
 0x7c3   : > { %p8357_p8 = pneg %p8356_p7 }
 0x7c5   : > { %8475 = dma.done.wait (%p8357_p8), %s6744_s11, 16  }
 0x7c6   : > { %8477 = vsyncadd (%p8357_p8), %s6744_s11, 4294967280  ;;  %p20_p9 = scmp.ge.s32.totalorder %s8580_s19, 4   ;;  %s11626_s13 = smov %s8484_s14 }
 0x7c7   : > { %s11627_s14 = smov %s8488_s15  ;;  %s11628_s15 = smov %s8591_s22 }
 0x7c8   : > { %s11629_s16 = smov %s8580_s19  ;;  %22 = sbr.rel (!%p20_p9) target bundleno = 5 (0x5), region = 103 }
 0x7cd   :  { %6749 = vsyncpa [#allocation6], 1 }
 0x7ce   :  { %6751 = vsyncpa [#allocation6 + $0x1], 1 }

</bundles_post_ra>
